<compile_context>
chip_gen: v7x
topology: tpu7x:2x2x1
jax: 0.10.0
libtpu: 0.0.40
codegen_flags: <defaults>
</compile_context>

<pallas_src>
import functools

import jax
import jax.numpy as jnp
from jax.experimental import pallas as pl
from jax.experimental.pallas import tpu as pltpu


# ----------------------------------------------------------------------------
# Fused whole-network kernel (one grid step = `tn` images, 10 rows per image)
# ----------------------------------------------------------------------------
def _lenet_kernel(xs_ref, m1_ref, v1s_ref, v1t_ref, m2_ref, v2s_ref, v2t_ref,
                  w3_ref, v3s_ref, v3t_ref, w4_ref, b4_ref,
                  o_ref, a1_ref, zp_ref, *, tn):
    f32 = jnp.float32
    bf16 = jnp.bfloat16
    r = tn * 10                      # row pitch: 10 rows per image (8 valid)

    # ---- conv1 (5x5, 1->20) + folded bias/BN + ReLU + 3x3/3 maxpool ---------
    # xs lanes already hold the 7 input-row taps of each pool-row group (built
    # in the wrapper), so conv1 is a single K=196 bf16 dot.  Output lane =
    # (u*3 + j)*256 + wp*20 + c with (oh, ow) = (3p+u, 3wp+j); the whole 3x3
    # pool window therefore lives in nine aligned 256-lane blocks and the pool
    # reduces to 8 aligned lane-block maxima (VPU only, no shuffles).
    y = jnp.dot(xs_ref[...], m1_ref[...], preferred_element_type=f32)   # (r, 2304)
    y = jnp.maximum(y * v1s_ref[...] + v1t_ref[...], 0.0)
    a1 = y[:, 0:256]
    for k in range(1, 9):
        a1 = jnp.maximum(a1, y[:, k * 256:(k + 1) * 256])               # (r, 256)
    # a1[10n + p, wp*20 + c] = pooled conv1 activation (valid for p < 8; rows
    # p in {8, 9} hold finite garbage that only ever feeds garbage rows below).

    # Stage a1 (plus a zeroed 8-row tail) so conv2's 5 height taps are plain
    # offset reads; the tail and per-image rows 8,9 only feed conv2 rows that
    # are never selected by the 2x2 pool picks.
    a1_ref[pl.ds(0, r), :] = a1
    a1_ref[pl.ds(r, 8), :] = jnp.zeros((8, 256), f32)

    # ---- conv2 (5x5, 20->50) + folded bias/BN + ReLU -------------------------
    # One K = 5*256 = 1280 bf16 dot; the every-3rd-width-tap selection and the
    # pool-friendly output layout (lane = jj*128 + wp2*50 + c2, ow2 = 2*wp2+jj)
    # are folded into the pre-scattered weight matrix m2.
    taps = [a1.astype(bf16)] + [a1_ref[pl.ds(ki, r), :].astype(bf16)
                                for ki in range(1, 5)]
    a2 = jnp.concatenate(taps, axis=1)                                   # (r, 1280)
    z = jnp.dot(a2, m2_ref[...], preferred_element_type=f32)            # (r, 256)
    z = jnp.maximum(z * v2s_ref[...] + v2t_ref[...], 0.0)

    # ---- maxpool 2x2 stride 2 ------------------------------------------------
    # Width: aligned 128-lane halves.  Height + flatten: stride-10 row picks
    # from a VMEM scratch (replaces the old O(tn^2) selector matmul).
    zp_ref[...] = jnp.maximum(z[:, 0:128], z[:, 128:256])                # (r, 128)
    h0 = jnp.maximum(zp_ref[pl.ds(0, tn, stride=10), :],
                     zp_ref[pl.ds(1, tn, stride=10), :])
    h1 = jnp.maximum(zp_ref[pl.ds(2, tn, stride=10), :],
                     zp_ref[pl.ds(3, tn, stride=10), :])
    flat = jnp.concatenate([h0, h1], axis=1).astype(bf16)                # (tn, 256)
    # flat lane = m*128 + wp2*50 + c2; the PyTorch NCHW View(200) permutation is
    # folded into w3.

    # ---- Linear(200->500) + folded bias/BN + ReLU (padded to 512 lanes) ------
    g = jnp.dot(flat, w3_ref[...], preferred_element_type=f32)          # (tn, 512)
    g = jnp.maximum(g * v3s_ref[...] + v3t_ref[...], 0.0)

    # ---- Linear(500->10): plain affine, lane-dense (tn, 128) store -----------
    o_ref[...] = (jnp.dot(g.astype(bf16), w4_ref[...],
                          preferred_element_type=f32) + b4_ref[...])


# ----------------------------------------------------------------------------
# Wrapper-side weight preprocessing (constant-folded by XLA under jit)
# ----------------------------------------------------------------------------
def _prepare_operands(params):
    f32 = jnp.float32
    bf16 = jnp.bfloat16

    # conv1 weights scattered for the width-contraction + pool-packed layout:
    #   m1[t*28 + w_in, (u*3+j)*256 + wp*20 + c] = W1[c, 0, t-u, w_in-(3wp+j)]
    w1t = jnp.transpose(params["w1"][:, 0], (1, 2, 0)).astype(f32)       # (ki,kj,c)
    m1 = jnp.zeros((7, 28, 3, 3, 8, 20), f32)                            # (t,w,u,j,wp,c)
    for u in range(3):
        for wp in range(8):
            for j in range(3):
                ow = 3 * wp + j
                m1 = m1.at[u:u + 5, ow:ow + 5, u, j, wp, :].set(w1t)
    m1 = m1.reshape(7, 28, 9, 160)
    m1 = jnp.pad(m1, ((0, 0), (0, 0), (0, 0), (0, 96)))                  # pad to 256
    m1 = m1.reshape(196, 2304).astype(bf16)

    # conv2 weights scattered for the stacked-tap layout:
    #   m2[ki*256 + wp*20 + ci, jj*128 + wp2*50 + c2] = W2[c2, ci, ki, wp-(2wp2+jj)]
    w2t = jnp.transpose(params["w2"], (2, 3, 1, 0)).astype(f32)          # (ki,kj,ci,c2)
    m2 = jnp.zeros((5, 8, 20, 2, 2, 50), f32)                            # (ki,wp,ci,jj,wp2,c2)
    for wp2 in range(2):
        for jj in range(2):
            ow2 = 2 * wp2 + jj
            m2 = m2.at[:, ow2:ow2 + 5, :, jj, wp2, :].set(w2t)
    m2 = m2.reshape(5, 160, 2, 100)
    m2 = jnp.pad(m2, ((0, 0), (0, 0), (0, 0), (0, 28)))                  # pad to 128
    m2 = m2.reshape(5, 160, 256)
    m2 = jnp.pad(m2, ((0, 0), (0, 96), (0, 0)))                          # pad K to 256
    m2 = m2.reshape(1280, 256).astype(bf16)

    # Folded affines:  (x + b) * s + t  ->  x * s + (b*s + t); pad lanes get 0.
    s1 = params["bn1_scale"].astype(f32)
    t1 = (params["b1"] * params["bn1_scale"] + params["bn1_shift"]).astype(f32)
    s2 = params["bn2_scale"].astype(f32)
    t2 = (params["b2"] * params["bn2_scale"] + params["bn2_shift"]).astype(f32)
    s3 = params["bn3_scale"].astype(f32)
    t3 = (params["b3"] * params["bn3_scale"] + params["bn3_shift"]).astype(f32)

    def tile_c1(v):                                   # (20,) -> (1, 2304)
        blk = jnp.pad(jnp.tile(v, 8), (0, 96))        # wp*20 + c, padded to 256
        return jnp.tile(blk, 9).reshape(1, 2304).astype(f32)

    def tile_c2(v):                                   # (50,) -> (1, 256)
        blk = jnp.pad(jnp.tile(v, 2), (0, 28))        # wp2*50 + c2, padded to 128
        return jnp.tile(blk, 2).reshape(1, 256).astype(f32)

    v1s, v1t = tile_c1(s1), tile_c1(t1)
    v2s, v2t = tile_c2(s2), tile_c2(t2)
    v3s = jnp.pad(s3, (0, 12)).reshape(1, 512).astype(f32)
    v3t = jnp.pad(t3, (0, 12)).reshape(1, 512).astype(f32)

    # FC1: fold the NCHW flatten order (c2*4 + m*2 + wp2) into the kernel's
    # lane order (m*128 + wp2*50 + c2); pad K to 256 and N to 512.
    lane_idx, feat_idx = [], []
    for m in range(2):
        for wp2 in range(2):
            for c2 in range(50):
                lane_idx.append(m * 128 + wp2 * 50 + c2)
                feat_idx.append(c2 * 4 + m * 2 + wp2)
    lane_idx = jnp.asarray(lane_idx, dtype=jnp.int32)
    feat_idx = jnp.asarray(feat_idx, dtype=jnp.int32)
    w3p = jnp.zeros((256, 512), f32).at[lane_idx, :500].set(
        params["w3"].astype(f32).T[feat_idx, :]).astype(bf16)

    # FC2 padded to K=512, N=128 (lane-dense output; logits in lanes 0..9).
    w4p = jnp.zeros((512, 128), f32).at[:500, :10].set(
        params["w4"].astype(f32).T).astype(bf16)
    b4 = jnp.zeros((1, 128), f32).at[0, :10].set(params["b4"].astype(f32))

    return [m1, v1s, v1t, m2, v2s, v2t, w3p, v3s, v3t, w4p, b4]


def _prepare_input(x_nchw, n_pad):
    """Pack the 7 input-row taps of each 3-row pool group onto lanes:
       xs[10n + p, t*28 + w] = X[n, 3p + t, w]   (zero-padded past row 27)."""
    n = x_nchw.shape[0]
    x = x_nchw.reshape(n, 28, 28).astype(jnp.float32)
    if n_pad != n:
        x = jnp.concatenate([x, jnp.zeros((n_pad - n, 28, 28), jnp.float32)], 0)
    xp = jnp.pad(x, ((0, 0), (0, 8), (0, 0)))                     # (n_pad, 36, 28)
    xs = jnp.stack([xp[:, 3 * p:3 * p + 7, :] for p in range(10)], axis=1)
    return xs.reshape(n_pad * 10, 196).astype(jnp.bfloat16)       # (n_pad*10, 196)


# ----------------------------------------------------------------------------
# Forward pass
# ----------------------------------------------------------------------------
def lenet_forward(x_nchw, params, batch_tile=32, single_buffer_weights=True):
    n = x_nchw.shape[0]
    batch_tile = max(8, (int(batch_tile) // 8) * 8)

    # Batch tile: multiple of 8 (aligned output rows) and always >= 2 grid
    # steps so the "parallel" axis can shard across v7x's two TensorCores.
    half = (n + 1) // 2
    tn = min(batch_tile, ((half + 7) // 8) * 8)
    grid_n = max(2, -(-n // tn))
    n_pad = grid_n * tn
    r = tn * 10

    xs = _prepare_input(x_nchw, n_pad)
    ops = _prepare_operands(params)

    def const_spec(arr):
        nd = arr.ndim
        idx = lambda i: (0,) * nd
        if single_buffer_weights and hasattr(pl, "Buffered"):
            try:
                # Constant blocks never change: no need for double buffering.
                return pl.BlockSpec(arr.shape, idx, pipeline_mode=pl.Buffered(1))
            except Exception:
                pass
        return pl.BlockSpec(arr.shape, idx)

    out = pl.pallas_call(
        functools.partial(_lenet_kernel, tn=tn),
        out_shape=jax.ShapeDtypeStruct((n_pad, 128), jnp.float32),
        grid=(grid_n,),
        in_specs=[pl.BlockSpec((r, 196), lambda i: (i, 0))]
                 + [const_spec(a) for a in ops],
        out_specs=pl.BlockSpec((tn, 128), lambda i: (i, 0)),
        scratch_shapes=[pltpu.VMEM((r + 8, 256), jnp.float32),   # pooled conv1 (+tail)
                        pltpu.VMEM((r, 128), jnp.float32)],      # width-pooled conv2
        compiler_params=pltpu.CompilerParams(
            dimension_semantics=("parallel",),
            vmem_limit_bytes=32 * 1024 * 1024),
    )(xs, *ops)
    return out[:n, :10]


# ----------------------------------------------------------------------------
# Deterministic synthetic parameters (shapes from the module's __init__)
# ----------------------------------------------------------------------------
def init_params(key):
    keys = jax.random.split(key, 24)
    it = iter(keys)

    def nrm(shape, scale=0.1):
        return (scale * jax.random.normal(next(it), shape)).astype(jnp.float32)

    eps = 1e-5

    def bn_fold(c):
        gamma = 1.0 + nrm((c,))
        beta = nrm((c,))
        mean = nrm((c,))
        var = jnp.abs(nrm((c,))) + 0.5
        scale = gamma / jnp.sqrt(var + eps)
        shift = beta - mean * scale
        return scale.astype(jnp.float32), shift.astype(jnp.float32)

    w1 = nrm((20, 1, 5, 5));    b1 = nrm((20,))
    w2 = nrm((50, 20, 5, 5));   b2 = nrm((50,))
    w3 = nrm((500, 200), 0.05); b3 = nrm((500,))
    w4 = nrm((10, 500), 0.05);  b4 = nrm((10,))
    bn1s, bn1t = bn_fold(20)
    bn2s, bn2t = bn_fold(50)
    bn3s, bn3t = bn_fold(500)
    return dict(
        w1=w1, b1=b1, bn1_scale=bn1s, bn1_shift=bn1t,
        w2=w2, b2=b2, bn2_scale=bn2s, bn2_shift=bn2t,
        w3=w3, b3=b3, bn3_scale=bn3s, bn3_shift=bn3t,
        w4=w4, b4=b4,
    )


if __name__ == "__main__":
    key = jax.random.PRNGKey(0)
    pkey, xkey = jax.random.split(key)
    params = init_params(pkey)

    # MNIST-shaped input (the View(200) stage requires 28x28 spatial size).
    x = jax.random.normal(xkey, (2, 1, 28, 28), dtype=jnp.float32)

    def run(single_buffer):
        fn = jax.jit(functools.partial(lenet_forward, params=params,
                                       single_buffer_weights=single_buffer))
        return jax.block_until_ready(fn(x))

    try:
        out = run(True)
    except Exception:
        # Fall back to default (double) buffering of constant operands if this
        # jax version rejects pl.Buffered(1).
        out = run(False)

    assert out.shape == (2, 10) and out.dtype == jnp.float32
    assert bool(jnp.all(jnp.isfinite(out)))
    print("KERNEL_OK")
</pallas_src>

<mosaic_0001>
module attributes {stable_mosaic.version = 11 : i64} {
  func.func @_lenet_kernel(%arg0: i32, %arg1: memref<80x196xbf16, #tpu.memory_space<vmem>>, %arg2: memref<196x2304xbf16, #tpu.memory_space<vmem>>, %arg3: memref<1x2304xf32, #tpu.memory_space<vmem>>, %arg4: memref<1x2304xf32, #tpu.memory_space<vmem>>, %arg5: memref<1280x256xbf16, #tpu.memory_space<vmem>>, %arg6: memref<1x256xf32, #tpu.memory_space<vmem>>, %arg7: memref<1x256xf32, #tpu.memory_space<vmem>>, %arg8: memref<256x512xbf16, #tpu.memory_space<vmem>>, %arg9: memref<1x512xf32, #tpu.memory_space<vmem>>, %arg10: memref<1x512xf32, #tpu.memory_space<vmem>>, %arg11: memref<512x128xbf16, #tpu.memory_space<vmem>>, %arg12: memref<1x128xf32, #tpu.memory_space<vmem>>, %arg13: memref<8x128xf32, #tpu.memory_space<vmem>>, %arg14: memref<88x256xf32, #tpu.memory_space<vmem>>, %arg15: memref<80x128xf32, #tpu.memory_space<vmem>>) attributes {dimension_semantics = [#tpu.dimension_semantics<parallel>], iteration_bounds = array<i64: 2>, scalar_prefetch = 0 : i64, scratch_operands = 2 : i64, tpu.core_type = #tpu.core_type<tc>, window_params = [{transform_indices = @transform_0, window_bounds = array<i64: 80, 196>}, {pipeline_mode = #tpu.pipeline_mode<synchronous>, transform_indices = @transform_1, window_bounds = array<i64: 196, 2304>}, {pipeline_mode = #tpu.pipeline_mode<synchronous>, transform_indices = @transform_2, window_bounds = array<i64: 1, 2304>}, {pipeline_mode = #tpu.pipeline_mode<synchronous>, transform_indices = @transform_3, window_bounds = array<i64: 1, 2304>}, {pipeline_mode = #tpu.pipeline_mode<synchronous>, transform_indices = @transform_4, window_bounds = array<i64: 1280, 256>}, {pipeline_mode = #tpu.pipeline_mode<synchronous>, transform_indices = @transform_5, window_bounds = array<i64: 1, 256>}, {pipeline_mode = #tpu.pipeline_mode<synchronous>, transform_indices = @transform_6, window_bounds = array<i64: 1, 256>}, {pipeline_mode = #tpu.pipeline_mode<synchronous>, transform_indices = @transform_7, window_bounds = array<i64: 256, 512>}, {pipeline_mode = #tpu.pipeline_mode<synchronous>, transform_indices = @transform_8, window_bounds = array<i64: 1, 512>}, {pipeline_mode = #tpu.pipeline_mode<synchronous>, transform_indices = @transform_9, window_bounds = array<i64: 1, 512>}, {pipeline_mode = #tpu.pipeline_mode<synchronous>, transform_indices = @transform_10, window_bounds = array<i64: 512, 128>}, {pipeline_mode = #tpu.pipeline_mode<synchronous>, transform_indices = @transform_11, window_bounds = array<i64: 1, 128>}, {transform_indices = @transform_12, window_bounds = array<i64: 8, 128>}]} {
    %c0 = arith.constant 0 : index
    %c0_0 = arith.constant 0 : index
    %0 = vector.load %arg1[%c0, %c0_0] : memref<80x196xbf16, #tpu.memory_space<vmem>>, vector<80x196xbf16>
    %c0_1 = arith.constant 0 : index
    %c0_2 = arith.constant 0 : index
    %1 = vector.load %arg2[%c0_1, %c0_2] : memref<196x2304xbf16, #tpu.memory_space<vmem>>, vector<196x2304xbf16>
    %cst = arith.constant dense<0.000000e+00> : vector<80x2304xf32>
    %2 = tpu.matmul %0, %1, %cst {dimension_numbers = #tpu.dot_dimension_numbers<[1], [0], [0], [1], [0, 0, 1, 1], [], []>} : vector<80x196xbf16>, vector<196x2304xbf16>, vector<80x2304xf32> -> vector<80x2304xf32>
    %c0_3 = arith.constant 0 : index
    %c0_4 = arith.constant 0 : index
    %3 = vector.load %arg3[%c0_3, %c0_4] : memref<1x2304xf32, #tpu.memory_space<vmem>>, vector<1x2304xf32>
    %4 = vector.broadcast %3 : vector<1x2304xf32> to vector<80x2304xf32>
    %5 = arith.mulf %2, %4 : vector<80x2304xf32>
    %c0_5 = arith.constant 0 : index
    %c0_6 = arith.constant 0 : index
    %6 = vector.load %arg4[%c0_5, %c0_6] : memref<1x2304xf32, #tpu.memory_space<vmem>>, vector<1x2304xf32>
    %7 = vector.broadcast %6 : vector<1x2304xf32> to vector<80x2304xf32>
    %8 = arith.addf %5, %7 : vector<80x2304xf32>
    %cst_7 = arith.constant 0.000000e+00 : f32
    %9 = vector.broadcast %cst_7 : f32 to vector<80x2304xf32>
    %10 = arith.maximumf %8, %9 : vector<80x2304xf32>
    %11 = vector.extract_strided_slice %10 {offsets = [0, 0], sizes = [80, 256], strides = [1, 1]} : vector<80x2304xf32> to vector<80x256xf32>
    %12 = vector.extract_strided_slice %10 {offsets = [0, 256], sizes = [80, 256], strides = [1, 1]} : vector<80x2304xf32> to vector<80x256xf32>
    %13 = arith.maximumf %11, %12 : vector<80x256xf32>
    %14 = vector.extract_strided_slice %10 {offsets = [0, 512], sizes = [80, 256], strides = [1, 1]} : vector<80x2304xf32> to vector<80x256xf32>
    %15 = arith.maximumf %13, %14 : vector<80x256xf32>
    %16 = vector.extract_strided_slice %10 {offsets = [0, 768], sizes = [80, 256], strides = [1, 1]} : vector<80x2304xf32> to vector<80x256xf32>
    %17 = arith.maximumf %15, %16 : vector<80x256xf32>
    %18 = vector.extract_strided_slice %10 {offsets = [0, 1024], sizes = [80, 256], strides = [1, 1]} : vector<80x2304xf32> to vector<80x256xf32>
    %19 = arith.maximumf %17, %18 : vector<80x256xf32>
    %20 = vector.extract_strided_slice %10 {offsets = [0, 1280], sizes = [80, 256], strides = [1, 1]} : vector<80x2304xf32> to vector<80x256xf32>
    %21 = arith.maximumf %19, %20 : vector<80x256xf32>
    %22 = vector.extract_strided_slice %10 {offsets = [0, 1536], sizes = [80, 256], strides = [1, 1]} : vector<80x2304xf32> to vector<80x256xf32>
    %23 = arith.maximumf %21, %22 : vector<80x256xf32>
    %24 = vector.extract_strided_slice %10 {offsets = [0, 1792], sizes = [80, 256], strides = [1, 1]} : vector<80x2304xf32> to vector<80x256xf32>
    %25 = arith.maximumf %23, %24 : vector<80x256xf32>
    %26 = vector.extract_strided_slice %10 {offsets = [0, 2048], sizes = [80, 256], strides = [1, 1]} : vector<80x2304xf32> to vector<80x256xf32>
    %27 = arith.maximumf %25, %26 : vector<80x256xf32>
    %c0_8 = arith.constant 0 : index
    %c0_9 = arith.constant 0 : index
    %28 = vector.load %arg14[%c0_8, %c0_9] : memref<88x256xf32, #tpu.memory_space<vmem>>, vector<80x256xf32>
    tpu.vector_store %arg14[%c0_8, %c0_9], %27 {strides = array<i32>} : memref<88x256xf32, #tpu.memory_space<vmem>>, vector<80x256xf32>,
    %cst_10 = arith.constant 0.000000e+00 : f32
    %29 = vector.broadcast %cst_10 : f32 to vector<8x256xf32>
    %c80 = arith.constant 80 : index
    %c0_11 = arith.constant 0 : index
    %30 = vector.load %arg14[%c80, %c0_11] : memref<88x256xf32, #tpu.memory_space<vmem>>, vector<8x256xf32>
    tpu.vector_store %arg14[%c80, %c0_11], %29 {strides = array<i32>} : memref<88x256xf32, #tpu.memory_space<vmem>>, vector<8x256xf32>,
    %31 = arith.truncf %27 : vector<80x256xf32> to vector<80x256xbf16>
    %c1 = arith.constant 1 : index
    %c0_12 = arith.constant 0 : index
    %32 = vector.load %arg14[%c1, %c0_12] : memref<88x256xf32, #tpu.memory_space<vmem>>, vector<80x256xf32>
    %33 = arith.truncf %32 : vector<80x256xf32> to vector<80x256xbf16>
    %c2 = arith.constant 2 : index
    %c0_13 = arith.constant 0 : index
    %34 = vector.load %arg14[%c2, %c0_13] : memref<88x256xf32, #tpu.memory_space<vmem>>, vector<80x256xf32>
    %35 = arith.truncf %34 : vector<80x256xf32> to vector<80x256xbf16>
    %c3 = arith.constant 3 : index
    %c0_14 = arith.constant 0 : index
    %36 = vector.load %arg14[%c3, %c0_14] : memref<88x256xf32, #tpu.memory_space<vmem>>, vector<80x256xf32>
    %37 = arith.truncf %36 : vector<80x256xf32> to vector<80x256xbf16>
    %c4 = arith.constant 4 : index
    %c0_15 = arith.constant 0 : index
    %38 = vector.load %arg14[%c4, %c0_15] : memref<88x256xf32, #tpu.memory_space<vmem>>, vector<80x256xf32>
    %39 = arith.truncf %38 : vector<80x256xf32> to vector<80x256xbf16>
    %40 = tpu.concatenate %31, %33, %35, %37, %39 in 1 : vector<80x256xbf16>, vector<80x256xbf16>, vector<80x256xbf16>, vector<80x256xbf16>, vector<80x256xbf16> -> vector<80x1280xbf16>
    %c0_16 = arith.constant 0 : index
    %c0_17 = arith.constant 0 : index
    %41 = vector.load %arg5[%c0_16, %c0_17] : memref<1280x256xbf16, #tpu.memory_space<vmem>>, vector<1280x256xbf16>
    %cst_18 = arith.constant dense<0.000000e+00> : vector<80x256xf32>
    %42 = tpu.matmul %40, %41, %cst_18 {dimension_numbers = #tpu.dot_dimension_numbers<[1], [0], [0], [1], [0, 0, 1, 1], [], []>} : vector<80x1280xbf16>, vector<1280x256xbf16>, vector<80x256xf32> -> vector<80x256xf32>
    %c0_19 = arith.constant 0 : index
    %c0_20 = arith.constant 0 : index
    %43 = vector.load %arg6[%c0_19, %c0_20] : memref<1x256xf32, #tpu.memory_space<vmem>>, vector<1x256xf32>
    %44 = vector.broadcast %43 : vector<1x256xf32> to vector<80x256xf32>
    %45 = arith.mulf %42, %44 : vector<80x256xf32>
    %c0_21 = arith.constant 0 : index
    %c0_22 = arith.constant 0 : index
    %46 = vector.load %arg7[%c0_21, %c0_22] : memref<1x256xf32, #tpu.memory_space<vmem>>, vector<1x256xf32>
    %47 = vector.broadcast %46 : vector<1x256xf32> to vector<80x256xf32>
    %48 = arith.addf %45, %47 : vector<80x256xf32>
    %cst_23 = arith.constant 0.000000e+00 : f32
    %49 = vector.broadcast %cst_23 : f32 to vector<80x256xf32>
    %50 = arith.maximumf %48, %49 : vector<80x256xf32>
    %51 = vector.extract_strided_slice %50 {offsets = [0, 0], sizes = [80, 128], strides = [1, 1]} : vector<80x256xf32> to vector<80x128xf32>
    %52 = vector.extract_strided_slice %50 {offsets = [0, 128], sizes = [80, 128], strides = [1, 1]} : vector<80x256xf32> to vector<80x128xf32>
    %53 = arith.maximumf %51, %52 : vector<80x128xf32>
    %c0_24 = arith.constant 0 : index
    %c0_25 = arith.constant 0 : index
    %54 = vector.load %arg15[%c0_24, %c0_25] : memref<80x128xf32, #tpu.memory_space<vmem>>, vector<80x128xf32>
    tpu.vector_store %arg15[%c0_24, %c0_25], %53 {strides = array<i32>} : memref<80x128xf32, #tpu.memory_space<vmem>>, vector<80x128xf32>,
    %c0_26 = arith.constant 0 : index
    %c0_27 = arith.constant 0 : index
    %55 = tpu.strided_load %arg15[%c0_26, %c0_27] {strides = array<i32: 10, 1>} : memref<80x128xf32, #tpu.memory_space<vmem>>, vector<8x128xf32>
    %c1_28 = arith.constant 1 : index
    %c0_29 = arith.constant 0 : index
    %56 = tpu.strided_load %arg15[%c1_28, %c0_29] {strides = array<i32: 10, 1>} : memref<80x128xf32, #tpu.memory_space<vmem>>, vector<8x128xf32>
    %57 = arith.maximumf %55, %56 : vector<8x128xf32>
    %c2_30 = arith.constant 2 : index
    %c0_31 = arith.constant 0 : index
    %58 = tpu.strided_load %arg15[%c2_30, %c0_31] {strides = array<i32: 10, 1>} : memref<80x128xf32, #tpu.memory_space<vmem>>, vector<8x128xf32>
    %c3_32 = arith.constant 3 : index
    %c0_33 = arith.constant 0 : index
    %59 = tpu.strided_load %arg15[%c3_32, %c0_33] {strides = array<i32: 10, 1>} : memref<80x128xf32, #tpu.memory_space<vmem>>, vector<8x128xf32>
    %60 = arith.maximumf %58, %59 : vector<8x128xf32>
    %61 = tpu.concatenate %57, %60 in 1 : vector<8x128xf32>, vector<8x128xf32> -> vector<8x256xf32>
    %62 = arith.truncf %61 : vector<8x256xf32> to vector<8x256xbf16>
    %c0_34 = arith.constant 0 : index
    %c0_35 = arith.constant 0 : index
    %63 = vector.load %arg8[%c0_34, %c0_35] : memref<256x512xbf16, #tpu.memory_space<vmem>>, vector<256x512xbf16>
    %cst_36 = arith.constant dense<0.000000e+00> : vector<8x512xf32>
    %64 = tpu.matmul %62, %63, %cst_36 {dimension_numbers = #tpu.dot_dimension_numbers<[1], [0], [0], [1], [0, 0, 1, 1], [], []>} : vector<8x256xbf16>, vector<256x512xbf16>, vector<8x512xf32> -> vector<8x512xf32>
    %c0_37 = arith.constant 0 : index
    %c0_38 = arith.constant 0 : index
    %65 = vector.load %arg9[%c0_37, %c0_38] : memref<1x512xf32, #tpu.memory_space<vmem>>, vector<1x512xf32>
    %66 = vector.broadcast %65 : vector<1x512xf32> to vector<8x512xf32>
    %67 = arith.mulf %64, %66 : vector<8x512xf32>
    %c0_39 = arith.constant 0 : index
    %c0_40 = arith.constant 0 : index
    %68 = vector.load %arg10[%c0_39, %c0_40] : memref<1x512xf32, #tpu.memory_space<vmem>>, vector<1x512xf32>
    %69 = vector.broadcast %68 : vector<1x512xf32> to vector<8x512xf32>
    %70 = arith.addf %67, %69 : vector<8x512xf32>
    %cst_41 = arith.constant 0.000000e+00 : f32
    %71 = vector.broadcast %cst_41 : f32 to vector<8x512xf32>
    %72 = arith.maximumf %70, %71 : vector<8x512xf32>
    %73 = arith.truncf %72 : vector<8x512xf32> to vector<8x512xbf16>
    %c0_42 = arith.constant 0 : index
    %c0_43 = arith.constant 0 : index
    %74 = vector.load %arg11[%c0_42, %c0_43] : memref<512x128xbf16, #tpu.memory_space<vmem>>, vector<512x128xbf16>
    %cst_44 = arith.constant dense<0.000000e+00> : vector<8x128xf32>
    %75 = tpu.matmul %73, %74, %cst_44 {dimension_numbers = #tpu.dot_dimension_numbers<[1], [0], [0], [1], [0, 0, 1, 1], [], []>} : vector<8x512xbf16>, vector<512x128xbf16>, vector<8x128xf32> -> vector<8x128xf32>
    %c0_45 = arith.constant 0 : index
    %c0_46 = arith.constant 0 : index
    %76 = vector.load %arg12[%c0_45, %c0_46] : memref<1x128xf32, #tpu.memory_space<vmem>>, vector<1x128xf32>
    %77 = vector.broadcast %76 : vector<1x128xf32> to vector<8x128xf32>
    %78 = arith.addf %75, %77 : vector<8x128xf32>
    %c0_47 = arith.constant 0 : index
    %c0_48 = arith.constant 0 : index
    %79 = vector.load %arg13[%c0_47, %c0_48] : memref<8x128xf32, #tpu.memory_space<vmem>>, vector<8x128xf32>
    tpu.vector_store %arg13[%c0_47, %c0_48], %78 {strides = array<i32>} : memref<8x128xf32, #tpu.memory_space<vmem>>, vector<8x128xf32>,
    return
  }
  func.func @transform_0(%arg0: i32) -> (i32, i32) {
    %c0_i32 = arith.constant 0 : i32
    %c0_i32_0 = arith.constant 0 : i32
    return %arg0, %c0_i32 : i32, i32
  }
  func.func @transform_1(%arg0: i32) -> (i32, i32) {
    %c0_i32 = arith.constant 0 : i32
    %c0_i32_0 = arith.constant 0 : i32
    %c0_i32_1 = arith.constant 0 : i32
    return %c0_i32, %c0_i32_0 : i32, i32
  }
  func.func @transform_2(%arg0: i32) -> (i32, i32) {
    %c0_i32 = arith.constant 0 : i32
    %c0_i32_0 = arith.constant 0 : i32
    %c0_i32_1 = arith.constant 0 : i32
    return %c0_i32, %c0_i32_0 : i32, i32
  }
  func.func @transform_3(%arg0: i32) -> (i32, i32) {
    %c0_i32 = arith.constant 0 : i32
    %c0_i32_0 = arith.constant 0 : i32
    %c0_i32_1 = arith.constant 0 : i32
    return %c0_i32, %c0_i32_0 : i32, i32
  }
  func.func @transform_4(%arg0: i32) -> (i32, i32) {
    %c0_i32 = arith.constant 0 : i32
    %c0_i32_0 = arith.constant 0 : i32
    %c0_i32_1 = arith.constant 0 : i32
    return %c0_i32, %c0_i32_0 : i32, i32
  }
  func.func @transform_5(%arg0: i32) -> (i32, i32) {
    %c0_i32 = arith.constant 0 : i32
    %c0_i32_0 = arith.constant 0 : i32
    %c0_i32_1 = arith.constant 0 : i32
    return %c0_i32, %c0_i32_0 : i32, i32
  }
  func.func @transform_6(%arg0: i32) -> (i32, i32) {
    %c0_i32 = arith.constant 0 : i32
    %c0_i32_0 = arith.constant 0 : i32
    %c0_i32_1 = arith.constant 0 : i32
    return %c0_i32, %c0_i32_0 : i32, i32
  }
  func.func @transform_7(%arg0: i32) -> (i32, i32) {
    %c0_i32 = arith.constant 0 : i32
    %c0_i32_0 = arith.constant 0 : i32
    %c0_i32_1 = arith.constant 0 : i32
    return %c0_i32, %c0_i32_0 : i32, i32
  }
  func.func @transform_8(%arg0: i32) -> (i32, i32) {
    %c0_i32 = arith.constant 0 : i32
    %c0_i32_0 = arith.constant 0 : i32
    %c0_i32_1 = arith.constant 0 : i32
    return %c0_i32, %c0_i32_0 : i32, i32
  }
  func.func @transform_9(%arg0: i32) -> (i32, i32) {
    %c0_i32 = arith.constant 0 : i32
    %c0_i32_0 = arith.constant 0 : i32
    %c0_i32_1 = arith.constant 0 : i32
    return %c0_i32, %c0_i32_0 : i32, i32
  }
  func.func @transform_10(%arg0: i32) -> (i32, i32) {
    %c0_i32 = arith.constant 0 : i32
    %c0_i32_0 = arith.constant 0 : i32
    %c0_i32_1 = arith.constant 0 : i32
    return %c0_i32, %c0_i32_0 : i32, i32
  }
  func.func @transform_11(%arg0: i32) -> (i32, i32) {
    %c0_i32 = arith.constant 0 : i32
    %c0_i32_0 = arith.constant 0 : i32
    %c0_i32_1 = arith.constant 0 : i32
    return %c0_i32, %c0_i32_0 : i32, i32
  }
  func.func @transform_12(%arg0: i32) -> (i32, i32) {
    %c0_i32 = arith.constant 0 : i32
    %c0_i32_0 = arith.constant 0 : i32
    return %arg0, %c0_i32 : i32, i32
  }
}

module attributes {stable_mosaic.version = 11 : i64} {
  func.func @_lenet_kernel(%arg0: i32, %arg1: memref<80x196xbf16, #tpu.memory_space<vmem>>, %arg2: memref<196x2304xbf16, #tpu.memory_space<vmem>>, %arg3: memref<1x2304xf32, #tpu.memory_space<vmem>>, %arg4: memref<1x2304xf32, #tpu.memory_space<vmem>>, %arg5: memref<1280x256xbf16, #tpu.memory_space<vmem>>, %arg6: memref<1x256xf32, #tpu.memory_space<vmem>>, %arg7: memref<1x256xf32, #tpu.memory_space<vmem>>, %arg8: memref<256x512xbf16, #tpu.memory_space<vmem>>, %arg9: memref<1x512xf32, #tpu.memory_space<vmem>>, %arg10: memref<1x512xf32, #tpu.memory_space<vmem>>, %arg11: memref<512x128xbf16, #tpu.memory_space<vmem>>, %arg12: memref<1x128xf32, #tpu.memory_space<vmem>>, %arg13: memref<8x128xf32, #tpu.memory_space<vmem>>, %arg14: memref<88x256xf32, #tpu.memory_space<vmem>>, %arg15: memref<80x128xf32, #tpu.memory_space<vmem>>) attributes {dimension_semantics = [#tpu.dimension_semantics<parallel>], iteration_bounds = array<i64: 2>, scalar_prefetch = 0 : i64, scratch_operands = 2 : i64, tpu.core_type = #tpu.core_type<tc>, window_params = [{transform_indices = @transform_0, window_bounds = array<i64: 80, 196>}, {pipeline_mode = #tpu.pipeline_mode<synchronous>, transform_indices = @transform_1, window_bounds = array<i64: 196, 2304>}, {pipeline_mode = #tpu.pipeline_mode<synchronous>, transform_indices = @transform_2, window_bounds = array<i64: 1, 2304>}, {pipeline_mode = #tpu.pipeline_mode<synchronous>, transform_indices = @transform_3, window_bounds = array<i64: 1, 2304>}, {pipeline_mode = #tpu.pipeline_mode<synchronous>, transform_indices = @transform_4, window_bounds = array<i64: 1280, 256>}, {pipeline_mode = #tpu.pipeline_mode<synchronous>, transform_indices = @transform_5, window_bounds = array<i64: 1, 256>}, {pipeline_mode = #tpu.pipeline_mode<synchronous>, transform_indices = @transform_6, window_bounds = array<i64: 1, 256>}, {pipeline_mode = #tpu.pipeline_mode<synchronous>, transform_indices = @transform_7, window_bounds = array<i64: 256, 512>}, {pipeline_mode = #tpu.pipeline_mode<synchronous>, transform_indices = @transform_8, window_bounds = array<i64: 1, 512>}, {pipeline_mode = #tpu.pipeline_mode<synchronous>, transform_indices = @transform_9, window_bounds = array<i64: 1, 512>}, {pipeline_mode = #tpu.pipeline_mode<synchronous>, transform_indices = @transform_10, window_bounds = array<i64: 512, 128>}, {pipeline_mode = #tpu.pipeline_mode<synchronous>, transform_indices = @transform_11, window_bounds = array<i64: 1, 128>}, {transform_indices = @transform_12, window_bounds = array<i64: 8, 128>}]} {
    %c0 = arith.constant 0 : index
    %c0_0 = arith.constant 0 : index
    %0 = vector.load %arg1[%c0, %c0_0] : memref<80x196xbf16, #tpu.memory_space<vmem>>, vector<80x196xbf16>
    %c0_1 = arith.constant 0 : index
    %c0_2 = arith.constant 0 : index
    %1 = vector.load %arg2[%c0_1, %c0_2] : memref<196x2304xbf16, #tpu.memory_space<vmem>>, vector<196x2304xbf16>
    %cst = arith.constant dense<0.000000e+00> : vector<80x2304xf32>
    %2 = tpu.matmul %0, %1, %cst {dimension_numbers = #tpu.dot_dimension_numbers<[1], [0], [0], [1], [0, 0, 1, 1], [], []>} : vector<80x196xbf16>, vector<196x2304xbf16>, vector<80x2304xf32> -> vector<80x2304xf32>
    %c0_3 = arith.constant 0 : index
    %c0_4 = arith.constant 0 : index
    %3 = vector.load %arg3[%c0_3, %c0_4] : memref<1x2304xf32, #tpu.memory_space<vmem>>, vector<1x2304xf32>
    %4 = vector.broadcast %3 : vector<1x2304xf32> to vector<80x2304xf32>
    %5 = arith.mulf %2, %4 : vector<80x2304xf32>
    %c0_5 = arith.constant 0 : index
    %c0_6 = arith.constant 0 : index
    %6 = vector.load %arg4[%c0_5, %c0_6] : memref<1x2304xf32, #tpu.memory_space<vmem>>, vector<1x2304xf32>
    %7 = vector.broadcast %6 : vector<1x2304xf32> to vector<80x2304xf32>
    %8 = arith.addf %5, %7 : vector<80x2304xf32>
    %cst_7 = arith.constant 0.000000e+00 : f32
    %9 = vector.broadcast %cst_7 : f32 to vector<80x2304xf32>
    %10 = arith.maximumf %8, %9 : vector<80x2304xf32>
    %11 = vector.extract_strided_slice %10 {offsets = [0, 0], sizes = [80, 256], strides = [1, 1]} : vector<80x2304xf32> to vector<80x256xf32>
    %12 = vector.extract_strided_slice %10 {offsets = [0, 256], sizes = [80, 256], strides = [1, 1]} : vector<80x2304xf32> to vector<80x256xf32>
    %13 = arith.maximumf %11, %12 : vector<80x256xf32>
    %14 = vector.extract_strided_slice %10 {offsets = [0, 512], sizes = [80, 256], strides = [1, 1]} : vector<80x2304xf32> to vector<80x256xf32>
    %15 = arith.maximumf %13, %14 : vector<80x256xf32>
    %16 = vector.extract_strided_slice %10 {offsets = [0, 768], sizes = [80, 256], strides = [1, 1]} : vector<80x2304xf32> to vector<80x256xf32>
    %17 = arith.maximumf %15, %16 : vector<80x256xf32>
    %18 = vector.extract_strided_slice %10 {offsets = [0, 1024], sizes = [80, 256], strides = [1, 1]} : vector<80x2304xf32> to vector<80x256xf32>
    %19 = arith.maximumf %17, %18 : vector<80x256xf32>
    %20 = vector.extract_strided_slice %10 {offsets = [0, 1280], sizes = [80, 256], strides = [1, 1]} : vector<80x2304xf32> to vector<80x256xf32>
    %21 = arith.maximumf %19, %20 : vector<80x256xf32>
    %22 = vector.extract_strided_slice %10 {offsets = [0, 1536], sizes = [80, 256], strides = [1, 1]} : vector<80x2304xf32> to vector<80x256xf32>
    %23 = arith.maximumf %21, %22 : vector<80x256xf32>
    %24 = vector.extract_strided_slice %10 {offsets = [0, 1792], sizes = [80, 256], strides = [1, 1]} : vector<80x2304xf32> to vector<80x256xf32>
    %25 = arith.maximumf %23, %24 : vector<80x256xf32>
    %26 = vector.extract_strided_slice %10 {offsets = [0, 2048], sizes = [80, 256], strides = [1, 1]} : vector<80x2304xf32> to vector<80x256xf32>
    %27 = arith.maximumf %25, %26 : vector<80x256xf32>
    %c0_8 = arith.constant 0 : index
    %c0_9 = arith.constant 0 : index
    %28 = vector.load %arg14[%c0_8, %c0_9] : memref<88x256xf32, #tpu.memory_space<vmem>>, vector<80x256xf32>
    tpu.vector_store %arg14[%c0_8, %c0_9], %27 {strides = array<i32>} : memref<88x256xf32, #tpu.memory_space<vmem>>, vector<80x256xf32>,
    %cst_10 = arith.constant 0.000000e+00 : f32
    %29 = vector.broadcast %cst_10 : f32 to vector<8x256xf32>
    %c80 = arith.constant 80 : index
    %c0_11 = arith.constant 0 : index
    %30 = vector.load %arg14[%c80, %c0_11] : memref<88x256xf32, #tpu.memory_space<vmem>>, vector<8x256xf32>
    tpu.vector_store %arg14[%c80, %c0_11], %29 {strides = array<i32>} : memref<88x256xf32, #tpu.memory_space<vmem>>, vector<8x256xf32>,
    %31 = arith.truncf %27 : vector<80x256xf32> to vector<80x256xbf16>
    %c1 = arith.constant 1 : index
    %c0_12 = arith.constant 0 : index
    %32 = vector.load %arg14[%c1, %c0_12] : memref<88x256xf32, #tpu.memory_space<vmem>>, vector<80x256xf32>
    %33 = arith.truncf %32 : vector<80x256xf32> to vector<80x256xbf16>
    %c2 = arith.constant 2 : index
    %c0_13 = arith.constant 0 : index
    %34 = vector.load %arg14[%c2, %c0_13] : memref<88x256xf32, #tpu.memory_space<vmem>>, vector<80x256xf32>
    %35 = arith.truncf %34 : vector<80x256xf32> to vector<80x256xbf16>
    %c3 = arith.constant 3 : index
    %c0_14 = arith.constant 0 : index
    %36 = vector.load %arg14[%c3, %c0_14] : memref<88x256xf32, #tpu.memory_space<vmem>>, vector<80x256xf32>
    %37 = arith.truncf %36 : vector<80x256xf32> to vector<80x256xbf16>
    %c4 = arith.constant 4 : index
    %c0_15 = arith.constant 0 : index
    %38 = vector.load %arg14[%c4, %c0_15] : memref<88x256xf32, #tpu.memory_space<vmem>>, vector<80x256xf32>
    %39 = arith.truncf %38 : vector<80x256xf32> to vector<80x256xbf16>
    %40 = tpu.concatenate %31, %33, %35, %37, %39 in 1 : vector<80x256xbf16>, vector<80x256xbf16>, vector<80x256xbf16>, vector<80x256xbf16>, vector<80x256xbf16> -> vector<80x1280xbf16>
    %c0_16 = arith.constant 0 : index
    %c0_17 = arith.constant 0 : index
    %41 = vector.load %arg5[%c0_16, %c0_17] : memref<1280x256xbf16, #tpu.memory_space<vmem>>, vector<1280x256xbf16>
    %cst_18 = arith.constant dense<0.000000e+00> : vector<80x256xf32>
    %42 = tpu.matmul %40, %41, %cst_18 {dimension_numbers = #tpu.dot_dimension_numbers<[1], [0], [0], [1], [0, 0, 1, 1], [], []>} : vector<80x1280xbf16>, vector<1280x256xbf16>, vector<80x256xf32> -> vector<80x256xf32>
    %c0_19 = arith.constant 0 : index
    %c0_20 = arith.constant 0 : index
    %43 = vector.load %arg6[%c0_19, %c0_20] : memref<1x256xf32, #tpu.memory_space<vmem>>, vector<1x256xf32>
    %44 = vector.broadcast %43 : vector<1x256xf32> to vector<80x256xf32>
    %45 = arith.mulf %42, %44 : vector<80x256xf32>
    %c0_21 = arith.constant 0 : index
    %c0_22 = arith.constant 0 : index
    %46 = vector.load %arg7[%c0_21, %c0_22] : memref<1x256xf32, #tpu.memory_space<vmem>>, vector<1x256xf32>
    %47 = vector.broadcast %46 : vector<1x256xf32> to vector<80x256xf32>
    %48 = arith.addf %45, %47 : vector<80x256xf32>
    %cst_23 = arith.constant 0.000000e+00 : f32
    %49 = vector.broadcast %cst_23 : f32 to vector<80x256xf32>
    %50 = arith.maximumf %48, %49 : vector<80x256xf32>
    %51 = vector.extract_strided_slice %50 {offsets = [0, 0], sizes = [80, 128], strides = [1, 1]} : vector<80x256xf32> to vector<80x128xf32>
    %52 = vector.extract_strided_slice %50 {offsets = [0, 128], sizes = [80, 128], strides = [1, 1]} : vector<80x256xf32> to vector<80x128xf32>
    %53 = arith.maximumf %51, %52 : vector<80x128xf32>
    %c0_24 = arith.constant 0 : index
    %c0_25 = arith.constant 0 : index
    %54 = vector.load %arg15[%c0_24, %c0_25] : memref<80x128xf32, #tpu.memory_space<vmem>>, vector<80x128xf32>
    tpu.vector_store %arg15[%c0_24, %c0_25], %53 {strides = array<i32>} : memref<80x128xf32, #tpu.memory_space<vmem>>, vector<80x128xf32>,
    %c0_26 = arith.constant 0 : index
    %c0_27 = arith.constant 0 : index
    %55 = tpu.strided_load %arg15[%c0_26, %c0_27] {strides = array<i32: 10, 1>} : memref<80x128xf32, #tpu.memory_space<vmem>>, vector<8x128xf32>
    %c1_28 = arith.constant 1 : index
    %c0_29 = arith.constant 0 : index
    %56 = tpu.strided_load %arg15[%c1_28, %c0_29] {strides = array<i32: 10, 1>} : memref<80x128xf32, #tpu.memory_space<vmem>>, vector<8x128xf32>
    %57 = arith.maximumf %55, %56 : vector<8x128xf32>
    %c2_30 = arith.constant 2 : index
    %c0_31 = arith.constant 0 : index
    %58 = tpu.strided_load %arg15[%c2_30, %c0_31] {strides = array<i32: 10, 1>} : memref<80x128xf32, #tpu.memory_space<vmem>>, vector<8x128xf32>
    %c3_32 = arith.constant 3 : index
    %c0_33 = arith.constant 0 : index
    %59 = tpu.strided_load %arg15[%c3_32, %c0_33] {strides = array<i32: 10, 1>} : memref<80x128xf32, #tpu.memory_space<vmem>>, vector<8x128xf32>
    %60 = arith.maximumf %58, %59 : vector<8x128xf32>
    %61 = tpu.concatenate %57, %60 in 1 : vector<8x128xf32>, vector<8x128xf32> -> vector<8x256xf32>
    %62 = arith.truncf %61 : vector<8x256xf32> to vector<8x256xbf16>
    %c0_34 = arith.constant 0 : index
    %c0_35 = arith.constant 0 : index
    %63 = vector.load %arg8[%c0_34, %c0_35] : memref<256x512xbf16, #tpu.memory_space<vmem>>, vector<256x512xbf16>
    %cst_36 = arith.constant dense<0.000000e+00> : vector<8x512xf32>
    %64 = tpu.matmul %62, %63, %cst_36 {dimension_numbers = #tpu.dot_dimension_numbers<[1], [0], [0], [1], [0, 0, 1, 1], [], []>} : vector<8x256xbf16>, vector<256x512xbf16>, vector<8x512xf32> -> vector<8x512xf32>
    %c0_37 = arith.constant 0 : index
    %c0_38 = arith.constant 0 : index
    %65 = vector.load %arg9[%c0_37, %c0_38] : memref<1x512xf32, #tpu.memory_space<vmem>>, vector<1x512xf32>
    %66 = vector.broadcast %65 : vector<1x512xf32> to vector<8x512xf32>
    %67 = arith.mulf %64, %66 : vector<8x512xf32>
    %c0_39 = arith.constant 0 : index
    %c0_40 = arith.constant 0 : index
    %68 = vector.load %arg10[%c0_39, %c0_40] : memref<1x512xf32, #tpu.memory_space<vmem>>, vector<1x512xf32>
    %69 = vector.broadcast %68 : vector<1x512xf32> to vector<8x512xf32>
    %70 = arith.addf %67, %69 : vector<8x512xf32>
    %cst_41 = arith.constant 0.000000e+00 : f32
    %71 = vector.broadcast %cst_41 : f32 to vector<8x512xf32>
    %72 = arith.maximumf %70, %71 : vector<8x512xf32>
    %73 = arith.truncf %72 : vector<8x512xf32> to vector<8x512xbf16>
    %c0_42 = arith.constant 0 : index
    %c0_43 = arith.constant 0 : index
    %74 = vector.load %arg11[%c0_42, %c0_43] : memref<512x128xbf16, #tpu.memory_space<vmem>>, vector<512x128xbf16>
    %cst_44 = arith.constant dense<0.000000e+00> : vector<8x128xf32>
    %75 = tpu.matmul %73, %74, %cst_44 {dimension_numbers = #tpu.dot_dimension_numbers<[1], [0], [0], [1], [0, 0, 1, 1], [], []>} : vector<8x512xbf16>, vector<512x128xbf16>, vector<8x128xf32> -> vector<8x128xf32>
    %c0_45 = arith.constant 0 : index
    %c0_46 = arith.constant 0 : index
    %76 = vector.load %arg12[%c0_45, %c0_46] : memref<1x128xf32, #tpu.memory_space<vmem>>, vector<1x128xf32>
    %77 = vector.broadcast %76 : vector<1x128xf32> to vector<8x128xf32>
    %78 = arith.addf %75, %77 : vector<8x128xf32>
    %c0_47 = arith.constant 0 : index
    %c0_48 = arith.constant 0 : index
    %79 = vector.load %arg13[%c0_47, %c0_48] : memref<8x128xf32, #tpu.memory_space<vmem>>, vector<8x128xf32>
    tpu.vector_store %arg13[%c0_47, %c0_48], %78 {strides = array<i32>} : memref<8x128xf32, #tpu.memory_space<vmem>>, vector<8x128xf32>,
    return
  }
  func.func @transform_0(%arg0: i32) -> (i32, i32) {
    %c0_i32 = arith.constant 0 : i32
    %c0_i32_0 = arith.constant 0 : i32
    return %arg0, %c0_i32 : i32, i32
  }
  func.func @transform_1(%arg0: i32) -> (i32, i32) {
    %c0_i32 = arith.constant 0 : i32
    %c0_i32_0 = arith.constant 0 : i32
    %c0_i32_1 = arith.constant 0 : i32
    return %c0_i32, %c0_i32_0 : i32, i32
  }
  func.func @transform_2(%arg0: i32) -> (i32, i32) {
    %c0_i32 = arith.constant 0 : i32
    %c0_i32_0 = arith.constant 0 : i32
    %c0_i32_1 = arith.constant 0 : i32
    return %c0_i32, %c0_i32_0 : i32, i32
  }
  func.func @transform_3(%arg0: i32) -> (i32, i32) {
    %c0_i32 = arith.constant 0 : i32
    %c0_i32_0 = arith.constant 0 : i32
    %c0_i32_1 = arith.constant 0 : i32
    return %c0_i32, %c0_i32_0 : i32, i32
  }
  func.func @transform_4(%arg0: i32) -> (i32, i32) {
    %c0_i32 = arith.constant 0 : i32
    %c0_i32_0 = arith.constant 0 : i32
    %c0_i32_1 = arith.constant 0 : i32
    return %c0_i32, %c0_i32_0 : i32, i32
  }
  func.func @transform_5(%arg0: i32) -> (i32, i32) {
    %c0_i32 = arith.constant 0 : i32
    %c0_i32_0 = arith.constant 0 : i32
    %c0_i32_1 = arith.constant 0 : i32
    return %c0_i32, %c0_i32_0 : i32, i32
  }
  func.func @transform_6(%arg0: i32) -> (i32, i32) {
    %c0_i32 = arith.constant 0 : i32
    %c0_i32_0 = arith.constant 0 : i32
    %c0_i32_1 = arith.constant 0 : i32
    return %c0_i32, %c0_i32_0 : i32, i32
  }
  func.func @transform_7(%arg0: i32) -> (i32, i32) {
    %c0_i32 = arith.constant 0 : i32
    %c0_i32_0 = arith.constant 0 : i32
    %c0_i32_1 = arith.constant 0 : i32
    return %c0_i32, %c0_i32_0 : i32, i32
  }
  func.func @transform_8(%arg0: i32) -> (i32, i32) {
    %c0_i32 = arith.constant 0 : i32
    %c0_i32_0 = arith.constant 0 : i32
    %c0_i32_1 = arith.constant 0 : i32
    return %c0_i32, %c0_i32_0 : i32, i32
  }
  func.func @transform_9(%arg0: i32) -> (i32, i32) {
    %c0_i32 = arith.constant 0 : i32
    %c0_i32_0 = arith.constant 0 : i32
    %c0_i32_1 = arith.constant 0 : i32
    return %c0_i32, %c0_i32_0 : i32, i32
  }
  func.func @transform_10(%arg0: i32) -> (i32, i32) {
    %c0_i32 = arith.constant 0 : i32
    %c0_i32_0 = arith.constant 0 : i32
    %c0_i32_1 = arith.constant 0 : i32
    return %c0_i32, %c0_i32_0 : i32, i32
  }
  func.func @transform_11(%arg0: i32) -> (i32, i32) {
    %c0_i32 = arith.constant 0 : i32
    %c0_i32_0 = arith.constant 0 : i32
    %c0_i32_1 = arith.constant 0 : i32
    return %c0_i32, %c0_i32_0 : i32, i32
  }
  func.func @transform_12(%arg0: i32) -> (i32, i32) {
    %c0_i32 = arith.constant 0 : i32
    %c0_i32_0 = arith.constant 0 : i32
    return %arg0, %c0_i32 : i32, i32
  }
}

</mosaic_0001>

<bundles_post_ra>
// kernel: tile.56
= control target key start
LH: loop header
LB: loop body
LE: loop exit
PB: predicated region body
PF: predicated region fallthrough
CT: control target
= control target key end

     0   :  { %s22_s0 = inlined_call_operand.vmem [shape: f32[50], index: 0, kind: input, shape index: {}]   ;;  %s23_s1 = inlined_call_operand.vmem [shape: f32[2,50], index: 1, kind: output, shape index: {}]  }
   0x1   :  { %v4_v0 = vld [vmem:[%s22_s0] ss:$0 sm:$0xff] }
   0x2   :  { %5 = vst [vmem:[%s23_s1] sm:$0x3] %v4_v0 }

// kernel: tile.57
= control target key start
LH: loop header
LB: loop body
LE: loop exit
PB: predicated region body
PF: predicated region fallthrough
CT: control target
= control target key end

     0   :  { %vm7_vm0 = vcmask 408576   ;;  %vm13_vm1 = vcmask 818576   ;;  %s39_s0 = inlined_call_operand.vmem [shape: f32[2,50], index: 0, kind: input, shape index: {}]   ;;  %s40_s1 = inlined_call_operand.vmem [shape: f32[100], index: 1, kind: output, shape index: {}]  }
   0x1   :  { %v4_v0 = vld [vmem:[%s39_s0] sm:$0x3]  ;;  %s22_s0 = smov 50  }
   0x2   :  { %5 = vst [vmem:[#allocation1] sm:$0x3] %v4_v0 }
   0x9   :  { %v10_v1 = vld [vmem:[#allocation1 + $0x1] sm:$0x1]   ;;  %v6_v2 = vld [vmem:[#allocation1] sm:$0x1]  }
   0xa   :  { %11 = vrot.lane.b32.xlu0 %v10_v1, %s22_s0  ;;  %8 = vst.msk [vmem:[#allocation0] sm:$0x1] %vm7_vm0, %v6_v2  }
  0x7c   :  { %v12_v3 = vpop.permute.xlu0 %11  }
  0x7d   :  { %14 = vst.msk [vmem:[#allocation0] sm:$0x1] %vm13_vm1, %v12_v3  }
  0x84   :  { %v18_v4 = vld [vmem:[#allocation0] sm:$0x1] }
  0x85   :  { %20 = vst [vmem:[%s40_s1] sm:$0x1] %v18_v4 }

// kernel: tile.61
= control target key start
LH: loop header
LB: loop body
LE: loop exit
PB: predicated region body
PF: predicated region fallthrough
CT: control target
= control target key end

     0   :  { %s22_s0 = inlined_call_operand.vmem [shape: f32[128], index: 0, kind: input, shape index: {}]   ;;  %s23_s1 = inlined_call_operand.vmem [shape: f32[2,128], index: 1, kind: output, shape index: {}]  }
   0x1   :  { %v4_v0 = vld [vmem:[%s22_s0] ss:$0 sm:$0xff] }
   0x2   :  { %5 = vst [vmem:[%s23_s1] sm:$0x3] %v4_v0 }

// kernel: tile.38
= control target key start
LH: loop header
LB: loop body
LE: loop exit
PB: predicated region body
PF: predicated region fallthrough
CT: control target
= control target key end

     0   :  { %s22_s0 = inlined_call_operand.vmem [shape: f32[20], index: 0, kind: input, shape index: {}]   ;;  %s23_s1 = inlined_call_operand.vmem [shape: f32[8,20], index: 1, kind: output, shape index: {}]  }
   0x1   :  { %v4_v0 = vld [vmem:[%s22_s0] ss:$0 sm:$0xff] }
   0x2   :  { %5 = vst [vmem:[%s23_s1] sm:$0xff] %v4_v0 }

// kernel: tile.39
= control target key start
LH: loop header
LB: loop body
LE: loop exit
PB: predicated region body
PF: predicated region fallthrough
CT: control target
= control target key end

     0   :  { %vm9_vm0 = vcmask 64512   ;;  %s76_s12 = smov 120   ;;  %s77_s13 = smov 80   ;;  %vm3_vm1 = vcmask 162816   ;;  %vm13_vm2 = vcmask 97280   ;;  %vm16_vm3 = vcmask 1048512   ;;  %s123_s0 = inlined_call_operand.vmem [shape: f32[8,20], index: 0, kind: input, shape index: {}]   ;;  %s124_s1 = inlined_call_operand.vmem [shape: f32[160], index: 1, kind: output, shape index: {}]  }
   0x1   :  { %v61_v0 = vld [vmem:[%s123_s0 + $0x6] sm:$0x1]   ;;  %v64_v3 = vld [vmem:[%s123_s0 + $0x4] sm:$0x1]   ;;  %v63_v4 = vld [vmem:[%s123_s0 + $0x5] sm:$0x1]  }
   0x2   :  { %v62_v1 = vld [vmem:[%s123_s0 + $0x6] sm:$0x1]   ;;  %26 = vrot.lane.b32.xlu1 %v64_v3, %s77_s13  ;;  %v65_v5 = vld [vmem:[%s123_s0 + $0x3] sm:$0x1]   ;;  %v2_v6 = vld [vmem:[%s123_s0] sm:$0x1]  }
   0x3   :  { %v10_v2 = vsel %vm9_vm0, %v62_v1, %v61_v0  ;;  %4 = vst.msk [vmem:[#allocation0] sm:$0x1] %vm3_vm1, %v2_v6   ;;  %s78_s20 = smov 100   ;;  %s79_s21 = smov 60   ;;  %v66_v7 = vld [vmem:[%s123_s0 + $0x2] sm:$0x1]  }
   0x4   :  { %11 = vrot.lane.b32.xlu0 %v10_v2, %s76_s12  ;;  %v67_v8 = vld [vmem:[%s123_s0 + $0x1] sm:$0x1]   ;;  %s80_s26 = smov 40   ;;  %s81_s27 = smov 20   ;;  %v68_v9 = vld [vmem:[%s123_s0 + $0x7] sm:$0x1]  }
   0x5   :  { %s82_s0 = smov 12   ;;  %vm22_vm4 = vcmask 982816   ;;  %vm28_vm5 = vcmask 818816   ;;  %vm34_vm6 = vcmask 654816   ;;  %vm40_vm7 = vcmask 490816  }
   0x6   :  { %32 = vrot.lane.b32.xlu1 %v65_v5, %s79_s21  ;;  %vm46_vm8 = vcmask 326816   ;;  %vm52_vm9 = vcmask 261216  }
   0x8   :  { %20 = vrot.lane.b32.xlu0 %v63_v4, %s78_s20 }
   0xa   :  { %44 = vrot.lane.b32.xlu1 %v67_v8, %s81_s27 }
   0xc   :  { %38 = vrot.lane.b32.xlu0 %v66_v7, %s80_s26 }
  0x10   :  { %50 = vrot.lane.b32.xlu0 %v68_v9, %s82_s0 }
  0x74   :  { %v27_v11 = vpop.permute.xlu1 %26  }
  0x76   :  { %v12_v10 = vpop.permute.xlu0 %11  }
  0x77   :  { %15 = vst.msk [vmem:[#allocation0 + $0x1] sm:$0x1] %vm13_vm2, %v12_v10  }
  0x78   :  { %17 = vst.msk [vmem:[#allocation0] sm:$0x1] %vm16_vm3, %v12_v10   ;;  %v33_v13 = vpop.permute.xlu1 %32  }
  0x7a   :  { %v21_v12 = vpop.permute.xlu0 %20  }
  0x7b   :  { %23 = vst.msk [vmem:[#allocation0] sm:$0x1] %vm22_vm4, %v21_v12  }
  0x7c   :  { %29 = vst.msk [vmem:[#allocation0] sm:$0x1] %vm28_vm5, %v27_v11   ;;  %v45_v15 = vpop.permute.xlu1 %44  }
  0x7d   :  { %35 = vst.msk [vmem:[#allocation0] sm:$0x1] %vm34_vm6, %v33_v13  }
  0x7e   :  { %v39_v14 = vpop.permute.xlu0 %38  }
  0x7f   :  { %41 = vst.msk [vmem:[#allocation0] sm:$0x1] %vm40_vm7, %v39_v14  }
  0x80   :  { %47 = vst.msk [vmem:[#allocation0] sm:$0x1] %vm46_vm8, %v45_v15  }
  0x82   :  { %v51_v16 = vpop.permute.xlu0 %50  }
  0x83   :  { %54 = vst.msk [vmem:[#allocation0 + $0x1] sm:$0x1] %vm52_vm9, %v51_v16  }
  0x8a   :  { %v58_v17 = vld [vmem:[#allocation0] sm:$0x3] }
  0x8b   :  { %60 = vst [vmem:[%s124_s1] sm:$0x3] %v58_v17 }

// kernel: lenet_forward.1
= control target key start
LH: loop header
LB: loop body
LE: loop exit
PB: predicated region body
PF: predicated region fallthrough
CT: control target
= control target key end

     0   :  { %s7802_s21 = smov 0   ;;  %s10901_s0 = inlined_call_operand.vmem [shape: bf16[160,196], index: 0, kind: input, shape index: {}]   ;;  %s10902_s1 = inlined_call_operand.vmem [shape: bf16[196,2304], index: 1, kind: input, shape index: {}]   ;;  %s10903_s2 = inlined_call_operand.vmem [shape: f32[1,2304], index: 2, kind: input, shape index: {}]   ;;  %s10904_s3 = inlined_call_operand.vmem [shape: f32[1,2304], index: 3, kind: input, shape index: {}]   ;;  %s10905_s4 = inlined_call_operand.vmem [shape: bf16[1280,256], index: 4, kind: input, shape index: {}]   ;;  %s10906_s5 = inlined_call_operand.vmem [shape: f32[1,256], index: 5, kind: input, shape index: {}]   ;;  %s10907_s6 = inlined_call_operand.vmem [shape: f32[1,256], index: 6, kind: input, shape index: {}]   ;;  %s10908_s7 = inlined_call_operand.vmem [shape: bf16[256,512], index: 7, kind: input, shape index: {}]   ;;  %s10909_s8 = inlined_call_operand.vmem [shape: f32[1,512], index: 8, kind: input, shape index: {}]   ;;  %s10910_s9 = inlined_call_operand.vmem [shape: f32[1,512], index: 9, kind: input, shape index: {}]   ;;  %s10911_s10 = inlined_call_operand.vmem [shape: bf16[512,128], index: 10, kind: input, shape index: {}]   ;;  %s10912_s11 = inlined_call_operand.vmem [shape: f32[1,128], index: 11, kind: input, shape index: {}]   ;;  %s10913_s12 = inlined_call_operand.vmem [shape: f32[16,128], index: 12, kind: output, shape index: {}]  }
   0x1 LB: > { %s7808_s22 = sadd.s32 4294967295, %s7734_s21   ;;  %p6298_p0 = scmp.ge.s32.totalorder %s7734_s21, 1  ;;  %s7734_s21 = sphi %s7802_s21, %s22_s21  }
   0x2   : > { %p364_p1 = scmp.lt.s32.totalorder %s7734_s21, 3 }
   0x4   : > { %p365_p2 = pnand %p6298_p0, %p364_p1 }
   0x6   : > { %368 = sbr.rel (%p365_p2) target bundleno = 1580 (0x62c), region = 68 }
   0xd   : > { %v6993_v0 = vld [vmem:[%s10902_s1 + $0x4] ss:$72 sps:$4 sm:$0xff]   ;;  %s406_s25 = smul.u32 10, %s7808_s22  ;;  %v6995_v1 = vld [vmem:[%s10902_s1] ss:$72 sps:$4 sm:$0xff]   ;;  %vm1823_vm0 = vcmask 556032  }
   0xe   : > { %1894 = vmatprep.subr.bf16.mxu0 %v6993_v0  ;;  %v6996_v2 = vld [vmem:[%s10902_s1 + $0x94] ss:$72 sps:$4 sm:$0xff]   ;;  %v6998_v3 = vld [vmem:[%s10902_s1 + $0x90] ss:$72 sps:$4 sm:$0xff]   ;;  %v6999_v4 = vld [vmem:[%s10902_s1 + $0x124] ss:$72 sps:$4 sm:$0xff]  }
   0xf   : > { %1895 = vmatpush1.bf16.msra.mxu0 %v6995_v1  ;;  %p407_p3 = scmp.lt.s32.totalorder %s406_s25, 19  ;;  %v7001_v5 = vld [vmem:[%s10902_s1 + $0x120] ss:$72 sps:$4 sm:$0xff]   ;;  %v7002_v6 = vld [vmem:[%s10902_s1 + $0x1b4] ss:$72 sps:$4 sm:$0xff]   ;;  %vm1839_vm1 = vcmask 1041408  }
  0x10   : > { %1896 = vmatprep.subr.bf16.mxu0 %v6996_v2  ;;  %v7004_v7 = vld [vmem:[%s10902_s1 + $0x1b0] ss:$72 sps:$4 sm:$0xff]   ;;  %v7005_v8 = vld [vmem:[%s10902_s1 + $0x244] ss:$72 sps:$4 sm:$0xff]   ;;  %v7007_v9 = vld [vmem:[%s10902_s1 + $0x240] ss:$72 sps:$4 sm:$0xff]  }
  0x11   : > { %s11003_s25 = smov (!%p407_p3, %s406_s25), 19  ;;  %v7008_v10 = vld [vmem:[%s10902_s1 + $0x2d4] ss:$72 sps:$4 sm:$0xff]   ;;  %v7010_v12 = vld [vmem:[%s10902_s1 + $0x2d0] ss:$72 sps:$4 sm:$0xff]   ;;  %vm3734_vm3 = vcmask 1046528  }
  0x12   : > { %s6859_s24 = sshll.u32 %s11003_s25, 3  ;;  %v7011_v13 = vld [vmem:[%s10902_s1 + $0x364] ss:$72 sps:$4 sm:$0xff]   ;;  %v7013_v14 = vld [vmem:[%s10902_s1 + $0x360] ss:$72 sps:$4 sm:$0xff]   ;;  %vm3848_vm5 = vcmask 1045504  }
  0x13   : > { %1897 = vmatpush1.bf16.msra.mxu0 %v6998_v3  ;;  %s7843_s30 = scalar_lea.vmem %s10901_s0, %s6859_s24  ;;  %v7014_v15 = vld [vmem:[%s10902_s1 + $0x3f4] ss:$72 sps:$4 sm:$0xff]   ;;  %v7016_v16 = vld [vmem:[%s10902_s1 + $0x3f0] ss:$72 sps:$4 sm:$0xff]   ;;  %v7017_v17 = vld [vmem:[%s10902_s1 + $0x484] ss:$72 sps:$4 sm:$0xff]  }
  0x14   : > { %1898 = vmatprep.subr.bf16.mxu0 %v6999_v4  ;;  %v7852_v11 = vld [vmem:[%s7843_s30 + $0x4] ss:$8 sps:$4 sm:$0xff]   ;;  %v7019_v18 = vld [vmem:[%s10902_s1 + $0x480] ss:$72 sps:$4 sm:$0xff]   ;;  %v7020_v19 = vld [vmem:[%s10902_s1 + $0x514] ss:$72 sps:$4 sm:$0xff]  }
  0x15   : > { %6547 = vmatprep.mubr.msk.bf16.mxu0 %vm1823_vm0, %v7852_v11  ;;  %6565 = vmatprep.mubr.msk.bf16.mxu1 %vm1823_vm0, %v7852_v11  ;;  %v7022_v20 = vld [vmem:[%s10902_s1 + $0x510] ss:$72 sps:$4 sm:$0xff]   ;;  %v7023_v21 = vld [vmem:[%s10902_s1 + $0x5a4] ss:$72 sps:$4 sm:$0xff]   ;;  %v7025_v22 = vld [vmem:[%s10902_s1 + $0x5a0] ss:$72 sps:$4 sm:$0xff]  }
  0x16   : > { %v7026_v23 = vld [vmem:[%s10902_s1 + $0x634] ss:$72 sps:$4 sm:$0xff]   ;;  %v644_v24 = vld [vmem:[%s10902_s1 + $0x6c0] sm:$0x33]  ;;  %v7028_v27 = vld [vmem:[%s10902_s1 + $0x630] ss:$72 sps:$4 sm:$0xff]  }
  0x17   : > { %1899 = vmatpush1.bf16.msra.mxu0 %v7001_v5  ;;  %v7087_v25 = vld [vmem:[%s10902_s1 + $0x1c] ss:$72 sps:$4 sm:$0xff]   ;;  %v7089_v26 = vld [vmem:[%s10902_s1 + $0x18] ss:$72 sps:$4 sm:$0xff]   ;;  %v6529_v28 = vcombine.high %v644_v24, %v644_v24  ;;  %v6528_v29 = vcombine.low %v644_v24, %v644_v24  ;;  %v7093_v30 = vld [vmem:[%s10902_s1 + $0xac] ss:$72 sps:$4 sm:$0xff]  }
  0x18   : > { %1900 = vmatprep.subr.bf16.mxu0 %v7002_v6  ;;  %2143 = vmatprep.subr.bf16.mxu1 %v7087_v25  ;;  %v7095_v31 = vld [vmem:[%s10902_s1 + $0xa8] ss:$72 sps:$4 sm:$0xff]   ;;  %v7099_v32 = vld [vmem:[%s10902_s1 + $0x13c] ss:$72 sps:$4 sm:$0xff]   ;;  %v7036_v34 = vld [vmem:[%s10902_s1 + $0xc] ss:$72 sps:$4 sm:$0xff]  }
  0x19   : > { %2144 = vmatpush1.bf16.msra.mxu1 %v7089_v26  ;;  %v1841_v33 = vsel %vm1839_vm1, %v6528_v29, 0  ;;  %v7101_v35 = vld [vmem:[%s10902_s1 + $0x138] ss:$72 sps:$4 sm:$0xff]   ;;  %v7105_v37 = vld [vmem:[%s10902_s1 + $0x1cc] ss:$72 sps:$4 sm:$0xff]   ;;  %p413_p4 = scmp.lt.s32.totalorder %s7808_s22, 1 }
  0x1a   : > { %2145 = vmatprep.subr.bf16.mxu1 %v7093_v30  ;;  %v7924_v36 = vld [vmem:[%s7843_s30] ss:$8 sps:$4 sm:$0xff]   ;;  %v7933_v39 = vld [vmem:[%s7843_s30 + $0x14] ss:$8 sps:$4 sm:$0xff]   ;;  %v7963_v48 = vld [vmem:[%s7843_s30 + $0x10] ss:$8 sps:$4 sm:$0xff]  }
  0x1b   : > { %1901 = vmatpush1.bf16.msra.mxu0 %v7004_v7  ;;  %v7034_v38 = vld [vmem:[%s10902_s1 + $0x8] ss:$72 sps:$4 sm:$0xff]   ;;  %v7039_v40 = vld [vmem:[%s10902_s1 + $0x9c] ss:$72 sps:$4 sm:$0xff]   ;;  %v7037_v43 = vld [vmem:[%s10902_s1 + $0x98] ss:$72 sps:$4 sm:$0xff]  }
  0x1c   : > { %1902 = vmatprep.subr.bf16.mxu0 %v7005_v8  ;;  %v7107_v41 = vld [vmem:[%s10902_s1 + $0x1c8] ss:$72 sps:$4 sm:$0xff]   ;;  %v7111_v42 = vld [vmem:[%s10902_s1 + $0x25c] ss:$72 sps:$4 sm:$0xff]   ;;  %v7042_v44 = vld [vmem:[%s10902_s1 + $0x12c] ss:$72 sps:$4 sm:$0xff]  }
  0x1d   : > { %2146 = vmatpush1.bf16.msra.mxu1 %v7095_v31  ;;  %v7113_v45 = vld [vmem:[%s10902_s1 + $0x258] ss:$72 sps:$4 sm:$0xff]   ;;  %v7040_v46 = vld [vmem:[%s10902_s1 + $0x128] ss:$72 sps:$4 sm:$0xff]   ;;  %v7117_v47 = vld [vmem:[%s10902_s1 + $0x2ec] ss:$72 sps:$4 sm:$0xff]  }
  0x1e   : > { %2147 = vmatprep.subr.bf16.mxu1 %v7099_v32  ;;  %v7966_v49 = vld [vmem:[%s7843_s30 + $0x24] ss:$8 sps:$4 sm:$0xff]   ;;  %v7119_v51 = vld [vmem:[%s10902_s1 + $0x2e8] ss:$72 sps:$4 sm:$0xff]   ;;  %v7043_v53 = vld [vmem:[%s10902_s1 + $0x1b8] ss:$72 sps:$4 sm:$0xff]  }
  0x1f   : > { %1903 = vmatpush1.bf16.msra.mxu0 %v7007_v9  ;;  %v7045_v50 = vld [vmem:[%s10902_s1 + $0x1bc] ss:$72 sps:$4 sm:$0xff]   ;;  %v7048_v54 = vld [vmem:[%s10902_s1 + $0x24c] ss:$72 sps:$4 sm:$0xff]   ;;  %v7125_v55 = vld [vmem:[%s10902_s1 + $0x378] ss:$72 sps:$4 sm:$0xff]  }
  0x20   : > { %1904 = vmatprep.subr.bf16.mxu0 %v7008_v10  ;;  %v7123_v52 = vld [vmem:[%s10902_s1 + $0x37c] ss:$72 sps:$4 sm:$0xff]   ;;  %v7046_v56 = vld [vmem:[%s10902_s1 + $0x248] ss:$72 sps:$4 sm:$0xff]   ;;  %v7129_v57 = vld [vmem:[%s10902_s1 + $0x40c] ss:$72 sps:$4 sm:$0xff]  }
  0x21   : > { %2148 = vmatpush1.bf16.msra.mxu1 %v7101_v35  ;;  %v7996_v58 = vld [vmem:[%s7843_s30 + $0x20] ss:$8 sps:$4 sm:$0xff]   ;;  %v7999_v59 = vld [vmem:[%s7843_s30 + $0x34] ss:$8 sps:$4 sm:$0xff]   ;;  %v8029_v4 = vld [vmem:[%s7843_s30 + $0x30] ss:$8 sps:$4 sm:$0xff]  }
  0x22   : > { %2149 = vmatprep.subr.bf16.mxu1 %v7105_v37  ;;  %v7054_v60 = vld [vmem:[%s10902_s1 + $0x2dc] ss:$72 sps:$4 sm:$0xff]   ;;  %v7131_v61 = vld [vmem:[%s10902_s1 + $0x408] ss:$72 sps:$4 sm:$0xff]   ;;  %v7052_v63 = vld [vmem:[%s10902_s1 + $0x2d8] ss:$72 sps:$4 sm:$0xff]  }
  0x23   : > { %1905 = vmatpush1.bf16.msra.mxu0 %v7010_v12  ;;  %v7135_v62 = vld [vmem:[%s10902_s1 + $0x49c] ss:$72 sps:$4 sm:$0xff]   ;;  %v7057_v0 = vld [vmem:[%s10902_s1 + $0x36c] ss:$72 sps:$4 sm:$0xff]   ;;  %v7137_v1 = vld [vmem:[%s10902_s1 + $0x498] ss:$72 sps:$4 sm:$0xff]  }
  0x24   : > { %1906 = vmatprep.subr.bf16.mxu0 %v7011_v13  ;;  %v7141_v2 = vld [vmem:[%s10902_s1 + $0x52c] ss:$72 sps:$4 sm:$0xff]   ;;  %v7055_v3 = vld [vmem:[%s10902_s1 + $0x368] ss:$72 sps:$4 sm:$0xff]   ;;  %v7063_v5 = vld [vmem:[%s10902_s1 + $0x3fc] ss:$72 sps:$4 sm:$0xff]  }
  0x25   : > { %2150 = vmatpush1.bf16.msra.mxu1 %v7107_v41  ;;  %v8035_v6 = vld [vmem:[%s7843_s30 + $0x44] ss:$8 sps:$4 sm:$0xff]   ;;  %v7143_v7 = vld [vmem:[%s10902_s1 + $0x528] ss:$72 sps:$4 sm:$0xff]   ;;  %v7061_v9 = vld [vmem:[%s10902_s1 + $0x3f8] ss:$72 sps:$4 sm:$0xff]  }
  0x26   : > { %2151 = vmatprep.subr.bf16.mxu1 %v7111_v42  ;;  %v7147_v8 = vld [vmem:[%s10902_s1 + $0x5bc] ss:$72 sps:$4 sm:$0xff]   ;;  %v7066_v10 = vld [vmem:[%s10902_s1 + $0x48c] ss:$72 sps:$4 sm:$0xff]   ;;  %v7149_v12 = vld [vmem:[%s10902_s1 + $0x5b8] ss:$72 sps:$4 sm:$0xff]  }
  0x27   : > { %1907 = vmatpush1.bf16.msra.mxu0 %v7013_v14  ;;  %v7153_v13 = vld [vmem:[%s10902_s1 + $0x64c] ss:$72 sps:$4 sm:$0xff]   ;;  %v8059_v14 = vld [vmem:[%s7843_s30 + $0x40] ss:$8 sps:$4 sm:$0xff]   ;;  %v7081_v26 = vld [vmem:[%s10902_s1 + $0x63c] ss:$72 sps:$4 sm:$0xff]  }
  0x28   : > { %1908 = vmatprep.subr.bf16.mxu0 %v7014_v15  ;;  %v647_v15 = vld [vmem:[%s10902_s1 + $0x6d8] sm:$0x33]  ;;  %v7165_v24 = vld [vmem:[%s10902_s1 + $0x2c] ss:$72 sps:$4 sm:$0xff]   ;;  %v7073_v25 = vld [vmem:[%s10902_s1 + $0x5a8] ss:$72 sps:$4 sm:$0xff]  }
  0x29   : > { %2152 = vmatpush1.bf16.msra.mxu1 %v7113_v45  ;;  %v7171_v29 = vld [vmem:[%s10902_s1 + $0xbc] ss:$72 sps:$4 sm:$0xff]   ;;  %v7079_v30 = vld [vmem:[%s10902_s1 + $0x638] ss:$72 sps:$4 sm:$0xff]   ;;  %vm3623_vm2 = vsmask.f32 7424 }
  0x2a   : > { %2153 = vmatprep.subr.bf16.mxu1 %v7117_v47  ;;  %v7086_v35 = vld [vmem:[%s10902_s1 + $0x14] ss:$72 sps:$4 sm:$0xff]   ;;  %v7084_v41 = vld [vmem:[%s10902_s1 + $0x10] ss:$72 sps:$4 sm:$0xff]   ;;  %v7092_v42 = vld [vmem:[%s10902_s1 + $0xa4] ss:$72 sps:$4 sm:$0xff]  }
  0x2b   : > { %1909 = vmatpush1.bf16.msra.mxu0 %v7016_v16  ;;  %v7064_v16 = vld [vmem:[%s10902_s1 + $0x488] ss:$72 sps:$4 sm:$0xff]   ;;  %vm3767_vm4 = vsmask.f32 6400  ;;  %s11005_s22 = smov (!%p413_p4, %s7808_s22), 1 }
  0x2c   : > { %1910 = vmatprep.subr.bf16.mxu0 %v7017_v17  ;;  %v7072_v17 = vld [vmem:[%s10902_s1 + $0x51c] ss:$72 sps:$4 sm:$0xff]   ;;  %v7090_v45 = vld [vmem:[%s10902_s1 + $0xa0] ss:$72 sps:$4 sm:$0xff]   ;;  %s6301_s28 = sshll.u32 %s11005_s22, 3 }
  0x2d   : > { %2154 = vmatpush1.bf16.msra.mxu1 %v7119_v51  ;;  %v7187_v47 = vld [vmem:[%s10902_s1 + $0x268] ss:$72 sps:$4 sm:$0xff]   ;;  %s416_s14 = scalar_lea.vmem %s10913_s12, %s6301_s28 }
  0x2e   : > { %2155 = vmatprep.subr.bf16.mxu1 %v7123_v52  ;;  %v7096_v51 = vld [vmem:[%s10902_s1 + $0x130] ss:$72 sps:$4 sm:$0xff]   ;;  %v7104_v52 = vld [vmem:[%s10902_s1 + $0x1c4] ss:$72 sps:$4 sm:$0xff]  }
  0x2f   : > { %1911 = vmatpush1.bf16.msra.mxu0 %v7019_v18  ;;  %v7155_v18 = vld [vmem:[%s10902_s1 + $0x648] ss:$72 sps:$4 sm:$0xff]  }
  0x30   : > { %1912 = vmatprep.subr.bf16.mxu0 %v7020_v19  ;;  %v6535_v19 = vcombine.high %v647_v15, %v647_v15 }
  0x31   : > { %2156 = vmatpush1.bf16.msra.mxu1 %v7125_v55  ;;  %v7102_v55 = vld [vmem:[%s10902_s1 + $0x1c0] ss:$72 sps:$4 sm:$0xff]  }
  0x32   : > { %2157 = vmatprep.subr.bf16.mxu1 %v7129_v57  ;;  %v7199_v57 = vld [vmem:[%s10902_s1 + $0x388] ss:$72 sps:$4 sm:$0xff]  }
  0x33   : > { %1913 = vmatpush1.bf16.msra.mxu0 %v7022_v20  ;;  %v6534_v20 = vcombine.low %v647_v15, %v647_v15  ;;  %v7223_v15 = vld [vmem:[%s10902_s1 + $0x5c8] ss:$72 sps:$4 sm:$0xff]  }
  0x34   : > { %1914 = vmatprep.subr.bf16.mxu0 %v7023_v21  ;;  %v7070_v21 = vld [vmem:[%s10902_s1 + $0x518] ss:$72 sps:$4 sm:$0xff]  }
  0x35   : > { %2158 = vmatpush1.bf16.msra.mxu1 %v7131_v61  ;;  %v7108_v61 = vld [vmem:[%s10902_s1 + $0x250] ss:$72 sps:$4 sm:$0xff]  }
  0x36   : > { %2159 = vmatprep.subr.bf16.mxu1 %v7135_v62  ;;  %v7116_v62 = vld [vmem:[%s10902_s1 + $0x2e4] ss:$72 sps:$4 sm:$0xff]  }
  0x37   : > { %1915 = vmatpush1.bf16.msra.mxu0 %v7025_v22  ;;  %v7075_v22 = vld [vmem:[%s10902_s1 + $0x5ac] ss:$72 sps:$4 sm:$0xff]  }
  0x38   : > { %1916 = vmatprep.subr.bf16.mxu0 %v7026_v23  ;;  %v1859_v23 = vsel %vm1839_vm1, %v6534_v20, 0  ;;  %v7229_v20 = vld [vmem:[%s10902_s1 + $0x658] ss:$72 sps:$4 sm:$0xff]  }
  0x39   : > { %2160 = vmatpush1.bf16.msra.mxu1 %v7137_v1  ;;  %v7114_v1 = vld [vmem:[%s10902_s1 + $0x2e0] ss:$72 sps:$4 sm:$0xff]  }
  0x3a   : > { %2161 = vmatprep.subr.bf16.mxu1 %v7141_v2  ;;  %v7122_v2 = vld [vmem:[%s10902_s1 + $0x374] ss:$72 sps:$4 sm:$0xff]  }
  0x3b   : > { %1917 = vmatpush1.bf16.msra.mxu0 %v7028_v27  ;;  %v645_v27 = vld [vmem:[%s10902_s1 + $0x6c8] sm:$0x33] }
  0x3c   : > { %6546 = vmatprep.subr.msk.bf16.mxu0 %vm1839_vm1, %v6529_v28  ;;  %v7163_v28 = vld [vmem:[%s10902_s1 + $0x28] ss:$72 sps:$4 sm:$0xff]   ;;  %v6531_v31 = vcombine.high %v645_v27, %v645_v27  ;;  %v6530_v32 = vcombine.low %v645_v27, %v645_v27  ;;  %v7241_v27 = vld [vmem:[%s10902_s1 + $0x3c] ss:$72 sps:$4 sm:$0xff]  }
  0x3d   : > { %2162 = vmatpush1.bf16.msra.mxu1 %v7143_v7  ;;  %v7120_v7 = vld [vmem:[%s10902_s1 + $0x370] ss:$72 sps:$4 sm:$0xff]  }
  0x3e   : > { %2163 = vmatprep.subr.bf16.mxu1 %v7147_v8  ;;  %v1847_v37 = vsel %vm1839_vm1, %v6530_v32, 0  ;;  %v7128_v8 = vld [vmem:[%s10902_s1 + $0x404] ss:$72 sps:$4 sm:$0xff]  }
  0x3f   : > { %1919 = vmatpush1.bf16.msra.mxu0 %v1841_v33  ;;  %v7169_v33 = vld [vmem:[%s10902_s1 + $0xb8] ss:$72 sps:$4 sm:$0xff]  }
  0x40   : > { %1977 = vmatprep.subr.bf16.mxu0 %v7036_v34  ;;  %v7177_v34 = vld [vmem:[%s10902_s1 + $0x14c] ss:$72 sps:$4 sm:$0xff]  }
  0x41   : > { %2164 = vmatpush1.bf16.msra.mxu1 %v7149_v12  ;;  %v7126_v12 = vld [vmem:[%s10902_s1 + $0x400] ss:$72 sps:$4 sm:$0xff]  }
  0x42   : > { %1927 = vmatmul.mubr.bf16.vlgmr.msra.gmra.mrb[0].mxu0 %v7924_v36  ;;  %2165 = vmatprep.subr.bf16.mxu1 %v7153_v13  ;;  %v7134_v13 = vld [vmem:[%s10902_s1 + $0x494] ss:$72 sps:$4 sm:$0xff]  }
  0x43   : > { %1978 = vmatpush1.bf16.msra.mxu0 %v7034_v38  ;;  %6548 = vmatprep.mubr.msk.bf16.mxu0 %vm1823_vm0, %v7933_v39  ;;  %v7175_v38 = vld [vmem:[%s10902_s1 + $0x148] ss:$72 sps:$4 sm:$0xff]  }
  0x44   : > { %1979 = vmatprep.subr.bf16.mxu0 %v7039_v40  ;;  %v7183_v40 = vld [vmem:[%s10902_s1 + $0x1dc] ss:$72 sps:$4 sm:$0xff]  }
  0x45   : > { %2166 = vmatpush1.bf16.msra.mxu1 %v7155_v18  ;;  %v7132_v18 = vld [vmem:[%s10902_s1 + $0x490] ss:$72 sps:$4 sm:$0xff]  }
  0x46   : > { %6564 = vmatprep.subr.msk.bf16.mxu1 %vm1839_vm1, %v6535_v19  ;;  %v7140_v19 = vld [vmem:[%s10902_s1 + $0x524] ss:$72 sps:$4 sm:$0xff]  }
  0x47   : > { %1980 = vmatpush1.bf16.msra.mxu0 %v7037_v43  ;;  %v7181_v43 = vld [vmem:[%s10902_s1 + $0x1d8] ss:$72 sps:$4 sm:$0xff]  }
  0x48   : > { %1981 = vmatprep.subr.bf16.mxu0 %v7042_v44  ;;  %v7189_v44 = vld [vmem:[%s10902_s1 + $0x26c] ss:$72 sps:$4 sm:$0xff]  }
  0x49   : > { %2168 = vmatpush1.bf16.msra.mxu1 %v1859_v23  ;;  %v7138_v23 = vld [vmem:[%s10902_s1 + $0x520] ss:$72 sps:$4 sm:$0xff]  }
  0x4a   : > { %1937 = vmatmul.mubr.bf16.gmra.mrb[4].mxu0 %v7963_v48  ;;  %2309 = vmatprep.subr.bf16.mxu1 %v7165_v24  ;;  %v7146_v24 = vld [vmem:[%s10902_s1 + $0x5b4] ss:$72 sps:$4 sm:$0xff]  }
  0x4b   : > { %1982 = vmatpush1.bf16.msra.mxu0 %v7040_v46  ;;  %6549 = vmatprep.mubr.msk.bf16.mxu0 %vm1823_vm0, %v7966_v49  ;;  %v7098_v46 = vld [vmem:[%s10902_s1 + $0x134] ss:$72 sps:$4 sm:$0xff]  }
  0x4c   : > { %1983 = vmatprep.subr.bf16.mxu0 %v7045_v50  ;;  %2176 = vmatmul.mubr.bf16.vlgmr.msra.gmra.mrb[0].mxu1 %v7924_v36  ;;  %v7195_v50 = vld [vmem:[%s10902_s1 + $0x2fc] ss:$72 sps:$4 sm:$0xff]  }
  0x4d   : > { %2310 = vmatpush1.bf16.msra.mxu1 %v7163_v28  ;;  %6566 = vmatprep.mubr.msk.bf16.mxu1 %vm1823_vm0, %v7933_v39  ;;  %v646_v28 = vld [vmem:[%s10902_s1 + $0x6d0] sm:$0x33] }
  0x4e   : > { %2311 = vmatprep.subr.bf16.mxu1 %v7171_v29  ;;  %v7239_v29 = vld [vmem:[%s10902_s1 + $0x38] ss:$72 sps:$4 sm:$0xff]   ;;  %v6533_v32 = vcombine.high %v646_v28, %v646_v28 }
  0x4f   : > { %1984 = vmatpush1.bf16.msra.mxu0 %v7043_v53  ;;  %v7193_v53 = vld [vmem:[%s10902_s1 + $0x2f8] ss:$72 sps:$4 sm:$0xff]  }
  0x50   : > { %1985 = vmatprep.subr.bf16.mxu0 %v7048_v54  ;;  %v7201_v54 = vld [vmem:[%s10902_s1 + $0x38c] ss:$72 sps:$4 sm:$0xff]  }
  0x51   : > { %2312 = vmatpush1.bf16.msra.mxu1 %v7169_v33  ;;  %v6532_v33 = vcombine.low %v646_v28, %v646_v28  ;;  %v7236_v28 = vld [vmem:[%s10902_s1 + $0x30] ss:$72 sps:$4 sm:$0xff]  }
  0x52   : > { %1947 = vmatmul.mubr.bf16.gmra.mrb[8].mxu0 %v7996_v58  ;;  %2313 = vmatprep.subr.bf16.mxu1 %v7177_v34  ;;  %v7245_v34 = vld [vmem:[%s10902_s1 + $0xc8] ss:$72 sps:$4 sm:$0xff]  }
  0x53   : > { %1986 = vmatpush1.bf16.msra.mxu0 %v7046_v56  ;;  %6550 = vmatprep.mubr.msk.bf16.mxu0 %vm1823_vm0, %v7999_v59  ;;  %v7110_v56 = vld [vmem:[%s10902_s1 + $0x254] ss:$72 sps:$4 sm:$0xff]  }
  0x54   : > { %1987 = vmatprep.subr.bf16.mxu0 %v7054_v60  ;;  %2186 = vmatmul.mubr.bf16.gmra.mrb[4].mxu1 %v7963_v48  ;;  %v7207_v60 = vld [vmem:[%s10902_s1 + $0x41c] ss:$72 sps:$4 sm:$0xff]  }
  0x55   : > { %2314 = vmatpush1.bf16.msra.mxu1 %v7175_v38  ;;  %6567 = vmatprep.mubr.msk.bf16.mxu1 %vm1823_vm0, %v7966_v49  ;;  %v7251_v38 = vld [vmem:[%s10902_s1 + $0x158] ss:$72 sps:$4 sm:$0xff]  }
  0x56   : > { %2315 = vmatprep.subr.bf16.mxu1 %v7183_v40  ;;  %v7259_v40 = vld [vmem:[%s10902_s1 + $0x1ec] ss:$72 sps:$4 sm:$0xff]  }
  0x57   : > { %1988 = vmatpush1.bf16.msra.mxu0 %v7052_v63  ;;  %v7205_v63 = vld [vmem:[%s10902_s1 + $0x418] ss:$72 sps:$4 sm:$0xff]  }
  0x58   : > { %1989 = vmatprep.subr.bf16.mxu0 %v7057_v0  ;;  %v7213_v0 = vld [vmem:[%s10902_s1 + $0x4ac] ss:$72 sps:$4 sm:$0xff]  }
  0x59   : > { %2316 = vmatpush1.bf16.msra.mxu1 %v7181_v43  ;;  %v7168_v43 = vld [vmem:[%s10902_s1 + $0xb4] ss:$72 sps:$4 sm:$0xff]  }
  0x5a   : > { %1957 = vmatmul.mubr.bf16.gmra.mrb[12].mxu0 %v8029_v4  ;;  %2317 = vmatprep.subr.bf16.mxu1 %v7189_v44  ;;  %v7257_v44 = vld [vmem:[%s10902_s1 + $0x1e8] ss:$72 sps:$4 sm:$0xff]  }
  0x5b   : > { %1990 = vmatpush1.bf16.msra.mxu0 %v7055_v3  ;;  %6551 = vmatprep.mubr.msk.bf16.mxu0 %vm1823_vm0, %v8035_v6  ;;  %v7211_v3 = vld [vmem:[%s10902_s1 + $0x4a8] ss:$72 sps:$4 sm:$0xff]  }
  0x5c   : > { %1991 = vmatprep.subr.bf16.mxu0 %v7063_v5  ;;  %2196 = vmatmul.mubr.bf16.gmra.mrb[8].mxu1 %v7996_v58  ;;  %v7219_v5 = vld [vmem:[%s10902_s1 + $0x53c] ss:$72 sps:$4 sm:$0xff]  }
  0x5d   : > { %2318 = vmatpush1.bf16.msra.mxu1 %v7187_v47  ;;  %6568 = vmatprep.mubr.msk.bf16.mxu1 %vm1823_vm0, %v7999_v59  ;;  %v7174_v47 = vld [vmem:[%s10902_s1 + $0x144] ss:$72 sps:$4 sm:$0xff]  }
  0x5e   : > { %2319 = vmatprep.subr.bf16.mxu1 %v7195_v50  ;;  %v7263_v50 = vld [vmem:[%s10902_s1 + $0x278] ss:$72 sps:$4 sm:$0xff]  }
  0x5f   : > { %1992 = vmatpush1.bf16.msra.mxu0 %v7061_v9  ;;  %v7217_v9 = vld [vmem:[%s10902_s1 + $0x538] ss:$72 sps:$4 sm:$0xff]  }
  0x60   : > { %1993 = vmatprep.subr.bf16.mxu0 %v7066_v10  ;;  %v7225_v10 = vld [vmem:[%s10902_s1 + $0x5cc] ss:$72 sps:$4 sm:$0xff]  }
  0x61   : > { %2320 = vmatpush1.bf16.msra.mxu1 %v7193_v53  ;;  %v7178_v53 = vld [vmem:[%s10902_s1 + $0x1d0] ss:$72 sps:$4 sm:$0xff]  }
  0x62   : > { %1967 = vmatmul.mubr.bf16.gmra.mrb[16].mxu0 %v8059_v14  ;;  %2321 = vmatprep.subr.bf16.mxu1 %v7201_v54  ;;  %v7277_v54 = vld [vmem:[%s10902_s1 + $0x39c] ss:$72 sps:$4 sm:$0xff]  }
  0x63   : > { %1994 = vmatpush1.bf16.msra.mxu0 %v7064_v16  ;;  %6553 = vmatprep.mubr.msk.bf16.mxu0 %vm1823_vm0, %v7852_v11  ;;  %v7231_v16 = vld [vmem:[%s10902_s1 + $0x65c] ss:$72 sps:$4 sm:$0xff]  }
  0x64   : > { %1995 = vmatprep.subr.bf16.mxu0 %v7072_v17  ;;  %2206 = vmatmul.mubr.bf16.gmra.mrb[12].mxu1 %v8029_v4  ;;  %v649_v17 = vld [vmem:[%s10902_s1 + $0x6e8] sm:$0x33] }
  0x65   : > { %2322 = vmatpush1.bf16.msra.mxu1 %v7199_v57  ;;  %6569 = vmatprep.mubr.msk.bf16.mxu1 %vm1823_vm0, %v8035_v6  ;;  %v7283_v57 = vld [vmem:[%s10902_s1 + $0x42c] ss:$72 sps:$4 sm:$0xff]  }
  0x66   : > { %2323 = vmatprep.subr.bf16.mxu1 %v7207_v60  ;;  %v7192_v60 = vld [vmem:[%s10902_s1 + $0x2f4] ss:$72 sps:$4 sm:$0xff]  }
  0x67   : > { %1996 = vmatpush1.bf16.msra.mxu0 %v7070_v21  ;;  %v6539_v21 = vcombine.high %v649_v17, %v649_v17 }
  0x68   : > { %1997 = vmatprep.subr.bf16.mxu0 %v7075_v22  ;;  %v6538_v22 = vcombine.low %v649_v17, %v649_v17 }
  0x69   : > { %2324 = vmatpush1.bf16.msra.mxu1 %v7205_v63  ;;  %v7198_v63 = vld [vmem:[%s10902_s1 + $0x384] ss:$72 sps:$4 sm:$0xff]  }
  0x6a   : > { %2325 = vmatprep.subr.bf16.mxu1 %v7213_v0  ;;  %v7287_v0 = vld [vmem:[%s10902_s1 + $0x4b8] ss:$72 sps:$4 sm:$0xff]  }
  0x6b   : > { %1998 = vmatpush1.bf16.msra.mxu0 %v7073_v25  ;;  %v7144_v25 = vld [vmem:[%s10902_s1 + $0x5b0] ss:$72 sps:$4 sm:$0xff]  }
  0x6c   : > { %1999 = vmatprep.subr.bf16.mxu0 %v7081_v26  ;;  %2216 = vmatmul.mubr.bf16.gmra.mrb[16].mxu1 %v8059_v14  ;;  %v1871_v26 = vsel %vm1839_vm1, %v6538_v22, 0  ;;  %v7226_v22 = vld [vmem:[%s10902_s1 + $0x650] ss:$72 sps:$4 sm:$0xff]  }
  0x6d   : > { %2326 = vmatpush1.bf16.msra.mxu1 %v7211_v3  ;;  %6577 = vmatprep.mubr.msk.bf16.mxu1 %vm1823_vm0, %v7852_v11  ;;  %v7301_v3 = vld [vmem:[%s10902_s1 + $0x5dc] ss:$72 sps:$4 sm:$0xff]  }
  0x6e   : > { %2327 = vmatprep.subr.bf16.mxu1 %v7219_v5  ;;  %v7202_v5 = vld [vmem:[%s10902_s1 + $0x410] ss:$72 sps:$4 sm:$0xff]  }
  0x6f   : > { %2000 = vmatpush1.bf16.msra.mxu0 %v7079_v30  ;;  %v7150_v30 = vld [vmem:[%s10902_s1 + $0x640] ss:$72 sps:$4 sm:$0xff]  }
  0x70   : > { %6552 = vmatprep.subr.msk.bf16.mxu0 %vm1839_vm1, %v6531_v31  ;;  %v7247_v31 = vld [vmem:[%s10902_s1 + $0xcc] ss:$72 sps:$4 sm:$0xff]  }
  0x71   : > { %2328 = vmatpush1.bf16.msra.mxu1 %v7217_v9  ;;  %v7299_v9 = vld [vmem:[%s10902_s1 + $0x5d8] ss:$72 sps:$4 sm:$0xff]  }
  0x72   : > { %2329 = vmatprep.subr.bf16.mxu1 %v7225_v10  ;;  %v7307_v10 = vld [vmem:[%s10902_s1 + $0x66c] ss:$72 sps:$4 sm:$0xff]  }
  0x73   : > { %2002 = vmatpush1.bf16.msra.mxu0 %v1847_v37  ;;  %v7162_v37 = vld [vmem:[%s10902_s1 + $0x24] ss:$72 sps:$4 sm:$0xff]  }
  0x74   : > { %2060 = vmatprep.subr.bf16.mxu0 %v7086_v35  ;;  %v7253_v35 = vld [vmem:[%s10902_s1 + $0x15c] ss:$72 sps:$4 sm:$0xff]  }
  0x75   : > { %2330 = vmatpush1.bf16.msra.mxu1 %v7223_v15  ;;  %v7214_v15 = vld [vmem:[%s10902_s1 + $0x530] ss:$72 sps:$4 sm:$0xff]  }
  0x76   : > { %2010 = vmatmul.mubr.bf16.vlgmr.msra.gmra.mrb[20].mxu0 %v7924_v36  ;;  %2331 = vmatprep.subr.bf16.mxu1 %v7231_v16 }
  0x77   : > { %2061 = vmatpush1.bf16.msra.mxu0 %v7084_v41  ;;  %6554 = vmatprep.mubr.msk.bf16.mxu0 %vm1823_vm0, %v7933_v39  ;;  %v1853_v41 = vsel %vm1839_vm1, %v6532_v33, 0  ;;  %v7250_v33 = vld [vmem:[%s10902_s1 + $0x154] ss:$72 sps:$4 sm:$0xff]  }
  0x78   : > { %2062 = vmatprep.subr.bf16.mxu0 %v7092_v42  ;;  %v7160_v42 = vld [vmem:[%s10902_s1 + $0x20] ss:$72 sps:$4 sm:$0xff]  }
  0x79   : > { %2332 = vmatpush1.bf16.msra.mxu1 %v7229_v20  ;;  %v7228_v20 = vld [vmem:[%s10902_s1 + $0x654] ss:$72 sps:$4 sm:$0xff]  }
  0x7a   : > { %6576 = vmatprep.subr.msk.bf16.mxu1 %vm1839_vm1, %v6539_v21  ;;  %v648_v21 = vld [vmem:[%s10902_s1 + $0x6e0] sm:$0x33] }
  0x7b   : > { %2063 = vmatpush1.bf16.msra.mxu0 %v7090_v45  ;;  %v7166_v45 = vld [vmem:[%s10902_s1 + $0xb0] ss:$72 sps:$4 sm:$0xff]  }
  0x7c   : > { %2064 = vmatprep.subr.bf16.mxu0 %v7098_v46  ;;  %v7265_v46 = vld [vmem:[%s10902_s1 + $0x27c] ss:$72 sps:$4 sm:$0xff]  }
  0x7d   : > { %2334 = vmatpush1.bf16.msra.mxu1 %v1871_v26  ;;  %v8472_v26 = vld [vmem:[%s7843_s30 + $0x14] ss:$8 sps:$4 sm:$0xff]  }
  0x7e   : > { %2020 = vmatmul.mubr.bf16.gmra.mrb[24].mxu0 %v7963_v48  ;;  %2475 = vmatprep.subr.bf16.mxu1 %v7241_v27  ;;  %v7238_v27 = vld [vmem:[%s10902_s1 + $0x34] ss:$72 sps:$4 sm:$0xff]  }
  0x7f   : > { %2065 = vmatpush1.bf16.msra.mxu0 %v7096_v51  ;;  %6555 = vmatprep.mubr.msk.bf16.mxu0 %vm1823_vm0, %v7966_v49  ;;  %v7271_v51 = vld [vmem:[%s10902_s1 + $0x30c] ss:$72 sps:$4 sm:$0xff]  }
  0x80   : > { %2066 = vmatprep.subr.bf16.mxu0 %v7104_v52  ;;  %2342 = vmatmul.mubr.bf16.vlgmr.msra.gmra.mrb[20].mxu1 %v7924_v36  ;;  %v7180_v52 = vld [vmem:[%s10902_s1 + $0x1d4] ss:$72 sps:$4 sm:$0xff]  }
  0x81   : > { %2476 = vmatpush1.bf16.msra.mxu1 %v7239_v29  ;;  %6578 = vmatprep.mubr.msk.bf16.mxu1 %vm1823_vm0, %v7933_v39  ;;  %v7244_v29 = vld [vmem:[%s10902_s1 + $0xc4] ss:$72 sps:$4 sm:$0xff]  }
  0x82   : > { %2477 = vmatprep.subr.bf16.mxu1 %v7247_v31  ;;  %v8492_v31 = vld [vmem:[%s7843_s30 + $0x24] ss:$8 sps:$4 sm:$0xff]  }
  0x83   : > { %2067 = vmatpush1.bf16.msra.mxu0 %v7102_v55  ;;  %v7186_v55 = vld [vmem:[%s10902_s1 + $0x264] ss:$72 sps:$4 sm:$0xff]  }
  0x84   : > { %2068 = vmatprep.subr.bf16.mxu0 %v7110_v56  ;;  %v7275_v56 = vld [vmem:[%s10902_s1 + $0x398] ss:$72 sps:$4 sm:$0xff]  }
  0x85   : > { %2478 = vmatpush1.bf16.msra.mxu1 %v7245_v34  ;;  %v7248_v34 = vld [vmem:[%s10902_s1 + $0x150] ss:$72 sps:$4 sm:$0xff]  }
  0x86   : > { %2030 = vmatmul.mubr.bf16.gmra.mrb[28].mxu0 %v7996_v58  ;;  %2479 = vmatprep.subr.bf16.mxu1 %v7253_v35  ;;  %v7256_v35 = vld [vmem:[%s10902_s1 + $0x1e4] ss:$72 sps:$4 sm:$0xff]  }
  0x87   : > { %2069 = vmatpush1.bf16.msra.mxu0 %v7108_v61  ;;  %6556 = vmatprep.mubr.msk.bf16.mxu0 %vm1823_vm0, %v7999_v59  ;;  %v7289_v61 = vld [vmem:[%s10902_s1 + $0x4bc] ss:$72 sps:$4 sm:$0xff]  }
  0x88   : > { %2070 = vmatprep.subr.bf16.mxu0 %v7116_v62  ;;  %2352 = vmatmul.mubr.bf16.gmra.mrb[24].mxu1 %v7963_v48  ;;  %v7190_v62 = vld [vmem:[%s10902_s1 + $0x2f0] ss:$72 sps:$4 sm:$0xff]  }
  0x89   : > { %2480 = vmatpush1.bf16.msra.mxu1 %v7251_v38  ;;  %6579 = vmatprep.mubr.msk.bf16.mxu1 %vm1823_vm0, %v7966_v49  ;;  %v8516_v38 = vld [vmem:[%s7843_s30 + $0x34] ss:$8 sps:$4 sm:$0xff]  }
  0x8a   : > { %2481 = vmatprep.subr.bf16.mxu1 %v7259_v40  ;;  %v7254_v40 = vld [vmem:[%s10902_s1 + $0x1e0] ss:$72 sps:$4 sm:$0xff]  }
  0x8b   : > { %2071 = vmatpush1.bf16.msra.mxu0 %v7114_v1  ;;  %v7295_v1 = vld [vmem:[%s10902_s1 + $0x54c] ss:$72 sps:$4 sm:$0xff]  }
  0x8c   : > { %2072 = vmatprep.subr.bf16.mxu0 %v7122_v2  ;;  %v7293_v2 = vld [vmem:[%s10902_s1 + $0x548] ss:$72 sps:$4 sm:$0xff]  }
  0x8d   : > { %2482 = vmatpush1.bf16.msra.mxu1 %v7257_v44  ;;  %v8536_v44 = vld [vmem:[%s7843_s30 + $0x30] ss:$8 sps:$4 sm:$0xff]  }
  0x8e   : > { %2040 = vmatmul.mubr.bf16.gmra.mrb[32].mxu0 %v8029_v4  ;;  %2483 = vmatprep.subr.bf16.mxu1 %v7265_v46  ;;  %v7266_v46 = vld [vmem:[%s10902_s1 + $0x300] ss:$72 sps:$4 sm:$0xff]  }
  0x8f   : > { %2073 = vmatpush1.bf16.msra.mxu0 %v7120_v7  ;;  %6557 = vmatprep.mubr.msk.bf16.mxu0 %vm1823_vm0, %v8035_v6  ;;  %v8416_v7 = vld [vmem:[%s7843_s30 + $0x4] ss:$8 sps:$4 sm:$0xff]  }
  0x90   : > { %2074 = vmatprep.subr.bf16.mxu0 %v7128_v8  ;;  %2362 = vmatmul.mubr.bf16.gmra.mrb[28].mxu1 %v7996_v58  ;;  %v7210_v8 = vld [vmem:[%s10902_s1 + $0x4a4] ss:$72 sps:$4 sm:$0xff]  }
  0x91   : > { %2484 = vmatpush1.bf16.msra.mxu1 %v7263_v50  ;;  %6580 = vmatprep.mubr.msk.bf16.mxu1 %vm1823_vm0, %v7999_v59  ;;  %v7272_v50 = vld [vmem:[%s10902_s1 + $0x390] ss:$72 sps:$4 sm:$0xff]  }
  0x92   : > { %2485 = vmatprep.subr.bf16.mxu1 %v7271_v51  ;;  %v7280_v51 = vld [vmem:[%s10902_s1 + $0x424] ss:$72 sps:$4 sm:$0xff]  }
  0x93   : > { %2075 = vmatpush1.bf16.msra.mxu0 %v7126_v12  ;;  %v7208_v12 = vld [vmem:[%s10902_s1 + $0x4a0] ss:$72 sps:$4 sm:$0xff]  }
  0x94   : > { %2076 = vmatprep.subr.bf16.mxu0 %v7134_v13  ;;  %v7216_v13 = vld [vmem:[%s10902_s1 + $0x534] ss:$72 sps:$4 sm:$0xff]  }
  0x96   : > { %2050 = vmatmul.mubr.bf16.gmra.mrb[36].mxu0 %v8059_v14 }
  0x97   : > { %2077 = vmatpush1.bf16.msra.mxu0 %v7132_v18  ;;  %6559 = vmatprep.mubr.msk.bf16.mxu0 %vm1823_vm0, %v7852_v11  ;;  %v7152_v11 = vld [vmem:[%s10902_s1 + $0x644] ss:$72 sps:$4 sm:$0xff]  }
  0x98   : > { %2078 = vmatprep.subr.bf16.mxu0 %v7140_v19  ;;  %2372 = vmatmul.mubr.bf16.gmra.mrb[32].mxu1 %v8029_v4  ;;  %v7222_v18 = vld [vmem:[%s10902_s1 + $0x5c4] ss:$72 sps:$4 sm:$0xff]   ;;  %v7220_v19 = vld [vmem:[%s10902_s1 + $0x5c0] ss:$72 sps:$4 sm:$0xff]  }
  0x99   : > { %6581 = vmatprep.mubr.msk.bf16.mxu1 %vm1823_vm0, %v8035_v6 }
  0x9b   : > { %2079 = vmatpush1.bf16.msra.mxu0 %v7138_v23  ;;  %v8468_v23 = vld [vmem:[%s7843_s30] ss:$8 sps:$4 sm:$0xff]  }
  0x9c   : > { %2080 = vmatprep.subr.bf16.mxu0 %v7146_v24  ;;  %v6537_v24 = vcombine.high %v648_v21, %v648_v21 }
  0x9f   : > { %2081 = vmatpush1.bf16.msra.mxu0 %v7144_v25  ;;  %v6536_v25 = vcombine.low %v648_v21, %v648_v21 }
  0xa0   : > { %2082 = vmatprep.subr.bf16.mxu0 %v7152_v11  ;;  %2382 = vmatmul.mubr.bf16.gmra.mrb[36].mxu1 %v8059_v14 }
  0xa1   : > { %6589 = vmatprep.mubr.msk.bf16.mxu1 %vm1823_vm0, %v8416_v7  ;;  %v1865_v11 = vsel %vm1839_vm1, %v6536_v25, 0 }
  0xa3   : > { %2083 = vmatpush1.bf16.msra.mxu0 %v7150_v30  ;;  %v8488_v30 = vld [vmem:[%s7843_s30 + $0x10] ss:$8 sps:$4 sm:$0xff]  }
  0xa4   : > { %6558 = vmatprep.subr.msk.bf16.mxu0 %vm1839_vm1, %v6533_v32  ;;  %v7242_v32 = vld [vmem:[%s10902_s1 + $0xc0] ss:$72 sps:$4 sm:$0xff]  }
  0xa7   : > { %2085 = vmatpush1.bf16.msra.mxu0 %v1853_v41  ;;  %v7262_v41 = vld [vmem:[%s10902_s1 + $0x274] ss:$72 sps:$4 sm:$0xff]  }
  0xa8   : > { %2226 = vmatprep.subr.bf16.mxu0 %v7162_v37  ;;  %v8512_v37 = vld [vmem:[%s7843_s30 + $0x20] ss:$8 sps:$4 sm:$0xff]  }
  0xaa   : > { %2093 = vmatmul.mubr.bf16.vlgmr.msra.gmra.mrb[40].mxu0 %v7924_v36  ;;  %v7172_v36 = vld [vmem:[%s10902_s1 + $0x140] ss:$72 sps:$4 sm:$0xff]  }
  0xab   : > { %2227 = vmatpush1.bf16.msra.mxu0 %v7160_v42  ;;  %6560 = vmatprep.mubr.msk.bf16.mxu0 %vm1823_vm0, %v7933_v39  ;;  %v7269_v39 = vld [vmem:[%s10902_s1 + $0x308] ss:$72 sps:$4 sm:$0xff]  }
  0xac   : > { %2228 = vmatprep.subr.bf16.mxu0 %v7168_v43  ;;  %2486 = vmatpush1.bf16.msra.mxu1 %v7269_v39  ;;  %v7260_v42 = vld [vmem:[%s10902_s1 + $0x270] ss:$72 sps:$4 sm:$0xff]   ;;  %v7268_v43 = vld [vmem:[%s10902_s1 + $0x304] ss:$72 sps:$4 sm:$0xff]   ;;  %v7286_v39 = vld [vmem:[%s10902_s1 + $0x4b4] ss:$72 sps:$4 sm:$0xff]  }
  0xad   : > { %2487 = vmatprep.subr.bf16.mxu1 %v7277_v54  ;;  %v7292_v54 = vld [vmem:[%s10902_s1 + $0x544] ss:$72 sps:$4 sm:$0xff]  }
  0xaf   : > { %2229 = vmatpush1.bf16.msra.mxu0 %v7166_v45  ;;  %v8540_v45 = vld [vmem:[%s7843_s30 + $0x44] ss:$8 sps:$4 sm:$0xff]  }
  0xb0   : > { %2230 = vmatprep.subr.bf16.mxu0 %v7174_v47  ;;  %2488 = vmatpush1.bf16.msra.mxu1 %v7275_v56  ;;  %v7274_v47 = vld [vmem:[%s10902_s1 + $0x394] ss:$72 sps:$4 sm:$0xff]  }
  0xb1   : > { %2489 = vmatprep.subr.bf16.mxu1 %v7283_v57  ;;  %v7298_v56 = vld [vmem:[%s10902_s1 + $0x5d4] ss:$72 sps:$4 sm:$0xff]   ;;  %v7296_v57 = vld [vmem:[%s10902_s1 + $0x5d0] ss:$72 sps:$4 sm:$0xff]  }
  0xb2   : > { %2103 = vmatmul.mubr.bf16.gmra.mrb[44].mxu0 %v7963_v48  ;;  %v7184_v48 = vld [vmem:[%s10902_s1 + $0x260] ss:$72 sps:$4 sm:$0xff]  }
  0xb3   : > { %2231 = vmatpush1.bf16.msra.mxu0 %v7172_v36  ;;  %6561 = vmatprep.mubr.msk.bf16.mxu0 %vm1823_vm0, %v7966_v49  ;;  %v7281_v49 = vld [vmem:[%s10902_s1 + $0x428] ss:$72 sps:$4 sm:$0xff]  }
  0xb4   : > { %2232 = vmatprep.subr.bf16.mxu0 %v7180_v52  ;;  %2490 = vmatpush1.bf16.msra.mxu1 %v7281_v49  ;;  %v8560_v36 = vld [vmem:[%s7843_s30 + $0x40] ss:$8 sps:$4 sm:$0xff]  }
  0xb5   : > { %2491 = vmatprep.subr.bf16.mxu1 %v7289_v61  ;;  %v7278_v52 = vld [vmem:[%s10902_s1 + $0x420] ss:$72 sps:$4 sm:$0xff]  }
  0xb6   : > { %v7302_v49 = vld [vmem:[%s10902_s1 + $0x660] ss:$72 sps:$4 sm:$0xff]  }
  0xb7   : > { %2233 = vmatpush1.bf16.msra.mxu0 %v7178_v53  ;;  %v7284_v53 = vld [vmem:[%s10902_s1 + $0x4b0] ss:$72 sps:$4 sm:$0xff]  }
  0xb8   : > { %2234 = vmatprep.subr.bf16.mxu0 %v7186_v55  ;;  %2492 = vmatpush1.bf16.msra.mxu1 %v7287_v0  ;;  %v7290_v55 = vld [vmem:[%s10902_s1 + $0x540] ss:$72 sps:$4 sm:$0xff]   ;;  %v7314_v0 = vld [vmem:[%s10902_s1 + $0x44] ss:$72 sps:$4 sm:$0xff]  }
  0xb9   : > { %2493 = vmatprep.subr.bf16.mxu1 %v7295_v1  ;;  %v7312_v1 = vld [vmem:[%s10902_s1 + $0x40] ss:$72 sps:$4 sm:$0xff]  }
  0xba   : > { %2113 = vmatmul.mubr.bf16.gmra.mrb[48].mxu0 %v7996_v58  ;;  %v7196_v58 = vld [vmem:[%s10902_s1 + $0x380] ss:$72 sps:$4 sm:$0xff]  }
  0xbb   : > { %2235 = vmatpush1.bf16.msra.mxu0 %v7184_v48  ;;  %6562 = vmatprep.mubr.msk.bf16.mxu0 %vm1823_vm0, %v7999_v59  ;;  %v7204_v59 = vld [vmem:[%s10902_s1 + $0x414] ss:$72 sps:$4 sm:$0xff]   ;;  %v7304_v48 = vld [vmem:[%s10902_s1 + $0x664] ss:$72 sps:$4 sm:$0xff]  }
  0xbc   : > { %2236 = vmatprep.subr.bf16.mxu0 %v7192_v60  ;;  %2494 = vmatpush1.bf16.msra.mxu1 %v7293_v2  ;;  %v650_v60 = vld [vmem:[%s10902_s1 + $0x6f0] sm:$0x33]  ;;  %v7320_v2 = vld [vmem:[%s10902_s1 + $0x164] ss:$72 sps:$4 sm:$0xff]  }
  0xbd   : > { %2495 = vmatprep.subr.bf16.mxu1 %v7301_v3  ;;  %v6541_v61 = vcombine.high %v650_v60, %v650_v60 }
  0xbf   : > { %2237 = vmatpush1.bf16.msra.mxu0 %v7190_v62  ;;  %v6540_v62 = vcombine.low %v650_v60, %v650_v60 }
  0xc0   : > { %2238 = vmatprep.subr.bf16.mxu0 %v7198_v63  ;;  %2496 = vmatpush1.bf16.msra.mxu1 %v7299_v9  ;;  %v7318_v9 = vld [vmem:[%s10902_s1 + $0x160] ss:$72 sps:$4 sm:$0xff]  }
  0xc1   : > { %2497 = vmatprep.subr.bf16.mxu1 %v7307_v10  ;;  %v1877_v63 = vsel %vm1839_vm1, %v6540_v62, 0 }
  0xc2   : > { %2123 = vmatmul.mubr.bf16.gmra.mrb[52].mxu0 %v8029_v4  ;;  %v651_v4 = vld [vmem:[%s10902_s1 + $0x6f8] sm:$0x33] }
  0xc3   : > { %2239 = vmatpush1.bf16.msra.mxu0 %v7196_v58  ;;  %6563 = vmatprep.mubr.msk.bf16.mxu0 %vm1823_vm0, %v8035_v6  ;;  %v7305_v6 = vld [vmem:[%s10902_s1 + $0x668] ss:$72 sps:$4 sm:$0xff]   ;;  %v6543_v16 = vcombine.high %v651_v4, %v651_v4  ;;  %v6542_v17 = vcombine.low %v651_v4, %v651_v4  ;;  %v7317_v58 = vld [vmem:[%s10902_s1 + $0xd4] ss:$72 sps:$4 sm:$0xff]  }
  0xc4   : > { %2240 = vmatprep.subr.bf16.mxu0 %v7204_v59  ;;  %2498 = vmatpush1.bf16.msra.mxu1 %v7305_v6  ;;  %v7315_v59 = vld [vmem:[%s10902_s1 + $0xd0] ss:$72 sps:$4 sm:$0xff]   ;;  %v7323_v4 = vld [vmem:[%s10902_s1 + $0x1f4] ss:$72 sps:$4 sm:$0xff]  }
  0xc5   : > { %6588 = vmatprep.subr.msk.bf16.mxu1 %vm1839_vm1, %v6543_v16  ;;  %v7324_v16 = vld [vmem:[%s10902_s1 + $0x280] ss:$72 sps:$4 sm:$0xff]  }
  0xc7   : > { %2241 = vmatpush1.bf16.msra.mxu0 %v7202_v5 }
  0xc8   : > { %2242 = vmatprep.subr.bf16.mxu0 %v7210_v8 }
  0xca   : > { %2133 = vmatmul.mubr.bf16.gmra.mrb[56].mxu0 %v8059_v14  ;;  %v1883_v14 = vsel %vm1839_vm1, %v6542_v17, 0 }
  0xcb   : > { %2243 = vmatpush1.bf16.msra.mxu0 %v7208_v12  ;;  %6571 = vmatprep.mubr.msk.bf16.mxu0 %vm1823_vm0, %v8416_v7  ;;  %v7321_v12 = vld [vmem:[%s10902_s1 + $0x1f0] ss:$72 sps:$4 sm:$0xff]  }
  0xcc   : > { %2244 = vmatprep.subr.bf16.mxu0 %v7216_v13  ;;  %2500 = vmatpush1.bf16.msra.mxu1 %v1883_v14  ;;  %v7326_v13 = vld [vmem:[%s10902_s1 + $0x284] ss:$72 sps:$4 sm:$0xff]   ;;  %v7327_v14 = vld [vmem:[%s10902_s1 + $0x310] ss:$72 sps:$4 sm:$0xff]  }
  0xcf   : > { %2245 = vmatpush1.bf16.msra.mxu0 %v7214_v15  ;;  %2508 = vmatmul.mubr.bf16.vlgmr.msra.gmra.mrb[40].mxu1 %v8468_v23 }
  0xd0   : > { %2246 = vmatprep.subr.bf16.mxu0 %v7222_v18  ;;  %6590 = vmatprep.mubr.msk.bf16.mxu1 %vm1823_vm0, %v8472_v26  ;;  %v7329_v18 = vld [vmem:[%s10902_s1 + $0x314] ss:$72 sps:$4 sm:$0xff]  }
  0xd3   : > { %2247 = vmatpush1.bf16.msra.mxu0 %v7220_v19 }
  0xd4   : > { %2248 = vmatprep.subr.bf16.mxu0 %v7228_v20  ;;  %v7332_v20 = vld [vmem:[%s10902_s1 + $0x3a4] ss:$72 sps:$4 sm:$0xff]  }
  0xd7   : > { %2249 = vmatpush1.bf16.msra.mxu0 %v7226_v22  ;;  %2518 = vmatmul.mubr.bf16.gmra.mrb[44].mxu1 %v8488_v30 }
  0xd8   : > { %6570 = vmatprep.subr.msk.bf16.mxu0 %vm1839_vm1, %v6537_v24  ;;  %6591 = vmatprep.mubr.msk.bf16.mxu1 %vm1823_vm0, %v8492_v31  ;;  %v7330_v24 = vld [vmem:[%s10902_s1 + $0x3a0] ss:$72 sps:$4 sm:$0xff]  }
  0xdb   : > { %2251 = vmatpush1.bf16.msra.mxu0 %v1865_v11 }
  0xdc   : > { %2392 = vmatprep.subr.bf16.mxu0 %v7238_v27  ;;  %v7335_v27 = vld [vmem:[%s10902_s1 + $0x434] ss:$72 sps:$4 sm:$0xff]  }
  0xde   : > { %2259 = vmatmul.mubr.bf16.vlgmr.msra.gmra.mrb[60].mxu0 %v8468_v23 }
  0xdf   : > { %2393 = vmatpush1.bf16.msra.mxu0 %v7236_v28  ;;  %6572 = vmatprep.mubr.msk.bf16.mxu0 %vm1823_vm0, %v8472_v26  ;;  %v7333_v28 = vld [vmem:[%s10902_s1 + $0x430] ss:$72 sps:$4 sm:$0xff]  }
  0xe0   : > { %2394 = vmatprep.subr.bf16.mxu0 %v7244_v29  ;;  %2528 = vmatmul.mubr.bf16.gmra.mrb[48].mxu1 %v8512_v37  ;;  %v7338_v29 = vld [vmem:[%s10902_s1 + $0x4c4] ss:$72 sps:$4 sm:$0xff]  }
  0xe1   : > { %6592 = vmatprep.mubr.msk.bf16.mxu1 %vm1823_vm0, %v8516_v38 }
  0xe3   : > { %2395 = vmatpush1.bf16.msra.mxu0 %v7242_v32 }
  0xe4   : > { %2396 = vmatprep.subr.bf16.mxu0 %v7250_v33 }
  0xe6   : > { %2269 = vmatmul.mubr.bf16.gmra.mrb[64].mxu0 %v8488_v30 }
  0xe7   : > { %2397 = vmatpush1.bf16.msra.mxu0 %v7248_v34  ;;  %6573 = vmatprep.mubr.msk.bf16.mxu0 %vm1823_vm0, %v8492_v31  ;;  %v7336_v34 = vld [vmem:[%s10902_s1 + $0x4c0] ss:$72 sps:$4 sm:$0xff]  }
  0xe8   : > { %2398 = vmatprep.subr.bf16.mxu0 %v7256_v35  ;;  %2538 = vmatmul.mubr.bf16.gmra.mrb[52].mxu1 %v8536_v44 }
  0xe9   : > { %6593 = vmatprep.mubr.msk.bf16.mxu1 %vm1823_vm0, %v8540_v45 }
  0xeb   : > { %2399 = vmatpush1.bf16.msra.mxu0 %v7254_v40  ;;  %v7341_v40 = vld [vmem:[%s10902_s1 + $0x554] ss:$72 sps:$4 sm:$0xff]  }
  0xec   : > { %2400 = vmatprep.subr.bf16.mxu0 %v7262_v41 }
  0xee   : > { %2279 = vmatmul.mubr.bf16.gmra.mrb[68].mxu0 %v8512_v37 }
  0xef   : > { %2401 = vmatpush1.bf16.msra.mxu0 %v7260_v42  ;;  %6574 = vmatprep.mubr.msk.bf16.mxu0 %vm1823_vm0, %v8516_v38  ;;  %v7339_v42 = vld [vmem:[%s10902_s1 + $0x550] ss:$72 sps:$4 sm:$0xff]  }
  0xf0   : > { %2402 = vmatprep.subr.bf16.mxu0 %v7268_v43  ;;  %2548 = vmatmul.mubr.bf16.gmra.mrb[56].mxu1 %v8560_v36  ;;  %v7344_v43 = vld [vmem:[%s10902_s1 + $0x5e4] ss:$72 sps:$4 sm:$0xff]  }
  0xf3   : > { %2403 = vmatpush1.bf16.msra.mxu0 %v7266_v46 }
  0xf4   : > { %2404 = vmatprep.subr.bf16.mxu0 %v7274_v47  ;;  %v2647_v47 = vlaneseq }
  0xf6   : > { %2289 = vmatmul.mubr.bf16.gmra.mrb[72].mxu0 %v8536_v44 }
  0xf7   : > { %2405 = vmatpush1.bf16.msra.mxu0 %v7272_v50  ;;  %6575 = vmatprep.mubr.msk.bf16.mxu0 %vm1823_vm0, %v8540_v45 }
  0xf8   : > { %2406 = vmatprep.subr.bf16.mxu0 %v7280_v51  ;;  %v7342_v51 = vld [vmem:[%s10902_s1 + $0x5e0] ss:$72 sps:$4 sm:$0xff]  }
  0xfb   : > { %2407 = vmatpush1.bf16.msra.mxu0 %v7278_v52 }
  0xfc   : > { %2408 = vmatprep.subr.bf16.mxu0 %v7286_v39 }
  0xfe   : > { %2299 = vmatmul.mubr.bf16.gmra.mrb[76].mxu0 %v8560_v36 }
  0xff   : > { %2409 = vmatpush1.bf16.msra.mxu0 %v7284_v53  ;;  %6583 = vmatprep.mubr.msk.bf16.mxu0 %vm1823_vm0, %v8416_v7  ;;  %v652_v53 = vld [vmem:[%s10902_s1 + $0x700] sm:$0x33] }
 0x100   : > { %2410 = vmatprep.subr.bf16.mxu0 %v7292_v54  ;;  %v8728_v54 = vshrl.u32 %v2647_v47, 7 }
 0x103   : > { %2411 = vmatpush1.bf16.msra.mxu0 %v7290_v55  ;;  %v7345_v55 = vld [vmem:[%s10902_s1 + $0x670] ss:$72 sps:$4 sm:$0xff]  }
 0x104   : > { %2412 = vmatprep.subr.bf16.mxu0 %v7298_v56  ;;  %v6545_v56 = vcombine.high %v652_v53, %v652_v53 }
 0x107   : > { %2413 = vmatpush1.bf16.msra.mxu0 %v7296_v57  ;;  %v6544_v57 = vcombine.low %v652_v53, %v652_v53 }
 0x108   : > { %2414 = vmatprep.subr.bf16.mxu0 %v7304_v48  ;;  %v8734_v48 = vsub.s32 0, %v8728_v54 }
 0x10a   : > { %10934 = vst [vmem:[#allocation4_spill] sm:$0xff] %v8734_v48 }
 0x10b   : > { %2415 = vmatpush1.bf16.msra.mxu0 %v7302_v49  ;;  %v8741_v49 = vld [vmem:[%s10903_s2] sm:$0xff] }
 0x10c   : > { %6582 = vmatprep.subr.msk.bf16.mxu0 %vm1839_vm1, %v6541_v61  ;;  %v8744_v61 = vsub.s32 1, %v8728_v54 }
 0x10e   : > { %10935 = vst [vmem:[#allocation5_spill] sm:$0xff] %v8744_v61 }
 0x10f   : > { %2417 = vmatpush1.bf16.msra.mxu0 %v1877_v63  ;;  %v1889_v63 = vsel %vm1839_vm1, %v6544_v57, 0 }
 0x110   : > { %2558 = vmatprep.subr.bf16.mxu0 %v7314_v0 }
 0x112   : > { %2425 = vmatmul.mubr.bf16.vlgmr.msra.gmra.mrb[80].mxu0 %v8468_v23 }
 0x113   : > { %2559 = vmatpush1.bf16.msra.mxu0 %v7312_v1  ;;  %6584 = vmatprep.mubr.msk.bf16.mxu0 %vm1823_vm0, %v8472_v26 }
 0x114   : > { %2560 = vmatprep.subr.bf16.mxu0 %v7317_v58  ;;  %v8756_v58 = vrot.slane %v8741_v49, %v8734_v48 }
 0x115   : > { %v8619_v3 = vpop.f32.mrb[0].mxu0 }
 0x116   : > { %v8621_v5 = vpop.f32.mrb[1].mxu0 }
 0x117   : > { %v8623_v8 = vpop.f32.mrb[2].mxu0  ;;  %2561 = vmatpush1.bf16.msra.mxu0 %v7315_v59  ;;  %v8759_v59 = vsub.s32 2, %v8728_v54 }
 0x118   : > { %v8628_v10 = vpop.f32.mrb[3].mxu0  ;;  %2562 = vmatprep.subr.bf16.mxu0 %v7320_v2  ;;  %v8764_v2 = vld [vmem:[%s10904_s3] sm:$0xff] }
 0x119   : > { %10936 = vst [vmem:[#allocation6_spill] sm:$0xff] %v8759_v59 }
 0x11a   : > { %2435 = vmatmul.mubr.bf16.gmra.mrb[84].mxu0 %v8488_v30 }
 0x11b   : > { %2563 = vmatpush1.bf16.msra.mxu0 %v7318_v9  ;;  %6585 = vmatprep.mubr.msk.bf16.mxu0 %vm1823_vm0, %v8492_v31  ;;  %v8768_v9 = vrot.slane %v8741_v49, %v8744_v61 }
 0x11c   : > { %2564 = vmatprep.subr.bf16.mxu0 %v7323_v4  ;;  %v8771_v4 = vsub.s32 3, %v8728_v54 }
 0x11d   : > { %v8642_v6 = vpop.f32.mrb[4].mxu0 }
 0x11e   : > { %v8644_v15 = vpop.f32.mrb[5].mxu0  ;;  %10937 = vst [vmem:[#allocation7_spill] sm:$0xff] %v8771_v4 }
 0x11f   : > { %2565 = vmatpush1.bf16.msra.mxu0 %v7321_v12  ;;  %v8649_v17 = vpop.f32.mrb[6].mxu0  ;;  %v8736_v60 = vpop.f32.mrb[0].mxu1  ;;  %v2737_v12 = vmul.f32 %v8756_v58, %v8619_v3  ;;  %v8794_v3 = vrot.slane %v8741_v49, %v8771_v4 }
 0x120   : > { %2566 = vmatprep.subr.bf16.mxu0 %v7326_v13  ;;  %v8654_v19 = vpop.f32.mrb[7].mxu0  ;;  %v8746_v62 = vpop.f32.mrb[1].mxu1  ;;  %v8777_v13 = vrot.slane %v8764_v2, %v8734_v48 }
 0x121   : > { %v8750_v0 = vpop.f32.mrb[2].mxu1 }
 0x122   : > { %2445 = vmatmul.mubr.bf16.gmra.mrb[88].mxu0 %v8512_v37  ;;  %v8752_v1 = vpop.f32.mrb[3].mxu1 }
 0x123   : > { %2567 = vmatpush1.bf16.msra.mxu0 %v7324_v16  ;;  %6586 = vmatprep.mubr.msk.bf16.mxu0 %vm1823_vm0, %v8516_v38  ;;  %v8782_v16 = vrot.slane %v8741_v49, %v8759_v59 }
 0x124   : > { %2568 = vmatprep.subr.bf16.mxu0 %v7329_v18 }
 0x125   : > { %v8665_v21 = vpop.f32.mrb[8].mxu0 }
 0x126   : > { %v8667_v22 = vpop.f32.mrb[9].mxu0 }
 0x127   : > { %2569 = vmatpush1.bf16.msra.mxu0 %v7327_v14  ;;  %v8672_v25 = vpop.f32.mrb[10].mxu0  ;;  %v8784_v18 = vpop.f32.mrb[4].mxu1  ;;  %v2738_v14 = vmul.f32 %v8768_v9, %v8621_v5 }
 0x128   : > { %2570 = vmatprep.subr.bf16.mxu0 %v7332_v20  ;;  %v8677_v11 = vpop.f32.mrb[11].mxu0  ;;  %v8790_v20 = vrot.slane %v8764_v2, %v8744_v61 }
 0x12a   : > { %2455 = vmatmul.mubr.bf16.gmra.mrb[92].mxu0 %v8536_v44 }
 0x12b   : > { %2571 = vmatpush1.bf16.msra.mxu0 %v7330_v24  ;;  %6587 = vmatprep.mubr.msk.bf16.mxu0 %vm1823_vm0, %v8540_v45  ;;  %v2755_v24 = vmul.f32 %v8756_v58, %v8623_v8 }
 0x12c   : > { %2572 = vmatprep.subr.bf16.mxu0 %v7335_v27  ;;  %v8804_v27 = vrot.slane %v8764_v2, %v8759_v59 }
 0x12d   : > { %v8688_v32 = vpop.f32.mrb[12].mxu0 }
 0x12e   : > { %v8690_v33 = vpop.f32.mrb[13].mxu0 }
 0x12f   : > { %2573 = vmatpush1.bf16.msra.mxu0 %v7333_v28  ;;  %v8695_v35 = vpop.f32.mrb[14].mxu0  ;;  %v2756_v28 = vmul.f32 %v8768_v9, %v8628_v10 }
 0x130   : > { %2574 = vmatprep.subr.bf16.mxu0 %v7338_v29  ;;  %v8700_v41 = vpop.f32.mrb[15].mxu0 }
 0x132   : > { %2465 = vmatmul.mubr.bf16.gmra.mrb[96].mxu0 %v8560_v36 }
 0x133   : > { %2575 = vmatpush1.bf16.msra.mxu0 %v7336_v34  ;;  %6595 = vmatprep.mubr.msk.bf16.mxu0 %vm1823_vm0, %v8416_v7  ;;  %v7347_v7 = vld [vmem:[%s10902_s1 + $0x674] ss:$72 sps:$4 sm:$0xff]   ;;  %v8812_v34 = vrot.slane %v8764_v2, %v8771_v4 }
 0x134   : > { %2576 = vmatprep.subr.bf16.mxu0 %v7341_v40  ;;  %v3013_v40 = vadd.f32 %v8777_v13, %v2737_v12 }
 0x135   : > { %v8711_v46 = vpop.f32.mrb[16].mxu0 }
 0x136   : > { %v8713_v50 = vpop.f32.mrb[17].mxu0  ;;  %v3193_v12 = vmax.f32 %v3013_v40, 0.0 }
 0x137   : > { %2577 = vmatpush1.bf16.msra.mxu0 %v7339_v42  ;;  %v8718_v52 = vpop.f32.mrb[18].mxu0 }
 0x138   : > { %2578 = vmatprep.subr.bf16.mxu0 %v7344_v43  ;;  %v8723_v39 = vpop.f32.mrb[19].mxu0  ;;  %v3014_v43 = vadd.f32 %v8790_v20, %v2738_v14  ;;  %v2773_v14 = vmul.f32 %v8756_v58, %v8642_v6 }
 0x13b   : > { %2579 = vmatpush1.bf16.msra.mxu0 %v7342_v51 }
 0x13c   : > { %2580 = vmatprep.subr.bf16.mxu0 %v7347_v7  ;;  %v3031_v7 = vadd.f32 %v8777_v13, %v2755_v24 }
 0x13e   : > { %v3211_v6 = vmax.f32 %v3031_v7, 0.0  ;;  %v3049_v7 = vadd.f32 %v8777_v13, %v2773_v14 }
 0x13f   : > { %2581 = vmatpush1.bf16.msra.mxu0 %v7345_v55 }
 0x140   : > { %6594 = vmatprep.subr.msk.bf16.mxu0 %vm1839_vm1, %v6545_v56  ;;  %v3032_v56 = vadd.f32 %v8790_v20, %v2756_v28 }
 0x143   : > { %2583 = vmatpush1.bf16.msra.mxu0 %v1889_v63 }
 0x146   : > { %2591 = vmatmul.mubr.bf16.vlgmr.msra.gmra.mrb[100].mxu0 %v8468_v23  ;;  %v8798_v23 = vpop.f32.mrb[5].mxu1 }
 0x147   : > { %6596 = vmatprep.mubr.msk.bf16.mxu0 %vm1823_vm0, %v8472_v26  ;;  %v8806_v5 = vpop.f32.mrb[6].mxu1 }
 0x148   : > { %v8814_v26 = vpop.f32.mrb[7].mxu1 }
 0x149   : > { %v2011_v29 = vpop.f32.mrb[20].mxu0  ;;  %v8830_v24 = vpop.f32.mrb[8].mxu1 }
 0x14a   : > { %v2739_v8 = vmul.f32 %v8782_v16, %v2011_v29  ;;  %v2013_v42 = vpop.f32.mrb[21].mxu0  ;;  %v8837_v40 = vpop.f32.mrb[9].mxu1 }
 0x14b   : > { %v2740_v47 = vmul.f32 %v8794_v3, %v2013_v42  ;;  %v2015_v51 = vpop.f32.mrb[22].mxu0 }
 0x14c   : > { %v3015_v10 = vadd.f32 %v8804_v27, %v2739_v8  ;;  %v2757_v53 = vmul.f32 %v8782_v16, %v2015_v51  ;;  %v2017_v55 = vpop.f32.mrb[23].mxu0  ;;  %v3194_v8 = vmax.f32 %v3014_v43, 0.0  ;;  %v2774_v51 = vmul.f32 %v8768_v9, %v8644_v15 }
 0x14d   : > { %v3016_v57 = vadd.f32 %v8812_v34, %v2740_v47  ;;  %v2758_v63 = vmul.f32 %v8794_v3, %v2017_v55  ;;  %v8843_v55 = vpop.f32.mrb[10].mxu1  ;;  %v3212_v43 = vmax.f32 %v3032_v56, 0.0  ;;  %v2792_v15 = vmul.f32 %v8768_v9, %v8654_v19 }
 0x14e   : > { %v3195_v29 = vmax.f32 %v3015_v10, 0.0  ;;  %v3033_v42 = vadd.f32 %v8804_v27, %v2757_v53  ;;  %2601 = vmatmul.mubr.bf16.gmra.mrb[104].mxu0 %v8488_v30  ;;  %v2791_v10 = vmul.f32 %v8756_v58, %v8649_v17 }
 0x14f   : > { %v3196_v28 = vmax.f32 %v3016_v57, 0.0  ;;  %v3034_v47 = vadd.f32 %v8812_v34, %v2758_v63  ;;  %6597 = vmatprep.mubr.msk.bf16.mxu0 %vm1823_vm0, %v8492_v31  ;;  %v8849_v31 = vpop.f32.mrb[11].mxu1  ;;  %v3068_v14 = vadd.f32 %v8790_v20, %v2792_v15 }
 0x150   : > { %v8841_v53 = vmax.f32 %v3193_v12, %v3195_v29  ;;  %v3213_v30 = vmax.f32 %v3033_v42, 0.0  ;;  %v3050_v29 = vadd.f32 %v8790_v20, %v2774_v51  ;;  %v2809_v51 = vmul.f32 %v8756_v58, %v8665_v21 }
 0x151   : > { %v8847_v57 = vmax.f32 %v3194_v8, %v3196_v28  ;;  %v3214_v63 = vmax.f32 %v3034_v47, 0.0  ;;  %v2021_v61 = vpop.f32.mrb[24].mxu0  ;;  %v3067_v8 = vadd.f32 %v8777_v13, %v2791_v10  ;;  %v8869_v10 = vpop.f32.mrb[12].mxu1 }
 0x152   : > { %v8852_v48 = vmax.f32 %v3211_v6, %v3213_v30  ;;  %v2775_v17 = vmul.f32 %v8782_v16, %v2021_v61  ;;  %v2023_v12 = vpop.f32.mrb[25].mxu0  ;;  %v3229_v30 = vmax.f32 %v3049_v7, 0.0  ;;  %v2827_v7 = vmul.f32 %v8756_v58, %v8672_v25 }
 0x153   : > { %v8856_v42 = vmax.f32 %v3212_v43, %v3214_v63  ;;  %v2776_v56 = vmul.f32 %v8794_v3, %v2023_v12  ;;  %v2025_v19 = vpop.f32.mrb[26].mxu0  ;;  %v2810_v12 = vmul.f32 %v8768_v9, %v8667_v22  ;;  %v3247_v21 = vmax.f32 %v3067_v8, 0.0 }
 0x154   : > { %v3051_v28 = vadd.f32 %v8804_v27, %v2775_v17  ;;  %v2793_v47 = vmul.f32 %v8782_v16, %v2025_v19  ;;  %v2027_v4 = vpop.f32.mrb[27].mxu0  ;;  %v3230_v17 = vmax.f32 %v3050_v29, 0.0  ;;  %v3248_v29 = vmax.f32 %v3068_v14, 0.0 }
 0x155   : > { %v3052_v6 = vadd.f32 %v8812_v34, %v2776_v56  ;;  %v2794_v61 = vmul.f32 %v8794_v3, %v2027_v4  ;;  %v8876_v4 = vpop.f32.mrb[13].mxu1  ;;  %v2828_v22 = vmul.f32 %v8768_v9, %v8677_v11  ;;  %v3085_v8 = vadd.f32 %v8777_v13, %v2809_v51 }
 0x156   : > { %v3231_v43 = vmax.f32 %v3051_v28, 0.0  ;;  %v3069_v63 = vadd.f32 %v8804_v27, %v2793_v47  ;;  %2611 = vmatmul.mubr.bf16.gmra.mrb[108].mxu0 %v8512_v37  ;;  %v8882_v28 = vpop.f32.mrb[14].mxu1 }
 0x157   : > { %v3232_v15 = vmax.f32 %v3052_v6, 0.0  ;;  %v3070_v56 = vadd.f32 %v8812_v34, %v2794_v61  ;;  %6598 = vmatprep.mubr.msk.bf16.mxu0 %vm1823_vm0, %v8516_v38  ;;  %v8888_v38 = vpop.f32.mrb[15].mxu1  ;;  %v3104_v51 = vadd.f32 %v8790_v20, %v2828_v22 }
 0x158   : > { %v8880_v19 = vmax.f32 %v3229_v30, %v3231_v43  ;;  %v3249_v37 = vmax.f32 %v3069_v63, 0.0  ;;  %10938 = vst [vmem:[#allocation8_spill] sm:$0xff] %v8888_v38  ;;  %v3086_v43 = vadd.f32 %v8790_v20, %v2810_v12  ;;  %v2845_v12 = vmul.f32 %v8756_v58, %v8688_v32 }
 0x159   : > { %v8886_v47 = vmax.f32 %v3230_v17, %v3232_v15  ;;  %v3250_v6 = vmax.f32 %v3070_v56, 0.0  ;;  %v2031_v61 = vpop.f32.mrb[28].mxu0  ;;  %v3103_v17 = vadd.f32 %v8777_v13, %v2827_v7  ;;  %v8908_v7 = vpop.f32.mrb[16].mxu1 }
 0x15a   : > { %v8891_v59 = vmax.f32 %v3247_v21, %v3249_v37  ;;  %v2811_v25 = vmul.f32 %v8782_v16, %v2031_v61  ;;  %v2033_v30 = vpop.f32.mrb[29].mxu0  ;;  %v3265_v61 = vmax.f32 %v3085_v8, 0.0  ;;  %v2863_v8 = vmul.f32 %v8756_v58, %v8695_v35 }
 0x15b   : > { %v8895_v63 = vmax.f32 %v3248_v29, %v3250_v6  ;;  %v2812_v14 = vmul.f32 %v8794_v3, %v2033_v30  ;;  %v2035_v11 = vpop.f32.mrb[30].mxu0  ;;  %v2846_v30 = vmul.f32 %v8768_v9, %v8690_v33  ;;  %v3283_v32 = vmax.f32 %v3103_v17, 0.0 }
 0x15c   : > { %v3087_v15 = vadd.f32 %v8804_v27, %v2811_v25  ;;  %v2829_v56 = vmul.f32 %v8782_v16, %v2035_v11  ;;  %v2037_v38 = vpop.f32.mrb[31].mxu0  ;;  %v3266_v25 = vmax.f32 %v3086_v43, 0.0  ;;  %v3284_v43 = vmax.f32 %v3104_v51, 0.0 }
 0x15d   : > { %v3088_v21 = vadd.f32 %v8812_v34, %v2812_v14  ;;  %v2830_v37 = vmul.f32 %v8794_v3, %v2037_v38  ;;  %v8915_v38 = vpop.f32.mrb[17].mxu1  ;;  %v2864_v33 = vmul.f32 %v8768_v9, %v8700_v41  ;;  %v3121_v17 = vadd.f32 %v8777_v13, %v2845_v12 }
 0x15e   : > { %v3267_v29 = vmax.f32 %v3087_v15, 0.0  ;;  %v3105_v6 = vadd.f32 %v8804_v27, %v2829_v56  ;;  %2621 = vmatmul.mubr.bf16.gmra.mrb[112].mxu0 %v8536_v44  ;;  %10939 = vst [vmem:[#allocation9_spill] sm:$0xff] %v8915_v38  ;;  %v8921_v15 = vpop.f32.mrb[18].mxu1 }
 0x15f   : > { %v3268_v22 = vmax.f32 %v3088_v21, 0.0  ;;  %v3106_v14 = vadd.f32 %v8812_v34, %v2830_v37  ;;  %6599 = vmatprep.mubr.msk.bf16.mxu0 %vm1823_vm0, %v8540_v45  ;;  %10940 = vst [vmem:[#allocation10_spill] sm:$0xff] %v8921_v15  ;;  %v8927_v45 = vpop.f32.mrb[19].mxu1  ;;  %v3140_v12 = vadd.f32 %v8790_v20, %v2864_v33  ;;  %v7350_v33 = vld [vmem:[%s10905_s4] ss:$8 sps:$4 sm:$0xff]  }
 0x160   : > { %v8919_v11 = vmax.f32 %v3265_v61, %v3267_v29  ;;  %v3285_v44 = vmax.f32 %v3105_v6, 0.0  ;;  %10941 = vst [vmem:[#allocation11_spill] sm:$0xff] %v8927_v45  ;;  %v3122_v29 = vadd.f32 %v8790_v20, %v2846_v30  ;;  %v7352_v30 = vld [vmem:[%s10905_s4 + $0x4] ss:$8 sps:$4 sm:$0xff]  }
 0x161   : > { %v8925_v56 = vmax.f32 %v3266_v25, %v3268_v22  ;;  %v3286_v21 = vmax.f32 %v3106_v14, 0.0  ;;  %v2041_v37 = vpop.f32.mrb[32].mxu0  ;;  %v3139_v25 = vadd.f32 %v8777_v13, %v2863_v8  ;;  %4841 = vmatprep.subr.bf16.mxu1 %v7352_v30 }
 0x162   : > { %v8930_v38 = vmax.f32 %v3283_v32, %v3285_v44  ;;  %v2847_v35 = vmul.f32 %v8782_v16, %v2041_v37  ;;  %v2043_v61 = vpop.f32.mrb[33].mxu0  ;;  %4842 = vmatpush1.bf16.msra.mxu1 %v7350_v33 }
 0x163   : > { %v8934_v6 = vmax.f32 %v3284_v43, %v3286_v21  ;;  %v2848_v51 = vmul.f32 %v8794_v3, %v2043_v61  ;;  %v2045_v41 = vpop.f32.mrb[34].mxu0  ;;  %v3301_v43 = vmax.f32 %v3121_v17, 0.0  ;;  %v2881_v21 = vmul.f32 %v8756_v58, %v8711_v46 }
 0x164   : > { %v3123_v22 = vadd.f32 %v8804_v27, %v2847_v35  ;;  %v2865_v14 = vmul.f32 %v8782_v16, %v2045_v41  ;;  %v2047_v45 = vpop.f32.mrb[35].mxu0  ;;  %v3302_v35 = vmax.f32 %v3122_v29, 0.0  ;;  %v3319_v17 = vmax.f32 %v3139_v25, 0.0 }
 0x165   : > { %v3124_v32 = vadd.f32 %v8812_v34, %v2848_v51  ;;  %v2866_v44 = vmul.f32 %v8794_v3, %v2047_v45  ;;  %v2882_v45 = vmul.f32 %v8768_v9, %v8713_v50  ;;  %v2899_v46 = vmul.f32 %v8756_v58, %v8718_v52 }
 0x166   : > { %v3303_v8 = vmax.f32 %v3123_v22, 0.0  ;;  %v3141_v37 = vadd.f32 %v8804_v27, %v2865_v14  ;;  %2631 = vmatmul.mubr.bf16.gmra.mrb[116].mxu0 %v8560_v36  ;;  %v3320_v36 = vmax.f32 %v3140_v12, 0.0  ;;  %v2900_v14 = vmul.f32 %v8768_v9, %v8723_v39  ;;  %v7353_v12 = vld [vmem:[%s10905_s4 + $0x10] ss:$8 sps:$4 sm:$0xff]  }
 0x167   : > { %v3304_v61 = vmax.f32 %v3124_v32, 0.0  ;;  %v3142_v51 = vadd.f32 %v8812_v34, %v2866_v44  ;;  %v7355_v32 = vld [vmem:[%s10905_s4 + $0x14] ss:$8 sps:$4 sm:$0xff]   ;;  %v3157_v25 = vadd.f32 %v8777_v13, %v2881_v21  ;;  %v3158_v39 = vadd.f32 %v8790_v20, %v2882_v45 }
 0x168   : > { %v8958_v41 = vmax.f32 %v3301_v43, %v3303_v8  ;;  %v3321_v22 = vmax.f32 %v3141_v37, 0.0  ;;  %4843 = vmatprep.subr.bf16.mxu1 %v7355_v32  ;;  %v3175_v8 = vadd.f32 %v8777_v13, %v2899_v46 }
 0x169   : > { %v8962_v29 = vmax.f32 %v3302_v35, %v3304_v61  ;;  %v3322_v15 = vmax.f32 %v3142_v51, 0.0  ;;  %v2051_v50 = vpop.f32.mrb[36].mxu0  ;;  %4844 = vmatpush1.bf16.msra.mxu1 %v7353_v12  ;;  %v3176_v35 = vadd.f32 %v8790_v20, %v2900_v14  ;;  %v3337_v51 = vmax.f32 %v3157_v25, 0.0  ;;  %v7359_v12 = vld [vmem:[%s10905_s4 + $0x30] ss:$8 sps:$4 sm:$0xff]  }
 0x16a   : > { %v8968_v44 = vmax.f32 %v3319_v17, %v3321_v22  ;;  %v2883_v52 = vmul.f32 %v8782_v16, %v2051_v50  ;;  %v2053_v58 = vpop.f32.mrb[37].mxu0  ;;  %v3338_v46 = vmax.f32 %v3158_v39, 0.0 }
 0x16b   : > { %v8975_v9 = vmax.f32 %v3320_v36, %v3322_v15  ;;  %v2884_v30 = vmul.f32 %v8794_v3, %v2053_v58  ;;  %v2055_v43 = vpop.f32.mrb[38].mxu0  ;;  %v7358_v15 = vld [vmem:[%s10905_s4 + $0x24] ss:$8 sps:$4 sm:$0xff]   ;;  %v3355_v36 = vmax.f32 %v3175_v8, 0.0  ;;  %v3356_v50 = vmax.f32 %v3176_v35, 0.0 }
 0x16c   : > { %v3159_v21 = vadd.f32 %v8804_v27, %v2883_v52  ;;  %v2901_v37 = vmul.f32 %v8782_v16, %v2055_v43  ;;  %v2057_v33 = vpop.f32.mrb[39].mxu0  ;;  %v7356_v16 = vld [vmem:[%s10905_s4 + $0x20] ss:$8 sps:$4 sm:$0xff]   ;;  %4845 = vmatprep.subr.bf16.mxu1 %v7358_v15  ;;  %v9002_v58 = vsub.s32 6, %v8728_v54 }
 0x16d   : > { %v3160_v61 = vadd.f32 %v8812_v34, %v2884_v30  ;;  %v2902_v45 = vmul.f32 %v8794_v3, %v2057_v33  ;;  %4846 = vmatpush1.bf16.msra.mxu1 %v7356_v16  ;;  %v9012_v30 = vsub.s32 7, %v8728_v54  ;;  %v9024_v33 = vsub.s32 4, %v8728_v54 }
 0x16e   : > { %v3339_v17 = vmax.f32 %v3159_v21, 0.0  ;;  %v3177_v13 = vadd.f32 %v8804_v27, %v2901_v37  ;;  %v7361_v27 = vld [vmem:[%s10905_s4 + $0x34] ss:$8 sps:$4 sm:$0xff]   ;;  %10942 = vst [vmem:[#allocation12_spill] sm:$0xff] %v9002_v58  ;;  %v7364_v37 = vld [vmem:[%s10905_s4 + $0x44] ss:$8 sps:$4 sm:$0xff]   ;;  %v9028_v35 = vrot.slane %v8741_v49, %v9002_v58 }
 0x16f   : > { %v3340_v22 = vmax.f32 %v3160_v61, 0.0  ;;  %v3178_v20 = vadd.f32 %v8812_v34, %v2902_v45  ;;  %v9004_v34 = vpop.f32.mrb[20].mxu1  ;;  %10943 = vst [vmem:[#allocation13_spill] sm:$0xff] %v9012_v30  ;;  %4847 = vmatprep.subr.bf16.mxu1 %v7361_v27  ;;  %10945 = vst [vmem:[#allocation15_spill] sm:$0xff] %v9024_v33  ;;  %v7362_v61 = vld [vmem:[%s10905_s4 + $0x40] ss:$8 sps:$4 sm:$0xff]   ;;  %v9038_v15 = vrot.slane %v8741_v49, %v9012_v30 }
 0x170   : > { %v8992_v14 = vmax.f32 %v3337_v51, %v3339_v17  ;;  %v3357_v3 = vmax.f32 %v3177_v13, 0.0  ;;  %v9014_v43 = vpop.f32.mrb[21].mxu1  ;;  %v9034_v45 = vsub.s32 5, %v8728_v54  ;;  %v7367_v51 = vld [vmem:[%s10905_s4 + $0x54] ss:$8 sps:$4 sm:$0xff]   ;;  %v9045_v17 = vrot.slane %v8741_v49, %v9024_v33 }
 0x171   : > { %v8994_v32 = vmax.f32 %v3338_v46, %v3340_v22  ;;  %v3358_v25 = vmax.f32 %v3178_v20, 0.0  ;;  %v9016_v8 = vpop.f32.mrb[22].mxu1  ;;  %4848 = vmatpush1.bf16.msra.mxu1 %v7359_v12  ;;  %v2743_v13 = vmul.f32 %v9028_v35, %v8736_v60  ;;  %v9051_v54 = vrot.slane %v8764_v2, %v9002_v58  ;;  %v7365_v46 = vld [vmem:[%s10905_s4 + $0x50] ss:$8 sps:$4 sm:$0xff]  }
 0x172   : > { %v8999_v52 = vmax.f32 %v3355_v36, %v3357_v3  ;;  %v9018_v21 = vpop.f32.mrb[23].mxu1  ;;  %10946 = vst [vmem:[#allocation16_spill] sm:$0xff] %v9034_v45  ;;  %4849 = vmatprep.subr.bf16.mxu1 %v7364_v37  ;;  %v9060_v22 = vrot.slane %v8741_v49, %v9034_v45  ;;  %v2744_v20 = vmul.f32 %v9038_v15, %v8746_v62  ;;  %v7370_v37 = vld [vmem:[%s10905_s4 + $0x64] ss:$8 sps:$4 sm:$0xff]  }
 0x173   : > { %v9009_v39 = vmax.f32 %v3356_v50, %v3358_v25  ;;  %10944 = vst [vmem:[#allocation14_spill] sm:$0xff] %v9018_v21  ;;  %v9053_v16 = vpop.f32.mrb[24].mxu1  ;;  %v9066_v60 = vrot.slane %v8764_v2, %v9012_v30  ;;  %v9072_v3 = vrot.slane %v8764_v2, %v9024_v33  ;;  %v2761_v50 = vmul.f32 %v9028_v35, %v8750_v0 }
 0x174   : > { %10947 = vst [vmem:[#allocation17_spill] sm:$0xff] %v9053_v16  ;;  %v9068_v36 = vpop.f32.mrb[25].mxu1  ;;  %v9080_v62 = vrot.slane %v8764_v2, %v9034_v45  ;;  %v2762_v27 = vmul.f32 %v9038_v15, %v8752_v1 }
 0x175   : > { %4850 = vmatpush1.bf16.msra.mxu1 %v7362_v61  ;;  %10948 = vst [vmem:[#allocation18_spill] sm:$0xff] %v9068_v36  ;;  %v9076_v25 = vpop.f32.mrb[26].mxu1  ;;  %v3020_v1 = vadd.f32 %v9066_v60, %v2744_v20 }
 0x176   : > { %4851 = vmatprep.subr.bf16.mxu1 %v7367_v51  ;;  %10949 = vst [vmem:[#allocation19_spill] sm:$0xff] %v9076_v25  ;;  %v9084_v12 = vpop.f32.mrb[27].mxu1  ;;  %v3019_v51 = vadd.f32 %v9051_v54, %v2743_v13  ;;  %v3038_v25 = vadd.f32 %v9066_v60, %v2762_v27 }
 0x177   : > { %10950 = vst [vmem:[#allocation20_spill] sm:$0xff] %v9084_v12  ;;  %v9108_v36 = vpop.f32.mrb[28].mxu1 }
 0x178   : > { %10951 = vst [vmem:[#allocation21_spill] sm:$0xff] %v9108_v36  ;;  %v2797_v36 = vmul.f32 %v9028_v35, %v8806_v5 }
 0x179   : > { %4852 = vmatpush1.bf16.msra.mxu1 %v7365_v46  ;;  %v7368_v46 = vld [vmem:[%s10905_s4 + $0x60] ss:$8 sps:$4 sm:$0xff]  }
 0x17a   : > { %4853 = vmatprep.subr.bf16.mxu1 %v7370_v37 }
 0x17d   : > { %v2094_v49 = vpop.f32.mrb[40].mxu0  ;;  %4854 = vmatpush1.bf16.msra.mxu1 %v7368_v46  ;;  %v3200_v46 = vmax.f32 %v3020_v1, 0.0  ;;  %v3218_v1 = vmax.f32 %v3038_v25, 0.0  ;;  %v7374_v25 = vld [vmem:[%s10905_s4 + $0x80] ss:$8 sps:$4 sm:$0xff]  }
 0x17e   : > { %v2741_v61 = vmul.f32 %v9045_v17, %v2094_v49  ;;  %v2096_v0 = vpop.f32.mrb[41].mxu0  ;;  %v3037_v49 = vadd.f32 %v9051_v54, %v2761_v50  ;;  %v7371_v50 = vld [vmem:[%s10905_s4 + $0x70] ss:$8 sps:$4 sm:$0xff]  }
 0x17f   : > { %v2742_v2 = vmul.f32 %v9060_v22, %v2096_v0  ;;  %v2098_v45 = vpop.f32.mrb[42].mxu0  ;;  %v7373_v0 = vld [vmem:[%s10905_s4 + $0x74] ss:$8 sps:$4 sm:$0xff]  }
 0x180   : > { %v3017_v33 = vadd.f32 %v9072_v3, %v2741_v61  ;;  %v2759_v30 = vmul.f32 %v9045_v17, %v2098_v45  ;;  %v2100_v58 = vpop.f32.mrb[43].mxu0  ;;  %v3199_v61 = vmax.f32 %v3019_v51, 0.0  ;;  %v2779_v45 = vmul.f32 %v9028_v35, %v8784_v18  ;;  %4855 = vmatprep.subr.bf16.mxu1 %v7373_v0 }
 0x181   : > { %v3018_v13 = vadd.f32 %v9080_v62, %v2742_v2  ;;  %v2760_v12 = vmul.f32 %v9060_v22, %v2100_v58  ;;  %v2780_v2 = vmul.f32 %v9038_v15, %v8798_v23  ;;  %v3217_v18 = vmax.f32 %v3037_v49, 0.0  ;;  %4856 = vmatpush1.bf16.msra.mxu1 %v7371_v50 }
 0x182   : > { %v3197_v20 = vmax.f32 %v3017_v33, 0.0  ;;  %v3035_v37 = vadd.f32 %v9072_v3, %v2759_v30  ;;  %v9116_v33 = vpop.f32.mrb[29].mxu1  ;;  %v2798_v23 = vmul.f32 %v9038_v15, %v8814_v26 }
 0x183   : > { %v3198_v58 = vmax.f32 %v3018_v13, 0.0  ;;  %v3036_v27 = vadd.f32 %v9080_v62, %v2760_v12  ;;  %10952 = vst [vmem:[#allocation22_spill] sm:$0xff] %v9116_v33  ;;  %v9121_v16 = vpop.f32.mrb[30].mxu1 }
 0x184   : > { %v3393_v30 = vmax.f32 %v8841_v53, %v3197_v20  ;;  %v3215_v51 = vmax.f32 %v3035_v37, 0.0  ;;  %v9126_v33 = vpop.f32.mrb[31].mxu1  ;;  %v7376_v53 = vld [vmem:[%s10905_s4 + $0x84] ss:$8 sps:$4 sm:$0xff]  }
 0x185   : > { %v3394_v13 = vmax.f32 %v8847_v57, %v3198_v58  ;;  %v3216_v12 = vmax.f32 %v3036_v27, 0.0  ;;  %v2104_v21 = vpop.f32.mrb[44].mxu0  ;;  %v3055_v57 = vadd.f32 %v9051_v54, %v2779_v45  ;;  %4857 = vmatprep.subr.bf16.mxu1 %v7376_v53 }
 0x186   : > { %v3395_v49 = vmax.f32 %v8852_v48, %v3215_v51  ;;  %v9132_v5 = vmax.f32 %v3393_v30, %v3199_v61  ;;  %v2777_v0 = vmul.f32 %v9045_v17, %v2104_v21  ;;  %v2106_v20 = vpop.f32.mrb[45].mxu0  ;;  %v3056_v48 = vadd.f32 %v9066_v60, %v2780_v2  ;;  %4858 = vmatpush1.bf16.msra.mxu1 %v7374_v25  ;;  %v7379_v2 = vld [vmem:[%s10905_s4 + $0x94] ss:$8 sps:$4 sm:$0xff]  }
 0x187   : > { %v3396_v26 = vmax.f32 %v8856_v42, %v3216_v12  ;;  %v9140_v37 = vmax.f32 %v3394_v13, %v3200_v46  ;;  %v2778_v50 = vmul.f32 %v9060_v22, %v2106_v20  ;;  %v2108_v58 = vpop.f32.mrb[46].mxu0  ;;  %v3073_v30 = vadd.f32 %v9051_v54, %v2797_v36  ;;  %4859 = vmatprep.subr.bf16.mxu1 %v7379_v2 }
 0x188   : > { %v9144_v61 = vmax.f32 %v3395_v49, %v3217_v18  ;;  %v3053_v21 = vadd.f32 %v9072_v3, %v2777_v0  ;;  %v2795_v45 = vmul.f32 %v9045_v17, %v2108_v58  ;;  %v2110_v27 = vpop.f32.mrb[47].mxu0  ;;  %v3074_v13 = vadd.f32 %v9066_v60, %v2798_v23  ;;  %v9160_v49 = vpop.f32.mrb[32].mxu1 }
 0x189   : > { %v9149_v51 = vmax.f32 %v3396_v26, %v3218_v1  ;;  %v3054_v42 = vadd.f32 %v9080_v62, %v2778_v50  ;;  %v2796_v46 = vmul.f32 %v9060_v22, %v2110_v27  ;;  %v3235_v53 = vmax.f32 %v3055_v57, 0.0  ;;  %v7377_v1 = vld [vmem:[%s10905_s4 + $0x90] ss:$8 sps:$4 sm:$0xff]   ;;  %v9168_v26 = vpop.f32.mrb[33].mxu1 }
 0x18a   : > { %v3233_v18 = vmax.f32 %v3053_v21, 0.0  ;;  %v3071_v12 = vadd.f32 %v9072_v3, %v2795_v45  ;;  %v2815_v36 = vmul.f32 %v9028_v35, %v8830_v24  ;;  %v3236_v20 = vmax.f32 %v3056_v48, 0.0  ;;  %v9173_v21 = vpop.f32.mrb[34].mxu1  ;;  %4860 = vmatpush1.bf16.msra.mxu1 %v7377_v1 }
 0x18b   : > { %v3234_v0 = vmax.f32 %v3054_v42, 0.0  ;;  %v3072_v23 = vadd.f32 %v9080_v62, %v2796_v46  ;;  %v2816_v25 = vmul.f32 %v9038_v15, %v8837_v40  ;;  %v3253_v24 = vmax.f32 %v3073_v30, 0.0  ;;  %v9178_v46 = vpop.f32.mrb[35].mxu1 }
 0x18c   : > { %v3397_v57 = vmax.f32 %v8880_v19, %v3233_v18  ;;  %v3251_v50 = vmax.f32 %v3071_v12, 0.0  ;;  %v2833_v58 = vmul.f32 %v9028_v35, %v8843_v55  ;;  %v3254_v48 = vmax.f32 %v3074_v13, 0.0  ;;  %v7382_v19 = vld [vmem:[%s10905_s4 + $0xa4] ss:$8 sps:$4 sm:$0xff]   ;;  %v7380_v13 = vld [vmem:[%s10905_s4 + $0xa0] ss:$8 sps:$4 sm:$0xff]  }
 0x18d   : > { %v3398_v45 = vmax.f32 %v8886_v47, %v3234_v0  ;;  %v3252_v27 = vmax.f32 %v3072_v23, 0.0  ;;  %v2114_v42 = vpop.f32.mrb[48].mxu0  ;;  %v2834_v40 = vmul.f32 %v9038_v15, %v8849_v31  ;;  %v3091_v47 = vadd.f32 %v9051_v54, %v2815_v36  ;;  %4861 = vmatprep.subr.bf16.mxu1 %v7382_v19 }
 0x18e   : > { %v3399_v30 = vmax.f32 %v8891_v59, %v3251_v50  ;;  %v9184_v55 = vmax.f32 %v3397_v57, %v3235_v53  ;;  %v2813_v2 = vmul.f32 %v9045_v17, %v2114_v42  ;;  %v2116_v18 = vpop.f32.mrb[49].mxu0  ;;  %v3092_v59 = vadd.f32 %v9066_v60, %v2816_v25  ;;  %4862 = vmatpush1.bf16.msra.mxu1 %v7380_v13  ;;  %v7383_v25 = vld [vmem:[%s10905_s4 + $0xb0] ss:$8 sps:$4 sm:$0xff]  }
 0x18f   : > { %v3400_v31 = vmax.f32 %v8895_v63, %v3252_v27  ;;  %v9192_v12 = vmax.f32 %v3398_v45, %v3236_v20  ;;  %v2814_v1 = vmul.f32 %v9060_v22, %v2116_v18  ;;  %v2118_v0 = vpop.f32.mrb[50].mxu0  ;;  %v3109_v50 = vadd.f32 %v9051_v54, %v2833_v58 }
 0x190   : > { %v9196_v53 = vmax.f32 %v3399_v30, %v3253_v24  ;;  %v3089_v23 = vadd.f32 %v9072_v3, %v2813_v2  ;;  %v2831_v36 = vmul.f32 %v9045_v17, %v2118_v0  ;;  %v2120_v57 = vpop.f32.mrb[51].mxu0  ;;  %v3110_v45 = vadd.f32 %v9066_v60, %v2834_v40  ;;  %v7385_v24 = vld [vmem:[%s10905_s4 + $0xb4] ss:$8 sps:$4 sm:$0xff]   ;;  %v9215_v30 = vpop.f32.mrb[36].mxu1  ;;  %v7388_v40 = vld [vmem:[%s10905_s4 + $0xc4] ss:$8 sps:$4 sm:$0xff]  }
 0x191   : > { %v9201_v42 = vmax.f32 %v3400_v31, %v3254_v48  ;;  %v3090_v63 = vadd.f32 %v9080_v62, %v2814_v1  ;;  %v2832_v20 = vmul.f32 %v9060_v22, %v2120_v57  ;;  %v3271_v19 = vmax.f32 %v3091_v47, 0.0  ;;  %v9223_v1 = vpop.f32.mrb[37].mxu1  ;;  %4863 = vmatprep.subr.bf16.mxu1 %v7385_v24  ;;  %v10954_v24 = vld [vmem:[#allocation8_spill] sm:$0xff] }
 0x192   : > { %v3269_v27 = vmax.f32 %v3089_v23, 0.0  ;;  %v3107_v58 = vadd.f32 %v9072_v3, %v2831_v36  ;;  %v2851_v48 = vmul.f32 %v9028_v35, %v8869_v10  ;;  %v3272_v13 = vmax.f32 %v3092_v59, 0.0  ;;  %v9228_v36 = vpop.f32.mrb[38].mxu1  ;;  %4864 = vmatpush1.bf16.msra.mxu1 %v7383_v25  ;;  %v7386_v59 = vld [vmem:[%s10905_s4 + $0xc0] ss:$8 sps:$4 sm:$0xff]  }
 0x193   : > { %v3270_v2 = vmax.f32 %v3090_v63, 0.0  ;;  %v3108_v18 = vadd.f32 %v9080_v62, %v2832_v20  ;;  %v2852_v31 = vmul.f32 %v9038_v15, %v8876_v4  ;;  %v3289_v10 = vmax.f32 %v3109_v50, 0.0  ;;  %10953 = vst [vmem:[#allocation23_spill] sm:$0xff] %v9228_v36  ;;  %4865 = vmatprep.subr.bf16.mxu1 %v7388_v40 }
 0x194   : > { %v3401_v47 = vmax.f32 %v8919_v11, %v3269_v27  ;;  %v3287_v0 = vmax.f32 %v3107_v58, 0.0  ;;  %v2869_v23 = vmul.f32 %v9028_v35, %v8882_v28  ;;  %v3290_v63 = vmax.f32 %v3110_v45, 0.0  ;;  %v9236_v27 = vpop.f32.mrb[39].mxu1 }
 0x195   : > { %v3402_v57 = vmax.f32 %v8925_v56, %v3270_v2  ;;  %v3288_v4 = vmax.f32 %v3108_v18, 0.0  ;;  %v2124_v20 = vpop.f32.mrb[52].mxu0  ;;  %v2870_v11 = vmul.f32 %v9038_v15, %v10954_v24  ;;  %10955 = vst [vmem:[#allocation8_spill] sm:$0xff] %v9236_v27  ;;  %v3127_v36 = vadd.f32 %v9051_v54, %v2851_v48 }
 0x196   : > { %v3403_v28 = vmax.f32 %v8930_v38, %v3287_v0  ;;  %v9239_v50 = vmax.f32 %v3401_v47, %v3271_v19  ;;  %v2849_v25 = vmul.f32 %v9045_v17, %v2124_v20  ;;  %v2126_v58 = vpop.f32.mrb[53].mxu0  ;;  %v3128_v24 = vadd.f32 %v9066_v60, %v2852_v31  ;;  %4866 = vmatpush1.bf16.msra.mxu1 %v7386_v59  ;;  %v7391_v31 = vld [vmem:[%s10905_s4 + $0xd4] ss:$8 sps:$4 sm:$0xff]   ;;  %v7389_v59 = vld [vmem:[%s10905_s4 + $0xd0] ss:$8 sps:$4 sm:$0xff]  }
 0x197   : > { %v3404_v56 = vmax.f32 %v8934_v6, %v3288_v4  ;;  %v9244_v2 = vmax.f32 %v3402_v57, %v3272_v13  ;;  %v2850_v45 = vmul.f32 %v9060_v22, %v2126_v58  ;;  %v2128_v18 = vpop.f32.mrb[54].mxu0  ;;  %v3145_v47 = vadd.f32 %v9051_v54, %v2869_v23  ;;  %4867 = vmatprep.subr.bf16.mxu1 %v7391_v31 }
 0x198   : > { %v9248_v27 = vmax.f32 %v3403_v28, %v3289_v10  ;;  %v3125_v38 = vadd.f32 %v9072_v3, %v2849_v25  ;;  %v2867_v19 = vmul.f32 %v9045_v17, %v2128_v18  ;;  %v2130_v40 = vpop.f32.mrb[55].mxu0  ;;  %v3146_v0 = vadd.f32 %v9066_v60, %v2870_v11  ;;  %v10956_v11 = vld [vmem:[#allocation9_spill] sm:$0xff] }
 0x199   : > { %v9253_v48 = vmax.f32 %v3404_v56, %v3290_v63  ;;  %v3126_v6 = vadd.f32 %v9080_v62, %v2850_v45  ;;  %v2868_v13 = vmul.f32 %v9060_v22, %v2130_v40  ;;  %v3307_v4 = vmax.f32 %v3127_v36, 0.0  ;;  %v10957_v36 = vld [vmem:[#allocation10_spill] sm:$0xff] }
 0x19a   : > { %v3305_v10 = vmax.f32 %v3125_v38, 0.0  ;;  %v3143_v57 = vadd.f32 %v9072_v3, %v2867_v19  ;;  %v2887_v23 = vmul.f32 %v9028_v35, %v8908_v7  ;;  %v3308_v28 = vmax.f32 %v3128_v24, 0.0  ;;  %4868 = vmatpush1.bf16.msra.mxu1 %v7389_v59 }
 0x19b   : > { %v3306_v63 = vmax.f32 %v3126_v6, 0.0  ;;  %v3144_v20 = vadd.f32 %v9080_v62, %v2868_v13  ;;  %v2888_v25 = vmul.f32 %v9038_v15, %v10956_v11  ;;  %v3325_v45 = vmax.f32 %v3145_v47, 0.0  ;;  %v10958_v6 = vld [vmem:[#allocation11_spill] sm:$0xff]  ;;  %v7394_v13 = vld [vmem:[%s10905_s4 + $0xe4] ss:$8 sps:$4 sm:$0xff]  }
 0x19c   : > { %v3405_v58 = vmax.f32 %v8958_v41, %v3305_v10  ;;  %v3323_v56 = vmax.f32 %v3143_v57, 0.0  ;;  %v2905_v18 = vmul.f32 %v9028_v35, %v10957_v36  ;;  %v3326_v19 = vmax.f32 %v3146_v0, 0.0  ;;  %4869 = vmatprep.subr.bf16.mxu1 %v7394_v13 }
 0x19d   : > { %v3406_v7 = vmax.f32 %v8962_v29, %v3306_v63  ;;  %v3324_v38 = vmax.f32 %v3144_v20, 0.0  ;;  %v2134_v40 = vpop.f32.mrb[56].mxu0  ;;  %v2906_v24 = vmul.f32 %v9038_v15, %v10958_v6  ;;  %v3163_v10 = vadd.f32 %v9051_v54, %v2887_v23  ;;  %v7392_v29 = vld [vmem:[%s10905_s4 + $0xe0] ss:$8 sps:$4 sm:$0xff]  }
 0x19e   : > { %v3407_v41 = vmax.f32 %v8968_v44, %v3323_v56  ;;  %v9280_v31 = vmax.f32 %v3405_v58, %v3307_v4  ;;  %v2885_v47 = vmul.f32 %v9045_v17, %v2134_v40  ;;  %v2136_v35 = vpop.f32.mrb[57].mxu0  ;;  %v3164_v44 = vadd.f32 %v9066_v60, %v2888_v25  ;;  %4870 = vmatpush1.bf16.msra.mxu1 %v7392_v29  ;;  %v7397_v25 = vld [vmem:[%s10905_s4 + $0xf4] ss:$8 sps:$4 sm:$0xff]  }
 0x19f   : > { %v3408_v0 = vmax.f32 %v8975_v9, %v3324_v38  ;;  %v9288_v15 = vmax.f32 %v3406_v7, %v3308_v28  ;;  %v2886_v57 = vmul.f32 %v9060_v22, %v2136_v35  ;;  %v2138_v59 = vpop.f32.mrb[58].mxu0  ;;  %v3181_v11 = vadd.f32 %v9051_v54, %v2905_v18  ;;  %v7395_v54 = vld [vmem:[%s10905_s4 + $0xf0] ss:$8 sps:$4 sm:$0xff]   ;;  %4871 = vmatprep.subr.bf16.mxu1 %v7397_v25 }
 0x1a0   : > { %v9292_v4 = vmax.f32 %v3407_v41, %v3325_v45  ;;  %v3161_v63 = vadd.f32 %v9072_v3, %v2885_v47  ;;  %v2903_v23 = vmul.f32 %v9045_v17, %v2138_v59  ;;  %v2140_v20 = vpop.f32.mrb[59].mxu0  ;;  %v3182_v56 = vadd.f32 %v9066_v60, %v2906_v24  ;;  %v10963_v59 = vld [vmem:[#allocation7_spill] sm:$0xff] }
 0x1a1   : > { %v9297_v58 = vmax.f32 %v3408_v0, %v3326_v19  ;;  %v3162_v9 = vadd.f32 %v9080_v62, %v2886_v57  ;;  %v2904_v28 = vmul.f32 %v9060_v22, %v2140_v20  ;;  %v3343_v17 = vmax.f32 %v3163_v10, 0.0  ;;  %v10962_v57 = vld [vmem:[#allocation6_spill] sm:$0xff] }
 0x1a2   : > { %v3341_v45 = vmax.f32 %v3161_v63, 0.0  ;;  %v3179_v36 = vadd.f32 %v9072_v3, %v2903_v23  ;;  %v3344_v38 = vmax.f32 %v3164_v44, 0.0  ;;  %v3361_v19 = vmax.f32 %v3181_v11, 0.0  ;;  %4872 = vmatpush1.bf16.msra.mxu1 %v7395_v54  ;;  %v7400_v3 = vld [vmem:[%s10905_s4 + $0x104] ss:$8 sps:$4 sm:$0xff]  }
 0x1a3   : > { %v3342_v18 = vmax.f32 %v3162_v9, 0.0  ;;  %v3180_v7 = vadd.f32 %v9080_v62, %v2904_v28  ;;  %v3362_v24 = vmax.f32 %v3182_v56, 0.0  ;;  %v9318_v62 = vpop.f32.mrb[40].mxu1  ;;  %4924 = vmatprep.subr.bf16.mxu1 %v7400_v3  ;;  %v9349_v63 = vld [vmem:[%s10904_s3 + $0x8] sm:$0xff]  ;;  %v10964_v23 = vld [vmem:[#allocation4_spill] sm:$0xff] }
 0x1a4   : > { %v3409_v22 = vmax.f32 %v8992_v14, %v3341_v45  ;;  %v3359_v60 = vmax.f32 %v3179_v36, 0.0  ;;  %v9323_v35 = vpop.f32.mrb[41].mxu1  ;;  %v9359_v9 = vrot.slane %v9349_v63, %v10962_v57  ;;  %v10966_v56 = vld [vmem:[#allocation5_spill] sm:$0xff]  ;;  %v9371_v36 = vrot.slane %v9349_v63, %v10963_v59 }
 0x1a5   : > { %v3410_v40 = vmax.f32 %v8994_v32, %v3342_v18  ;;  %v3360_v6 = vmax.f32 %v3180_v7, 0.0  ;;  %10959 = vst [vmem:[#allocation9_spill] sm:$0xff] %v9323_v35  ;;  %v9327_v10 = vpop.f32.mrb[42].mxu1 }
 0x1a6   : > { %v3411_v13 = vmax.f32 %v8999_v52, %v3359_v60  ;;  %v9316_v41 = vmax.f32 %v3409_v22, %v3343_v17  ;;  %10960 = vst [vmem:[#allocation10_spill] sm:$0xff] %v9327_v10  ;;  %v9334_v52 = vld [vmem:[%s10903_s2 + $0x8] sm:$0xff]  ;;  %v9336_v0 = vpop.f32.mrb[43].mxu1 }
 0x1a7   : > { %v3412_v47 = vmax.f32 %v9009_v39, %v3360_v6  ;;  %v9321_v14 = vmax.f32 %v3410_v40, %v3344_v38  ;;  %10961 = vst [vmem:[#allocation11_spill] sm:$0xff] %v9336_v0  ;;  %v9340_v39 = vrot.slane %v9334_v52, %v10962_v57  ;;  %v9344_v44 = vrot.slane %v9334_v52, %v10963_v59 }
 0x1a8   : > { %v9325_v32 = vmax.f32 %v3411_v13, %v3361_v19  ;;  %v9353_v20 = vrot.slane %v9334_v52, %v10964_v23  ;;  %v9365_v25 = vrot.slane %v9334_v52, %v10966_v56  ;;  %v9385_v38 = vrot.slane %v9349_v63, %v10966_v56 }
 0x1a9   : > { %v9329_v29 = vmax.f32 %v3412_v47, %v3362_v24  ;;  %v2747_v11 = vmul.f32 %v9340_v39, %v9004_v34  ;;  %v2748_v45 = vmul.f32 %v9344_v44, %v9014_v43  ;;  %v9377_v34 = vrot.slane %v9349_v63, %v10964_v23  ;;  %v10969_v43 = vld [vmem:[#allocation14_spill] sm:$0xff]  ;;  %v10971_v23 = vld [vmem:[#allocation17_spill] sm:$0xff] }
 0x1aa   : > { %v9361_v28 = vpop.f32.mrb[44].mxu1  ;;  %v2765_v54 = vmul.f32 %v9340_v39, %v9016_v8  ;;  %v2766_v22 = vmul.f32 %v9344_v44, %v10969_v43 }
 0x1ab   : > { %10965 = vst [vmem:[#allocation24_spill] sm:$0xff] %v9361_v28  ;;  %v9373_v17 = vpop.f32.mrb[45].mxu1  ;;  %v3023_v6 = vadd.f32 %v9359_v9, %v2747_v11  ;;  %v3024_v3 = vadd.f32 %v9371_v36, %v2748_v45  ;;  %v2783_v11 = vmul.f32 %v9340_v39, %v10971_v23  ;;  %v10974_v28 = vld [vmem:[#allocation19_spill] sm:$0xff] }
 0x1ac   : > { %10967 = vst [vmem:[#allocation25_spill] sm:$0xff] %v9373_v17  ;;  %v9381_v18 = vpop.f32.mrb[46].mxu1  ;;  %v3041_v57 = vadd.f32 %v9359_v9, %v2765_v54 }
 0x1ad   : > { %10968 = vst [vmem:[#allocation26_spill] sm:$0xff] %v9381_v18  ;;  %v9389_v60 = vpop.f32.mrb[47].mxu1  ;;  %v3203_v45 = vmax.f32 %v3023_v6, 0.0  ;;  %v10972_v18 = vld [vmem:[#allocation18_spill] sm:$0xff] }
 0x1ae   : > { %10970 = vst [vmem:[#allocation14_spill] sm:$0xff] %v9389_v60  ;;  %v3221_v0 = vmax.f32 %v3041_v57, 0.0 }
 0x1b1   : > { %v2260_v7 = vpop.f32.mrb[60].mxu0 }
 0x1b2   : > { %v2745_v19 = vmul.f32 %v9353_v20, %v2260_v7  ;;  %v2262_v40 = vpop.f32.mrb[61].mxu0  ;;  %v3042_v7 = vadd.f32 %v9371_v36, %v2766_v22 }
 0x1b3   : > { %v2746_v24 = vmul.f32 %v9365_v25, %v2262_v40  ;;  %v2264_v8 = vpop.f32.mrb[62].mxu0 }
 0x1b4   : > { %v3021_v13 = vadd.f32 %v9377_v34, %v2745_v19  ;;  %v2763_v47 = vmul.f32 %v9353_v20, %v2264_v8  ;;  %v2266_v59 = vpop.f32.mrb[63].mxu0  ;;  %v2784_v19 = vmul.f32 %v9344_v44, %v10972_v18  ;;  %v9406_v8 = vpop.f32.mrb[48].mxu1 }
 0x1b5   : > { %v3022_v43 = vadd.f32 %v9385_v38, %v2746_v24  ;;  %v2764_v56 = vmul.f32 %v9365_v25, %v2266_v59  ;;  %10973 = vst [vmem:[#allocation17_spill] sm:$0xff] %v9406_v8  ;;  %v3204_v24 = vmax.f32 %v3024_v3, 0.0  ;;  %v2801_v59 = vmul.f32 %v9340_v39, %v10974_v28  ;;  %v9411_v22 = vpop.f32.mrb[49].mxu1 }
 0x1b6   : > { %v3201_v40 = vmax.f32 %v3021_v13, 0.0  ;;  %v3039_v60 = vadd.f32 %v9377_v34, %v2763_v47  ;;  %10975 = vst [vmem:[#allocation18_spill] sm:$0xff] %v9411_v22  ;;  %v10976_v47 = vld [vmem:[#allocation20_spill] sm:$0xff]  ;;  %v9416_v10 = vpop.f32.mrb[50].mxu1  ;;  %v3222_v8 = vmax.f32 %v3042_v7, 0.0  ;;  %v3059_v3 = vadd.f32 %v9359_v9, %v2783_v11 }
 0x1b7   : > { %v3202_v17 = vmax.f32 %v3022_v43, 0.0  ;;  %v3040_v54 = vadd.f32 %v9385_v38, %v2764_v56  ;;  %v2802_v6 = vmul.f32 %v9344_v44, %v10976_v47  ;;  %v9420_v35 = vpop.f32.mrb[51].mxu1  ;;  %v3077_v7 = vadd.f32 %v9359_v9, %v2801_v59 }
 0x1b8   : > { %v3433_v23 = vmax.f32 %v9132_v5, %v3201_v40  ;;  %v3219_v13 = vmax.f32 %v3039_v60, 0.0  ;;  %v3060_v60 = vadd.f32 %v9371_v36, %v2784_v19  ;;  %v3239_v59 = vmax.f32 %v3059_v3, 0.0 }
 0x1b9   : > { %v3434_v18 = vmax.f32 %v9140_v37, %v3202_v17  ;;  %v3220_v43 = vmax.f32 %v3040_v54, 0.0  ;;  %v2270_v56 = vpop.f32.mrb[64].mxu0 }
 0x1ba   : > { %v3435_v28 = vmax.f32 %v9144_v61, %v3219_v13  ;;  %v9423_v22 = vmax.f32 %v3433_v23, %v3203_v45  ;;  %v2781_v5 = vmul.f32 %v9353_v20, %v2270_v56  ;;  %v2272_v57 = vpop.f32.mrb[65].mxu0  ;;  %v3078_v23 = vadd.f32 %v9371_v36, %v2802_v6  ;;  %v10978_v56 = vld [vmem:[#allocation22_spill] sm:$0xff] }
 0x1bb   : > { %v3436_v40 = vmax.f32 %v9149_v51, %v3220_v43  ;;  %v9428_v47 = vmax.f32 %v3434_v18, %v3204_v24  ;;  %v2782_v37 = vmul.f32 %v9365_v25, %v2272_v57  ;;  %v2274_v17 = vpop.f32.mrb[66].mxu0  ;;  %v10977_v24 = vld [vmem:[#allocation21_spill] sm:$0xff]  ;;  %v3240_v6 = vmax.f32 %v3060_v60, 0.0 }
 0x1bc   : > { %v9432_v11 = vmax.f32 %v3435_v28, %v3221_v0  ;;  %v3057_v61 = vadd.f32 %v9377_v34, %v2781_v5  ;;  %v2799_v45 = vmul.f32 %v9353_v20, %v2274_v17  ;;  %v2276_v54 = vpop.f32.mrb[67].mxu0  ;;  %v2819_v18 = vmul.f32 %v9340_v39, %v10977_v24  ;;  %v9446_v5 = vpop.f32.mrb[52].mxu1 }
 0x1bd   : > { %v9437_v13 = vmax.f32 %v3436_v40, %v3222_v8  ;;  %v3058_v51 = vadd.f32 %v9385_v38, %v2782_v37  ;;  %v2800_v19 = vmul.f32 %v9365_v25, %v2276_v54  ;;  %v2820_v28 = vmul.f32 %v9344_v44, %v10978_v56  ;;  %10979 = vst [vmem:[#allocation19_spill] sm:$0xff] %v9446_v5  ;;  %v9449_v37 = vpop.f32.mrb[53].mxu1 }
 0x1be   : > { %v3237_v43 = vmax.f32 %v3057_v61, 0.0  ;;  %v3075_v0 = vadd.f32 %v9377_v34, %v2799_v45  ;;  %v3257_v40 = vmax.f32 %v3077_v7, 0.0  ;;  %v3258_v24 = vmax.f32 %v3078_v23, 0.0  ;;  %v9454_v3 = vpop.f32.mrb[54].mxu1 }
 0x1bf   : > { %v3238_v57 = vmax.f32 %v3058_v51, 0.0  ;;  %v3076_v8 = vadd.f32 %v9385_v38, %v2800_v19  ;;  %v2837_v61 = vmul.f32 %v9340_v39, %v9121_v16  ;;  %v3095_v51 = vadd.f32 %v9359_v9, %v2819_v18  ;;  %v9460_v7 = vpop.f32.mrb[55].mxu1 }
 0x1c0   : > { %v3437_v17 = vmax.f32 %v9184_v55, %v3237_v43  ;;  %v3255_v54 = vmax.f32 %v3075_v0, 0.0  ;;  %v2838_v60 = vmul.f32 %v9344_v44, %v9126_v33  ;;  %v3096_v43 = vadd.f32 %v9371_v36, %v2820_v28 }
 0x1c1   : > { %v3438_v45 = vmax.f32 %v9192_v12, %v3238_v57  ;;  %v3256_v56 = vmax.f32 %v3076_v8, 0.0  ;;  %v2280_v5 = vpop.f32.mrb[68].mxu0  ;;  %v2855_v33 = vmul.f32 %v9340_v39, %v9160_v49 }
 0x1c2   : > { %v3439_v55 = vmax.f32 %v9196_v53, %v3255_v54  ;;  %v9463_v19 = vmax.f32 %v3437_v17, %v3239_v59  ;;  %v2817_v23 = vmul.f32 %v9353_v20, %v2280_v5  ;;  %v2282_v16 = vpop.f32.mrb[69].mxu0  ;;  %v3113_v17 = vadd.f32 %v9359_v9, %v2837_v61 }
 0x1c3   : > { %v3440_v12 = vmax.f32 %v9201_v42, %v3256_v56  ;;  %v9468_v0 = vmax.f32 %v3438_v45, %v3240_v6  ;;  %v2818_v18 = vmul.f32 %v9365_v25, %v2282_v16  ;;  %v2284_v57 = vpop.f32.mrb[70].mxu0  ;;  %v3114_v54 = vadd.f32 %v9371_v36, %v2838_v60 }
 0x1c4   : > { %v9473_v8 = vmax.f32 %v3439_v55, %v3257_v40  ;;  %v3093_v53 = vadd.f32 %v9377_v34, %v2817_v23  ;;  %v2835_v59 = vmul.f32 %v9353_v20, %v2284_v57  ;;  %v2286_v5 = vpop.f32.mrb[71].mxu0  ;;  %v3275_v40 = vmax.f32 %v3095_v51, 0.0  ;;  %v9486_v55 = vpop.f32.mrb[56].mxu1 }
 0x1c5   : > { %v9478_v28 = vmax.f32 %v3440_v12, %v3258_v24  ;;  %v3094_v42 = vadd.f32 %v9385_v38, %v2818_v18  ;;  %v2836_v6 = vmul.f32 %v9365_v25, %v2286_v5  ;;  %v2856_v56 = vmul.f32 %v9344_v44, %v9168_v26  ;;  %v9490_v12 = vpop.f32.mrb[57].mxu1 }
 0x1c6   : > { %v3273_v45 = vmax.f32 %v3093_v53, 0.0  ;;  %v3111_v49 = vadd.f32 %v9377_v34, %v2835_v59  ;;  %v3276_v24 = vmax.f32 %v3096_v43, 0.0  ;;  %v3131_v16 = vadd.f32 %v9359_v9, %v2855_v33  ;;  %v9495_v53 = vpop.f32.mrb[58].mxu1 }
 0x1c7   : > { %v3274_v23 = vmax.f32 %v3094_v42, 0.0  ;;  %v3112_v61 = vadd.f32 %v9385_v38, %v2836_v6  ;;  %v3293_v57 = vmax.f32 %v3113_v17, 0.0  ;;  %v2873_v51 = vmul.f32 %v9340_v39, %v9173_v21  ;;  %v9500_v33 = vpop.f32.mrb[59].mxu1 }
 0x1c8   : > { %v3441_v18 = vmax.f32 %v9239_v50, %v3273_v45  ;;  %v3291_v60 = vmax.f32 %v3111_v49, 0.0  ;;  %v3294_v5 = vmax.f32 %v3114_v54, 0.0  ;;  %v2874_v43 = vmul.f32 %v9344_v44, %v9178_v46  ;;  %10980 = vst [vmem:[#allocation20_spill] sm:$0xff] %v9500_v33 }
 0x1c9   : > { %v3442_v26 = vmax.f32 %v9244_v2, %v3274_v23  ;;  %v3292_v59 = vmax.f32 %v3112_v61, 0.0  ;;  %v2290_v42 = vpop.f32.mrb[72].mxu0  ;;  %v3132_v21 = vadd.f32 %v9371_v36, %v2856_v56  ;;  %v3311_v61 = vmax.f32 %v3131_v16, 0.0 }
 0x1ca   : > { %v3443_v6 = vmax.f32 %v9248_v27, %v3291_v60  ;;  %v9503_v50 = vmax.f32 %v3441_v18, %v3275_v40  ;;  %v2853_v17 = vmul.f32 %v9353_v20, %v2290_v42  ;;  %v2292_v45 = vpop.f32.mrb[73].mxu0  ;;  %v3149_v18 = vadd.f32 %v9359_v9, %v2873_v51 }
 0x1cb   : > { %v3444_v49 = vmax.f32 %v9253_v48, %v3292_v59  ;;  %v9508_v2 = vmax.f32 %v3442_v26, %v3276_v24  ;;  %v2854_v54 = vmul.f32 %v9365_v25, %v2292_v45  ;;  %v2294_v23 = vpop.f32.mrb[74].mxu0  ;;  %v3150_v24 = vadd.f32 %v9371_v36, %v2874_v43 }
 0x1cc   : > { %v9511_v46 = vmax.f32 %v3443_v6, %v3293_v57  ;;  %v3129_v33 = vadd.f32 %v9377_v34, %v2853_v17  ;;  %v2871_v27 = vmul.f32 %v9353_v20, %v2294_v23  ;;  %v2296_v40 = vpop.f32.mrb[75].mxu0  ;;  %v3312_v57 = vmax.f32 %v3132_v21, 0.0 }
 0x1cd   : > { %v9516_v60 = vmax.f32 %v3444_v49, %v3294_v5  ;;  %v3130_v56 = vadd.f32 %v9385_v38, %v2854_v54  ;;  %v2872_v48 = vmul.f32 %v9365_v25, %v2296_v40  ;;  %v2891_v59 = vmul.f32 %v9340_v39, %v9215_v30  ;;  %v10981_v49 = vld [vmem:[#allocation23_spill] sm:$0xff] }
 0x1ce   : > { %v3309_v26 = vmax.f32 %v3129_v33, 0.0  ;;  %v3147_v16 = vadd.f32 %v9377_v34, %v2871_v27  ;;  %v2892_v51 = vmul.f32 %v9344_v44, %v9223_v1  ;;  %v3329_v45 = vmax.f32 %v3149_v18, 0.0  ;;  %v10982_v27 = vld [vmem:[#allocation8_spill] sm:$0xff] }
 0x1cf   : > { %v3310_v42 = vmax.f32 %v3130_v56, 0.0  ;;  %v3148_v6 = vadd.f32 %v9385_v38, %v2872_v48  ;;  %v2909_v43 = vmul.f32 %v9340_v39, %v10981_v49  ;;  %v7736_v33 = vmov 0.0  }
 0x1d0   : > { %v3445_v5 = vmax.f32 %v9280_v31, %v3309_v26  ;;  %v3327_v17 = vmax.f32 %v3147_v16, 0.0  ;;  %3554 = vst [vmem:[#allocation2 + $0xa8] sm:$0xff] %v7736_v33  ;;  %3553 = vst [vmem:[#allocation2 + $0xa0] sm:$0xff] %v7736_v33  ;;  %v3330_v30 = vmax.f32 %v3150_v24, 0.0  ;;  %v2910_v40 = vmul.f32 %v9344_v44, %v10982_v27 }
 0x1d1   : > { %v3446_v21 = vmax.f32 %v9288_v15, %v3310_v42  ;;  %v3328_v54 = vmax.f32 %v3148_v6, 0.0  ;;  %v2300_v23 = vpop.f32.mrb[76].mxu0  ;;  %v3167_v39 = vadd.f32 %v9359_v9, %v2891_v59  ;;  %v3168_v16 = vadd.f32 %v9371_v36, %v2892_v51 }
 0x1d2   : > { %v3447_v1 = vmax.f32 %v9292_v4, %v3327_v17  ;;  %v9534_v56 = vmax.f32 %v3445_v5, %v3311_v61  ;;  %v2889_v31 = vmul.f32 %v9353_v20, %v2300_v23  ;;  %v2302_v18 = vpop.f32.mrb[77].mxu0  ;;  %v3185_v6 = vadd.f32 %v9359_v9, %v2909_v43 }
 0x1d3   : > { %v3448_v48 = vmax.f32 %v9297_v58, %v3328_v54  ;;  %v9539_v26 = vmax.f32 %v3446_v21, %v3312_v57  ;;  %v2890_v15 = vmul.f32 %v9365_v25, %v2302_v18  ;;  %v2304_v24 = vpop.f32.mrb[78].mxu0  ;;  %v3186_v59 = vadd.f32 %v9371_v36, %v2910_v40  ;;  %v10985_v18 = vld [vmem:[#allocation15_spill] sm:$0xff] }
 0x1d4   : > { %v9543_v42 = vmax.f32 %v3447_v1, %v3329_v45  ;;  %v3165_v4 = vadd.f32 %v9377_v34, %v2889_v31  ;;  %v2907_v44 = vmul.f32 %v9353_v20, %v2304_v24  ;;  %v2306_v61 = vpop.f32.mrb[79].mxu0  ;;  %v3347_v45 = vmax.f32 %v3167_v39, 0.0  ;;  %v10983_v1 = vld [vmem:[#allocation12_spill] sm:$0xff]  ;;  %v10984_v31 = vld [vmem:[#allocation13_spill] sm:$0xff] }
 0x1d5   : > { %v9548_v5 = vmax.f32 %v3448_v48, %v3330_v30  ;;  %v3166_v58 = vadd.f32 %v9385_v38, %v2890_v15  ;;  %v2908_v57 = vmul.f32 %v9365_v25, %v2306_v61  ;;  %v3348_v21 = vmax.f32 %v3168_v16, 0.0  ;;  %v10986_v48 = vld [vmem:[#allocation16_spill] sm:$0xff]  ;;  %v10987_v24 = vld [vmem:[#allocation9_spill] sm:$0xff] }
 0x1d6   : > { %v3345_v17 = vmax.f32 %v3165_v4, 0.0  ;;  %v3183_v51 = vadd.f32 %v9377_v34, %v2907_v44  ;;  %v3365_v9 = vmax.f32 %v3185_v6, 0.0  ;;  %v3366_v23 = vmax.f32 %v3186_v59, 0.0 }
 0x1d7   : > { %v3346_v49 = vmax.f32 %v3166_v58, 0.0  ;;  %v3184_v33 = vadd.f32 %v9385_v38, %v2908_v57  ;;  %v9583_v39 = vrot.slane %v9349_v63, %v10983_v1  ;;  %v9587_v15 = vrot.slane %v9334_v52, %v10986_v48 }
 0x1d8   : > { %v3449_v20 = vmax.f32 %v9316_v41, %v3345_v17  ;;  %v3363_v54 = vmax.f32 %v3183_v51, 0.0  ;;  %v9569_v41 = vrot.slane %v9334_v52, %v10983_v1  ;;  %v9593_v4 = vrot.slane %v9349_v63, %v10984_v31  ;;  %v10990_v1 = vld [vmem:[#allocation24_spill] sm:$0xff] }
 0x1d9   : > { %v3450_v43 = vmax.f32 %v9321_v14, %v3346_v49  ;;  %v3364_v30 = vmax.f32 %v3184_v33, 0.0  ;;  %v9573_v14 = vrot.slane %v9334_v52, %v10984_v31  ;;  %v9597_v44 = vrot.slane %v9349_v63, %v10985_v18 }
 0x1da   : > { %v3451_v25 = vmax.f32 %v9325_v32, %v3363_v54  ;;  %v9558_v27 = vmax.f32 %v3449_v20, %v3347_v45  ;;  %v9577_v32 = vrot.slane %v9334_v52, %v10985_v18  ;;  %v9603_v58 = vrot.slane %v9349_v63, %v10986_v48  ;;  %v10989_v52 = vld [vmem:[#allocation11_spill] sm:$0xff] }
 0x1db   : > { %v3452_v36 = vmax.f32 %v9329_v29, %v3364_v30  ;;  %v9561_v34 = vmax.f32 %v3450_v43, %v3348_v21  ;;  %v2751_v29 = vmul.f32 %v9569_v41, %v9318_v62  ;;  %v2752_v16 = vmul.f32 %v9573_v14, %v10987_v24  ;;  %v10988_v62 = vld [vmem:[#allocation10_spill] sm:$0xff]  ;;  %v10991_v24 = vld [vmem:[#allocation25_spill] sm:$0xff] }
 0x1dc   : > { %v9563_v40 = vmax.f32 %v3451_v25, %v3365_v9  ;;  %v2769_v61 = vmul.f32 %v9569_v41, %v10988_v62  ;;  %v2770_v57 = vmul.f32 %v9573_v14, %v10989_v52  ;;  %v2787_v31 = vmul.f32 %v9569_v41, %v10990_v1  ;;  %v10992_v52 = vld [vmem:[#allocation26_spill] sm:$0xff] }
 0x1dd   : > { %v9565_v38 = vmax.f32 %v3452_v36, %v3366_v23  ;;  %v3027_v51 = vadd.f32 %v9583_v39, %v2751_v29  ;;  %v3028_v33 = vadd.f32 %v9593_v4, %v2752_v16  ;;  %v2788_v16 = vmul.f32 %v9573_v14, %v10991_v24 }
 0x1de   : > { %v3045_v63 = vadd.f32 %v9583_v39, %v2769_v61  ;;  %v3046_v30 = vadd.f32 %v9593_v4, %v2770_v57  ;;  %v2805_v57 = vmul.f32 %v9569_v41, %v10992_v52 }
 0x1df   : > { %v3207_v36 = vmax.f32 %v3027_v51, 0.0  ;;  %v3208_v48 = vmax.f32 %v3028_v33, 0.0 }
 0x1e0   : > { %v3226_v51 = vmax.f32 %v3046_v30, 0.0 }
 0x1e5   : > { %v2426_v6 = vpop.f32.mrb[80].mxu0 }
 0x1e6   : > { %v2749_v59 = vmul.f32 %v9577_v32, %v2426_v6  ;;  %v2428_v17 = vpop.f32.mrb[81].mxu0  ;;  %v3225_v6 = vmax.f32 %v3045_v63, 0.0  ;;  %v3063_v63 = vadd.f32 %v9583_v39, %v2787_v31 }
 0x1e7   : > { %v2750_v45 = vmul.f32 %v9587_v15, %v2428_v17  ;;  %v2430_v49 = vpop.f32.mrb[82].mxu0 }
 0x1e8   : > { %v3025_v21 = vadd.f32 %v9597_v44, %v2749_v59  ;;  %v2767_v20 = vmul.f32 %v9577_v32, %v2430_v49  ;;  %v2432_v54 = vpop.f32.mrb[83].mxu0  ;;  %v10993_v49 = vld [vmem:[#allocation14_spill] sm:$0xff] }
 0x1e9   : > { %v3026_v9 = vadd.f32 %v9603_v58, %v2750_v45  ;;  %v2768_v43 = vmul.f32 %v9587_v15, %v2432_v54 }
 0x1ea   : > { %v3205_v23 = vmax.f32 %v3025_v21, 0.0  ;;  %v3043_v25 = vadd.f32 %v9597_v44, %v2767_v20  ;;  %v2806_v21 = vmul.f32 %v9573_v14, %v10993_v49 }
 0x1eb   : > { %v3206_v18 = vmax.f32 %v3026_v9, 0.0  ;;  %v3044_v29 = vadd.f32 %v9603_v58, %v2768_v43 }
 0x1ec   : > { %v3473_v62 = vmax.f32 %v9423_v22, %v3205_v23  ;;  %v3223_v61 = vmax.f32 %v3043_v25, 0.0  ;;  %v3064_v23 = vadd.f32 %v9593_v4, %v2788_v16 }
 0x1ed   : > { %v3474_v59 = vmax.f32 %v9428_v47, %v3206_v18  ;;  %v3224_v17 = vmax.f32 %v3044_v29, 0.0  ;;  %v2436_v45 = vpop.f32.mrb[84].mxu0  ;;  %v3081_v18 = vadd.f32 %v9583_v39, %v2805_v57  ;;  %v10995_v57 = vld [vmem:[#allocation18_spill] sm:$0xff] }
 0x1ee   : > { %v3475_v33 = vmax.f32 %v9432_v11, %v3223_v61  ;;  %v9630_v20 = vmax.f32 %v3473_v62, %v3207_v36  ;;  %v2785_v54 = vmul.f32 %v9577_v32, %v2436_v45  ;;  %v2438_v22 = vpop.f32.mrb[85].mxu0  ;;  %v3243_v62 = vmax.f32 %v3063_v63, 0.0  ;;  %v10994_v61 = vld [vmem:[#allocation17_spill] sm:$0xff] }
 0x1ef   : > { %v3476_v9 = vmax.f32 %v9437_v13, %v3224_v17  ;;  %v9635_v43 = vmax.f32 %v3474_v59, %v3208_v48  ;;  %v2786_v47 = vmul.f32 %v9587_v15, %v2438_v22  ;;  %v2440_v30 = vpop.f32.mrb[86].mxu0  ;;  %v3082_v48 = vadd.f32 %v9593_v4, %v2806_v21 }
 0x1f0   : > { %v9639_v25 = vmax.f32 %v3475_v33, %v3225_v6  ;;  %v3061_v11 = vadd.f32 %v9597_v44, %v2785_v54  ;;  %v2803_v36 = vmul.f32 %v9577_v32, %v2440_v30  ;;  %v2442_v1 = vpop.f32.mrb[87].mxu0  ;;  %v2823_v6 = vmul.f32 %v9569_v41, %v10994_v61 }
 0x1f1   : > { %v9644_v29 = vmax.f32 %v3476_v9, %v3226_v51  ;;  %v3062_v13 = vadd.f32 %v9603_v58, %v2786_v47  ;;  %v2804_v31 = vmul.f32 %v9587_v15, %v2442_v1  ;;  %v3244_v17 = vmax.f32 %v3064_v23, 0.0 }
 0x1f2   : > { %v3241_v24 = vmax.f32 %v3061_v11, 0.0  ;;  %v3079_v16 = vadd.f32 %v9597_v44, %v2803_v36  ;;  %v2824_v51 = vmul.f32 %v9573_v14, %v10995_v57  ;;  %v3261_v33 = vmax.f32 %v3081_v18, 0.0 }
 0x1f3   : > { %v3242_v52 = vmax.f32 %v3062_v13, 0.0  ;;  %v3080_v59 = vadd.f32 %v9603_v58, %v2804_v31  ;;  %v2841_v21 = vmul.f32 %v9569_v41, %v9416_v10  ;;  %v3262_v63 = vmax.f32 %v3082_v48, 0.0 }
 0x1f4   : > { %v3477_v45 = vmax.f32 %v9463_v19, %v3241_v24  ;;  %v3259_v49 = vmax.f32 %v3079_v16, 0.0  ;;  %v2842_v47 = vmul.f32 %v9573_v14, %v9420_v35  ;;  %v3099_v36 = vadd.f32 %v9583_v39, %v2823_v6 }
 0x1f5   : > { %v3478_v54 = vmax.f32 %v9468_v0, %v3242_v52  ;;  %v3260_v22 = vmax.f32 %v3080_v59, 0.0  ;;  %v2446_v9 = vpop.f32.mrb[88].mxu0  ;;  %v3100_v13 = vadd.f32 %v9593_v4, %v2824_v51  ;;  %v3117_v24 = vadd.f32 %v9583_v39, %v2841_v21 }
 0x1f6   : > { %v3479_v30 = vmax.f32 %v9473_v8, %v3259_v49  ;;  %v9662_v23 = vmax.f32 %v3477_v45, %v3243_v62  ;;  %v2821_v11 = vmul.f32 %v9577_v32, %v2446_v9  ;;  %v2448_v19 = vpop.f32.mrb[89].mxu0  ;;  %v3118_v61 = vadd.f32 %v9593_v4, %v2842_v47 }
 0x1f7   : > { %v3480_v1 = vmax.f32 %v9478_v28, %v3260_v22  ;;  %v9667_v10 = vmax.f32 %v3478_v54, %v3244_v17  ;;  %v2822_v0 = vmul.f32 %v9587_v15, %v2448_v19  ;;  %v2450_v18 = vpop.f32.mrb[90].mxu0  ;;  %v3279_v59 = vmax.f32 %v3099_v36, 0.0  ;;  %v10996_v17 = vld [vmem:[#allocation19_spill] sm:$0xff] }
 0x1f8   : > { %v9671_v31 = vmax.f32 %v3479_v30, %v3261_v33  ;;  %v3097_v35 = vadd.f32 %v9597_v44, %v2821_v11  ;;  %v2839_v8 = vmul.f32 %v9577_v32, %v2450_v18  ;;  %v2452_v48 = vpop.f32.mrb[91].mxu0  ;;  %v2859_v57 = vmul.f32 %v9569_v41, %v10996_v17 }
 0x1f9   : > { %v9676_v16 = vmax.f32 %v3480_v1, %v3262_v63  ;;  %v3098_v28 = vadd.f32 %v9603_v58, %v2822_v0  ;;  %v2840_v62 = vmul.f32 %v9587_v15, %v2452_v48  ;;  %v3280_v49 = vmax.f32 %v3100_v13, 0.0 }
 0x1fa   : > { %v3277_v6 = vmax.f32 %v3097_v35, 0.0  ;;  %v3115_v52 = vadd.f32 %v9597_v44, %v2839_v8  ;;  %v2860_v33 = vmul.f32 %v9573_v14, %v9449_v37  ;;  %v3297_v22 = vmax.f32 %v3117_v24, 0.0 }
 0x1fb   : > { %v3278_v51 = vmax.f32 %v3098_v28, 0.0  ;;  %v3116_v45 = vadd.f32 %v9603_v58, %v2840_v62  ;;  %v2877_v63 = vmul.f32 %v9569_v41, %v9454_v3  ;;  %v3298_v30 = vmax.f32 %v3118_v61, 0.0 }
 0x1fc   : > { %v3481_v21 = vmax.f32 %v9503_v50, %v3277_v6  ;;  %v3295_v54 = vmax.f32 %v3115_v52, 0.0  ;;  %v2878_v19 = vmul.f32 %v9573_v14, %v9460_v7  ;;  %v3135_v0 = vadd.f32 %v9583_v39, %v2859_v57 }
 0x1fd   : > { %v3482_v9 = vmax.f32 %v9508_v2, %v3278_v51  ;;  %v3296_v47 = vmax.f32 %v3116_v45, 0.0  ;;  %v2456_v11 = vpop.f32.mrb[92].mxu0  ;;  %v3136_v35 = vadd.f32 %v9593_v4, %v2860_v33  ;;  %v3153_v24 = vadd.f32 %v9583_v39, %v2877_v63 }
 0x1fe   : > { %v3483_v36 = vmax.f32 %v9511_v46, %v3295_v54  ;;  %v9694_v1 = vmax.f32 %v3481_v21, %v3279_v59  ;;  %v2857_v37 = vmul.f32 %v9577_v32, %v2456_v11  ;;  %v2458_v50 = vpop.f32.mrb[93].mxu0  ;;  %v3154_v61 = vadd.f32 %v9593_v4, %v2878_v19 }
 0x1ff   : > { %v3484_v18 = vmax.f32 %v9516_v60, %v3296_v47  ;;  %v9699_v3 = vmax.f32 %v3482_v9, %v3280_v49  ;;  %v2858_v2 = vmul.f32 %v9587_v15, %v2458_v50  ;;  %v2460_v13 = vpop.f32.mrb[94].mxu0  ;;  %v3315_v59 = vmax.f32 %v3135_v0, 0.0 }
 0x200   : > { %v9703_v8 = vmax.f32 %v3483_v36, %v3297_v22  ;;  %v3133_v7 = vadd.f32 %v9597_v44, %v2857_v37  ;;  %v2875_v46 = vmul.f32 %v9577_v32, %v2460_v13  ;;  %v2462_v48 = vpop.f32.mrb[95].mxu0  ;;  %v2895_v17 = vmul.f32 %v9569_v41, %v9486_v55  ;;  %v10997_v55 = vld [vmem:[#allocation20_spill] sm:$0xff] }
 0x201   : > { %v9708_v28 = vmax.f32 %v3484_v18, %v3298_v30  ;;  %v3134_v60 = vadd.f32 %v9603_v58, %v2858_v2  ;;  %v2876_v62 = vmul.f32 %v9587_v15, %v2462_v48  ;;  %v3316_v45 = vmax.f32 %v3136_v35, 0.0 }
 0x202   : > { %v3313_v6 = vmax.f32 %v3133_v7, 0.0  ;;  %v3151_v52 = vadd.f32 %v9597_v44, %v2875_v46  ;;  %v2896_v49 = vmul.f32 %v9573_v14, %v9490_v12  ;;  %v3333_v54 = vmax.f32 %v3153_v24, 0.0 }
 0x203   : > { %v3314_v57 = vmax.f32 %v3134_v60, 0.0  ;;  %v3152_v51 = vadd.f32 %v9603_v58, %v2876_v62  ;;  %v2913_v22 = vmul.f32 %v9569_v41, %v9495_v53  ;;  %v3334_v47 = vmax.f32 %v3154_v61, 0.0 }
 0x204   : > { %v3485_v33 = vmax.f32 %v9534_v56, %v3313_v6  ;;  %v3331_v21 = vmax.f32 %v3151_v52, 0.0  ;;  %v2914_v11 = vmul.f32 %v9573_v14, %v10997_v55  ;;  %v3171_v37 = vadd.f32 %v9583_v39, %v2895_v17 }
 0x205   : > { %v3486_v63 = vmax.f32 %v9539_v26, %v3314_v57  ;;  %v3332_v9 = vmax.f32 %v3152_v51, 0.0  ;;  %v2466_v30 = vpop.f32.mrb[96].mxu0  ;;  %v3172_v0 = vadd.f32 %v9593_v4, %v2896_v49  ;;  %v3189_v13 = vadd.f32 %v9583_v39, %v2913_v22  ;;  %v10998_v49 = vld [vmem:[#allocation4_spill] sm:$0xff] }
 0x206   : > { %v3487_v19 = vmax.f32 %v9543_v42, %v3331_v21  ;;  %v9726_v36 = vmax.f32 %v3485_v33, %v3315_v59  ;;  %v2893_v12 = vmul.f32 %v9577_v32, %v2466_v30  ;;  %v2468_v56 = vpop.f32.mrb[97].mxu0  ;;  %v3190_v46 = vadd.f32 %v9593_v4, %v2914_v11  ;;  %v10999_v33 = vld [vmem:[#allocation5_spill] sm:$0xff] }
 0x207   : > { %v3488_v50 = vmax.f32 %v9548_v5, %v3332_v9  ;;  %v9731_v53 = vmax.f32 %v3486_v63, %v3316_v45  ;;  %v2894_v26 = vmul.f32 %v9587_v15, %v2468_v56  ;;  %v2470_v41 = vpop.f32.mrb[98].mxu0  ;;  %v3351_v60 = vmax.f32 %v3171_v37, 0.0 }
 0x208   : > { %v9735_v18 = vmax.f32 %v3487_v19, %v3333_v54  ;;  %v3169_v42 = vadd.f32 %v9597_v44, %v2893_v12  ;;  %v2911_v14 = vmul.f32 %v9577_v32, %v2470_v41  ;;  %v2472_v2 = vpop.f32.mrb[99].mxu0  ;;  %v3352_v6 = vmax.f32 %v3172_v0, 0.0 }
 0x209   : > { %v9740_v35 = vmax.f32 %v3488_v50, %v3334_v47  ;;  %v3170_v5 = vadd.f32 %v9603_v58, %v2894_v26  ;;  %v2912_v7 = vmul.f32 %v9587_v15, %v2472_v2  ;;  %v3369_v39 = vmax.f32 %v3189_v13, 0.0 }
 0x20a   : > { %v3349_v48 = vmax.f32 %v3169_v42, 0.0  ;;  %v3187_v24 = vadd.f32 %v9597_v44, %v2911_v14  ;;  %v3370_v57 = vmax.f32 %v3190_v46, 0.0 }
 0x20b   : > { %v3350_v62 = vmax.f32 %v3170_v5, 0.0  ;;  %v3188_v61 = vadd.f32 %v9603_v58, %v2912_v7 }
 0x20c   : > { %v3489_v32 = vmax.f32 %v9558_v27, %v3349_v48  ;;  %v3367_v52 = vmax.f32 %v3187_v24, 0.0  ;;  %v2643_v27 = vld [vmem:[%s10903_s2 + $0x10] sm:$0x3] }
 0x20d   : > { %v3490_v59 = vmax.f32 %v9561_v34, %v3350_v62  ;;  %v3368_v17 = vmax.f32 %v3188_v61, 0.0  ;;  %v2919_v34 = vld [vmem:[%s10904_s3 + $0x10] sm:$0x3]  ;;  %v9769_v21 = vrot.slane %v2643_v27, %v10999_v33 }
 0x20e   : > { %v3491_v15 = vmax.f32 %v9563_v40, %v3367_v52  ;;  %v9750_v51 = vmax.f32 %v3489_v32, %v3351_v60  ;;  %v9766_v40 = vrot.slane %v2643_v27, %v10998_v49  ;;  %v9775_v22 = vrot.slane %v2919_v34, %v10999_v33 }
 0x20f   : > { %v3492_v4 = vmax.f32 %v9565_v38, %v3368_v17  ;;  %v9753_v44 = vmax.f32 %v3490_v59, %v3352_v6  ;;  %v9772_v38 = vrot.slane %v2919_v34, %v10998_v49  ;;  %v7403_v59 = vld [vmem:[%s10905_s4 + $0x114] ss:$8 sps:$4 sm:$0xff]  }
 0x210   : > { %v9755_v45 = vmax.f32 %v3491_v15, %v3369_v39 }
 0x211   : > { %v9757_v58 = vmax.f32 %v3492_v4, %v3370_v57 }
 0x219   : > { %v2592_v54 = vpop.f32.mrb[100].mxu0 }
 0x21a   : > { %v2753_v63 = vmul.f32 %v9766_v40, %v2592_v54  ;;  %v2594_v9 = vpop.f32.mrb[101].mxu0 }
 0x21b   : > { %v2754_v47 = vmul.f32 %v9769_v21, %v2594_v9  ;;  %v2596_v30 = vpop.f32.mrb[102].mxu0 }
 0x21c   : > { %v3029_v55 = vadd.f32 %v9772_v38, %v2753_v63  ;;  %v2771_v11 = vmul.f32 %v9766_v40, %v2596_v30  ;;  %v2598_v19 = vpop.f32.mrb[103].mxu0  ;;  %v7401_v63 = vld [vmem:[%s10905_s4 + $0x110] ss:$8 sps:$4 sm:$0xff]  }
 0x21d   : > { %v3030_v12 = vadd.f32 %v9775_v22, %v2754_v47  ;;  %v2772_v56 = vmul.f32 %v9769_v21, %v2598_v19 }
 0x21e   : > { %v3209_v37 = vmax.f32 %v3029_v55, 0.0  ;;  %v3047_v50 = vadd.f32 %v9772_v38, %v2771_v11 }
 0x21f   : > { %v3210_v26 = vmax.f32 %v3030_v12, 0.0  ;;  %v3048_v41 = vadd.f32 %v9775_v22, %v2772_v56 }
 0x220   : > { %v3513_v0 = vmax.f32 %v9630_v20, %v3209_v37  ;;  %v3227_v42 = vmax.f32 %v3047_v50, 0.0 }
 0x221   : > { %v3514_v14 = vmax.f32 %v9635_v43, %v3210_v26  ;;  %v3228_v2 = vmax.f32 %v3048_v41, 0.0  ;;  %v2602_v13 = vpop.f32.mrb[104].mxu0 }
 0x222   : > { %3533 = vst [vmem:[#allocation2] sm:$0xff] %v3513_v0  ;;  %v9788_v5 = vmax.f32 %v9639_v25, %v3227_v42  ;;  %v2789_v7 = vmul.f32 %v9766_v40, %v2602_v13  ;;  %v2604_v46 = vpop.f32.mrb[105].mxu0 }
 0x223   : > { %3534 = vst [vmem:[#allocation2 + $0x8] sm:$0xff] %v3514_v14  ;;  %v9792_v48 = vmax.f32 %v9644_v29, %v3228_v2  ;;  %v2790_v24 = vmul.f32 %v9769_v21, %v2604_v46  ;;  %v2606_v60 = vpop.f32.mrb[106].mxu0  ;;  %v7398_v29 = vld [vmem:[%s10905_s4 + $0x100] ss:$8 sps:$4 sm:$0xff]  }
 0x224   : > { %v3555_v20 = vpack.c.bf16 %v9788_v5, %v3513_v0  ;;  %v3065_v43 = vadd.f32 %v9772_v38, %v2789_v7  ;;  %v2807_v62 = vmul.f32 %v9766_v40, %v2606_v60  ;;  %v2608_v61 = vpop.f32.mrb[107].mxu0  ;;  %v7404_v2 = vld [vmem:[%s10905_s4 + $0x120] ss:$8 sps:$4 sm:$0xff]  }
 0x225   : > { %v3066_v25 = vadd.f32 %v9775_v22, %v2790_v24  ;;  %v2808_v6 = vmul.f32 %v9769_v21, %v2608_v61  ;;  %v3556_v32 = vpack.c.bf16 %v9792_v48, %v3514_v14  ;;  %v7409_v24 = vld [vmem:[%s10905_s4 + $0x134] ss:$8 sps:$4 sm:$0xff]  }
 0x226   : > { %v3245_v52 = vmax.f32 %v3065_v43, 0.0  ;;  %v3083_v39 = vadd.f32 %v9772_v38, %v2807_v62 }
 0x227   : > { %v3246_v17 = vmax.f32 %v3066_v25, 0.0  ;;  %v3084_v57 = vadd.f32 %v9775_v22, %v2808_v6  ;;  %4873 = vmatprep.mubr.bf16.mxu1 %v3556_v32 }
 0x228   : > { %v3517_v15 = vmax.f32 %v9662_v23, %v3245_v52  ;;  %v3263_v4 = vmax.f32 %v3083_v39, 0.0  ;;  %4874 = vmatmul.mubr.bf16.vlgmr.msra.gmra.mrb[60].mxu1 %v3555_v20  ;;  %v7406_v23 = vld [vmem:[%s10905_s4 + $0x124] ss:$8 sps:$4 sm:$0xff]  }
 0x229   : > { %v3518_v27 = vmax.f32 %v9667_v10, %v3246_v17  ;;  %v3264_v34 = vmax.f32 %v3084_v57, 0.0  ;;  %4925 = vmatpush1.bf16.msra.mxu1 %v7398_v29  ;;  %v2612_v54 = vpop.f32.mrb[108].mxu0  ;;  %v3565_v9 = vld [vmem:[#allocation2] sm:$0xfe] }
 0x22a   : > { %v3519_v47 = vmax.f32 %v9671_v31, %v3263_v4  ;;  %v2825_v30 = vmul.f32 %v9766_v40, %v2612_v54  ;;  %v2614_v55 = vpop.f32.mrb[109].mxu0  ;;  %4926 = vmatprep.subr.bf16.mxu1 %v7403_v59  ;;  %v3566_v11 = vld [vmem:[#allocation2 + $0x8] sm:$0xfe]  ;;  %v3587_v10 = vpack.c.bf16 %v9788_v5, %v3565_v9 }
 0x22b   : > { %v3520_v19 = vmax.f32 %v9676_v16, %v3264_v34  ;;  %v2826_v12 = vmul.f32 %v9769_v21, %v2614_v55  ;;  %v2616_v56 = vpop.f32.mrb[110].mxu0  ;;  %v3588_v37 = vpack.c.bf16 %v9792_v48, %v3566_v11  ;;  %v9844_v39 = vld [vmem:[#allocation2 + $0x8] sm:$0xfc] }
 0x22c   : > { %v3101_v31 = vadd.f32 %v9772_v38, %v2825_v30  ;;  %v2843_v50 = vmul.f32 %v9766_v40, %v2616_v56  ;;  %v2618_v26 = vpop.f32.mrb[111].mxu0  ;;  %v9825_v41 = vpack.c.bf16 %v3519_v47, %v3517_v15  ;;  %v3625_v0 = vshrl.u32 %v3587_v10, 16  ;;  %v7407_v15 = vld [vmem:[%s10905_s4 + $0x130] ss:$8 sps:$4 sm:$0xff]  }
 0x22d   : > { %v3102_v42 = vadd.f32 %v9775_v22, %v2826_v12  ;;  %v2844_v14 = vmul.f32 %v9769_v21, %v2618_v26  ;;  %4927 = vmatpush1.bf16.msra.mxu1 %v7401_v63  ;;  %v9829_v16 = vpack.c.bf16 %v3520_v19, %v3518_v27  ;;  %v3637_v13 = vshrl.u32 %v3588_v37, 16 }
 0x22e   : > { %v3281_v7 = vmax.f32 %v3101_v31, 0.0  ;;  %v3119_v46 = vadd.f32 %v9772_v38, %v2843_v50  ;;  %4928 = vmatprep.subr.bf16.mxu1 %v7406_v23  ;;  %v3639_v60 = vshll.u32 %v3588_v37, 16  ;;  %v3627_v20 = vshll.u32 %v3587_v10, 16  ;;  %v7410_v31 = vld [vmem:[%s10905_s4 + $0x140] ss:$8 sps:$4 sm:$0xff]  }
 0x22f   : > { %v3282_v43 = vmax.f32 %v3102_v42, 0.0  ;;  %v3120_v62 = vadd.f32 %v9775_v22, %v2844_v14  ;;  %4883 = vmatprep.mubr.bf16.mxu1 %v9829_v16  ;;  %v3644_v61 = vshll.u32 %v9829_v16, 16  ;;  %v3632_v25 = vshll.u32 %v9825_v41, 16  ;;  %v7415_v42 = vld [vmem:[%s10905_s4 + $0x154] ss:$8 sps:$4 sm:$0xff]  }
 0x230   : > { %v3521_v6 = vmax.f32 %v9694_v1, %v3281_v7  ;;  %v3299_v32 = vmax.f32 %v3119_v46, 0.0  ;;  %4884 = vmatmul.mubr.bf16.gmra.mrb[64].mxu1 %v9825_v41  ;;  %v3641_v29 = vrot.slane %v3639_v60, 1  ;;  %v3629_v52 = vrot.slane %v3627_v20, 1  ;;  %v9890_v60 = vld [vmem:[#allocation2] sm:$0xfc] }
 0x231   : > { %v3522_v59 = vmax.f32 %v9699_v3, %v3282_v43  ;;  %v3300_v17 = vmax.f32 %v3120_v62, 0.0  ;;  %4929 = vmatpush1.bf16.msra.mxu1 %v7404_v2  ;;  %v2622_v57 = vpop.f32.mrb[112].mxu0  ;;  %v3646_v4 = vrot.slane %v3644_v61, 1  ;;  %v3634_v1 = vrot.slane %v3632_v25, 1  ;;  %v7412_v3 = vld [vmem:[%s10905_s4 + $0x144] ss:$8 sps:$4 sm:$0xff]  }
 0x232   : > { %v3523_v27 = vmax.f32 %v9703_v8, %v3299_v32  ;;  %v2861_v34 = vmul.f32 %v9766_v40, %v2622_v57  ;;  %v2624_v54 = vpop.f32.mrb[113].mxu0  ;;  %4930 = vmatprep.subr.bf16.mxu1 %v7409_v24  ;;  %v3642_v63 = vor.u32 %v3641_v29, %v3637_v13  ;;  %v3630_v9 = vor.u32 %v3629_v52, %v3625_v0 }
 0x233   : > { %v3524_v47 = vmax.f32 %v9708_v28, %v3300_v17  ;;  %v2862_v30 = vmul.f32 %v9769_v21, %v2624_v54  ;;  %v2626_v55 = vpop.f32.mrb[114].mxu0  ;;  %v3604_v23 = vpack.c.bf16 %v9792_v48, %v9844_v39  ;;  %v3656_v14 = vshrl.u32 %v9829_v16, 16  ;;  %v7413_v39 = vld [vmem:[%s10905_s4 + $0x150] ss:$8 sps:$4 sm:$0xff]  }
 0x234   : > { %v3137_v8 = vadd.f32 %v9772_v38, %v2861_v34  ;;  %v2879_v11 = vmul.f32 %v9766_v40, %v2626_v55  ;;  %v2628_v10 = vpop.f32.mrb[115].mxu0  ;;  %v9865_v19 = vpack.c.bf16 %v3523_v27, %v3521_v6  ;;  %v9868_v12 = vsel %vm3623_vm2, %v3642_v63, %v3646_v4 }
 0x235   : > { %v3138_v56 = vadd.f32 %v9775_v22, %v2862_v30  ;;  %v2880_v28 = vmul.f32 %v9769_v21, %v2628_v10  ;;  %4931 = vmatpush1.bf16.msra.mxu1 %v7407_v15  ;;  %v9872_v37 = vpack.c.bf16 %v3524_v47, %v3522_v59  ;;  %v9878_v50 = vsel %vm3623_vm2, %v3630_v9, %v3634_v1  ;;  %v7416_v10 = vld [vmem:[%s10905_s4 + $0x160] ss:$8 sps:$4 sm:$0xff]  }
 0x236   : > { %v3317_v26 = vmax.f32 %v3137_v8, 0.0  ;;  %v3155_v0 = vadd.f32 %v9772_v38, %v2879_v11  ;;  %4932 = vmatprep.subr.bf16.mxu1 %v7412_v3  ;;  %v3648_v2 = vshrl.u32 %v9825_v41, 16  ;;  %v3652_v24 = vshll.u32 %v9865_v19, 16 }
 0x237   : > { %v3318_v13 = vmax.f32 %v3138_v56, 0.0  ;;  %v3156_v7 = vadd.f32 %v9775_v22, %v2880_v28  ;;  %4893 = vmatprep.mubr.bf16.mxu1 %v9872_v37  ;;  %v3660_v46 = vshll.u32 %v9872_v37, 16  ;;  %v3658_v62 = vor.u32 %v3656_v14, %v3646_v4 }
 0x238   : > { %v3525_v20 = vmax.f32 %v9726_v36, %v3317_v26  ;;  %v3335_v43 = vmax.f32 %v3155_v0, 0.0  ;;  %4894 = vmatmul.mubr.bf16.gmra.mrb[68].mxu1 %v9865_v19  ;;  %v3650_v6 = vor.u32 %v3648_v2, %v3634_v1  ;;  %v3654_v59 = vrot.slane %v3652_v24, 1 }
 0x239   : > { %v3526_v32 = vmax.f32 %v9731_v53, %v3318_v13  ;;  %v3336_v29 = vmax.f32 %v3156_v7, 0.0  ;;  %4933 = vmatpush1.bf16.msra.mxu1 %v7410_v31  ;;  %v2632_v52 = vpop.f32.mrb[116].mxu0  ;;  %v3662_v36 = vrot.slane %v3660_v46, 1  ;;  %v7418_v53 = vld [vmem:[%s10905_s4 + $0x164] ss:$8 sps:$4 sm:$0xff]   ;;  %v3672_v4 = vshrl.u32 %v9872_v37, 16 }
 0x23a   : > { %v3527_v17 = vmax.f32 %v9735_v18, %v3335_v43  ;;  %v2897_v57 = vmul.f32 %v9766_v40, %v2632_v52  ;;  %v2634_v15 = vpop.f32.mrb[117].mxu0  ;;  %4934 = vmatprep.subr.bf16.mxu1 %v7415_v42  ;;  %v3603_v1 = vpack.c.bf16 %v9788_v5, %v9890_v60  ;;  %v9920_v3 = vsel %vm3623_vm2, %v3650_v6, %v3654_v59  ;;  %v7421_v31 = vld [vmem:[%s10905_s4 + $0x174] ss:$8 sps:$4 sm:$0xff]  }
 0x23b   : > { %v3528_v27 = vmax.f32 %v9740_v35, %v3336_v29  ;;  %v2898_v34 = vmul.f32 %v9769_v21, %v2634_v15  ;;  %v2636_v54 = vpop.f32.mrb[118].mxu0  ;;  %v9917_v18 = vsel %vm3623_vm2, %v3658_v62, %v3662_v36  ;;  %v3664_v55 = vshrl.u32 %v9865_v19, 16  ;;  %v7419_v62 = vld [vmem:[%s10905_s4 + $0x170] ss:$8 sps:$4 sm:$0xff]   ;;  %v7424_v29 = vld [vmem:[%s10905_s4 + $0x184] ss:$8 sps:$4 sm:$0xff]  }
 0x23c   : > { %v3173_v63 = vadd.f32 %v9772_v38, %v2897_v57  ;;  %v2915_v9 = vmul.f32 %v9766_v40, %v2636_v54  ;;  %v2638_v47 = vpop.f32.mrb[119].mxu0  ;;  %v9924_v30 = vpack.c.bf16 %v3527_v17, %v3525_v20  ;;  %v3738_v56 = vrot.slane %v3604_v23, 1 }
 0x23d   : > { %v3174_v35 = vadd.f32 %v9775_v22, %v2898_v34  ;;  %v2916_v8 = vmul.f32 %v9769_v21, %v2638_v47  ;;  %4935 = vmatpush1.bf16.msra.mxu1 %v7413_v39  ;;  %v9929_v11 = vpack.c.bf16 %v3528_v27, %v3526_v32  ;;  %v3674_v26 = vor.u32 %v3672_v4, %v3662_v36  ;;  %v3608_v36 = vld [vmem:[#allocation2 + $0x8] sm:$0xf8]  ;;  %v7427_v47 = vld [vmem:[%s10905_s4 + $0x194] ss:$8 sps:$4 sm:$0xff]  }
 0x23e   : > { %v3353_v28 = vmax.f32 %v3173_v63, 0.0  ;;  %v3191_v40 = vadd.f32 %v9772_v38, %v2915_v9  ;;  %4936 = vmatprep.subr.bf16.mxu1 %v7418_v53  ;;  %v3668_v21 = vshll.u32 %v9924_v30, 16  ;;  %v3666_v38 = vor.u32 %v3664_v55, %v3654_v59 }
 0x23f   : > { %v3354_v0 = vmax.f32 %v3174_v35, 0.0  ;;  %v3192_v42 = vadd.f32 %v9775_v22, %v2916_v8  ;;  %4903 = vmatprep.mubr.bf16.mxu1 %v9929_v11  ;;  %v3676_v23 = vshll.u32 %v9929_v11, 16  ;;  %v3739_v20 = vrot.slane %v9829_v16, 1 }
 0x240   : > { %v3529_v13 = vmax.f32 %v9750_v51, %v3353_v28  ;;  %v3371_v7 = vmax.f32 %v3191_v40, 0.0  ;;  %4904 = vmatmul.mubr.bf16.gmra.mrb[72].mxu1 %v9924_v30  ;;  %v3670_v60 = vrot.slane %v3668_v21, 1  ;;  %v3680_v51 = vshrl.u32 %v9924_v30, 16 }
 0x241   : > { %v3530_v43 = vmax.f32 %v9753_v44, %v3354_v0  ;;  %v3372_v22 = vmax.f32 %v3192_v42, 0.0  ;;  %4937 = vmatpush1.bf16.msra.mxu1 %v7416_v10  ;;  %v3678_v6 = vrot.slane %v3676_v23, 1  ;;  %v3688_v52 = vshrl.u32 %v9929_v11, 16 }
 0x242   : > { %v3531_v32 = vmax.f32 %v9755_v45, %v3371_v7  ;;  %4938 = vmatprep.subr.bf16.mxu1 %v7421_v31  ;;  %v9963_v44 = vsel %vm3623_vm2, %v3666_v38, %v3670_v60  ;;  %v9967_v39 = vsel %vm3734_vm3, %v3738_v56, %v3739_v20  ;;  %v3735_v45 = vrot.slane %v3603_v1, 1  ;;  %v7425_v7 = vld [vmem:[%s10905_s4 + $0x190] ss:$8 sps:$4 sm:$0xff]  }
 0x243   : > { %v3532_v59 = vmax.f32 %v9757_v58, %v3372_v22  ;;  %v9971_v17 = vsel %vm3623_vm2, %v3674_v26, %v3678_v6  ;;  %v3736_v57 = vrot.slane %v9825_v41, 1  ;;  %v3743_v53 = vrot.slane %v9872_v37, 1  ;;  %v7422_v58 = vld [vmem:[%s10905_s4 + $0x180] ss:$8 sps:$4 sm:$0xff]  }
 0x244   : > { %v9974_v15 = vpack.c.bf16 %v3531_v32, %v3529_v13  ;;  %v3741_v27 = vrot.slane %v9865_v19, 1  ;;  %v3747_v34 = vrot.slane %v9929_v11, 1  ;;  %v3745_v1 = vrot.slane %v9924_v30, 1  ;;  %v7428_v32 = vld [vmem:[%s10905_s4 + $0x1a0] ss:$8 sps:$4 sm:$0xff]  }
 0x245   : > { %4939 = vmatpush1.bf16.msra.mxu1 %v7419_v62  ;;  %v9979_v54 = vpack.c.bf16 %v3532_v59, %v3530_v43  ;;  %v9985_v63 = vsel %vm3734_vm3, %v3735_v45, %v3736_v57  ;;  %v3612_v9 = vpack.c.bf16 %v9792_v48, %v3608_v36  ;;  %v3682_v35 = vor.u32 %v3680_v51, %v3670_v60  ;;  %v7433_v59 = vld [vmem:[%s10905_s4 + $0x1b4] ss:$8 sps:$4 sm:$0xff]  }
 0x246   : > { %4940 = vmatprep.subr.bf16.mxu1 %v7424_v29  ;;  %v3684_v8 = vshll.u32 %v9974_v15, 16  ;;  %v9996_v10 = vsel %vm3734_vm3, %v3739_v20, %v3743_v53  ;;  %v9999_v56 = vsel %vm3734_vm3, %v3736_v57, %v3741_v27  ;;  %v3690_v28 = vor.u32 %v3688_v52, %v3678_v6 }
 0x247   : > { %4913 = vmatprep.mubr.bf16.mxu1 %v9979_v54  ;;  %v3692_v40 = vshll.u32 %v9979_v54, 16  ;;  %v10006_v31 = vsel %vm3734_vm3, %v3743_v53, %v3747_v34  ;;  %v10009_v26 = vsel %vm3734_vm3, %v3741_v27, %v3745_v1  ;;  %v3751_v42 = vrot.slane %v9979_v54, 1 }
 0x248   : > { %4914 = vmatmul.mubr.bf16.gmra.mrb[76].mxu1 %v9974_v15  ;;  %v10014_v0 = vrot.slane %v3684_v8, 1  ;;  %v3749_v38 = vrot.slane %v9974_v15, 1  ;;  %v3781_v13 = vshrl.u32 %v3612_v9, 16  ;;  %v3784_v20 = vshll.u32 %v3612_v9, 16  ;;  %v3616_v9 = vld [vmem:[#allocation2 + $0x8] sm:$0xf0] }
 0x249   : > { %4941 = vmatpush1.bf16.msra.mxu1 %v7422_v58  ;;  %4956 = vmatprep.mubr.bf16.mxu1 %v9868_v12  ;;  %v10024_v60 = vrot.slane %v3692_v40, 1  ;;  %v3788_v43 = vrot.slane %v3656_v14, 1  ;;  %v3789_v22 = vrot.slane %v3644_v61, 2  ;;  %v7430_v12 = vld [vmem:[%s10905_s4 + $0x1a4] ss:$8 sps:$4 sm:$0xff]   ;;  %v10040_v6 = vsel %vm3734_vm3, %v3747_v34, %v3751_v42 }
 0x24a   : > { %4942 = vmatprep.subr.bf16.mxu1 %v7427_v47  ;;  %v10035_v62 = vsel %vm3623_vm2, %v3682_v35, %v10014_v0  ;;  %v10045_v14 = vsel %vm3734_vm3, %v3745_v1, %v3749_v38  ;;  %v3607_v61 = vld [vmem:[#allocation2] sm:$0xf8]  ;;  %v3776_v29 = vrot.slane %v3648_v2, 1  ;;  %v3696_v45 = vshrl.u32 %v9974_v15, 16 }
 0x24b   : > { %v10054_v36 = vsel %vm3623_vm2, %v3690_v28, %v10024_v60  ;;  %v3783_v57 = vrot.slane %v3781_v13, 1  ;;  %v3786_v53 = vrot.slane %v3784_v20, 2  ;;  %v3790_v27 = vor.u32 %v3789_v22, %v3788_v43 }
 0x24c   : > { %v3704_v34 = vshrl.u32 %v9979_v54, 16  ;;  %v3611_v2 = vpack.c.bf16 %v9788_v5, %v3607_v61  ;;  %v3777_v58 = vrot.slane %v3632_v25, 2  ;;  %v3796_v1 = vrot.slane %v3672_v4, 1 }
 0x24d   : > { %4943 = vmatpush1.bf16.msra.mxu1 %v7425_v7  ;;  %v3787_v47 = vor.u32 %v3786_v53, %v3783_v57  ;;  %v3797_v35 = vrot.slane %v3660_v46, 2  ;;  %v3792_v28 = vrot.slane %v3664_v55, 1  ;;  %v3793_v13 = vrot.slane %v3652_v24, 2  ;;  %v3615_v7 = vld [vmem:[#allocation2] sm:$0xf0] }
 0x24e   : > { %4944 = vmatprep.subr.bf16.mxu1 %v7430_v12  ;;  %v3769_v20 = vshrl.u32 %v3611_v2, 16  ;;  %v3772_v43 = vshll.u32 %v3611_v2, 16  ;;  %v3778_v22 = vor.u32 %v3777_v58, %v3776_v29  ;;  %v3804_v25 = vrot.slane %v3688_v52, 1  ;;  %v7431_v24 = vld [vmem:[%s10905_s4 + $0x1b0] ss:$8 sps:$4 sm:$0xff]  }
 0x24f   : > { %v10075_v4 = vsel %vm3767_vm4, %v3787_v47, %v3790_v27  ;;  %v3798_v12 = vor.u32 %v3797_v35, %v3796_v1  ;;  %v3794_v61 = vor.u32 %v3793_v13, %v3792_v28  ;;  %v3805_v46 = vrot.slane %v3676_v23, 2  ;;  %v7436_v52 = vld [vmem:[%s10905_s4 + $0x1c4] ss:$8 sps:$4 sm:$0xff]  }
 0x250   : > { %v3771_v55 = vrot.slane %v3769_v20, 1  ;;  %v3774_v57 = vrot.slane %v3772_v43, 2  ;;  %v3620_v29 = vpack.c.bf16 %v9792_v48, %v3616_v9  ;;  %v3619_v53 = vpack.c.bf16 %v9788_v5, %v3615_v7  ;;  %v7439_v7 = vld [vmem:[%s10905_s4 + $0x1d4] ss:$8 sps:$4 sm:$0xff]  }
 0x251   : > { %4945 = vmatpush1.bf16.msra.mxu1 %v7428_v32  ;;  %v10088_v2 = vsel %vm3767_vm4, %v3790_v27, %v3798_v12  ;;  %v10091_v23 = vsel %vm3767_vm4, %v3778_v22, %v3794_v61  ;;  %v3806_v32 = vor.u32 %v3805_v46, %v3804_v25  ;;  %v3800_v58 = vrot.slane %v3680_v51, 1 }
 0x252   : > { %4946 = vmatprep.subr.bf16.mxu1 %v7433_v59  ;;  %v3775_v1 = vor.u32 %v3774_v57, %v3771_v55  ;;  %v3801_v48 = vrot.slane %v3668_v21, 2  ;;  %v3812_v5 = vrot.slane %v3704_v34, 1  ;;  %v3813_v59 = vrot.slane %v3692_v40, 2  ;;  %v7434_v21 = vld [vmem:[%s10905_s4 + $0x1c0] ss:$8 sps:$4 sm:$0xff]  }
 0x253   : > { %v10102_v27 = vsel %vm3767_vm4, %v3798_v12, %v3806_v32  ;;  %v3808_v9 = vrot.slane %v3696_v45, 1  ;;  %v3809_v47 = vrot.slane %v3684_v8, 2  ;;  %v3852_v51 = vrot.slane %v3620_v29, 2  ;;  %v7442_v57 = vld [vmem:[%s10905_s4 + $0x1e4] ss:$8 sps:$4 sm:$0xff]  }
 0x254   : > { %v10112_v35 = vsel %vm3767_vm4, %v3775_v1, %v3778_v22  ;;  %v3802_v28 = vor.u32 %v3801_v48, %v3800_v58  ;;  %v10114_v40 = vor.u32 %v3813_v59, %v3812_v5  ;;  %v3853_v13 = vrot.slane %v9829_v16, 2  ;;  %v7440_v1 = vld [vmem:[%s10905_s4 + $0x1e0] ss:$8 sps:$4 sm:$0xff]   ;;  %v7445_v48 = vld [vmem:[%s10905_s4 + $0x1f4] ss:$8 sps:$4 sm:$0xff]  }
 0x255   : > { %4947 = vmatpush1.bf16.msra.mxu1 %v7431_v24  ;;  %v10120_v8 = vor.u32 %v3809_v47, %v3808_v9  ;;  %v3849_v20 = vrot.slane %v3619_v53, 2  ;;  %v3850_v43 = vrot.slane %v9825_v41, 2  ;;  %v3857_v25 = vrot.slane %v9872_v37, 2  ;;  %v7437_v37 = vld [vmem:[%s10905_s4 + $0x1d0] ss:$8 sps:$4 sm:$0xff]  }
 0x256   : > { %4948 = vmatprep.subr.bf16.mxu1 %v7436_v52  ;;  %v10125_v22 = vsel %vm3767_vm4, %v3794_v61, %v3802_v28  ;;  %v10129_v12 = vsel %vm3767_vm4, %v3806_v32, %v10114_v40  ;;  %v10132_v16 = vsel %vm3848_vm5, %v3852_v51, %v3853_v13  ;;  %v3855_v61 = vrot.slane %v9865_v19, 2  ;;  %v7443_v5 = vld [vmem:[%s10905_s4 + $0x1f0] ss:$8 sps:$4 sm:$0xff]   ;;  %v7448_v59 = vld [vmem:[%s10905_s4 + $0x204] ss:$8 sps:$4 sm:$0xff]  }
 0x257   : > { %v10136_v46 = vsel %vm3767_vm4, %v3802_v28, %v10120_v8  ;;  %v10139_v24 = vsel %vm3848_vm5, %v3849_v20, %v3850_v43  ;;  %v10142_v41 = vsel %vm3848_vm5, %v3853_v13, %v3857_v25  ;;  %v3861_v55 = vrot.slane %v9929_v11, 2  ;;  %v7446_v9 = vld [vmem:[%s10905_s4 + $0x200] ss:$8 sps:$4 sm:$0xff]   ;;  %v7451_v47 = vld [vmem:[%s10905_s4 + $0x214] ss:$8 sps:$4 sm:$0xff]  }
 0x258   : > { %v3859_v29 = vrot.slane %v9924_v30, 2  ;;  %v3865_v53 = vrot.slane %v9979_v54, 2  ;;  %v3863_v52 = vrot.slane %v9974_v15, 2  ;;  %v10156_v32 = vsel %vm3848_vm5, %v3850_v43, %v3855_v61  ;;  %v7449_v51 = vld [vmem:[%s10905_s4 + $0x210] ss:$8 sps:$4 sm:$0xff]  }
 0x259   : > { %4949 = vmatpush1.bf16.msra.mxu1 %v7434_v21  ;;  %v10159_v58 = vsel %vm3848_vm5, %v3857_v25, %v3861_v55  ;;  %v7454_v21 = vld [vmem:[%s10905_s4 + $0x224] ss:$8 sps:$4 sm:$0xff]   ;;  %v7452_v28 = vld [vmem:[%s10905_s4 + $0x220] ss:$8 sps:$4 sm:$0xff]  }
 0x25a   : > { %4950 = vmatprep.subr.bf16.mxu1 %v7439_v7  ;;  %v10162_v19 = vsel %vm3848_vm5, %v3855_v61, %v3859_v29  ;;  %v10167_v11 = vsel %vm3848_vm5, %v3861_v55, %v3865_v53  ;;  %v10172_v30 = vsel %vm3848_vm5, %v3859_v29, %v3863_v52  ;;  %v3586_v13 = vld [vmem:[#allocation2 + $0xa8] sm:$0x1]  ;;  %v7460_v7 = vld [vmem:[%s10905_s4 + $0x244] ss:$8 sps:$4 sm:$0xff]   ;;  %v3585_v25 = vld [vmem:[#allocation2 + $0xa0] sm:$0x1] }
 0x25b   : > { %v3598_v20 = vpack.c.bf16 %v3586_v13, %v3586_v13  ;;  %v7458_v43 = vld [vmem:[%s10905_s4 + $0x240] ss:$8 sps:$4 sm:$0xff]   ;;  %v7466_v61 = vld [vmem:[%s10905_s4 + $0x264] ss:$8 sps:$4 sm:$0xff]   ;;  %v3597_v55 = vpack.c.bf16 %v3585_v25, %v3585_v25  ;;  %v7469_v29 = vld [vmem:[%s10905_s4 + $0x274] ss:$8 sps:$4 sm:$0xff]  }
 0x25c   : > { %v7485_v13 = vld [vmem:[%s10905_s4 + $0x2d0] ss:$8 sps:$4 sm:$0xff]   ;;  %v7494_v25 = vld [vmem:[%s10905_s4 + $0x300] ss:$8 sps:$4 sm:$0xff]   ;;  %v7601_v15 = vld [vmem:[%s10908_s7 + $0x64] ss:$16 sps:$4 sm:$0xff]  }
 0x25d   : > { %4951 = vmatpush1.bf16.msra.mxu1 %v7437_v37  ;;  %v7461_v37 = vld [vmem:[%s10905_s4 + $0x250] ss:$8 sps:$4 sm:$0xff]  }
 0x25e   : > { %4952 = vmatprep.subr.bf16.mxu1 %v7442_v57  ;;  %v3706_v57 = vor.u32 %v3704_v34, %v10024_v60  ;;  %v7467_v60 = vld [vmem:[%s10905_s4 + $0x270] ss:$8 sps:$4 sm:$0xff]   ;;  %v7472_v34 = vld [vmem:[%s10905_s4 + $0x284] ss:$8 sps:$4 sm:$0xff]  }
 0x25f   : > { %v7599_v54 = vld [vmem:[%s10908_s7 + $0x60] ss:$16 sps:$4 sm:$0xff]  }
 0x261   : > { %4953 = vmatpush1.bf16.msra.mxu1 %v7440_v1  ;;  %v3700_v1 = vshll.u32 %v3597_v55, 16  ;;  %v7502_v55 = vld [vmem:[%s10905_s4 + $0x324] ss:$8 sps:$4 sm:$0xff]  }
 0x262   : > { %4954 = vmatprep.subr.bf16.mxu1 %v7445_v48 }
 0x265   : > { %4955 = vmatpush1.bf16.msra.mxu1 %v7443_v5  ;;  %v3698_v5 = vor.u32 %v3696_v45, %v10014_v0  ;;  %v7473_v0 = vld [vmem:[%s10905_s4 + $0x290] ss:$8 sps:$4 sm:$0xff]   ;;  %v7478_v45 = vld [vmem:[%s10905_s4 + $0x2a4] ss:$8 sps:$4 sm:$0xff]  }
 0x266   : > { %5007 = vmatprep.subr.bf16.mxu1 %v7448_v59  ;;  %v3702_v59 = vrot.slane %v3700_v1, 1  ;;  %v7509_v1 = vld [vmem:[%s10905_s4 + $0x350] ss:$8 sps:$4 sm:$0xff]  }
 0x268   : > { %4957 = vmatmul.mubr.bf16.vlgmr.msra.gmra.mrb[60].mxu1 %v9878_v50  ;;  %v7457_v50 = vld [vmem:[%s10905_s4 + $0x234] ss:$8 sps:$4 sm:$0xff]  }
 0x269   : > { %4966 = vmatprep.mubr.bf16.mxu1 %v9917_v18  ;;  %5008 = vmatpush1.bf16.msra.mxu1 %v7446_v9  ;;  %v7455_v18 = vld [vmem:[%s10905_s4 + $0x230] ss:$8 sps:$4 sm:$0xff]   ;;  %v7475_v9 = vld [vmem:[%s10905_s4 + $0x294] ss:$8 sps:$4 sm:$0xff]  }
 0x26a   : > { %5009 = vmatprep.subr.bf16.mxu1 %v7451_v47  ;;  %v3703_v47 = vsel %vm3623_vm2, %v3698_v5, %v3702_v59 }
 0x26d   : > { %5010 = vmatpush1.bf16.msra.mxu1 %v7449_v51  ;;  %v7476_v51 = vld [vmem:[%s10905_s4 + $0x2a0] ss:$8 sps:$4 sm:$0xff]  }
 0x26e   : > { %5011 = vmatprep.subr.bf16.mxu1 %v7454_v21  ;;  %v7481_v21 = vld [vmem:[%s10905_s4 + $0x2b4] ss:$8 sps:$4 sm:$0xff]  }
 0x270   : > { %4967 = vmatmul.mubr.bf16.gmra.mrb[64].mxu1 %v9920_v3  ;;  %v7463_v3 = vld [vmem:[%s10905_s4 + $0x254] ss:$8 sps:$4 sm:$0xff]  }
 0x271   : > { %4976 = vmatprep.mubr.bf16.mxu1 %v9971_v17  ;;  %5012 = vmatpush1.bf16.msra.mxu1 %v7452_v28  ;;  %v3708_v17 = vshll.u32 %v3598_v20, 16  ;;  %v7484_v28 = vld [vmem:[%s10905_s4 + $0x2c4] ss:$8 sps:$4 sm:$0xff]   ;;  %v7488_v20 = vld [vmem:[%s10905_s4 + $0x2e0] ss:$8 sps:$4 sm:$0xff]  }
 0x272   : > { %5013 = vmatprep.subr.bf16.mxu1 %v7457_v50  ;;  %v7482_v50 = vld [vmem:[%s10905_s4 + $0x2c0] ss:$8 sps:$4 sm:$0xff]  }
 0x275   : > { %5014 = vmatpush1.bf16.msra.mxu1 %v7455_v18  ;;  %v7487_v18 = vld [vmem:[%s10905_s4 + $0x2d4] ss:$8 sps:$4 sm:$0xff]  }
 0x276   : > { %5015 = vmatprep.subr.bf16.mxu1 %v7460_v7  ;;  %v7490_v7 = vld [vmem:[%s10905_s4 + $0x2e4] ss:$8 sps:$4 sm:$0xff]  }
 0x278   : > { %4977 = vmatmul.mubr.bf16.gmra.mrb[68].mxu1 %v9963_v44  ;;  %v3710_v44 = vrot.slane %v3708_v17, 1  ;;  %v7496_v17 = vld [vmem:[%s10905_s4 + $0x304] ss:$8 sps:$4 sm:$0xff]  }
 0x279   : > { %4986 = vmatprep.mubr.bf16.mxu1 %v10054_v36  ;;  %5016 = vmatpush1.bf16.msra.mxu1 %v7458_v43  ;;  %v7464_v36 = vld [vmem:[%s10905_s4 + $0x260] ss:$8 sps:$4 sm:$0xff]   ;;  %v7493_v43 = vld [vmem:[%s10905_s4 + $0x2f4] ss:$8 sps:$4 sm:$0xff]  }
 0x27a   : > { %5017 = vmatprep.subr.bf16.mxu1 %v7463_v3  ;;  %v3711_v48 = vsel %vm3623_vm2, %v3706_v57, %v3710_v44  ;;  %v7491_v3 = vld [vmem:[%s10905_s4 + $0x2f0] ss:$8 sps:$4 sm:$0xff]   ;;  %v7500_v57 = vld [vmem:[%s10905_s4 + $0x320] ss:$8 sps:$4 sm:$0xff]   ;;  %v7508_v44 = vld [vmem:[%s10905_s4 + $0x344] ss:$8 sps:$4 sm:$0xff]  }
 0x27d   : > { %5018 = vmatpush1.bf16.msra.mxu1 %v7461_v37  ;;  %v7499_v37 = vld [vmem:[%s10905_s4 + $0x314] ss:$8 sps:$4 sm:$0xff]  }
 0x27e   : > { %5019 = vmatprep.subr.bf16.mxu1 %v7466_v61  ;;  %v7497_v61 = vld [vmem:[%s10905_s4 + $0x310] ss:$8 sps:$4 sm:$0xff]  }
 0x280   : > { %4987 = vmatmul.mubr.bf16.gmra.mrb[72].mxu1 %v10035_v62  ;;  %v7470_v62 = vld [vmem:[%s10905_s4 + $0x280] ss:$8 sps:$4 sm:$0xff]  }
 0x281   : > { %4996 = vmatprep.mubr.bf16.mxu1 %v3711_v48  ;;  %5020 = vmatpush1.bf16.msra.mxu1 %v7464_v36  ;;  %v7506_v36 = vld [vmem:[%s10905_s4 + $0x340] ss:$8 sps:$4 sm:$0xff]   ;;  %v7514_v48 = vld [vmem:[%s10905_s4 + $0x364] ss:$8 sps:$4 sm:$0xff]  }
 0x282   : > { %5021 = vmatprep.subr.bf16.mxu1 %v7469_v29  ;;  %v3602_v29 = vld [vmem:[#allocation2 + $0xa8] sm:$0x3] }
 0x285   : > { %5022 = vmatpush1.bf16.msra.mxu1 %v7467_v60 }
 0x286   : > { %5023 = vmatprep.subr.bf16.mxu1 %v7472_v34  ;;  %v3601_v34 = vld [vmem:[#allocation2 + $0xa0] sm:$0x3] }
 0x287   : > { %v3605_v5 = vpack.c.bf16 %v3601_v34, %v3601_v34 }
 0x288   : > { %4997 = vmatmul.mubr.bf16.gmra.mrb[76].mxu1 %v3703_v47 }
 0x289   : > { %5024 = vmatpush1.bf16.msra.mxu1 %v7470_v62  ;;  %5039 = vmatprep.mubr.bf16.mxu1 %v9967_v39  ;;  %v7479_v39 = vld [vmem:[%s10905_s4 + $0x2b0] ss:$8 sps:$4 sm:$0xff]   ;;  %v3753_v47 = vrot.slane %v3605_v5, 1  ;;  %v7562_v5 = vld [vmem:[%s10905_s4 + $0x464] ss:$8 sps:$4 sm:$0xff]  }
 0x28a   : > { %5025 = vmatprep.subr.bf16.mxu1 %v7475_v9  ;;  %v7515_v62 = vld [vmem:[%s10905_s4 + $0x370] ss:$8 sps:$4 sm:$0xff]   ;;  %v7520_v9 = vld [vmem:[%s10905_s4 + $0x384] ss:$8 sps:$4 sm:$0xff]  }
 0x28d   : > { %5026 = vmatpush1.bf16.msra.mxu1 %v7473_v0  ;;  %v3754_v0 = vsel %vm3734_vm3, %v3749_v38, %v3753_v47  ;;  %v7595_v38 = vld [vmem:[%s10908_s7 + $0x24] ss:$16 sps:$4 sm:$0xff]  }
 0x28e   : > { %5027 = vmatprep.subr.bf16.mxu1 %v7478_v45  ;;  %v7590_v45 = vld [vmem:[%s10908_s7] ss:$16 sps:$4 sm:$0xff]  }
 0x291   : > { %5028 = vmatpush1.bf16.msra.mxu1 %v7476_v51  ;;  %v7592_v51 = vld [vmem:[%s10908_s7 + $0x4] ss:$16 sps:$4 sm:$0xff]  }
 0x292   : > { %5029 = vmatprep.subr.bf16.mxu1 %v7481_v21  ;;  %v7521_v21 = vld [vmem:[%s10905_s4 + $0x390] ss:$8 sps:$4 sm:$0xff]   ;;  %5755 = vmatprep.subr.bf16.mxu0 %v7592_v51 }
 0x293   : > { %5756 = vmatpush1.bf16.msra.mxu0 %v7590_v45  ;;  %v7568_v45 = vld [vmem:[%s10905_s4 + $0x484] ss:$8 sps:$4 sm:$0xff]  }
 0x294   : > { %5757 = vmatprep.subr.bf16.mxu0 %v7595_v38  ;;  %v7569_v38 = vld [vmem:[%s10905_s4 + $0x490] ss:$8 sps:$4 sm:$0xff]  }
 0x295   : > { %5030 = vmatpush1.bf16.msra.mxu1 %v7479_v39  ;;  %v7526_v39 = vld [vmem:[%s10905_s4 + $0x3a4] ss:$8 sps:$4 sm:$0xff]  }
 0x296   : > { %5031 = vmatprep.subr.bf16.mxu1 %v7484_v28  ;;  %v7593_v28 = vld [vmem:[%s10908_s7 + $0x20] ss:$16 sps:$4 sm:$0xff]  }
 0x297   : > { %5758 = vmatpush1.bf16.msra.mxu0 %v7593_v28  ;;  %v7572_v28 = vld [vmem:[%s10905_s4 + $0x4a0] ss:$8 sps:$4 sm:$0xff]  }
 0x299   : > { %5032 = vmatpush1.bf16.msra.mxu1 %v7482_v50  ;;  %v7529_v50 = vld [vmem:[%s10905_s4 + $0x3b4] ss:$8 sps:$4 sm:$0xff]  }
 0x29a   : > { %5033 = vmatprep.subr.bf16.mxu1 %v7487_v18  ;;  %v7527_v18 = vld [vmem:[%s10905_s4 + $0x3b0] ss:$8 sps:$4 sm:$0xff]  }
 0x29d   : > { %5034 = vmatpush1.bf16.msra.mxu1 %v7485_v13  ;;  %v7532_v13 = vld [vmem:[%s10905_s4 + $0x3c4] ss:$8 sps:$4 sm:$0xff]  }
 0x29e   : > { %5035 = vmatprep.subr.bf16.mxu1 %v7490_v7  ;;  %v7530_v7 = vld [vmem:[%s10905_s4 + $0x3c0] ss:$8 sps:$4 sm:$0xff]  }
 0x2a1   : > { %5036 = vmatpush1.bf16.msra.mxu1 %v7488_v20  ;;  %v7535_v20 = vld [vmem:[%s10905_s4 + $0x3d4] ss:$8 sps:$4 sm:$0xff]  }
 0x2a2   : > { %5037 = vmatprep.subr.bf16.mxu1 %v7493_v43  ;;  %v7533_v43 = vld [vmem:[%s10905_s4 + $0x3d0] ss:$8 sps:$4 sm:$0xff]  }
 0x2a5   : > { %5038 = vmatpush1.bf16.msra.mxu1 %v7491_v3  ;;  %v7538_v3 = vld [vmem:[%s10905_s4 + $0x3e4] ss:$8 sps:$4 sm:$0xff]  }
 0x2a6   : > { %5090 = vmatprep.subr.bf16.mxu1 %v7496_v17  ;;  %v7536_v17 = vld [vmem:[%s10905_s4 + $0x3e0] ss:$8 sps:$4 sm:$0xff]  }
 0x2a8   : > { %5040 = vmatmul.mubr.bf16.vlgmr.msra.gmra.mrb[60].mxu1 %v9985_v63  ;;  %v7505_v63 = vld [vmem:[%s10905_s4 + $0x334] ss:$8 sps:$4 sm:$0xff]  }
 0x2a9   : > { %5049 = vmatprep.mubr.bf16.mxu1 %v9996_v10  ;;  %5091 = vmatpush1.bf16.msra.mxu1 %v7494_v25  ;;  %v7503_v10 = vld [vmem:[%s10905_s4 + $0x330] ss:$8 sps:$4 sm:$0xff]   ;;  %v7541_v25 = vld [vmem:[%s10905_s4 + $0x3f4] ss:$8 sps:$4 sm:$0xff]  }
 0x2aa   : > { %5092 = vmatprep.subr.bf16.mxu1 %v7499_v37  ;;  %v7539_v37 = vld [vmem:[%s10905_s4 + $0x3f0] ss:$8 sps:$4 sm:$0xff]  }
 0x2ad   : > { %5093 = vmatpush1.bf16.msra.mxu1 %v7497_v61  ;;  %v7544_v61 = vld [vmem:[%s10905_s4 + $0x404] ss:$8 sps:$4 sm:$0xff]  }
 0x2ae   : > { %5094 = vmatprep.subr.bf16.mxu1 %v7502_v55  ;;  %v7542_v55 = vld [vmem:[%s10905_s4 + $0x400] ss:$8 sps:$4 sm:$0xff]  }
 0x2b0   : > { %5050 = vmatmul.mubr.bf16.gmra.mrb[64].mxu1 %v9999_v56  ;;  %v7511_v56 = vld [vmem:[%s10905_s4 + $0x354] ss:$8 sps:$4 sm:$0xff]  }
 0x2b1   : > { %5059 = vmatprep.mubr.bf16.mxu1 %v10006_v31  ;;  %5095 = vmatpush1.bf16.msra.mxu1 %v7500_v57  ;;  %v3606_v31 = vpack.c.bf16 %v3602_v29, %v3602_v29  ;;  %v7547_v57 = vld [vmem:[%s10905_s4 + $0x414] ss:$8 sps:$4 sm:$0xff]   ;;  %v7551_v29 = vld [vmem:[%s10905_s4 + $0x430] ss:$8 sps:$4 sm:$0xff]  }
 0x2b2   : > { %5096 = vmatprep.subr.bf16.mxu1 %v7505_v63  ;;  %v7545_v63 = vld [vmem:[%s10905_s4 + $0x410] ss:$8 sps:$4 sm:$0xff]  }
 0x2b3   : > { %v3755_v60 = vrot.slane %v3606_v31, 1 }
 0x2b5   : > { %5097 = vmatpush1.bf16.msra.mxu1 %v7503_v10  ;;  %v3756_v59 = vsel %vm3734_vm3, %v3751_v42, %v3755_v60  ;;  %v7523_v42 = vld [vmem:[%s10905_s4 + $0x394] ss:$8 sps:$4 sm:$0xff]   ;;  %v7550_v10 = vld [vmem:[%s10905_s4 + $0x424] ss:$8 sps:$4 sm:$0xff]  }
 0x2b6   : > { %5098 = vmatprep.subr.bf16.mxu1 %v7508_v44  ;;  %v7548_v44 = vld [vmem:[%s10905_s4 + $0x420] ss:$8 sps:$4 sm:$0xff]  }
 0x2b8   : > { %5060 = vmatmul.mubr.bf16.gmra.mrb[68].mxu1 %v10009_v26  ;;  %v7512_v26 = vld [vmem:[%s10905_s4 + $0x360] ss:$8 sps:$4 sm:$0xff]  }
 0x2b9   : > { %5069 = vmatprep.mubr.bf16.mxu1 %v10040_v6  ;;  %5099 = vmatpush1.bf16.msra.mxu1 %v7506_v36  ;;  %v7517_v6 = vld [vmem:[%s10905_s4 + $0x374] ss:$8 sps:$4 sm:$0xff]   ;;  %v3610_v36 = vld [vmem:[#allocation2 + $0xa8] sm:$0x7] }
 0x2ba   : > { %5100 = vmatprep.subr.bf16.mxu1 %v7511_v56  ;;  %v7556_v56 = vld [vmem:[%s10905_s4 + $0x444] ss:$8 sps:$4 sm:$0xff]  }
 0x2bd   : > { %5101 = vmatpush1.bf16.msra.mxu1 %v7509_v1 }
 0x2be   : > { %5102 = vmatprep.subr.bf16.mxu1 %v7514_v48  ;;  %v3609_v48 = vld [vmem:[#allocation2 + $0xa0] sm:$0x7] }
 0x2bf   : > { %v3613_v60 = vpack.c.bf16 %v3609_v48, %v3609_v48  ;;  %v7625_v48 = vld [vmem:[%s10908_s7 + $0x164] ss:$16 sps:$4 sm:$0xff]  }
 0x2c0   : > { %5070 = vmatmul.mubr.bf16.gmra.mrb[72].mxu1 %v10045_v14  ;;  %v7518_v14 = vld [vmem:[%s10905_s4 + $0x380] ss:$8 sps:$4 sm:$0xff]  }
 0x2c1   : > { %5079 = vmatprep.mubr.bf16.mxu1 %v3756_v59  ;;  %5103 = vmatpush1.bf16.msra.mxu1 %v7512_v26  ;;  %v3817_v59 = vshrl.u32 %v3613_v60, 16 }
 0x2c2   : > { %5104 = vmatprep.subr.bf16.mxu1 %v7517_v6  ;;  %v7557_v6 = vld [vmem:[%s10905_s4 + $0x450] ss:$8 sps:$4 sm:$0xff]  }
 0x2c3   : > { %v3819_v47 = vrot.slane %v3817_v59, 1  ;;  %v7635_v59 = vld [vmem:[%s10908_s7 + $0x1e0] ss:$16 sps:$4 sm:$0xff]  }
 0x2c5   : > { %5105 = vmatpush1.bf16.msra.mxu1 %v7515_v62  ;;  %v3820_v62 = vshll.u32 %v3613_v60, 16  ;;  %v7631_v60 = vld [vmem:[%s10908_s7 + $0x1a4] ss:$16 sps:$4 sm:$0xff]  }
 0x2c6   : > { %5106 = vmatprep.subr.bf16.mxu1 %v7520_v9 }
 0x2c8   : > { %5080 = vmatmul.mubr.bf16.gmra.mrb[76].mxu1 %v3754_v0  ;;  %v7563_v0 = vld [vmem:[%s10905_s4 + $0x470] ss:$8 sps:$4 sm:$0xff]  }
 0x2c9   : > { %5107 = vmatpush1.bf16.msra.mxu1 %v7518_v14  ;;  %5122 = vmatprep.mubr.bf16.mxu1 %v10075_v4  ;;  %v7524_v4 = vld [vmem:[%s10905_s4 + $0x3a0] ss:$8 sps:$4 sm:$0xff]   ;;  %v3822_v14 = vrot.slane %v3820_v62, 2  ;;  %v7640_v62 = vld [vmem:[%s10908_s7 + $0xc] ss:$16 sps:$4 sm:$0xff]  }
 0x2ca   : > { %5108 = vmatprep.subr.bf16.mxu1 %v7523_v42 }
 0x2cb   : > { %v3823_v51 = vor.u32 %v3822_v14, %v3819_v47 }
 0x2cd   : > { %5109 = vmatpush1.bf16.msra.mxu1 %v7521_v21  ;;  %v3824_v21 = vsel %vm3767_vm4, %v10120_v8, %v3823_v51  ;;  %v7577_v8 = vld [vmem:[%s10905_s4 + $0x4b4] ss:$8 sps:$4 sm:$0xff]  }
 0x2ce   : > { %5110 = vmatprep.subr.bf16.mxu1 %v7526_v39  ;;  %v7574_v39 = vld [vmem:[%s10905_s4 + $0x4a4] ss:$8 sps:$4 sm:$0xff]  }
 0x2d1   : > { %5111 = vmatpush1.bf16.msra.mxu1 %v7524_v4  ;;  %v7580_v4 = vld [vmem:[%s10905_s4 + $0x4c4] ss:$8 sps:$4 sm:$0xff]  }
 0x2d2   : > { %5112 = vmatprep.subr.bf16.mxu1 %v7529_v50  ;;  %v7578_v50 = vld [vmem:[%s10905_s4 + $0x4c0] ss:$8 sps:$4 sm:$0xff]  }
 0x2d5   : > { %5113 = vmatpush1.bf16.msra.mxu1 %v7527_v18  ;;  %v7583_v18 = vld [vmem:[%s10905_s4 + $0x4d4] ss:$8 sps:$4 sm:$0xff]  }
 0x2d6   : > { %5114 = vmatprep.subr.bf16.mxu1 %v7532_v13  ;;  %v7581_v13 = vld [vmem:[%s10905_s4 + $0x4d0] ss:$8 sps:$4 sm:$0xff]  }
 0x2d9   : > { %5115 = vmatpush1.bf16.msra.mxu1 %v7530_v7  ;;  %v7586_v7 = vld [vmem:[%s10905_s4 + $0x4e4] ss:$8 sps:$4 sm:$0xff]  }
 0x2da   : > { %5116 = vmatprep.subr.bf16.mxu1 %v7535_v20  ;;  %v7584_v20 = vld [vmem:[%s10905_s4 + $0x4e0] ss:$8 sps:$4 sm:$0xff]  }
 0x2dd   : > { %5117 = vmatpush1.bf16.msra.mxu1 %v7533_v43  ;;  %v7589_v43 = vld [vmem:[%s10905_s4 + $0x4f4] ss:$8 sps:$4 sm:$0xff]  }
 0x2de   : > { %5118 = vmatprep.subr.bf16.mxu1 %v7538_v3  ;;  %v7587_v3 = vld [vmem:[%s10905_s4 + $0x4f0] ss:$8 sps:$4 sm:$0xff]  }
 0x2e1   : > { %5119 = vmatpush1.bf16.msra.mxu1 %v7536_v17  ;;  %v3618_v17 = vld [vmem:[#allocation2 + $0xa8] sm:$0xf] }
 0x2e2   : > { %5120 = vmatprep.subr.bf16.mxu1 %v7541_v25  ;;  %v3622_v25 = vpack.c.bf16 %v3618_v17, %v3618_v17 }
 0x2e5   : > { %5121 = vmatpush1.bf16.msra.mxu1 %v7539_v37  ;;  %v3869_v37 = vrot.slane %v3622_v25, 2 }
 0x2e6   : > { %5173 = vmatprep.subr.bf16.mxu1 %v7544_v61  ;;  %v3617_v61 = vld [vmem:[#allocation2 + $0xa0] sm:$0xf] }
 0x2e8   : > { %5123 = vmatmul.mubr.bf16.vlgmr.msra.gmra.mrb[60].mxu1 %v10112_v35  ;;  %v3614_v35 = vpack.c.bf16 %v3610_v36, %v3610_v36  ;;  %v7616_v36 = vld [vmem:[%s10908_s7 + $0x104] ss:$16 sps:$4 sm:$0xff]  }
 0x2e9   : > { %5132 = vmatprep.mubr.bf16.mxu1 %v10088_v2  ;;  %5174 = vmatpush1.bf16.msra.mxu1 %v7542_v55  ;;  %v7553_v2 = vld [vmem:[%s10905_s4 + $0x434] ss:$8 sps:$4 sm:$0xff]   ;;  %v3621_v55 = vpack.c.bf16 %v3617_v61, %v3617_v61 }
 0x2ea   : > { %5175 = vmatprep.subr.bf16.mxu1 %v7547_v57  ;;  %v3826_v31 = vshrl.u32 %v3614_v35, 16  ;;  %v3829_v1 = vshll.u32 %v3614_v35, 16  ;;  %v7610_v57 = vld [vmem:[%s10908_s7 + $0xc4] ss:$16 sps:$4 sm:$0xff]   ;;  %v7617_v35 = vld [vmem:[%s10908_s7 + $0x120] ss:$16 sps:$4 sm:$0xff]  }
 0x2ec   : > { %v3828_v34 = vrot.slane %v3826_v31, 1  ;;  %v3831_v26 = vrot.slane %v3829_v1, 2  ;;  %v7620_v31 = vld [vmem:[%s10908_s7 + $0x140] ss:$16 sps:$4 sm:$0xff]  }
 0x2ed   : > { %5176 = vmatpush1.bf16.msra.mxu1 %v7545_v63  ;;  %v7608_v63 = vld [vmem:[%s10908_s7 + $0xc0] ss:$16 sps:$4 sm:$0xff]  }
 0x2ee   : > { %5177 = vmatprep.subr.bf16.mxu1 %v7550_v10  ;;  %v3832_v9 = vor.u32 %v3831_v26, %v3828_v34  ;;  %v7611_v10 = vld [vmem:[%s10908_s7 + $0xe0] ss:$16 sps:$4 sm:$0xff]   ;;  %v7634_v26 = vld [vmem:[%s10908_s7 + $0x1c4] ss:$16 sps:$4 sm:$0xff]  }
 0x2ef   : > { %v7623_v1 = vld [vmem:[%s10908_s7 + $0x160] ss:$16 sps:$4 sm:$0xff]  }
 0x2f0   : > { %5133 = vmatmul.mubr.bf16.gmra.mrb[64].mxu1 %v10091_v23  ;;  %v7554_v23 = vld [vmem:[%s10905_s4 + $0x440] ss:$8 sps:$4 sm:$0xff]   ;;  %v3833_v42 = vsel %vm3767_vm4, %v10114_v40, %v3832_v9  ;;  %v7571_v40 = vld [vmem:[%s10905_s4 + $0x494] ss:$8 sps:$4 sm:$0xff]  }
 0x2f1   : > { %5142 = vmatprep.mubr.bf16.mxu1 %v10102_v27  ;;  %5178 = vmatpush1.bf16.msra.mxu1 %v7548_v44  ;;  %v7559_v27 = vld [vmem:[%s10905_s4 + $0x454] ss:$8 sps:$4 sm:$0xff]   ;;  %v7629_v34 = vld [vmem:[%s10908_s7 + $0x1a0] ss:$16 sps:$4 sm:$0xff]  }
 0x2f2   : > { %5179 = vmatprep.subr.bf16.mxu1 %v7553_v2  ;;  %v7613_v44 = vld [vmem:[%s10908_s7 + $0xe4] ss:$16 sps:$4 sm:$0xff]   ;;  %v7614_v2 = vld [vmem:[%s10908_s7 + $0x100] ss:$16 sps:$4 sm:$0xff]  }
 0x2f3   : > { %v5256_v9 = vld [vmem:[%s10906_s5] sm:$0x3] }
 0x2f4   : > { %v10635_v47 = vrot.slane %v5256_v9, %v10999_v33 }
 0x2f5   : > { %5180 = vmatpush1.bf16.msra.mxu1 %v7551_v29  ;;  %v7619_v29 = vld [vmem:[%s10908_s7 + $0x124] ss:$16 sps:$4 sm:$0xff]  }
 0x2f6   : > { %5181 = vmatprep.subr.bf16.mxu1 %v7556_v56  ;;  %v7622_v56 = vld [vmem:[%s10908_s7 + $0x144] ss:$16 sps:$4 sm:$0xff]  }
 0x2f8   : > { %5143 = vmatmul.mubr.bf16.gmra.mrb[68].mxu1 %v10125_v22  ;;  %v7560_v22 = vld [vmem:[%s10905_s4 + $0x460] ss:$8 sps:$4 sm:$0xff]  }
 0x2f9   : > { %5152 = vmatprep.mubr.bf16.mxu1 %v10129_v12  ;;  %5182 = vmatpush1.bf16.msra.mxu1 %v7554_v23  ;;  %v7565_v12 = vld [vmem:[%s10905_s4 + $0x474] ss:$8 sps:$4 sm:$0xff]  }
 0x2fa   : > { %5183 = vmatprep.subr.bf16.mxu1 %v7559_v27  ;;  %v7628_v23 = vld [vmem:[%s10908_s7 + $0x184] ss:$16 sps:$4 sm:$0xff]   ;;  %v7626_v27 = vld [vmem:[%s10908_s7 + $0x180] ss:$16 sps:$4 sm:$0xff]  }
 0x2fd   : > { %5184 = vmatpush1.bf16.msra.mxu1 %v7557_v6  ;;  %v7632_v6 = vld [vmem:[%s10908_s7 + $0x1c0] ss:$16 sps:$4 sm:$0xff]  }
 0x2fe   : > { %5185 = vmatprep.subr.bf16.mxu1 %v7562_v5  ;;  %v7637_v5 = vld [vmem:[%s10908_s7 + $0x1e4] ss:$16 sps:$4 sm:$0xff]  }
 0x300   : > { %5153 = vmatmul.mubr.bf16.gmra.mrb[72].mxu1 %v10136_v46  ;;  %v7566_v46 = vld [vmem:[%s10905_s4 + $0x480] ss:$8 sps:$4 sm:$0xff]  }
 0x301   : > { %5162 = vmatprep.mubr.bf16.mxu1 %v3833_v42  ;;  %5186 = vmatpush1.bf16.msra.mxu1 %v7560_v22  ;;  %v5288_v22 = vld [vmem:[%s10907_s6] sm:$0x3] }
 0x302   : > { %5187 = vmatprep.subr.bf16.mxu1 %v7565_v12  ;;  %v10632_v12 = vrot.slane %v5256_v9, %v10998_v49  ;;  %v10638_v14 = vrot.slane %v5288_v22, %v10998_v49 }
 0x305   : > { %5188 = vmatpush1.bf16.msra.mxu1 %v7563_v0  ;;  %v10641_v0 = vrot.slane %v5288_v22, %v10999_v33 }
 0x306   : > { %5189 = vmatprep.subr.bf16.mxu1 %v7568_v45 }
 0x308   : > { %5163 = vmatmul.mubr.bf16.gmra.mrb[76].mxu1 %v3824_v21 }
 0x309   : > { %5190 = vmatpush1.bf16.msra.mxu1 %v7566_v46  ;;  %5205 = vmatprep.mubr.bf16.mxu1 %v10132_v16  ;;  %v7575_v16 = vld [vmem:[%s10905_s4 + $0x4b0] ss:$8 sps:$4 sm:$0xff]  }
 0x30a   : > { %5191 = vmatprep.subr.bf16.mxu1 %v7571_v40 }
 0x30d   : > { %5192 = vmatpush1.bf16.msra.mxu1 %v7569_v38 }
 0x30e   : > { %5193 = vmatprep.subr.bf16.mxu1 %v7574_v39 }
 0x311   : > { %5194 = vmatpush1.bf16.msra.mxu1 %v7572_v28 }
 0x312   : > { %5195 = vmatprep.subr.bf16.mxu1 %v7577_v8 }
 0x315   : > { %5196 = vmatpush1.bf16.msra.mxu1 %v7575_v16 }
 0x316   : > { %5197 = vmatprep.subr.bf16.mxu1 %v7580_v4 }
 0x319   : > { %5198 = vmatpush1.bf16.msra.mxu1 %v7578_v50 }
 0x31a   : > { %5199 = vmatprep.subr.bf16.mxu1 %v7583_v18 }
 0x31d   : > { %5200 = vmatpush1.bf16.msra.mxu1 %v7581_v13 }
 0x31e   : > { %5201 = vmatprep.subr.bf16.mxu1 %v7586_v7 }
 0x321   : > { %5202 = vmatpush1.bf16.msra.mxu1 %v7584_v20 }
 0x322   : > { %5203 = vmatprep.subr.bf16.mxu1 %v7589_v43 }
 0x325   : > { %5204 = vmatpush1.bf16.msra.mxu1 %v7587_v3 }
 0x328   : > { %5206 = vmatmul.mubr.bf16.vlgmr.msra.gmra.mrb[60].mxu1 %v10139_v24  ;;  %v3870_v24 = vsel %vm3848_vm5, %v3865_v53, %v3869_v37  ;;  %v7604_v53 = vld [vmem:[%s10908_s7 + $0x84] ss:$16 sps:$4 sm:$0xff]  }
 0x329   : > { %5215 = vmatprep.mubr.bf16.mxu1 %v10142_v41  ;;  %v3867_v41 = vrot.slane %v3621_v55, 2 }
 0x330   : > { %5216 = vmatmul.mubr.bf16.gmra.mrb[64].mxu1 %v10156_v32  ;;  %v3868_v32 = vsel %vm3848_vm5, %v3863_v52, %v3867_v41  ;;  %v7602_v52 = vld [vmem:[%s10908_s7 + $0x80] ss:$16 sps:$4 sm:$0xff]  }
 0x331   : > { %5225 = vmatprep.mubr.bf16.mxu1 %v10159_v58  ;;  %v7596_v58 = vld [vmem:[%s10908_s7 + $0x40] ss:$16 sps:$4 sm:$0xff]  }
 0x338   : > { %5226 = vmatmul.mubr.bf16.gmra.mrb[68].mxu1 %v10162_v19  ;;  %v7598_v19 = vld [vmem:[%s10908_s7 + $0x44] ss:$16 sps:$4 sm:$0xff]  }
 0x339   : > { %5235 = vmatprep.mubr.bf16.mxu1 %v10167_v11  ;;  %5759 = vmatprep.subr.bf16.mxu0 %v7598_v19  ;;  %v7605_v11 = vld [vmem:[%s10908_s7 + $0xa0] ss:$16 sps:$4 sm:$0xff]  }
 0x33a   : > { %5760 = vmatpush1.bf16.msra.mxu0 %v7596_v58 }
 0x33b   : > { %5761 = vmatprep.subr.bf16.mxu0 %v7601_v15 }
 0x33e   : > { %5762 = vmatpush1.bf16.msra.mxu0 %v7599_v54 }
 0x33f   : > { %5763 = vmatprep.subr.bf16.mxu0 %v7604_v53 }
 0x340   : > { %5236 = vmatmul.mubr.bf16.gmra.mrb[72].mxu1 %v10172_v30  ;;  %v7607_v30 = vld [vmem:[%s10908_s7 + $0xa4] ss:$16 sps:$4 sm:$0xff]  }
 0x341   : > { %5245 = vmatprep.mubr.bf16.mxu1 %v3870_v24 }
 0x342   : > { %5764 = vmatpush1.bf16.msra.mxu0 %v7602_v52 }
 0x343   : > { %5765 = vmatprep.subr.bf16.mxu0 %v7607_v30 }
 0x346   : > { %5766 = vmatpush1.bf16.msra.mxu0 %v7605_v11 }
 0x347   : > { %5767 = vmatprep.subr.bf16.mxu0 %v7610_v57 }
 0x348   : > { %5246 = vmatmul.mubr.bf16.gmra.mrb[76].mxu1 %v3868_v32 }
 0x34a   : > { %5768 = vmatpush1.bf16.msra.mxu0 %v7608_v63 }
 0x34b   : > { %5769 = vmatprep.subr.bf16.mxu0 %v7613_v44 }
 0x34e   : > { %5770 = vmatpush1.bf16.msra.mxu0 %v7611_v10 }
 0x34f   : > { %5771 = vmatprep.subr.bf16.mxu0 %v7616_v36 }
 0x352   : > { %5772 = vmatpush1.bf16.msra.mxu0 %v7614_v2 }
 0x353   : > { %5773 = vmatprep.subr.bf16.mxu0 %v7619_v29 }
 0x356   : > { %5774 = vmatpush1.bf16.msra.mxu0 %v7617_v35 }
 0x357   : > { %5775 = vmatprep.subr.bf16.mxu0 %v7622_v56 }
 0x35a   : > { %5776 = vmatpush1.bf16.msra.mxu0 %v7620_v31 }
 0x35b   : > { %5777 = vmatprep.subr.bf16.mxu0 %v7625_v48 }
 0x35e   : > { %5778 = vmatpush1.bf16.msra.mxu0 %v7623_v1 }
 0x35f   : > { %5779 = vmatprep.subr.bf16.mxu0 %v7628_v23 }
 0x362   : > { %5780 = vmatpush1.bf16.msra.mxu0 %v7626_v27 }
 0x363   : > { %5781 = vmatprep.subr.bf16.mxu0 %v7631_v60 }
 0x366   : > { %5782 = vmatpush1.bf16.msra.mxu0 %v7629_v34 }
 0x367   : > { %5783 = vmatprep.subr.bf16.mxu0 %v7634_v26 }
 0x36a   : > { %5784 = vmatpush1.bf16.msra.mxu0 %v7632_v6 }
 0x36b   : > { %5785 = vmatprep.subr.bf16.mxu0 %v7637_v5 }
 0x36e   : > { %5786 = vmatpush1.bf16.msra.mxu0 %v7635_v59 }
 0x36f   : > { %5796 = vmatprep.subr.bf16.mxu0 %v7640_v62 }
 0x3fb   : > { %v5207_v42 = vpop.f32.mrb[60].mxu1 }
 0x3fc   : > { %v5268_v45 = vmul.f32 %v10632_v12, %v5207_v42  ;;  %v5209_v51 = vpop.f32.mrb[61].mxu1 }
 0x3fd   : > { %v5269_v46 = vmul.f32 %v10635_v47, %v5209_v51  ;;  %v5211_v40 = vpop.f32.mrb[62].mxu1 }
 0x3fe   : > { %v5300_v21 = vadd.f32 %v10638_v14, %v5268_v45  ;;  %v5270_v38 = vmul.f32 %v10632_v12, %v5211_v40  ;;  %v5213_v39 = vpop.f32.mrb[63].mxu1 }
 0x3ff   : > { %v5301_v28 = vadd.f32 %v10641_v0, %v5269_v46  ;;  %v5271_v8 = vmul.f32 %v10635_v47, %v5213_v39 }
 0x400   : > { %v5320_v16 = vmax.f32 %v5300_v21, 0.0  ;;  %v5302_v4 = vadd.f32 %v10638_v14, %v5270_v38 }
 0x401   : > { %v5321_v50 = vmax.f32 %v5301_v28, 0.0  ;;  %v5303_v18 = vadd.f32 %v10641_v0, %v5271_v8 }
 0x402   : > { %v5322_v13 = vmax.f32 %v5302_v4, 0.0 }
 0x403   : > { %v5340_v7 = vmax.f32 %v5320_v16, %v5321_v50  ;;  %v5323_v20 = vmax.f32 %v5303_v18, 0.0  ;;  %v5217_v43 = vpop.f32.mrb[64].mxu1 }
 0x404   : > { %v5272_v3 = vmul.f32 %v10632_v12, %v5217_v43  ;;  %v5219_v17 = vpop.f32.mrb[65].mxu1 }
 0x405   : > { %5350 = vst [vmem:[#allocation3] sm:$0xff] %v5340_v7  ;;  %v5341_v25 = vmax.f32 %v5322_v13, %v5323_v20  ;;  %v5273_v37 = vmul.f32 %v10635_v47, %v5219_v17  ;;  %v5221_v61 = vpop.f32.mrb[66].mxu1 }
 0x406   : > { %v5304_v55 = vadd.f32 %v10638_v14, %v5272_v3  ;;  %v5274_v24 = vmul.f32 %v10632_v12, %v5221_v61  ;;  %v5223_v41 = vpop.f32.mrb[67].mxu1 }
 0x407   : > { %5351 = vst [vmem:[#allocation3 + $0x8] sm:$0xff] %v5341_v25  ;;  %v5305_v32 = vadd.f32 %v10641_v0, %v5273_v37  ;;  %v5275_v58 = vmul.f32 %v10635_v47, %v5223_v41 }
 0x408   : > { %v5324_v19 = vmax.f32 %v5304_v55, 0.0  ;;  %v5306_v54 = vadd.f32 %v10638_v14, %v5274_v24 }
 0x409   : > { %v5325_v15 = vmax.f32 %v5305_v32, 0.0  ;;  %v5307_v53 = vadd.f32 %v10641_v0, %v5275_v58 }
 0x40a   : > { %v5326_v52 = vmax.f32 %v5306_v54, 0.0 }
 0x40b   : > { %v5342_v11 = vmax.f32 %v5324_v19, %v5325_v15  ;;  %v5327_v30 = vmax.f32 %v5307_v53, 0.0  ;;  %v5227_v57 = vpop.f32.mrb[68].mxu1 }
 0x40c   : > { %v5276_v63 = vmul.f32 %v10632_v12, %v5227_v57  ;;  %v5229_v10 = vpop.f32.mrb[69].mxu1 }
 0x40d   : > { %5352 = vst [vmem:[#allocation3 + $0x10] sm:$0xff] %v5342_v11  ;;  %v5343_v44 = vmax.f32 %v5326_v52, %v5327_v30  ;;  %v5277_v36 = vmul.f32 %v10635_v47, %v5229_v10  ;;  %v5231_v2 = vpop.f32.mrb[70].mxu1 }
 0x40e   : > { %v5308_v35 = vadd.f32 %v10638_v14, %v5276_v63  ;;  %v5278_v29 = vmul.f32 %v10632_v12, %v5231_v2  ;;  %v5233_v56 = vpop.f32.mrb[71].mxu1  ;;  %v7644_v2 = vld [vmem:[%s10908_s7 + $0x48] ss:$16 sps:$4 sm:$0xff]  }
 0x40f   : > { %5353 = vst [vmem:[#allocation3 + $0x18] sm:$0xff] %v5343_v44  ;;  %v5309_v31 = vadd.f32 %v10641_v0, %v5277_v36  ;;  %v5279_v1 = vmul.f32 %v10635_v47, %v5233_v56  ;;  %v7641_v44 = vld [vmem:[%s10908_s7 + $0x28] ss:$16 sps:$4 sm:$0xff]   ;;  %v7646_v36 = vld [vmem:[%s10908_s7 + $0x4c] ss:$16 sps:$4 sm:$0xff]  }
 0x410   : > { %v5328_v48 = vmax.f32 %v5308_v35, 0.0  ;;  %v5310_v23 = vadd.f32 %v10638_v14, %v5278_v29  ;;  %v7649_v35 = vld [vmem:[%s10908_s7 + $0x6c] ss:$16 sps:$4 sm:$0xff]   ;;  %v7647_v29 = vld [vmem:[%s10908_s7 + $0x68] ss:$16 sps:$4 sm:$0xff]  }
 0x411   : > { %v5329_v27 = vmax.f32 %v5309_v31, 0.0  ;;  %v5311_v60 = vadd.f32 %v10641_v0, %v5279_v1  ;;  %v7652_v56 = vld [vmem:[%s10908_s7 + $0x8c] ss:$16 sps:$4 sm:$0xff]   ;;  %v7650_v31 = vld [vmem:[%s10908_s7 + $0x88] ss:$16 sps:$4 sm:$0xff]  }
 0x412   : > { %v5330_v34 = vmax.f32 %v5310_v23, 0.0  ;;  %v7655_v1 = vld [vmem:[%s10908_s7 + $0xac] ss:$16 sps:$4 sm:$0xff]  }
 0x413   : > { %v5344_v26 = vmax.f32 %v5328_v48, %v5329_v27  ;;  %v5331_v6 = vmax.f32 %v5311_v60, 0.0  ;;  %v5237_v5 = vpop.f32.mrb[72].mxu1  ;;  %v7653_v48 = vld [vmem:[%s10908_s7 + $0xa8] ss:$16 sps:$4 sm:$0xff]   ;;  %v7658_v23 = vld [vmem:[%s10908_s7 + $0xcc] ss:$16 sps:$4 sm:$0xff]  }
 0x414   : > { %v5280_v59 = vmul.f32 %v10632_v12, %v5237_v5  ;;  %v5239_v62 = vpop.f32.mrb[73].mxu1  ;;  %v7656_v27 = vld [vmem:[%s10908_s7 + $0xc8] ss:$16 sps:$4 sm:$0xff]   ;;  %v7661_v60 = vld [vmem:[%s10908_s7 + $0xec] ss:$16 sps:$4 sm:$0xff]  }
 0x415   : > { %5354 = vst [vmem:[#allocation3 + $0x20] sm:$0xff] %v5344_v26  ;;  %v5345_v9 = vmax.f32 %v5330_v34, %v5331_v6  ;;  %v5281_v22 = vmul.f32 %v10635_v47, %v5239_v62  ;;  %v5241_v42 = vpop.f32.mrb[74].mxu1  ;;  %v7659_v34 = vld [vmem:[%s10908_s7 + $0xe8] ss:$16 sps:$4 sm:$0xff]   ;;  %v7664_v26 = vld [vmem:[%s10908_s7 + $0x10c] ss:$16 sps:$4 sm:$0xff]  }
 0x416   : > { %v5312_v45 = vadd.f32 %v10638_v14, %v5280_v59  ;;  %v5282_v51 = vmul.f32 %v10632_v12, %v5241_v42  ;;  %v5243_v46 = vpop.f32.mrb[75].mxu1  ;;  %v7662_v6 = vld [vmem:[%s10908_s7 + $0x108] ss:$16 sps:$4 sm:$0xff]   ;;  %v7667_v5 = vld [vmem:[%s10908_s7 + $0x12c] ss:$16 sps:$4 sm:$0xff]  }
 0x417   : > { %5355 = vst [vmem:[#allocation3 + $0x28] sm:$0xff] %v5345_v9  ;;  %v5313_v40 = vadd.f32 %v10641_v0, %v5281_v22  ;;  %v5283_v21 = vmul.f32 %v10635_v47, %v5243_v46  ;;  %v7665_v59 = vld [vmem:[%s10908_s7 + $0x128] ss:$16 sps:$4 sm:$0xff]   ;;  %v7670_v62 = vld [vmem:[%s10908_s7 + $0x14c] ss:$16 sps:$4 sm:$0xff]  }
 0x418   : > { %v5332_v38 = vmax.f32 %v5312_v45, 0.0  ;;  %v5314_v39 = vadd.f32 %v10638_v14, %v5282_v51  ;;  %v7668_v9 = vld [vmem:[%s10908_s7 + $0x148] ss:$16 sps:$4 sm:$0xff]   ;;  %v7673_v22 = vld [vmem:[%s10908_s7 + $0x16c] ss:$16 sps:$4 sm:$0xff]  }
 0x419   : > { %v5333_v28 = vmax.f32 %v5313_v40, 0.0  ;;  %v5315_v8 = vadd.f32 %v10641_v0, %v5283_v21  ;;  %v7671_v42 = vld [vmem:[%s10908_s7 + $0x168] ss:$16 sps:$4 sm:$0xff]   ;;  %v7676_v45 = vld [vmem:[%s10908_s7 + $0x18c] ss:$16 sps:$4 sm:$0xff]  }
 0x41a   : > { %v5334_v16 = vmax.f32 %v5314_v39, 0.0  ;;  %v7674_v51 = vld [vmem:[%s10908_s7 + $0x188] ss:$16 sps:$4 sm:$0xff]   ;;  %v7679_v46 = vld [vmem:[%s10908_s7 + $0x1ac] ss:$16 sps:$4 sm:$0xff]  }
 0x41b   : > { %v5346_v4 = vmax.f32 %v5332_v38, %v5333_v28  ;;  %v5335_v50 = vmax.f32 %v5315_v8, 0.0  ;;  %v5247_v18 = vpop.f32.mrb[76].mxu1  ;;  %v7677_v40 = vld [vmem:[%s10908_s7 + $0x1a8] ss:$16 sps:$4 sm:$0xff]   ;;  %v7682_v21 = vld [vmem:[%s10908_s7 + $0x1cc] ss:$16 sps:$4 sm:$0xff]  }
 0x41c   : > { %v5284_v13 = vmul.f32 %v10632_v12, %v5247_v18  ;;  %v5249_v7 = vpop.f32.mrb[77].mxu1  ;;  %v7680_v38 = vld [vmem:[%s10908_s7 + $0x1c8] ss:$16 sps:$4 sm:$0xff]   ;;  %v7685_v39 = vld [vmem:[%s10908_s7 + $0x1ec] ss:$16 sps:$4 sm:$0xff]   ;;  %v7686_v8 = vld [vmem:[%s10911_s10 + $0x40] sm:$0xff]  }
 0x41d   : > { %5356 = vst [vmem:[#allocation3 + $0x30] sm:$0xff] %v5346_v4  ;;  %v5347_v20 = vmax.f32 %v5334_v16, %v5335_v50  ;;  %v5285_v43 = vmul.f32 %v10635_v47, %v5249_v7  ;;  %v5251_v3 = vpop.f32.mrb[78].mxu1  ;;  %v7683_v28 = vld [vmem:[%s10908_s7 + $0x1e8] ss:$16 sps:$4 sm:$0xff]   ;;  %v7687_v16 = vld [vmem:[%s10911_s10] sm:$0xff]   ;;  %v7690_v18 = vld [vmem:[%s10911_s10 + $0x50] sm:$0xff]  }
 0x41e   : > { %v5316_v17 = vadd.f32 %v10638_v14, %v5284_v13  ;;  %v5286_v25 = vmul.f32 %v10632_v12, %v5251_v3  ;;  %v5253_v37 = vpop.f32.mrb[79].mxu1  ;;  %v7688_v4 = vld [vmem:[%s10911_s10 + $0x48] sm:$0xff]   ;;  %v7691_v13 = vld [vmem:[%s10911_s10 + $0x10] sm:$0xff]   ;;  %v7692_v7 = vld [vmem:[%s10911_s10 + $0x58] sm:$0xff]  }
 0x41f   : > { %5357 = vst [vmem:[#allocation3 + $0x38] sm:$0xff] %v5347_v20  ;;  %v5317_v61 = vadd.f32 %v10641_v0, %v5285_v43  ;;  %v5287_v55 = vmul.f32 %v10635_v47, %v5253_v37  ;;  %v7638_v47 = vld [vmem:[%s10908_s7 + $0x8] ss:$16 sps:$4 sm:$0xff]   ;;  %v7694_v43 = vld [vmem:[%s10911_s10 + $0x60] sm:$0xff]   ;;  %v7698_v37 = vld [vmem:[%s10911_s10 + $0x70] sm:$0xff]  }
 0x420   : > { %v5336_v24 = vmax.f32 %v5316_v17, 0.0  ;;  %v5318_v41 = vadd.f32 %v10638_v14, %v5286_v25  ;;  %v7689_v50 = vld [vmem:[%s10911_s10 + $0x8] sm:$0xff]   ;;  %v7693_v20 = vld [vmem:[%s10911_s10 + $0x18] sm:$0xff]   ;;  %v7695_v3 = vld [vmem:[%s10911_s10 + $0x20] sm:$0xff]  }
 0x421   : > { %v5337_v32 = vmax.f32 %v5317_v61, 0.0  ;;  %v5319_v58 = vadd.f32 %v10641_v0, %v5287_v55  ;;  %v7643_v0 = vld [vmem:[%s10908_s7 + $0x2c] ss:$16 sps:$4 sm:$0xff]   ;;  %v7699_v61 = vld [vmem:[%s10911_s10 + $0x30] sm:$0xff]  }
 0x422   : > { %v5338_v19 = vmax.f32 %v5318_v41, 0.0  ;;  %v7696_v17 = vld [vmem:[%s10911_s10 + $0x68] sm:$0xff]   ;;  %v7700_v55 = vld [vmem:[%s10911_s10 + $0x78] sm:$0xff]   ;;  %v7702_v41 = vld [vmem:[%s10911_s10 + $0xc0] sm:$0xff]  }
 0x423   : > { %v5348_v54 = vmax.f32 %v5336_v24, %v5337_v32  ;;  %v5339_v15 = vmax.f32 %v5319_v58, 0.0  ;;  %v7697_v25 = vld [vmem:[%s10911_s10 + $0x28] sm:$0xff]   ;;  %v7701_v24 = vld [vmem:[%s10911_s10 + $0x38] sm:$0xff]   ;;  %v5837_v32 = vld [vmem:[%s10909_s8] sm:$0xf] }
 0x424   : > { %v5863_v58 = vld [vmem:[%s10910_s9] sm:$0xf] }
 0x425   : > { %5358 = vst [vmem:[#allocation3 + $0x40] sm:$0xff] %v5348_v54  ;;  %v5349_v53 = vmax.f32 %v5338_v19, %v5339_v15  ;;  %v5842_v19 = vrot.slane %v5837_v32, %v10998_v49  ;;  %v5846_v54 = vrot.slane %v5837_v32, %v10999_v33  ;;  %v5868_v15 = vrot.slane %v5863_v58, %v10998_v49  ;;  %v7704_v49 = vld [vmem:[%s10911_s10 + $0xc8] sm:$0xff]  }
 0x427   : > { %5359 = vst [vmem:[#allocation3 + $0x48] sm:$0xff] %v5349_v53 }
 0x42c   : > { %v5360_v52 = vld [vmem:[#allocation3] ss:$10 sm:$0xff]  ;;  %v5362_v12 = vld [vmem:[#allocation3 + $0x1] ss:$10 sm:$0xff] }
 0x42d   : > { %v5363_v57 = vmax.f32 %v5360_v52, %v5362_v12  ;;  %v5872_v52 = vrot.slane %v5863_v58, %v10999_v33  ;;  %v7705_v33 = vld [vmem:[%s10911_s10 + $0x88] sm:$0xff]  }
 0x42e   : > { %v5365_v11 = vld [vmem:[#allocation3 + $0x2] ss:$10 sm:$0xff]  ;;  %v5367_v30 = vld [vmem:[#allocation3 + $0x3] ss:$10 sm:$0xff] }
 0x42f   : > { %v5368_v63 = vmax.f32 %v5365_v11, %v5367_v30  ;;  %v10686_v14 = vpack.c.bf16 %v5363_v57, %v5363_v57 }
 0x431   : > { %v5370_v10 = vpack.c.bf16 %v5368_v63, %v5368_v63 }
 0x433   : > { %5787 = vmatprep.mubr.bf16.mxu0 %v5370_v10 }
 0x434   : > { %5788 = vmatmul.mubr.bf16.vlgmr.msra.gmra.mrb[120].mxu0 %v10686_v14 }
 0x435   : > { %5797 = vmatpush1.bf16.msra.mxu0 %v7638_v47  ;;  %5828 = vmatprep.mubr.bf16.mxu0 %v5370_v10 }
 0x436   : > { %5798 = vmatprep.subr.bf16.mxu0 %v7643_v0 }
 0x439   : > { %5799 = vmatpush1.bf16.msra.mxu0 %v7641_v44 }
 0x43a   : > { %5800 = vmatprep.subr.bf16.mxu0 %v7646_v36  ;;  %v7703_v36 = vld [vmem:[%s10911_s10 + $0x80] sm:$0xff]  }
 0x43d   : > { %5801 = vmatpush1.bf16.msra.mxu0 %v7644_v2 }
 0x43e   : > { %5802 = vmatprep.subr.bf16.mxu0 %v7649_v35  ;;  %v7706_v35 = vld [vmem:[%s10911_s10 + $0xd0] sm:$0xff]  }
 0x441   : > { %5803 = vmatpush1.bf16.msra.mxu0 %v7647_v29  ;;  %v7707_v29 = vld [vmem:[%s10911_s10 + $0x90] sm:$0xff]  }
 0x442   : > { %5804 = vmatprep.subr.bf16.mxu0 %v7652_v56  ;;  %v7708_v56 = vld [vmem:[%s10911_s10 + $0xd8] sm:$0xff]  }
 0x445   : > { %5805 = vmatpush1.bf16.msra.mxu0 %v7650_v31  ;;  %v7709_v31 = vld [vmem:[%s10911_s10 + $0x98] sm:$0xff]  }
 0x446   : > { %5806 = vmatprep.subr.bf16.mxu0 %v7655_v1  ;;  %v7710_v1 = vld [vmem:[%s10911_s10 + $0xe0] sm:$0xff]  }
 0x449   : > { %5807 = vmatpush1.bf16.msra.mxu0 %v7653_v48  ;;  %v7711_v48 = vld [vmem:[%s10911_s10 + $0xa0] sm:$0xff]  }
 0x44a   : > { %5808 = vmatprep.subr.bf16.mxu0 %v7658_v23  ;;  %v7712_v23 = vld [vmem:[%s10911_s10 + $0xe8] sm:$0xff]  }
 0x44d   : > { %5809 = vmatpush1.bf16.msra.mxu0 %v7656_v27  ;;  %v7713_v27 = vld [vmem:[%s10911_s10 + $0xa8] sm:$0xff]  }
 0x44e   : > { %5810 = vmatprep.subr.bf16.mxu0 %v7661_v60  ;;  %v7714_v60 = vld [vmem:[%s10911_s10 + $0xf0] sm:$0xff]  }
 0x451   : > { %5811 = vmatpush1.bf16.msra.mxu0 %v7659_v34  ;;  %v7715_v34 = vld [vmem:[%s10911_s10 + $0xb0] sm:$0xff]  }
 0x452   : > { %5812 = vmatprep.subr.bf16.mxu0 %v7664_v26  ;;  %v7716_v26 = vld [vmem:[%s10911_s10 + $0xf8] sm:$0xff]  }
 0x455   : > { %5813 = vmatpush1.bf16.msra.mxu0 %v7662_v6  ;;  %v7717_v6 = vld [vmem:[%s10911_s10 + $0xb8] sm:$0xff]  }
 0x456   : > { %5814 = vmatprep.subr.bf16.mxu0 %v7667_v5  ;;  %v11000_v5 = vld [vmem:[#allocation6_spill] sm:$0xff] }
 0x459   : > { %5815 = vmatpush1.bf16.msra.mxu0 %v7665_v59  ;;  %v5850_v59 = vrot.slane %v5837_v32, %v11000_v5 }
 0x45a   : > { %5816 = vmatprep.subr.bf16.mxu0 %v7670_v62  ;;  %v11001_v62 = vld [vmem:[#allocation7_spill] sm:$0xff] }
 0x45d   : > { %5817 = vmatpush1.bf16.msra.mxu0 %v7668_v9  ;;  %v5854_v9 = vrot.slane %v5837_v32, %v11001_v62 }
 0x45e   : > { %5818 = vmatprep.subr.bf16.mxu0 %v7673_v22  ;;  %v5876_v22 = vrot.slane %v5863_v58, %v11000_v5 }
 0x461   : > { %5819 = vmatpush1.bf16.msra.mxu0 %v7671_v42 }
 0x462   : > { %5820 = vmatprep.subr.bf16.mxu0 %v7676_v45  ;;  %v5880_v45 = vrot.slane %v5863_v58, %v11001_v62 }
 0x465   : > { %5821 = vmatpush1.bf16.msra.mxu0 %v7674_v51 }
 0x466   : > { %5822 = vmatprep.subr.bf16.mxu0 %v7679_v46 }
 0x469   : > { %5823 = vmatpush1.bf16.msra.mxu0 %v7677_v40 }
 0x46a   : > { %5824 = vmatprep.subr.bf16.mxu0 %v7682_v21 }
 0x46d   : > { %5825 = vmatpush1.bf16.msra.mxu0 %v7680_v38 }
 0x46e   : > { %5826 = vmatprep.subr.bf16.mxu0 %v7685_v39 }
 0x471   : > { %5827 = vmatpush1.bf16.msra.mxu0 %v7683_v28 }
 0x472   : > { %6860 = vmatprep.subr.bf16.mxu0 %v7686_v8 }
 0x474   : > { %5829 = vmatmul.mubr.bf16.vlgmr.msra.gmra.mrb[124].mxu0 %v10686_v14 }
 0x475   : > { %6861 = vmatpush3.bf16.msra.mxu0 %v7687_v16 }
 0x476   : > { %6862 = vmatprep.subr.bf16.mxu0 %v7688_v4 }
 0x479   : > { %6863 = vmatpush3.bf16.msra.mxu0 %v7689_v50 }
 0x47a   : > { %6864 = vmatprep.subr.bf16.mxu0 %v7690_v18 }
 0x47d   : > { %6865 = vmatpush3.bf16.msra.mxu0 %v7691_v13 }
 0x47e   : > { %6866 = vmatprep.subr.bf16.mxu0 %v7692_v7 }
 0x481   : > { %6867 = vmatpush3.bf16.msra.mxu0 %v7693_v20 }
 0x482   : > { %6868 = vmatprep.subr.bf16.mxu0 %v7694_v43 }
 0x485   : > { %6869 = vmatpush3.bf16.msra.mxu0 %v7695_v3  ;;  %v6824_v3 = vld [vmem:[%s10912_s11] ss:$0 sm:$0xff] }
 0x486   : > { %6870 = vmatprep.subr.bf16.mxu0 %v7696_v17 }
 0x489   : > { %6871 = vmatpush3.bf16.msra.mxu0 %v7697_v25 }
 0x48a   : > { %6872 = vmatprep.subr.bf16.mxu0 %v7698_v37 }
 0x48d   : > { %6873 = vmatpush3.bf16.msra.mxu0 %v7699_v61 }
 0x48e   : > { %6874 = vmatprep.subr.bf16.mxu0 %v7700_v55 }
 0x491   : > { %6875 = vmatpush3.bf16.msra.mxu0 %v7701_v24 }
 0x492   : > { %6882 = vmatprep.subr.bf16.mxu0 %v7702_v41 }
 0x507   : > { %v5789_v53 = vpop.f32.mrb[120].mxu0 }
 0x508   : > { %v5859_v12 = vmul.f32 %v5842_v19, %v5789_v53  ;;  %v5791_v11 = vpop.f32.mrb[121].mxu0 }
 0x509   : > { %v5860_v30 = vmul.f32 %v5846_v54, %v5791_v11  ;;  %v5793_v57 = vpop.f32.mrb[122].mxu0 }
 0x50a   : > { %v5885_v63 = vadd.f32 %v5868_v15, %v5859_v12  ;;  %v5794_v10 = vpop.f32.mrb[123].mxu0 }
 0x50b   : > { %v5886_v47 = vadd.f32 %v5872_v52, %v5860_v30 }
 0x50c   : > { %v5889_v14 = vmax.f32 %v5885_v63, 0.0 }
 0x50d   : > { %v5890_v0 = vmax.f32 %v5886_v47, 0.0 }
 0x50e   : > { %v5893_v2 = vpack.c.bf16 %v5889_v14, %v5889_v14 }
 0x50f   : > { %v5894_v44 = vpack.c.bf16 %v5890_v0, %v5890_v0 }
 0x511   : > { %6192 = vmatprep.mubr.bf16.mxu0 %v5894_v44 }
 0x512   : > { %6193 = vmatmul.mubr.bf16.vlgmr.msra.gmra.mrb[128].mxu0 %v5893_v2 }
 0x513   : > { %6883 = vmatpush3.bf16.msra.mxu0 %v7703_v36 }
 0x514   : > { %6884 = vmatprep.subr.bf16.mxu0 %v7704_v49 }
 0x517   : > { %6885 = vmatpush3.bf16.msra.mxu0 %v7705_v33 }
 0x518   : > { %6886 = vmatprep.subr.bf16.mxu0 %v7706_v35 }
 0x51b   : > { %6887 = vmatpush3.bf16.msra.mxu0 %v7707_v29 }
 0x51c   : > { %6888 = vmatprep.subr.bf16.mxu0 %v7708_v56 }
 0x51f   : > { %6889 = vmatpush3.bf16.msra.mxu0 %v7709_v31 }
 0x520   : > { %6890 = vmatprep.subr.bf16.mxu0 %v7710_v1 }
 0x523   : > { %6891 = vmatpush3.bf16.msra.mxu0 %v7711_v48 }
 0x524   : > { %6892 = vmatprep.subr.bf16.mxu0 %v7712_v23 }
 0x527   : > { %6893 = vmatpush3.bf16.msra.mxu0 %v7713_v27 }
 0x528   : > { %6894 = vmatprep.subr.bf16.mxu0 %v7714_v60 }
 0x52b   : > { %6895 = vmatpush3.bf16.msra.mxu0 %v7715_v34 }
 0x52c   : > { %6896 = vmatprep.subr.bf16.mxu0 %v7716_v26 }
 0x52f   : > { %6897 = vmatpush3.bf16.msra.mxu0 %v7717_v6 }
 0x547   : > { %v5830_v42 = vpop.f32.mrb[124].mxu0 }
 0x548   : > { %v5861_v51 = vmul.f32 %v5850_v59, %v5830_v42  ;;  %v5832_v46 = vpop.f32.mrb[125].mxu0 }
 0x549   : > { %v5862_v40 = vmul.f32 %v5854_v9, %v5832_v46  ;;  %v5834_v21 = vpop.f32.mrb[126].mxu0 }
 0x54a   : > { %v5887_v38 = vadd.f32 %v5876_v22, %v5861_v51  ;;  %v5835_v39 = vpop.f32.mrb[127].mxu0 }
 0x54b   : > { %v5888_v28 = vadd.f32 %v5880_v45, %v5862_v40 }
 0x54c   : > { %v5891_v8 = vmax.f32 %v5887_v38, 0.0 }
 0x54d   : > { %v5892_v16 = vmax.f32 %v5888_v28, 0.0 }
 0x54e   : > { %v5895_v50 = vpack.c.bf16 %v5891_v8, %v5891_v8 }
 0x54f   : > { %v5896_v4 = vpack.c.bf16 %v5892_v16, %v5892_v16 }
 0x551   : > { %6232 = vmatprep.mubr.bf16.mxu0 %v5896_v4 }
 0x552   : > { %6233 = vmatmul.mubr.bf16.vlgmr.msra.gmra.mrb[132].mxu0 %v5895_v50 }
 0x5e5   : > { %v6876_v18 = vpop.f32.mrb[128].mxu0 }
 0x5e6   : > { %v6877_v13 = vpop.f32.mrb[129].mxu0 }
 0x5e7   : > { %v6878_v7 = vadd.f32 %v6877_v13, %v6876_v18  ;;  %v6879_v20 = vpop.f32.mrb[130].mxu0 }
 0x5e8   : > { %v6880_v43 = vpop.f32.mrb[131].mxu0 }
 0x5e9   : > { %v6195_v37 = vadd.f32 %v6878_v7, %v6824_v3 }
 0x625   : > { %v6898_v17 = vpop.f32.mrb[132].mxu0 }
 0x626   : > { %v6899_v25 = vpop.f32.mrb[133].mxu0 }
 0x627   : > { %v6900_v61 = vadd.f32 %v6899_v25, %v6898_v17  ;;  %v6901_v55 = vpop.f32.mrb[134].mxu0 }
 0x628   : > { %v6902_v24 = vpop.f32.mrb[135].mxu0 }
 0x629   : > { %v6235_v41 = vadd.f32 %v6900_v61, %v6195_v37 }
 0x62b   : > { %6240 = vst [vmem:[%s416_s14] sm:$0xff] %v6235_v41 }
 0x62c PF: > { %s22_s21 = sadd.s32 1, %s7734_s21  }
 0x62d   : > { %p19_p5 = scmp.ge.s32.totalorder %s22_s21, 4  }
 0x62f   :  { %21 = sbr.rel (!%p19_p5) target bundleno = 1 (0x1), region = 101 }

// kernel: tile.56
= control target key start
LH: loop header
LB: loop body
LE: loop exit
PB: predicated region body
PF: predicated region fallthrough
CT: control target
= control target key end

     0   :  { %s22_s0 = inlined_call_operand.vmem [shape: f32[50], index: 0, kind: input, shape index: {}]   ;;  %s23_s1 = inlined_call_operand.vmem [shape: f32[2,50], index: 1, kind: output, shape index: {}]  }
   0x1   :  { %v4_v0 = vld [vmem:[%s22_s0] ss:$0 sm:$0xff] }
   0x2   :  { %5 = vst [vmem:[%s23_s1] sm:$0x3] %v4_v0 }

// kernel: tile.57
= control target key start
LH: loop header
LB: loop body
LE: loop exit
PB: predicated region body
PF: predicated region fallthrough
CT: control target
= control target key end

     0   :  { %vm7_vm0 = vcmask 408576   ;;  %vm13_vm1 = vcmask 818576   ;;  %s39_s0 = inlined_call_operand.vmem [shape: f32[2,50], index: 0, kind: input, shape index: {}]   ;;  %s40_s1 = inlined_call_operand.vmem [shape: f32[100], index: 1, kind: output, shape index: {}]  }
   0x1   :  { %v4_v0 = vld [vmem:[%s39_s0] sm:$0x3]  ;;  %s22_s0 = smov 50  }
   0x2   :  { %5 = vst [vmem:[#allocation1] sm:$0x3] %v4_v0 }
   0x9   :  { %v10_v1 = vld [vmem:[#allocation1 + $0x1] sm:$0x1]   ;;  %v6_v2 = vld [vmem:[#allocation1] sm:$0x1]  }
   0xa   :  { %11 = vrot.lane.b32.xlu0 %v10_v1, %s22_s0  ;;  %8 = vst.msk [vmem:[#allocation0] sm:$0x1] %vm7_vm0, %v6_v2  }
  0x7c   :  { %v12_v3 = vpop.permute.xlu0 %11  }
  0x7d   :  { %14 = vst.msk [vmem:[#allocation0] sm:$0x1] %vm13_vm1, %v12_v3  }
  0x84   :  { %v18_v4 = vld [vmem:[#allocation0] sm:$0x1] }
  0x85   :  { %20 = vst [vmem:[%s40_s1] sm:$0x1] %v18_v4 }

// kernel: tile.38
= control target key start
LH: loop header
LB: loop body
LE: loop exit
PB: predicated region body
PF: predicated region fallthrough
CT: control target
= control target key end

     0   :  { %s22_s0 = inlined_call_operand.vmem [shape: f32[20], index: 0, kind: input, shape index: {}]   ;;  %s23_s1 = inlined_call_operand.vmem [shape: f32[8,20], index: 1, kind: output, shape index: {}]  }
   0x1   :  { %v4_v0 = vld [vmem:[%s22_s0] ss:$0 sm:$0xff] }
   0x2   :  { %5 = vst [vmem:[%s23_s1] sm:$0xff] %v4_v0 }

// kernel: tile.61
= control target key start
LH: loop header
LB: loop body
LE: loop exit
PB: predicated region body
PF: predicated region fallthrough
CT: control target
= control target key end

     0   :  { %s22_s0 = inlined_call_operand.vmem [shape: f32[128], index: 0, kind: input, shape index: {}]   ;;  %s23_s1 = inlined_call_operand.vmem [shape: f32[2,128], index: 1, kind: output, shape index: {}]  }
   0x1   :  { %v4_v0 = vld [vmem:[%s22_s0] ss:$0 sm:$0xff] }
   0x2   :  { %5 = vst [vmem:[%s23_s1] sm:$0x3] %v4_v0 }

// kernel: tile.39
= control target key start
LH: loop header
LB: loop body
LE: loop exit
PB: predicated region body
PF: predicated region fallthrough
CT: control target
= control target key end

     0   :  { %vm9_vm0 = vcmask 64512   ;;  %s76_s12 = smov 120   ;;  %s77_s13 = smov 80   ;;  %vm3_vm1 = vcmask 162816   ;;  %vm13_vm2 = vcmask 97280   ;;  %vm16_vm3 = vcmask 1048512   ;;  %s123_s0 = inlined_call_operand.vmem [shape: f32[8,20], index: 0, kind: input, shape index: {}]   ;;  %s124_s1 = inlined_call_operand.vmem [shape: f32[160], index: 1, kind: output, shape index: {}]  }
   0x1   :  { %v61_v0 = vld [vmem:[%s123_s0 + $0x6] sm:$0x1]   ;;  %v64_v3 = vld [vmem:[%s123_s0 + $0x4] sm:$0x1]   ;;  %v63_v4 = vld [vmem:[%s123_s0 + $0x5] sm:$0x1]  }
   0x2   :  { %v62_v1 = vld [vmem:[%s123_s0 + $0x6] sm:$0x1]   ;;  %26 = vrot.lane.b32.xlu1 %v64_v3, %s77_s13  ;;  %v65_v5 = vld [vmem:[%s123_s0 + $0x3] sm:$0x1]   ;;  %v2_v6 = vld [vmem:[%s123_s0] sm:$0x1]  }
   0x3   :  { %v10_v2 = vsel %vm9_vm0, %v62_v1, %v61_v0  ;;  %4 = vst.msk [vmem:[#allocation0] sm:$0x1] %vm3_vm1, %v2_v6   ;;  %s78_s20 = smov 100   ;;  %s79_s21 = smov 60   ;;  %v66_v7 = vld [vmem:[%s123_s0 + $0x2] sm:$0x1]  }
   0x4   :  { %11 = vrot.lane.b32.xlu0 %v10_v2, %s76_s12  ;;  %v67_v8 = vld [vmem:[%s123_s0 + $0x1] sm:$0x1]   ;;  %s80_s26 = smov 40   ;;  %s81_s27 = smov 20   ;;  %v68_v9 = vld [vmem:[%s123_s0 + $0x7] sm:$0x1]  }
   0x5   :  { %s82_s0 = smov 12   ;;  %vm22_vm4 = vcmask 982816   ;;  %vm28_vm5 = vcmask 818816   ;;  %vm34_vm6 = vcmask 654816   ;;  %vm40_vm7 = vcmask 490816  }
   0x6   :  { %32 = vrot.lane.b32.xlu1 %v65_v5, %s79_s21  ;;  %vm46_vm8 = vcmask 326816   ;;  %vm52_vm9 = vcmask 261216  }
   0x8   :  { %20 = vrot.lane.b32.xlu0 %v63_v4, %s78_s20 }
   0xa   :  { %44 = vrot.lane.b32.xlu1 %v67_v8, %s81_s27 }
   0xc   :  { %38 = vrot.lane.b32.xlu0 %v66_v7, %s80_s26 }
  0x10   :  { %50 = vrot.lane.b32.xlu0 %v68_v9, %s82_s0 }
  0x74   :  { %v27_v11 = vpop.permute.xlu1 %26  }
  0x76   :  { %v12_v10 = vpop.permute.xlu0 %11  }
  0x77   :  { %15 = vst.msk [vmem:[#allocation0 + $0x1] sm:$0x1] %vm13_vm2, %v12_v10  }
  0x78   :  { %17 = vst.msk [vmem:[#allocation0] sm:$0x1] %vm16_vm3, %v12_v10   ;;  %v33_v13 = vpop.permute.xlu1 %32  }
  0x7a   :  { %v21_v12 = vpop.permute.xlu0 %20  }
  0x7b   :  { %23 = vst.msk [vmem:[#allocation0] sm:$0x1] %vm22_vm4, %v21_v12  }
  0x7c   :  { %29 = vst.msk [vmem:[#allocation0] sm:$0x1] %vm28_vm5, %v27_v11   ;;  %v45_v15 = vpop.permute.xlu1 %44  }
  0x7d   :  { %35 = vst.msk [vmem:[#allocation0] sm:$0x1] %vm34_vm6, %v33_v13  }
  0x7e   :  { %v39_v14 = vpop.permute.xlu0 %38  }
  0x7f   :  { %41 = vst.msk [vmem:[#allocation0] sm:$0x1] %vm40_vm7, %v39_v14  }
  0x80   :  { %47 = vst.msk [vmem:[#allocation0] sm:$0x1] %vm46_vm8, %v45_v15  }
  0x82   :  { %v51_v16 = vpop.permute.xlu0 %50  }
  0x83   :  { %54 = vst.msk [vmem:[#allocation0 + $0x1] sm:$0x1] %vm52_vm9, %v51_v16  }
  0x8a   :  { %v58_v17 = vld [vmem:[#allocation0] sm:$0x3] }
  0x8b   :  { %60 = vst [vmem:[%s124_s1] sm:$0x3] %v58_v17 }

// kernel: lenet_forward.1
= control target key start
LH: loop header
LB: loop body
LE: loop exit
PB: predicated region body
PF: predicated region fallthrough
CT: control target
= control target key end

     0   :  { %s7802_s21 = smov 0   ;;  %s10901_s0 = inlined_call_operand.vmem [shape: bf16[160,196], index: 0, kind: input, shape index: {}]   ;;  %s10902_s1 = inlined_call_operand.vmem [shape: bf16[196,2304], index: 1, kind: input, shape index: {}]   ;;  %s10903_s2 = inlined_call_operand.vmem [shape: f32[1,2304], index: 2, kind: input, shape index: {}]   ;;  %s10904_s3 = inlined_call_operand.vmem [shape: f32[1,2304], index: 3, kind: input, shape index: {}]   ;;  %s10905_s4 = inlined_call_operand.vmem [shape: bf16[1280,256], index: 4, kind: input, shape index: {}]   ;;  %s10906_s5 = inlined_call_operand.vmem [shape: f32[1,256], index: 5, kind: input, shape index: {}]   ;;  %s10907_s6 = inlined_call_operand.vmem [shape: f32[1,256], index: 6, kind: input, shape index: {}]   ;;  %s10908_s7 = inlined_call_operand.vmem [shape: bf16[256,512], index: 7, kind: input, shape index: {}]   ;;  %s10909_s8 = inlined_call_operand.vmem [shape: f32[1,512], index: 8, kind: input, shape index: {}]   ;;  %s10910_s9 = inlined_call_operand.vmem [shape: f32[1,512], index: 9, kind: input, shape index: {}]   ;;  %s10911_s10 = inlined_call_operand.vmem [shape: bf16[512,128], index: 10, kind: input, shape index: {}]   ;;  %s10912_s11 = inlined_call_operand.vmem [shape: f32[1,128], index: 11, kind: input, shape index: {}]   ;;  %s10913_s12 = inlined_call_operand.vmem [shape: f32[16,128], index: 12, kind: output, shape index: {}]  }
   0x1 LB: > { %s7808_s22 = sadd.s32 4294967295, %s7734_s21   ;;  %p6298_p0 = scmp.ge.s32.totalorder %s7734_s21, 1  ;;  %s7734_s21 = sphi %s7802_s21, %s22_s21  }
   0x2   : > { %p364_p1 = scmp.lt.s32.totalorder %s7734_s21, 3 }
   0x4   : > { %p365_p2 = pnand %p6298_p0, %p364_p1 }
   0x6   : > { %368 = sbr.rel (%p365_p2) target bundleno = 1580 (0x62c), region = 68 }
   0xd   : > { %v6993_v0 = vld [vmem:[%s10902_s1 + $0x4] ss:$72 sps:$4 sm:$0xff]   ;;  %s406_s25 = smul.u32 10, %s7808_s22  ;;  %v6995_v1 = vld [vmem:[%s10902_s1] ss:$72 sps:$4 sm:$0xff]   ;;  %vm1823_vm0 = vcmask 556032  }
   0xe   : > { %1894 = vmatprep.subr.bf16.mxu0 %v6993_v0  ;;  %v6996_v2 = vld [vmem:[%s10902_s1 + $0x94] ss:$72 sps:$4 sm:$0xff]   ;;  %v6998_v3 = vld [vmem:[%s10902_s1 + $0x90] ss:$72 sps:$4 sm:$0xff]   ;;  %v6999_v4 = vld [vmem:[%s10902_s1 + $0x124] ss:$72 sps:$4 sm:$0xff]  }
   0xf   : > { %1895 = vmatpush1.bf16.msra.mxu0 %v6995_v1  ;;  %p407_p3 = scmp.lt.s32.totalorder %s406_s25, 19  ;;  %v7001_v5 = vld [vmem:[%s10902_s1 + $0x120] ss:$72 sps:$4 sm:$0xff]   ;;  %v7002_v6 = vld [vmem:[%s10902_s1 + $0x1b4] ss:$72 sps:$4 sm:$0xff]   ;;  %vm1839_vm1 = vcmask 1041408  }
  0x10   : > { %1896 = vmatprep.subr.bf16.mxu0 %v6996_v2  ;;  %v7004_v7 = vld [vmem:[%s10902_s1 + $0x1b0] ss:$72 sps:$4 sm:$0xff]   ;;  %v7005_v8 = vld [vmem:[%s10902_s1 + $0x244] ss:$72 sps:$4 sm:$0xff]   ;;  %v7007_v9 = vld [vmem:[%s10902_s1 + $0x240] ss:$72 sps:$4 sm:$0xff]  }
  0x11   : > { %s11003_s25 = smov (!%p407_p3, %s406_s25), 19  ;;  %v7008_v10 = vld [vmem:[%s10902_s1 + $0x2d4] ss:$72 sps:$4 sm:$0xff]   ;;  %v7010_v12 = vld [vmem:[%s10902_s1 + $0x2d0] ss:$72 sps:$4 sm:$0xff]   ;;  %vm3734_vm3 = vcmask 1046528  }
  0x12   : > { %s6859_s24 = sshll.u32 %s11003_s25, 3  ;;  %v7011_v13 = vld [vmem:[%s10902_s1 + $0x364] ss:$72 sps:$4 sm:$0xff]   ;;  %v7013_v14 = vld [vmem:[%s10902_s1 + $0x360] ss:$72 sps:$4 sm:$0xff]   ;;  %vm3848_vm5 = vcmask 1045504  }
  0x13   : > { %1897 = vmatpush1.bf16.msra.mxu0 %v6998_v3  ;;  %s7843_s30 = scalar_lea.vmem %s10901_s0, %s6859_s24  ;;  %v7014_v15 = vld [vmem:[%s10902_s1 + $0x3f4] ss:$72 sps:$4 sm:$0xff]   ;;  %v7016_v16 = vld [vmem:[%s10902_s1 + $0x3f0] ss:$72 sps:$4 sm:$0xff]   ;;  %v7017_v17 = vld [vmem:[%s10902_s1 + $0x484] ss:$72 sps:$4 sm:$0xff]  }
  0x14   : > { %1898 = vmatprep.subr.bf16.mxu0 %v6999_v4  ;;  %v7852_v11 = vld [vmem:[%s7843_s30 + $0x4] ss:$8 sps:$4 sm:$0xff]   ;;  %v7019_v18 = vld [vmem:[%s10902_s1 + $0x480] ss:$72 sps:$4 sm:$0xff]   ;;  %v7020_v19 = vld [vmem:[%s10902_s1 + $0x514] ss:$72 sps:$4 sm:$0xff]  }
  0x15   : > { %6547 = vmatprep.mubr.msk.bf16.mxu0 %vm1823_vm0, %v7852_v11  ;;  %6565 = vmatprep.mubr.msk.bf16.mxu1 %vm1823_vm0, %v7852_v11  ;;  %v7022_v20 = vld [vmem:[%s10902_s1 + $0x510] ss:$72 sps:$4 sm:$0xff]   ;;  %v7023_v21 = vld [vmem:[%s10902_s1 + $0x5a4] ss:$72 sps:$4 sm:$0xff]   ;;  %v7025_v22 = vld [vmem:[%s10902_s1 + $0x5a0] ss:$72 sps:$4 sm:$0xff]  }
  0x16   : > { %v7026_v23 = vld [vmem:[%s10902_s1 + $0x634] ss:$72 sps:$4 sm:$0xff]   ;;  %v644_v24 = vld [vmem:[%s10902_s1 + $0x6c0] sm:$0x33]  ;;  %v7028_v27 = vld [vmem:[%s10902_s1 + $0x630] ss:$72 sps:$4 sm:$0xff]  }
  0x17   : > { %1899 = vmatpush1.bf16.msra.mxu0 %v7001_v5  ;;  %v7087_v25 = vld [vmem:[%s10902_s1 + $0x1c] ss:$72 sps:$4 sm:$0xff]   ;;  %v7089_v26 = vld [vmem:[%s10902_s1 + $0x18] ss:$72 sps:$4 sm:$0xff]   ;;  %v6529_v28 = vcombine.high %v644_v24, %v644_v24  ;;  %v6528_v29 = vcombine.low %v644_v24, %v644_v24  ;;  %v7093_v30 = vld [vmem:[%s10902_s1 + $0xac] ss:$72 sps:$4 sm:$0xff]  }
  0x18   : > { %1900 = vmatprep.subr.bf16.mxu0 %v7002_v6  ;;  %2143 = vmatprep.subr.bf16.mxu1 %v7087_v25  ;;  %v7095_v31 = vld [vmem:[%s10902_s1 + $0xa8] ss:$72 sps:$4 sm:$0xff]   ;;  %v7099_v32 = vld [vmem:[%s10902_s1 + $0x13c] ss:$72 sps:$4 sm:$0xff]   ;;  %v7036_v34 = vld [vmem:[%s10902_s1 + $0xc] ss:$72 sps:$4 sm:$0xff]  }
  0x19   : > { %2144 = vmatpush1.bf16.msra.mxu1 %v7089_v26  ;;  %v1841_v33 = vsel %vm1839_vm1, %v6528_v29, 0  ;;  %v7101_v35 = vld [vmem:[%s10902_s1 + $0x138] ss:$72 sps:$4 sm:$0xff]   ;;  %v7105_v37 = vld [vmem:[%s10902_s1 + $0x1cc] ss:$72 sps:$4 sm:$0xff]   ;;  %p413_p4 = scmp.lt.s32.totalorder %s7808_s22, 1 }
  0x1a   : > { %2145 = vmatprep.subr.bf16.mxu1 %v7093_v30  ;;  %v7924_v36 = vld [vmem:[%s7843_s30] ss:$8 sps:$4 sm:$0xff]   ;;  %v7933_v39 = vld [vmem:[%s7843_s30 + $0x14] ss:$8 sps:$4 sm:$0xff]   ;;  %v7963_v48 = vld [vmem:[%s7843_s30 + $0x10] ss:$8 sps:$4 sm:$0xff]  }
  0x1b   : > { %1901 = vmatpush1.bf16.msra.mxu0 %v7004_v7  ;;  %v7034_v38 = vld [vmem:[%s10902_s1 + $0x8] ss:$72 sps:$4 sm:$0xff]   ;;  %v7039_v40 = vld [vmem:[%s10902_s1 + $0x9c] ss:$72 sps:$4 sm:$0xff]   ;;  %v7037_v43 = vld [vmem:[%s10902_s1 + $0x98] ss:$72 sps:$4 sm:$0xff]  }
  0x1c   : > { %1902 = vmatprep.subr.bf16.mxu0 %v7005_v8  ;;  %v7107_v41 = vld [vmem:[%s10902_s1 + $0x1c8] ss:$72 sps:$4 sm:$0xff]   ;;  %v7111_v42 = vld [vmem:[%s10902_s1 + $0x25c] ss:$72 sps:$4 sm:$0xff]   ;;  %v7042_v44 = vld [vmem:[%s10902_s1 + $0x12c] ss:$72 sps:$4 sm:$0xff]  }
  0x1d   : > { %2146 = vmatpush1.bf16.msra.mxu1 %v7095_v31  ;;  %v7113_v45 = vld [vmem:[%s10902_s1 + $0x258] ss:$72 sps:$4 sm:$0xff]   ;;  %v7040_v46 = vld [vmem:[%s10902_s1 + $0x128] ss:$72 sps:$4 sm:$0xff]   ;;  %v7117_v47 = vld [vmem:[%s10902_s1 + $0x2ec] ss:$72 sps:$4 sm:$0xff]  }
  0x1e   : > { %2147 = vmatprep.subr.bf16.mxu1 %v7099_v32  ;;  %v7966_v49 = vld [vmem:[%s7843_s30 + $0x24] ss:$8 sps:$4 sm:$0xff]   ;;  %v7119_v51 = vld [vmem:[%s10902_s1 + $0x2e8] ss:$72 sps:$4 sm:$0xff]   ;;  %v7043_v53 = vld [vmem:[%s10902_s1 + $0x1b8] ss:$72 sps:$4 sm:$0xff]  }
  0x1f   : > { %1903 = vmatpush1.bf16.msra.mxu0 %v7007_v9  ;;  %v7045_v50 = vld [vmem:[%s10902_s1 + $0x1bc] ss:$72 sps:$4 sm:$0xff]   ;;  %v7048_v54 = vld [vmem:[%s10902_s1 + $0x24c] ss:$72 sps:$4 sm:$0xff]   ;;  %v7125_v55 = vld [vmem:[%s10902_s1 + $0x378] ss:$72 sps:$4 sm:$0xff]  }
  0x20   : > { %1904 = vmatprep.subr.bf16.mxu0 %v7008_v10  ;;  %v7123_v52 = vld [vmem:[%s10902_s1 + $0x37c] ss:$72 sps:$4 sm:$0xff]   ;;  %v7046_v56 = vld [vmem:[%s10902_s1 + $0x248] ss:$72 sps:$4 sm:$0xff]   ;;  %v7129_v57 = vld [vmem:[%s10902_s1 + $0x40c] ss:$72 sps:$4 sm:$0xff]  }
  0x21   : > { %2148 = vmatpush1.bf16.msra.mxu1 %v7101_v35  ;;  %v7996_v58 = vld [vmem:[%s7843_s30 + $0x20] ss:$8 sps:$4 sm:$0xff]   ;;  %v7999_v59 = vld [vmem:[%s7843_s30 + $0x34] ss:$8 sps:$4 sm:$0xff]   ;;  %v8029_v4 = vld [vmem:[%s7843_s30 + $0x30] ss:$8 sps:$4 sm:$0xff]  }
  0x22   : > { %2149 = vmatprep.subr.bf16.mxu1 %v7105_v37  ;;  %v7054_v60 = vld [vmem:[%s10902_s1 + $0x2dc] ss:$72 sps:$4 sm:$0xff]   ;;  %v7131_v61 = vld [vmem:[%s10902_s1 + $0x408] ss:$72 sps:$4 sm:$0xff]   ;;  %v7052_v63 = vld [vmem:[%s10902_s1 + $0x2d8] ss:$72 sps:$4 sm:$0xff]  }
  0x23   : > { %1905 = vmatpush1.bf16.msra.mxu0 %v7010_v12  ;;  %v7135_v62 = vld [vmem:[%s10902_s1 + $0x49c] ss:$72 sps:$4 sm:$0xff]   ;;  %v7057_v0 = vld [vmem:[%s10902_s1 + $0x36c] ss:$72 sps:$4 sm:$0xff]   ;;  %v7137_v1 = vld [vmem:[%s10902_s1 + $0x498] ss:$72 sps:$4 sm:$0xff]  }
  0x24   : > { %1906 = vmatprep.subr.bf16.mxu0 %v7011_v13  ;;  %v7141_v2 = vld [vmem:[%s10902_s1 + $0x52c] ss:$72 sps:$4 sm:$0xff]   ;;  %v7055_v3 = vld [vmem:[%s10902_s1 + $0x368] ss:$72 sps:$4 sm:$0xff]   ;;  %v7063_v5 = vld [vmem:[%s10902_s1 + $0x3fc] ss:$72 sps:$4 sm:$0xff]  }
  0x25   : > { %2150 = vmatpush1.bf16.msra.mxu1 %v7107_v41  ;;  %v8035_v6 = vld [vmem:[%s7843_s30 + $0x44] ss:$8 sps:$4 sm:$0xff]   ;;  %v7143_v7 = vld [vmem:[%s10902_s1 + $0x528] ss:$72 sps:$4 sm:$0xff]   ;;  %v7061_v9 = vld [vmem:[%s10902_s1 + $0x3f8] ss:$72 sps:$4 sm:$0xff]  }
  0x26   : > { %2151 = vmatprep.subr.bf16.mxu1 %v7111_v42  ;;  %v7147_v8 = vld [vmem:[%s10902_s1 + $0x5bc] ss:$72 sps:$4 sm:$0xff]   ;;  %v7066_v10 = vld [vmem:[%s10902_s1 + $0x48c] ss:$72 sps:$4 sm:$0xff]   ;;  %v7149_v12 = vld [vmem:[%s10902_s1 + $0x5b8] ss:$72 sps:$4 sm:$0xff]  }
  0x27   : > { %1907 = vmatpush1.bf16.msra.mxu0 %v7013_v14  ;;  %v7153_v13 = vld [vmem:[%s10902_s1 + $0x64c] ss:$72 sps:$4 sm:$0xff]   ;;  %v8059_v14 = vld [vmem:[%s7843_s30 + $0x40] ss:$8 sps:$4 sm:$0xff]   ;;  %v7081_v26 = vld [vmem:[%s10902_s1 + $0x63c] ss:$72 sps:$4 sm:$0xff]  }
  0x28   : > { %1908 = vmatprep.subr.bf16.mxu0 %v7014_v15  ;;  %v647_v15 = vld [vmem:[%s10902_s1 + $0x6d8] sm:$0x33]  ;;  %v7165_v24 = vld [vmem:[%s10902_s1 + $0x2c] ss:$72 sps:$4 sm:$0xff]   ;;  %v7073_v25 = vld [vmem:[%s10902_s1 + $0x5a8] ss:$72 sps:$4 sm:$0xff]  }
  0x29   : > { %2152 = vmatpush1.bf16.msra.mxu1 %v7113_v45  ;;  %v7171_v29 = vld [vmem:[%s10902_s1 + $0xbc] ss:$72 sps:$4 sm:$0xff]   ;;  %v7079_v30 = vld [vmem:[%s10902_s1 + $0x638] ss:$72 sps:$4 sm:$0xff]   ;;  %vm3623_vm2 = vsmask.f32 7424 }
  0x2a   : > { %2153 = vmatprep.subr.bf16.mxu1 %v7117_v47  ;;  %v7086_v35 = vld [vmem:[%s10902_s1 + $0x14] ss:$72 sps:$4 sm:$0xff]   ;;  %v7084_v41 = vld [vmem:[%s10902_s1 + $0x10] ss:$72 sps:$4 sm:$0xff]   ;;  %v7092_v42 = vld [vmem:[%s10902_s1 + $0xa4] ss:$72 sps:$4 sm:$0xff]  }
  0x2b   : > { %1909 = vmatpush1.bf16.msra.mxu0 %v7016_v16  ;;  %v7064_v16 = vld [vmem:[%s10902_s1 + $0x488] ss:$72 sps:$4 sm:$0xff]   ;;  %vm3767_vm4 = vsmask.f32 6400  ;;  %s11005_s22 = smov (!%p413_p4, %s7808_s22), 1 }
  0x2c   : > { %1910 = vmatprep.subr.bf16.mxu0 %v7017_v17  ;;  %v7072_v17 = vld [vmem:[%s10902_s1 + $0x51c] ss:$72 sps:$4 sm:$0xff]   ;;  %v7090_v45 = vld [vmem:[%s10902_s1 + $0xa0] ss:$72 sps:$4 sm:$0xff]   ;;  %s6301_s28 = sshll.u32 %s11005_s22, 3 }
  0x2d   : > { %2154 = vmatpush1.bf16.msra.mxu1 %v7119_v51  ;;  %v7187_v47 = vld [vmem:[%s10902_s1 + $0x268] ss:$72 sps:$4 sm:$0xff]   ;;  %s416_s14 = scalar_lea.vmem %s10913_s12, %s6301_s28 }
  0x2e   : > { %2155 = vmatprep.subr.bf16.mxu1 %v7123_v52  ;;  %v7096_v51 = vld [vmem:[%s10902_s1 + $0x130] ss:$72 sps:$4 sm:$0xff]   ;;  %v7104_v52 = vld [vmem:[%s10902_s1 + $0x1c4] ss:$72 sps:$4 sm:$0xff]  }
  0x2f   : > { %1911 = vmatpush1.bf16.msra.mxu0 %v7019_v18  ;;  %v7155_v18 = vld [vmem:[%s10902_s1 + $0x648] ss:$72 sps:$4 sm:$0xff]  }
  0x30   : > { %1912 = vmatprep.subr.bf16.mxu0 %v7020_v19  ;;  %v6535_v19 = vcombine.high %v647_v15, %v647_v15 }
  0x31   : > { %2156 = vmatpush1.bf16.msra.mxu1 %v7125_v55  ;;  %v7102_v55 = vld [vmem:[%s10902_s1 + $0x1c0] ss:$72 sps:$4 sm:$0xff]  }
  0x32   : > { %2157 = vmatprep.subr.bf16.mxu1 %v7129_v57  ;;  %v7199_v57 = vld [vmem:[%s10902_s1 + $0x388] ss:$72 sps:$4 sm:$0xff]  }
  0x33   : > { %1913 = vmatpush1.bf16.msra.mxu0 %v7022_v20  ;;  %v6534_v20 = vcombine.low %v647_v15, %v647_v15  ;;  %v7223_v15 = vld [vmem:[%s10902_s1 + $0x5c8] ss:$72 sps:$4 sm:$0xff]  }
  0x34   : > { %1914 = vmatprep.subr.bf16.mxu0 %v7023_v21  ;;  %v7070_v21 = vld [vmem:[%s10902_s1 + $0x518] ss:$72 sps:$4 sm:$0xff]  }
  0x35   : > { %2158 = vmatpush1.bf16.msra.mxu1 %v7131_v61  ;;  %v7108_v61 = vld [vmem:[%s10902_s1 + $0x250] ss:$72 sps:$4 sm:$0xff]  }
  0x36   : > { %2159 = vmatprep.subr.bf16.mxu1 %v7135_v62  ;;  %v7116_v62 = vld [vmem:[%s10902_s1 + $0x2e4] ss:$72 sps:$4 sm:$0xff]  }
  0x37   : > { %1915 = vmatpush1.bf16.msra.mxu0 %v7025_v22  ;;  %v7075_v22 = vld [vmem:[%s10902_s1 + $0x5ac] ss:$72 sps:$4 sm:$0xff]  }
  0x38   : > { %1916 = vmatprep.subr.bf16.mxu0 %v7026_v23  ;;  %v1859_v23 = vsel %vm1839_vm1, %v6534_v20, 0  ;;  %v7229_v20 = vld [vmem:[%s10902_s1 + $0x658] ss:$72 sps:$4 sm:$0xff]  }
  0x39   : > { %2160 = vmatpush1.bf16.msra.mxu1 %v7137_v1  ;;  %v7114_v1 = vld [vmem:[%s10902_s1 + $0x2e0] ss:$72 sps:$4 sm:$0xff]  }
  0x3a   : > { %2161 = vmatprep.subr.bf16.mxu1 %v7141_v2  ;;  %v7122_v2 = vld [vmem:[%s10902_s1 + $0x374] ss:$72 sps:$4 sm:$0xff]  }
  0x3b   : > { %1917 = vmatpush1.bf16.msra.mxu0 %v7028_v27  ;;  %v645_v27 = vld [vmem:[%s10902_s1 + $0x6c8] sm:$0x33] }
  0x3c   : > { %6546 = vmatprep.subr.msk.bf16.mxu0 %vm1839_vm1, %v6529_v28  ;;  %v7163_v28 = vld [vmem:[%s10902_s1 + $0x28] ss:$72 sps:$4 sm:$0xff]   ;;  %v6531_v31 = vcombine.high %v645_v27, %v645_v27  ;;  %v6530_v32 = vcombine.low %v645_v27, %v645_v27  ;;  %v7241_v27 = vld [vmem:[%s10902_s1 + $0x3c] ss:$72 sps:$4 sm:$0xff]  }
  0x3d   : > { %2162 = vmatpush1.bf16.msra.mxu1 %v7143_v7  ;;  %v7120_v7 = vld [vmem:[%s10902_s1 + $0x370] ss:$72 sps:$4 sm:$0xff]  }
  0x3e   : > { %2163 = vmatprep.subr.bf16.mxu1 %v7147_v8  ;;  %v1847_v37 = vsel %vm1839_vm1, %v6530_v32, 0  ;;  %v7128_v8 = vld [vmem:[%s10902_s1 + $0x404] ss:$72 sps:$4 sm:$0xff]  }
  0x3f   : > { %1919 = vmatpush1.bf16.msra.mxu0 %v1841_v33  ;;  %v7169_v33 = vld [vmem:[%s10902_s1 + $0xb8] ss:$72 sps:$4 sm:$0xff]  }
  0x40   : > { %1977 = vmatprep.subr.bf16.mxu0 %v7036_v34  ;;  %v7177_v34 = vld [vmem:[%s10902_s1 + $0x14c] ss:$72 sps:$4 sm:$0xff]  }
  0x41   : > { %2164 = vmatpush1.bf16.msra.mxu1 %v7149_v12  ;;  %v7126_v12 = vld [vmem:[%s10902_s1 + $0x400] ss:$72 sps:$4 sm:$0xff]  }
  0x42   : > { %1927 = vmatmul.mubr.bf16.vlgmr.msra.gmra.mrb[0].mxu0 %v7924_v36  ;;  %2165 = vmatprep.subr.bf16.mxu1 %v7153_v13  ;;  %v7134_v13 = vld [vmem:[%s10902_s1 + $0x494] ss:$72 sps:$4 sm:$0xff]  }
  0x43   : > { %1978 = vmatpush1.bf16.msra.mxu0 %v7034_v38  ;;  %6548 = vmatprep.mubr.msk.bf16.mxu0 %vm1823_vm0, %v7933_v39  ;;  %v7175_v38 = vld [vmem:[%s10902_s1 + $0x148] ss:$72 sps:$4 sm:$0xff]  }
  0x44   : > { %1979 = vmatprep.subr.bf16.mxu0 %v7039_v40  ;;  %v7183_v40 = vld [vmem:[%s10902_s1 + $0x1dc] ss:$72 sps:$4 sm:$0xff]  }
  0x45   : > { %2166 = vmatpush1.bf16.msra.mxu1 %v7155_v18  ;;  %v7132_v18 = vld [vmem:[%s10902_s1 + $0x490] ss:$72 sps:$4 sm:$0xff]  }
  0x46   : > { %6564 = vmatprep.subr.msk.bf16.mxu1 %vm1839_vm1, %v6535_v19  ;;  %v7140_v19 = vld [vmem:[%s10902_s1 + $0x524] ss:$72 sps:$4 sm:$0xff]  }
  0x47   : > { %1980 = vmatpush1.bf16.msra.mxu0 %v7037_v43  ;;  %v7181_v43 = vld [vmem:[%s10902_s1 + $0x1d8] ss:$72 sps:$4 sm:$0xff]  }
  0x48   : > { %1981 = vmatprep.subr.bf16.mxu0 %v7042_v44  ;;  %v7189_v44 = vld [vmem:[%s10902_s1 + $0x26c] ss:$72 sps:$4 sm:$0xff]  }
  0x49   : > { %2168 = vmatpush1.bf16.msra.mxu1 %v1859_v23  ;;  %v7138_v23 = vld [vmem:[%s10902_s1 + $0x520] ss:$72 sps:$4 sm:$0xff]  }
  0x4a   : > { %1937 = vmatmul.mubr.bf16.gmra.mrb[4].mxu0 %v7963_v48  ;;  %2309 = vmatprep.subr.bf16.mxu1 %v7165_v24  ;;  %v7146_v24 = vld [vmem:[%s10902_s1 + $0x5b4] ss:$72 sps:$4 sm:$0xff]  }
  0x4b   : > { %1982 = vmatpush1.bf16.msra.mxu0 %v7040_v46  ;;  %6549 = vmatprep.mubr.msk.bf16.mxu0 %vm1823_vm0, %v7966_v49  ;;  %v7098_v46 = vld [vmem:[%s10902_s1 + $0x134] ss:$72 sps:$4 sm:$0xff]  }
  0x4c   : > { %1983 = vmatprep.subr.bf16.mxu0 %v7045_v50  ;;  %2176 = vmatmul.mubr.bf16.vlgmr.msra.gmra.mrb[0].mxu1 %v7924_v36  ;;  %v7195_v50 = vld [vmem:[%s10902_s1 + $0x2fc] ss:$72 sps:$4 sm:$0xff]  }
  0x4d   : > { %2310 = vmatpush1.bf16.msra.mxu1 %v7163_v28  ;;  %6566 = vmatprep.mubr.msk.bf16.mxu1 %vm1823_vm0, %v7933_v39  ;;  %v646_v28 = vld [vmem:[%s10902_s1 + $0x6d0] sm:$0x33] }
  0x4e   : > { %2311 = vmatprep.subr.bf16.mxu1 %v7171_v29  ;;  %v7239_v29 = vld [vmem:[%s10902_s1 + $0x38] ss:$72 sps:$4 sm:$0xff]   ;;  %v6533_v32 = vcombine.high %v646_v28, %v646_v28 }
  0x4f   : > { %1984 = vmatpush1.bf16.msra.mxu0 %v7043_v53  ;;  %v7193_v53 = vld [vmem:[%s10902_s1 + $0x2f8] ss:$72 sps:$4 sm:$0xff]  }
  0x50   : > { %1985 = vmatprep.subr.bf16.mxu0 %v7048_v54  ;;  %v7201_v54 = vld [vmem:[%s10902_s1 + $0x38c] ss:$72 sps:$4 sm:$0xff]  }
  0x51   : > { %2312 = vmatpush1.bf16.msra.mxu1 %v7169_v33  ;;  %v6532_v33 = vcombine.low %v646_v28, %v646_v28  ;;  %v7236_v28 = vld [vmem:[%s10902_s1 + $0x30] ss:$72 sps:$4 sm:$0xff]  }
  0x52   : > { %1947 = vmatmul.mubr.bf16.gmra.mrb[8].mxu0 %v7996_v58  ;;  %2313 = vmatprep.subr.bf16.mxu1 %v7177_v34  ;;  %v7245_v34 = vld [vmem:[%s10902_s1 + $0xc8] ss:$72 sps:$4 sm:$0xff]  }
  0x53   : > { %1986 = vmatpush1.bf16.msra.mxu0 %v7046_v56  ;;  %6550 = vmatprep.mubr.msk.bf16.mxu0 %vm1823_vm0, %v7999_v59  ;;  %v7110_v56 = vld [vmem:[%s10902_s1 + $0x254] ss:$72 sps:$4 sm:$0xff]  }
  0x54   : > { %1987 = vmatprep.subr.bf16.mxu0 %v7054_v60  ;;  %2186 = vmatmul.mubr.bf16.gmra.mrb[4].mxu1 %v7963_v48  ;;  %v7207_v60 = vld [vmem:[%s10902_s1 + $0x41c] ss:$72 sps:$4 sm:$0xff]  }
  0x55   : > { %2314 = vmatpush1.bf16.msra.mxu1 %v7175_v38  ;;  %6567 = vmatprep.mubr.msk.bf16.mxu1 %vm1823_vm0, %v7966_v49  ;;  %v7251_v38 = vld [vmem:[%s10902_s1 + $0x158] ss:$72 sps:$4 sm:$0xff]  }
  0x56   : > { %2315 = vmatprep.subr.bf16.mxu1 %v7183_v40  ;;  %v7259_v40 = vld [vmem:[%s10902_s1 + $0x1ec] ss:$72 sps:$4 sm:$0xff]  }
  0x57   : > { %1988 = vmatpush1.bf16.msra.mxu0 %v7052_v63  ;;  %v7205_v63 = vld [vmem:[%s10902_s1 + $0x418] ss:$72 sps:$4 sm:$0xff]  }
  0x58   : > { %1989 = vmatprep.subr.bf16.mxu0 %v7057_v0  ;;  %v7213_v0 = vld [vmem:[%s10902_s1 + $0x4ac] ss:$72 sps:$4 sm:$0xff]  }
  0x59   : > { %2316 = vmatpush1.bf16.msra.mxu1 %v7181_v43  ;;  %v7168_v43 = vld [vmem:[%s10902_s1 + $0xb4] ss:$72 sps:$4 sm:$0xff]  }
  0x5a   : > { %1957 = vmatmul.mubr.bf16.gmra.mrb[12].mxu0 %v8029_v4  ;;  %2317 = vmatprep.subr.bf16.mxu1 %v7189_v44  ;;  %v7257_v44 = vld [vmem:[%s10902_s1 + $0x1e8] ss:$72 sps:$4 sm:$0xff]  }
  0x5b   : > { %1990 = vmatpush1.bf16.msra.mxu0 %v7055_v3  ;;  %6551 = vmatprep.mubr.msk.bf16.mxu0 %vm1823_vm0, %v8035_v6  ;;  %v7211_v3 = vld [vmem:[%s10902_s1 + $0x4a8] ss:$72 sps:$4 sm:$0xff]  }
  0x5c   : > { %1991 = vmatprep.subr.bf16.mxu0 %v7063_v5  ;;  %2196 = vmatmul.mubr.bf16.gmra.mrb[8].mxu1 %v7996_v58  ;;  %v7219_v5 = vld [vmem:[%s10902_s1 + $0x53c] ss:$72 sps:$4 sm:$0xff]  }
  0x5d   : > { %2318 = vmatpush1.bf16.msra.mxu1 %v7187_v47  ;;  %6568 = vmatprep.mubr.msk.bf16.mxu1 %vm1823_vm0, %v7999_v59  ;;  %v7174_v47 = vld [vmem:[%s10902_s1 + $0x144] ss:$72 sps:$4 sm:$0xff]  }
  0x5e   : > { %2319 = vmatprep.subr.bf16.mxu1 %v7195_v50  ;;  %v7263_v50 = vld [vmem:[%s10902_s1 + $0x278] ss:$72 sps:$4 sm:$0xff]  }
  0x5f   : > { %1992 = vmatpush1.bf16.msra.mxu0 %v7061_v9  ;;  %v7217_v9 = vld [vmem:[%s10902_s1 + $0x538] ss:$72 sps:$4 sm:$0xff]  }
  0x60   : > { %1993 = vmatprep.subr.bf16.mxu0 %v7066_v10  ;;  %v7225_v10 = vld [vmem:[%s10902_s1 + $0x5cc] ss:$72 sps:$4 sm:$0xff]  }
  0x61   : > { %2320 = vmatpush1.bf16.msra.mxu1 %v7193_v53  ;;  %v7178_v53 = vld [vmem:[%s10902_s1 + $0x1d0] ss:$72 sps:$4 sm:$0xff]  }
  0x62   : > { %1967 = vmatmul.mubr.bf16.gmra.mrb[16].mxu0 %v8059_v14  ;;  %2321 = vmatprep.subr.bf16.mxu1 %v7201_v54  ;;  %v7277_v54 = vld [vmem:[%s10902_s1 + $0x39c] ss:$72 sps:$4 sm:$0xff]  }
  0x63   : > { %1994 = vmatpush1.bf16.msra.mxu0 %v7064_v16  ;;  %6553 = vmatprep.mubr.msk.bf16.mxu0 %vm1823_vm0, %v7852_v11  ;;  %v7231_v16 = vld [vmem:[%s10902_s1 + $0x65c] ss:$72 sps:$4 sm:$0xff]  }
  0x64   : > { %1995 = vmatprep.subr.bf16.mxu0 %v7072_v17  ;;  %2206 = vmatmul.mubr.bf16.gmra.mrb[12].mxu1 %v8029_v4  ;;  %v649_v17 = vld [vmem:[%s10902_s1 + $0x6e8] sm:$0x33] }
  0x65   : > { %2322 = vmatpush1.bf16.msra.mxu1 %v7199_v57  ;;  %6569 = vmatprep.mubr.msk.bf16.mxu1 %vm1823_vm0, %v8035_v6  ;;  %v7283_v57 = vld [vmem:[%s10902_s1 + $0x42c] ss:$72 sps:$4 sm:$0xff]  }
  0x66   : > { %2323 = vmatprep.subr.bf16.mxu1 %v7207_v60  ;;  %v7192_v60 = vld [vmem:[%s10902_s1 + $0x2f4] ss:$72 sps:$4 sm:$0xff]  }
  0x67   : > { %1996 = vmatpush1.bf16.msra.mxu0 %v7070_v21  ;;  %v6539_v21 = vcombine.high %v649_v17, %v649_v17 }
  0x68   : > { %1997 = vmatprep.subr.bf16.mxu0 %v7075_v22  ;;  %v6538_v22 = vcombine.low %v649_v17, %v649_v17 }
  0x69   : > { %2324 = vmatpush1.bf16.msra.mxu1 %v7205_v63  ;;  %v7198_v63 = vld [vmem:[%s10902_s1 + $0x384] ss:$72 sps:$4 sm:$0xff]  }
  0x6a   : > { %2325 = vmatprep.subr.bf16.mxu1 %v7213_v0  ;;  %v7287_v0 = vld [vmem:[%s10902_s1 + $0x4b8] ss:$72 sps:$4 sm:$0xff]  }
  0x6b   : > { %1998 = vmatpush1.bf16.msra.mxu0 %v7073_v25  ;;  %v7144_v25 = vld [vmem:[%s10902_s1 + $0x5b0] ss:$72 sps:$4 sm:$0xff]  }
  0x6c   : > { %1999 = vmatprep.subr.bf16.mxu0 %v7081_v26  ;;  %2216 = vmatmul.mubr.bf16.gmra.mrb[16].mxu1 %v8059_v14  ;;  %v1871_v26 = vsel %vm1839_vm1, %v6538_v22, 0  ;;  %v7226_v22 = vld [vmem:[%s10902_s1 + $0x650] ss:$72 sps:$4 sm:$0xff]  }
  0x6d   : > { %2326 = vmatpush1.bf16.msra.mxu1 %v7211_v3  ;;  %6577 = vmatprep.mubr.msk.bf16.mxu1 %vm1823_vm0, %v7852_v11  ;;  %v7301_v3 = vld [vmem:[%s10902_s1 + $0x5dc] ss:$72 sps:$4 sm:$0xff]  }
  0x6e   : > { %2327 = vmatprep.subr.bf16.mxu1 %v7219_v5  ;;  %v7202_v5 = vld [vmem:[%s10902_s1 + $0x410] ss:$72 sps:$4 sm:$0xff]  }
  0x6f   : > { %2000 = vmatpush1.bf16.msra.mxu0 %v7079_v30  ;;  %v7150_v30 = vld [vmem:[%s10902_s1 + $0x640] ss:$72 sps:$4 sm:$0xff]  }
  0x70   : > { %6552 = vmatprep.subr.msk.bf16.mxu0 %vm1839_vm1, %v6531_v31  ;;  %v7247_v31 = vld [vmem:[%s10902_s1 + $0xcc] ss:$72 sps:$4 sm:$0xff]  }
  0x71   : > { %2328 = vmatpush1.bf16.msra.mxu1 %v7217_v9  ;;  %v7299_v9 = vld [vmem:[%s10902_s1 + $0x5d8] ss:$72 sps:$4 sm:$0xff]  }
  0x72   : > { %2329 = vmatprep.subr.bf16.mxu1 %v7225_v10  ;;  %v7307_v10 = vld [vmem:[%s10902_s1 + $0x66c] ss:$72 sps:$4 sm:$0xff]  }
  0x73   : > { %2002 = vmatpush1.bf16.msra.mxu0 %v1847_v37  ;;  %v7162_v37 = vld [vmem:[%s10902_s1 + $0x24] ss:$72 sps:$4 sm:$0xff]  }
  0x74   : > { %2060 = vmatprep.subr.bf16.mxu0 %v7086_v35  ;;  %v7253_v35 = vld [vmem:[%s10902_s1 + $0x15c] ss:$72 sps:$4 sm:$0xff]  }
  0x75   : > { %2330 = vmatpush1.bf16.msra.mxu1 %v7223_v15  ;;  %v7214_v15 = vld [vmem:[%s10902_s1 + $0x530] ss:$72 sps:$4 sm:$0xff]  }
  0x76   : > { %2010 = vmatmul.mubr.bf16.vlgmr.msra.gmra.mrb[20].mxu0 %v7924_v36  ;;  %2331 = vmatprep.subr.bf16.mxu1 %v7231_v16 }
  0x77   : > { %2061 = vmatpush1.bf16.msra.mxu0 %v7084_v41  ;;  %6554 = vmatprep.mubr.msk.bf16.mxu0 %vm1823_vm0, %v7933_v39  ;;  %v1853_v41 = vsel %vm1839_vm1, %v6532_v33, 0  ;;  %v7250_v33 = vld [vmem:[%s10902_s1 + $0x154] ss:$72 sps:$4 sm:$0xff]  }
  0x78   : > { %2062 = vmatprep.subr.bf16.mxu0 %v7092_v42  ;;  %v7160_v42 = vld [vmem:[%s10902_s1 + $0x20] ss:$72 sps:$4 sm:$0xff]  }
  0x79   : > { %2332 = vmatpush1.bf16.msra.mxu1 %v7229_v20  ;;  %v7228_v20 = vld [vmem:[%s10902_s1 + $0x654] ss:$72 sps:$4 sm:$0xff]  }
  0x7a   : > { %6576 = vmatprep.subr.msk.bf16.mxu1 %vm1839_vm1, %v6539_v21  ;;  %v648_v21 = vld [vmem:[%s10902_s1 + $0x6e0] sm:$0x33] }
  0x7b   : > { %2063 = vmatpush1.bf16.msra.mxu0 %v7090_v45  ;;  %v7166_v45 = vld [vmem:[%s10902_s1 + $0xb0] ss:$72 sps:$4 sm:$0xff]  }
  0x7c   : > { %2064 = vmatprep.subr.bf16.mxu0 %v7098_v46  ;;  %v7265_v46 = vld [vmem:[%s10902_s1 + $0x27c] ss:$72 sps:$4 sm:$0xff]  }
  0x7d   : > { %2334 = vmatpush1.bf16.msra.mxu1 %v1871_v26  ;;  %v8472_v26 = vld [vmem:[%s7843_s30 + $0x14] ss:$8 sps:$4 sm:$0xff]  }
  0x7e   : > { %2020 = vmatmul.mubr.bf16.gmra.mrb[24].mxu0 %v7963_v48  ;;  %2475 = vmatprep.subr.bf16.mxu1 %v7241_v27  ;;  %v7238_v27 = vld [vmem:[%s10902_s1 + $0x34] ss:$72 sps:$4 sm:$0xff]  }
  0x7f   : > { %2065 = vmatpush1.bf16.msra.mxu0 %v7096_v51  ;;  %6555 = vmatprep.mubr.msk.bf16.mxu0 %vm1823_vm0, %v7966_v49  ;;  %v7271_v51 = vld [vmem:[%s10902_s1 + $0x30c] ss:$72 sps:$4 sm:$0xff]  }
  0x80   : > { %2066 = vmatprep.subr.bf16.mxu0 %v7104_v52  ;;  %2342 = vmatmul.mubr.bf16.vlgmr.msra.gmra.mrb[20].mxu1 %v7924_v36  ;;  %v7180_v52 = vld [vmem:[%s10902_s1 + $0x1d4] ss:$72 sps:$4 sm:$0xff]  }
  0x81   : > { %2476 = vmatpush1.bf16.msra.mxu1 %v7239_v29  ;;  %6578 = vmatprep.mubr.msk.bf16.mxu1 %vm1823_vm0, %v7933_v39  ;;  %v7244_v29 = vld [vmem:[%s10902_s1 + $0xc4] ss:$72 sps:$4 sm:$0xff]  }
  0x82   : > { %2477 = vmatprep.subr.bf16.mxu1 %v7247_v31  ;;  %v8492_v31 = vld [vmem:[%s7843_s30 + $0x24] ss:$8 sps:$4 sm:$0xff]  }
  0x83   : > { %2067 = vmatpush1.bf16.msra.mxu0 %v7102_v55  ;;  %v7186_v55 = vld [vmem:[%s10902_s1 + $0x264] ss:$72 sps:$4 sm:$0xff]  }
  0x84   : > { %2068 = vmatprep.subr.bf16.mxu0 %v7110_v56  ;;  %v7275_v56 = vld [vmem:[%s10902_s1 + $0x398] ss:$72 sps:$4 sm:$0xff]  }
  0x85   : > { %2478 = vmatpush1.bf16.msra.mxu1 %v7245_v34  ;;  %v7248_v34 = vld [vmem:[%s10902_s1 + $0x150] ss:$72 sps:$4 sm:$0xff]  }
  0x86   : > { %2030 = vmatmul.mubr.bf16.gmra.mrb[28].mxu0 %v7996_v58  ;;  %2479 = vmatprep.subr.bf16.mxu1 %v7253_v35  ;;  %v7256_v35 = vld [vmem:[%s10902_s1 + $0x1e4] ss:$72 sps:$4 sm:$0xff]  }
  0x87   : > { %2069 = vmatpush1.bf16.msra.mxu0 %v7108_v61  ;;  %6556 = vmatprep.mubr.msk.bf16.mxu0 %vm1823_vm0, %v7999_v59  ;;  %v7289_v61 = vld [vmem:[%s10902_s1 + $0x4bc] ss:$72 sps:$4 sm:$0xff]  }
  0x88   : > { %2070 = vmatprep.subr.bf16.mxu0 %v7116_v62  ;;  %2352 = vmatmul.mubr.bf16.gmra.mrb[24].mxu1 %v7963_v48  ;;  %v7190_v62 = vld [vmem:[%s10902_s1 + $0x2f0] ss:$72 sps:$4 sm:$0xff]  }
  0x89   : > { %2480 = vmatpush1.bf16.msra.mxu1 %v7251_v38  ;;  %6579 = vmatprep.mubr.msk.bf16.mxu1 %vm1823_vm0, %v7966_v49  ;;  %v8516_v38 = vld [vmem:[%s7843_s30 + $0x34] ss:$8 sps:$4 sm:$0xff]  }
  0x8a   : > { %2481 = vmatprep.subr.bf16.mxu1 %v7259_v40  ;;  %v7254_v40 = vld [vmem:[%s10902_s1 + $0x1e0] ss:$72 sps:$4 sm:$0xff]  }
  0x8b   : > { %2071 = vmatpush1.bf16.msra.mxu0 %v7114_v1  ;;  %v7295_v1 = vld [vmem:[%s10902_s1 + $0x54c] ss:$72 sps:$4 sm:$0xff]  }
  0x8c   : > { %2072 = vmatprep.subr.bf16.mxu0 %v7122_v2  ;;  %v7293_v2 = vld [vmem:[%s10902_s1 + $0x548] ss:$72 sps:$4 sm:$0xff]  }
  0x8d   : > { %2482 = vmatpush1.bf16.msra.mxu1 %v7257_v44  ;;  %v8536_v44 = vld [vmem:[%s7843_s30 + $0x30] ss:$8 sps:$4 sm:$0xff]  }
  0x8e   : > { %2040 = vmatmul.mubr.bf16.gmra.mrb[32].mxu0 %v8029_v4  ;;  %2483 = vmatprep.subr.bf16.mxu1 %v7265_v46  ;;  %v7266_v46 = vld [vmem:[%s10902_s1 + $0x300] ss:$72 sps:$4 sm:$0xff]  }
  0x8f   : > { %2073 = vmatpush1.bf16.msra.mxu0 %v7120_v7  ;;  %6557 = vmatprep.mubr.msk.bf16.mxu0 %vm1823_vm0, %v8035_v6  ;;  %v8416_v7 = vld [vmem:[%s7843_s30 + $0x4] ss:$8 sps:$4 sm:$0xff]  }
  0x90   : > { %2074 = vmatprep.subr.bf16.mxu0 %v7128_v8  ;;  %2362 = vmatmul.mubr.bf16.gmra.mrb[28].mxu1 %v7996_v58  ;;  %v7210_v8 = vld [vmem:[%s10902_s1 + $0x4a4] ss:$72 sps:$4 sm:$0xff]  }
  0x91   : > { %2484 = vmatpush1.bf16.msra.mxu1 %v7263_v50  ;;  %6580 = vmatprep.mubr.msk.bf16.mxu1 %vm1823_vm0, %v7999_v59  ;;  %v7272_v50 = vld [vmem:[%s10902_s1 + $0x390] ss:$72 sps:$4 sm:$0xff]  }
  0x92   : > { %2485 = vmatprep.subr.bf16.mxu1 %v7271_v51  ;;  %v7280_v51 = vld [vmem:[%s10902_s1 + $0x424] ss:$72 sps:$4 sm:$0xff]  }
  0x93   : > { %2075 = vmatpush1.bf16.msra.mxu0 %v7126_v12  ;;  %v7208_v12 = vld [vmem:[%s10902_s1 + $0x4a0] ss:$72 sps:$4 sm:$0xff]  }
  0x94   : > { %2076 = vmatprep.subr.bf16.mxu0 %v7134_v13  ;;  %v7216_v13 = vld [vmem:[%s10902_s1 + $0x534] ss:$72 sps:$4 sm:$0xff]  }
  0x96   : > { %2050 = vmatmul.mubr.bf16.gmra.mrb[36].mxu0 %v8059_v14 }
  0x97   : > { %2077 = vmatpush1.bf16.msra.mxu0 %v7132_v18  ;;  %6559 = vmatprep.mubr.msk.bf16.mxu0 %vm1823_vm0, %v7852_v11  ;;  %v7152_v11 = vld [vmem:[%s10902_s1 + $0x644] ss:$72 sps:$4 sm:$0xff]  }
  0x98   : > { %2078 = vmatprep.subr.bf16.mxu0 %v7140_v19  ;;  %2372 = vmatmul.mubr.bf16.gmra.mrb[32].mxu1 %v8029_v4  ;;  %v7222_v18 = vld [vmem:[%s10902_s1 + $0x5c4] ss:$72 sps:$4 sm:$0xff]   ;;  %v7220_v19 = vld [vmem:[%s10902_s1 + $0x5c0] ss:$72 sps:$4 sm:$0xff]  }
  0x99   : > { %6581 = vmatprep.mubr.msk.bf16.mxu1 %vm1823_vm0, %v8035_v6 }
  0x9b   : > { %2079 = vmatpush1.bf16.msra.mxu0 %v7138_v23  ;;  %v8468_v23 = vld [vmem:[%s7843_s30] ss:$8 sps:$4 sm:$0xff]  }
  0x9c   : > { %2080 = vmatprep.subr.bf16.mxu0 %v7146_v24  ;;  %v6537_v24 = vcombine.high %v648_v21, %v648_v21 }
  0x9f   : > { %2081 = vmatpush1.bf16.msra.mxu0 %v7144_v25  ;;  %v6536_v25 = vcombine.low %v648_v21, %v648_v21 }
  0xa0   : > { %2082 = vmatprep.subr.bf16.mxu0 %v7152_v11  ;;  %2382 = vmatmul.mubr.bf16.gmra.mrb[36].mxu1 %v8059_v14 }
  0xa1   : > { %6589 = vmatprep.mubr.msk.bf16.mxu1 %vm1823_vm0, %v8416_v7  ;;  %v1865_v11 = vsel %vm1839_vm1, %v6536_v25, 0 }
  0xa3   : > { %2083 = vmatpush1.bf16.msra.mxu0 %v7150_v30  ;;  %v8488_v30 = vld [vmem:[%s7843_s30 + $0x10] ss:$8 sps:$4 sm:$0xff]  }
  0xa4   : > { %6558 = vmatprep.subr.msk.bf16.mxu0 %vm1839_vm1, %v6533_v32  ;;  %v7242_v32 = vld [vmem:[%s10902_s1 + $0xc0] ss:$72 sps:$4 sm:$0xff]  }
  0xa7   : > { %2085 = vmatpush1.bf16.msra.mxu0 %v1853_v41  ;;  %v7262_v41 = vld [vmem:[%s10902_s1 + $0x274] ss:$72 sps:$4 sm:$0xff]  }
  0xa8   : > { %2226 = vmatprep.subr.bf16.mxu0 %v7162_v37  ;;  %v8512_v37 = vld [vmem:[%s7843_s30 + $0x20] ss:$8 sps:$4 sm:$0xff]  }
  0xaa   : > { %2093 = vmatmul.mubr.bf16.vlgmr.msra.gmra.mrb[40].mxu0 %v7924_v36  ;;  %v7172_v36 = vld [vmem:[%s10902_s1 + $0x140] ss:$72 sps:$4 sm:$0xff]  }
  0xab   : > { %2227 = vmatpush1.bf16.msra.mxu0 %v7160_v42  ;;  %6560 = vmatprep.mubr.msk.bf16.mxu0 %vm1823_vm0, %v7933_v39  ;;  %v7269_v39 = vld [vmem:[%s10902_s1 + $0x308] ss:$72 sps:$4 sm:$0xff]  }
  0xac   : > { %2228 = vmatprep.subr.bf16.mxu0 %v7168_v43  ;;  %2486 = vmatpush1.bf16.msra.mxu1 %v7269_v39  ;;  %v7260_v42 = vld [vmem:[%s10902_s1 + $0x270] ss:$72 sps:$4 sm:$0xff]   ;;  %v7268_v43 = vld [vmem:[%s10902_s1 + $0x304] ss:$72 sps:$4 sm:$0xff]   ;;  %v7286_v39 = vld [vmem:[%s10902_s1 + $0x4b4] ss:$72 sps:$4 sm:$0xff]  }
  0xad   : > { %2487 = vmatprep.subr.bf16.mxu1 %v7277_v54  ;;  %v7292_v54 = vld [vmem:[%s10902_s1 + $0x544] ss:$72 sps:$4 sm:$0xff]  }
  0xaf   : > { %2229 = vmatpush1.bf16.msra.mxu0 %v7166_v45  ;;  %v8540_v45 = vld [vmem:[%s7843_s30 + $0x44] ss:$8 sps:$4 sm:$0xff]  }
  0xb0   : > { %2230 = vmatprep.subr.bf16.mxu0 %v7174_v47  ;;  %2488 = vmatpush1.bf16.msra.mxu1 %v7275_v56  ;;  %v7274_v47 = vld [vmem:[%s10902_s1 + $0x394] ss:$72 sps:$4 sm:$0xff]  }
  0xb1   : > { %2489 = vmatprep.subr.bf16.mxu1 %v7283_v57  ;;  %v7298_v56 = vld [vmem:[%s10902_s1 + $0x5d4] ss:$72 sps:$4 sm:$0xff]   ;;  %v7296_v57 = vld [vmem:[%s10902_s1 + $0x5d0] ss:$72 sps:$4 sm:$0xff]  }
  0xb2   : > { %2103 = vmatmul.mubr.bf16.gmra.mrb[44].mxu0 %v7963_v48  ;;  %v7184_v48 = vld [vmem:[%s10902_s1 + $0x260] ss:$72 sps:$4 sm:$0xff]  }
  0xb3   : > { %2231 = vmatpush1.bf16.msra.mxu0 %v7172_v36  ;;  %6561 = vmatprep.mubr.msk.bf16.mxu0 %vm1823_vm0, %v7966_v49  ;;  %v7281_v49 = vld [vmem:[%s10902_s1 + $0x428] ss:$72 sps:$4 sm:$0xff]  }
  0xb4   : > { %2232 = vmatprep.subr.bf16.mxu0 %v7180_v52  ;;  %2490 = vmatpush1.bf16.msra.mxu1 %v7281_v49  ;;  %v8560_v36 = vld [vmem:[%s7843_s30 + $0x40] ss:$8 sps:$4 sm:$0xff]  }
  0xb5   : > { %2491 = vmatprep.subr.bf16.mxu1 %v7289_v61  ;;  %v7278_v52 = vld [vmem:[%s10902_s1 + $0x420] ss:$72 sps:$4 sm:$0xff]  }
  0xb6   : > { %v7302_v49 = vld [vmem:[%s10902_s1 + $0x660] ss:$72 sps:$4 sm:$0xff]  }
  0xb7   : > { %2233 = vmatpush1.bf16.msra.mxu0 %v7178_v53  ;;  %v7284_v53 = vld [vmem:[%s10902_s1 + $0x4b0] ss:$72 sps:$4 sm:$0xff]  }
  0xb8   : > { %2234 = vmatprep.subr.bf16.mxu0 %v7186_v55  ;;  %2492 = vmatpush1.bf16.msra.mxu1 %v7287_v0  ;;  %v7290_v55 = vld [vmem:[%s10902_s1 + $0x540] ss:$72 sps:$4 sm:$0xff]   ;;  %v7314_v0 = vld [vmem:[%s10902_s1 + $0x44] ss:$72 sps:$4 sm:$0xff]  }
  0xb9   : > { %2493 = vmatprep.subr.bf16.mxu1 %v7295_v1  ;;  %v7312_v1 = vld [vmem:[%s10902_s1 + $0x40] ss:$72 sps:$4 sm:$0xff]  }
  0xba   : > { %2113 = vmatmul.mubr.bf16.gmra.mrb[48].mxu0 %v7996_v58  ;;  %v7196_v58 = vld [vmem:[%s10902_s1 + $0x380] ss:$72 sps:$4 sm:$0xff]  }
  0xbb   : > { %2235 = vmatpush1.bf16.msra.mxu0 %v7184_v48  ;;  %6562 = vmatprep.mubr.msk.bf16.mxu0 %vm1823_vm0, %v7999_v59  ;;  %v7204_v59 = vld [vmem:[%s10902_s1 + $0x414] ss:$72 sps:$4 sm:$0xff]   ;;  %v7304_v48 = vld [vmem:[%s10902_s1 + $0x664] ss:$72 sps:$4 sm:$0xff]  }
  0xbc   : > { %2236 = vmatprep.subr.bf16.mxu0 %v7192_v60  ;;  %2494 = vmatpush1.bf16.msra.mxu1 %v7293_v2  ;;  %v650_v60 = vld [vmem:[%s10902_s1 + $0x6f0] sm:$0x33]  ;;  %v7320_v2 = vld [vmem:[%s10902_s1 + $0x164] ss:$72 sps:$4 sm:$0xff]  }
  0xbd   : > { %2495 = vmatprep.subr.bf16.mxu1 %v7301_v3  ;;  %v6541_v61 = vcombine.high %v650_v60, %v650_v60 }
  0xbf   : > { %2237 = vmatpush1.bf16.msra.mxu0 %v7190_v62  ;;  %v6540_v62 = vcombine.low %v650_v60, %v650_v60 }
  0xc0   : > { %2238 = vmatprep.subr.bf16.mxu0 %v7198_v63  ;;  %2496 = vmatpush1.bf16.msra.mxu1 %v7299_v9  ;;  %v7318_v9 = vld [vmem:[%s10902_s1 + $0x160] ss:$72 sps:$4 sm:$0xff]  }
  0xc1   : > { %2497 = vmatprep.subr.bf16.mxu1 %v7307_v10  ;;  %v1877_v63 = vsel %vm1839_vm1, %v6540_v62, 0 }
  0xc2   : > { %2123 = vmatmul.mubr.bf16.gmra.mrb[52].mxu0 %v8029_v4  ;;  %v651_v4 = vld [vmem:[%s10902_s1 + $0x6f8] sm:$0x33] }
  0xc3   : > { %2239 = vmatpush1.bf16.msra.mxu0 %v7196_v58  ;;  %6563 = vmatprep.mubr.msk.bf16.mxu0 %vm1823_vm0, %v8035_v6  ;;  %v7305_v6 = vld [vmem:[%s10902_s1 + $0x668] ss:$72 sps:$4 sm:$0xff]   ;;  %v6543_v16 = vcombine.high %v651_v4, %v651_v4  ;;  %v6542_v17 = vcombine.low %v651_v4, %v651_v4  ;;  %v7317_v58 = vld [vmem:[%s10902_s1 + $0xd4] ss:$72 sps:$4 sm:$0xff]  }
  0xc4   : > { %2240 = vmatprep.subr.bf16.mxu0 %v7204_v59  ;;  %2498 = vmatpush1.bf16.msra.mxu1 %v7305_v6  ;;  %v7315_v59 = vld [vmem:[%s10902_s1 + $0xd0] ss:$72 sps:$4 sm:$0xff]   ;;  %v7323_v4 = vld [vmem:[%s10902_s1 + $0x1f4] ss:$72 sps:$4 sm:$0xff]  }
  0xc5   : > { %6588 = vmatprep.subr.msk.bf16.mxu1 %vm1839_vm1, %v6543_v16  ;;  %v7324_v16 = vld [vmem:[%s10902_s1 + $0x280] ss:$72 sps:$4 sm:$0xff]  }
  0xc7   : > { %2241 = vmatpush1.bf16.msra.mxu0 %v7202_v5 }
  0xc8   : > { %2242 = vmatprep.subr.bf16.mxu0 %v7210_v8 }
  0xca   : > { %2133 = vmatmul.mubr.bf16.gmra.mrb[56].mxu0 %v8059_v14  ;;  %v1883_v14 = vsel %vm1839_vm1, %v6542_v17, 0 }
  0xcb   : > { %2243 = vmatpush1.bf16.msra.mxu0 %v7208_v12  ;;  %6571 = vmatprep.mubr.msk.bf16.mxu0 %vm1823_vm0, %v8416_v7  ;;  %v7321_v12 = vld [vmem:[%s10902_s1 + $0x1f0] ss:$72 sps:$4 sm:$0xff]  }
  0xcc   : > { %2244 = vmatprep.subr.bf16.mxu0 %v7216_v13  ;;  %2500 = vmatpush1.bf16.msra.mxu1 %v1883_v14  ;;  %v7326_v13 = vld [vmem:[%s10902_s1 + $0x284] ss:$72 sps:$4 sm:$0xff]   ;;  %v7327_v14 = vld [vmem:[%s10902_s1 + $0x310] ss:$72 sps:$4 sm:$0xff]  }
  0xcf   : > { %2245 = vmatpush1.bf16.msra.mxu0 %v7214_v15  ;;  %2508 = vmatmul.mubr.bf16.vlgmr.msra.gmra.mrb[40].mxu1 %v8468_v23 }
  0xd0   : > { %2246 = vmatprep.subr.bf16.mxu0 %v7222_v18  ;;  %6590 = vmatprep.mubr.msk.bf16.mxu1 %vm1823_vm0, %v8472_v26  ;;  %v7329_v18 = vld [vmem:[%s10902_s1 + $0x314] ss:$72 sps:$4 sm:$0xff]  }
  0xd3   : > { %2247 = vmatpush1.bf16.msra.mxu0 %v7220_v19 }
  0xd4   : > { %2248 = vmatprep.subr.bf16.mxu0 %v7228_v20  ;;  %v7332_v20 = vld [vmem:[%s10902_s1 + $0x3a4] ss:$72 sps:$4 sm:$0xff]  }
  0xd7   : > { %2249 = vmatpush1.bf16.msra.mxu0 %v7226_v22  ;;  %2518 = vmatmul.mubr.bf16.gmra.mrb[44].mxu1 %v8488_v30 }
  0xd8   : > { %6570 = vmatprep.subr.msk.bf16.mxu0 %vm1839_vm1, %v6537_v24  ;;  %6591 = vmatprep.mubr.msk.bf16.mxu1 %vm1823_vm0, %v8492_v31  ;;  %v7330_v24 = vld [vmem:[%s10902_s1 + $0x3a0] ss:$72 sps:$4 sm:$0xff]  }
  0xdb   : > { %2251 = vmatpush1.bf16.msra.mxu0 %v1865_v11 }
  0xdc   : > { %2392 = vmatprep.subr.bf16.mxu0 %v7238_v27  ;;  %v7335_v27 = vld [vmem:[%s10902_s1 + $0x434] ss:$72 sps:$4 sm:$0xff]  }
  0xde   : > { %2259 = vmatmul.mubr.bf16.vlgmr.msra.gmra.mrb[60].mxu0 %v8468_v23 }
  0xdf   : > { %2393 = vmatpush1.bf16.msra.mxu0 %v7236_v28  ;;  %6572 = vmatprep.mubr.msk.bf16.mxu0 %vm1823_vm0, %v8472_v26  ;;  %v7333_v28 = vld [vmem:[%s10902_s1 + $0x430] ss:$72 sps:$4 sm:$0xff]  }
  0xe0   : > { %2394 = vmatprep.subr.bf16.mxu0 %v7244_v29  ;;  %2528 = vmatmul.mubr.bf16.gmra.mrb[48].mxu1 %v8512_v37  ;;  %v7338_v29 = vld [vmem:[%s10902_s1 + $0x4c4] ss:$72 sps:$4 sm:$0xff]  }
  0xe1   : > { %6592 = vmatprep.mubr.msk.bf16.mxu1 %vm1823_vm0, %v8516_v38 }
  0xe3   : > { %2395 = vmatpush1.bf16.msra.mxu0 %v7242_v32 }
  0xe4   : > { %2396 = vmatprep.subr.bf16.mxu0 %v7250_v33 }
  0xe6   : > { %2269 = vmatmul.mubr.bf16.gmra.mrb[64].mxu0 %v8488_v30 }
  0xe7   : > { %2397 = vmatpush1.bf16.msra.mxu0 %v7248_v34  ;;  %6573 = vmatprep.mubr.msk.bf16.mxu0 %vm1823_vm0, %v8492_v31  ;;  %v7336_v34 = vld [vmem:[%s10902_s1 + $0x4c0] ss:$72 sps:$4 sm:$0xff]  }
  0xe8   : > { %2398 = vmatprep.subr.bf16.mxu0 %v7256_v35  ;;  %2538 = vmatmul.mubr.bf16.gmra.mrb[52].mxu1 %v8536_v44 }
  0xe9   : > { %6593 = vmatprep.mubr.msk.bf16.mxu1 %vm1823_vm0, %v8540_v45 }
  0xeb   : > { %2399 = vmatpush1.bf16.msra.mxu0 %v7254_v40  ;;  %v7341_v40 = vld [vmem:[%s10902_s1 + $0x554] ss:$72 sps:$4 sm:$0xff]  }
  0xec   : > { %2400 = vmatprep.subr.bf16.mxu0 %v7262_v41 }
  0xee   : > { %2279 = vmatmul.mubr.bf16.gmra.mrb[68].mxu0 %v8512_v37 }
  0xef   : > { %2401 = vmatpush1.bf16.msra.mxu0 %v7260_v42  ;;  %6574 = vmatprep.mubr.msk.bf16.mxu0 %vm1823_vm0, %v8516_v38  ;;  %v7339_v42 = vld [vmem:[%s10902_s1 + $0x550] ss:$72 sps:$4 sm:$0xff]  }
  0xf0   : > { %2402 = vmatprep.subr.bf16.mxu0 %v7268_v43  ;;  %2548 = vmatmul.mubr.bf16.gmra.mrb[56].mxu1 %v8560_v36  ;;  %v7344_v43 = vld [vmem:[%s10902_s1 + $0x5e4] ss:$72 sps:$4 sm:$0xff]  }
  0xf3   : > { %2403 = vmatpush1.bf16.msra.mxu0 %v7266_v46 }
  0xf4   : > { %2404 = vmatprep.subr.bf16.mxu0 %v7274_v47  ;;  %v2647_v47 = vlaneseq }
  0xf6   : > { %2289 = vmatmul.mubr.bf16.gmra.mrb[72].mxu0 %v8536_v44 }
  0xf7   : > { %2405 = vmatpush1.bf16.msra.mxu0 %v7272_v50  ;;  %6575 = vmatprep.mubr.msk.bf16.mxu0 %vm1823_vm0, %v8540_v45 }
  0xf8   : > { %2406 = vmatprep.subr.bf16.mxu0 %v7280_v51  ;;  %v7342_v51 = vld [vmem:[%s10902_s1 + $0x5e0] ss:$72 sps:$4 sm:$0xff]  }
  0xfb   : > { %2407 = vmatpush1.bf16.msra.mxu0 %v7278_v52 }
  0xfc   : > { %2408 = vmatprep.subr.bf16.mxu0 %v7286_v39 }
  0xfe   : > { %2299 = vmatmul.mubr.bf16.gmra.mrb[76].mxu0 %v8560_v36 }
  0xff   : > { %2409 = vmatpush1.bf16.msra.mxu0 %v7284_v53  ;;  %6583 = vmatprep.mubr.msk.bf16.mxu0 %vm1823_vm0, %v8416_v7  ;;  %v652_v53 = vld [vmem:[%s10902_s1 + $0x700] sm:$0x33] }
 0x100   : > { %2410 = vmatprep.subr.bf16.mxu0 %v7292_v54  ;;  %v8728_v54 = vshrl.u32 %v2647_v47, 7 }
 0x103   : > { %2411 = vmatpush1.bf16.msra.mxu0 %v7290_v55  ;;  %v7345_v55 = vld [vmem:[%s10902_s1 + $0x670] ss:$72 sps:$4 sm:$0xff]  }
 0x104   : > { %2412 = vmatprep.subr.bf16.mxu0 %v7298_v56  ;;  %v6545_v56 = vcombine.high %v652_v53, %v652_v53 }
 0x107   : > { %2413 = vmatpush1.bf16.msra.mxu0 %v7296_v57  ;;  %v6544_v57 = vcombine.low %v652_v53, %v652_v53 }
 0x108   : > { %2414 = vmatprep.subr.bf16.mxu0 %v7304_v48  ;;  %v8734_v48 = vsub.s32 0, %v8728_v54 }
 0x10a   : > { %10934 = vst [vmem:[#allocation4_spill] sm:$0xff] %v8734_v48 }
 0x10b   : > { %2415 = vmatpush1.bf16.msra.mxu0 %v7302_v49  ;;  %v8741_v49 = vld [vmem:[%s10903_s2] sm:$0xff] }
 0x10c   : > { %6582 = vmatprep.subr.msk.bf16.mxu0 %vm1839_vm1, %v6541_v61  ;;  %v8744_v61 = vsub.s32 1, %v8728_v54 }
 0x10e   : > { %10935 = vst [vmem:[#allocation5_spill] sm:$0xff] %v8744_v61 }
 0x10f   : > { %2417 = vmatpush1.bf16.msra.mxu0 %v1877_v63  ;;  %v1889_v63 = vsel %vm1839_vm1, %v6544_v57, 0 }
 0x110   : > { %2558 = vmatprep.subr.bf16.mxu0 %v7314_v0 }
 0x112   : > { %2425 = vmatmul.mubr.bf16.vlgmr.msra.gmra.mrb[80].mxu0 %v8468_v23 }
 0x113   : > { %2559 = vmatpush1.bf16.msra.mxu0 %v7312_v1  ;;  %6584 = vmatprep.mubr.msk.bf16.mxu0 %vm1823_vm0, %v8472_v26 }
 0x114   : > { %2560 = vmatprep.subr.bf16.mxu0 %v7317_v58  ;;  %v8756_v58 = vrot.slane %v8741_v49, %v8734_v48 }
 0x115   : > { %v8619_v3 = vpop.f32.mrb[0].mxu0 }
 0x116   : > { %v8621_v5 = vpop.f32.mrb[1].mxu0 }
 0x117   : > { %v8623_v8 = vpop.f32.mrb[2].mxu0  ;;  %2561 = vmatpush1.bf16.msra.mxu0 %v7315_v59  ;;  %v8759_v59 = vsub.s32 2, %v8728_v54 }
 0x118   : > { %v8628_v10 = vpop.f32.mrb[3].mxu0  ;;  %2562 = vmatprep.subr.bf16.mxu0 %v7320_v2  ;;  %v8764_v2 = vld [vmem:[%s10904_s3] sm:$0xff] }
 0x119   : > { %10936 = vst [vmem:[#allocation6_spill] sm:$0xff] %v8759_v59 }
 0x11a   : > { %2435 = vmatmul.mubr.bf16.gmra.mrb[84].mxu0 %v8488_v30 }
 0x11b   : > { %2563 = vmatpush1.bf16.msra.mxu0 %v7318_v9  ;;  %6585 = vmatprep.mubr.msk.bf16.mxu0 %vm1823_vm0, %v8492_v31  ;;  %v8768_v9 = vrot.slane %v8741_v49, %v8744_v61 }
 0x11c   : > { %2564 = vmatprep.subr.bf16.mxu0 %v7323_v4  ;;  %v8771_v4 = vsub.s32 3, %v8728_v54 }
 0x11d   : > { %v8642_v6 = vpop.f32.mrb[4].mxu0 }
 0x11e   : > { %v8644_v15 = vpop.f32.mrb[5].mxu0  ;;  %10937 = vst [vmem:[#allocation7_spill] sm:$0xff] %v8771_v4 }
 0x11f   : > { %2565 = vmatpush1.bf16.msra.mxu0 %v7321_v12  ;;  %v8649_v17 = vpop.f32.mrb[6].mxu0  ;;  %v8736_v60 = vpop.f32.mrb[0].mxu1  ;;  %v2737_v12 = vmul.f32 %v8756_v58, %v8619_v3  ;;  %v8794_v3 = vrot.slane %v8741_v49, %v8771_v4 }
 0x120   : > { %2566 = vmatprep.subr.bf16.mxu0 %v7326_v13  ;;  %v8654_v19 = vpop.f32.mrb[7].mxu0  ;;  %v8746_v62 = vpop.f32.mrb[1].mxu1  ;;  %v8777_v13 = vrot.slane %v8764_v2, %v8734_v48 }
 0x121   : > { %v8750_v0 = vpop.f32.mrb[2].mxu1 }
 0x122   : > { %2445 = vmatmul.mubr.bf16.gmra.mrb[88].mxu0 %v8512_v37  ;;  %v8752_v1 = vpop.f32.mrb[3].mxu1 }
 0x123   : > { %2567 = vmatpush1.bf16.msra.mxu0 %v7324_v16  ;;  %6586 = vmatprep.mubr.msk.bf16.mxu0 %vm1823_vm0, %v8516_v38  ;;  %v8782_v16 = vrot.slane %v8741_v49, %v8759_v59 }
 0x124   : > { %2568 = vmatprep.subr.bf16.mxu0 %v7329_v18 }
 0x125   : > { %v8665_v21 = vpop.f32.mrb[8].mxu0 }
 0x126   : > { %v8667_v22 = vpop.f32.mrb[9].mxu0 }
 0x127   : > { %2569 = vmatpush1.bf16.msra.mxu0 %v7327_v14  ;;  %v8672_v25 = vpop.f32.mrb[10].mxu0  ;;  %v8784_v18 = vpop.f32.mrb[4].mxu1  ;;  %v2738_v14 = vmul.f32 %v8768_v9, %v8621_v5 }
 0x128   : > { %2570 = vmatprep.subr.bf16.mxu0 %v7332_v20  ;;  %v8677_v11 = vpop.f32.mrb[11].mxu0  ;;  %v8790_v20 = vrot.slane %v8764_v2, %v8744_v61 }
 0x12a   : > { %2455 = vmatmul.mubr.bf16.gmra.mrb[92].mxu0 %v8536_v44 }
 0x12b   : > { %2571 = vmatpush1.bf16.msra.mxu0 %v7330_v24  ;;  %6587 = vmatprep.mubr.msk.bf16.mxu0 %vm1823_vm0, %v8540_v45  ;;  %v2755_v24 = vmul.f32 %v8756_v58, %v8623_v8 }
 0x12c   : > { %2572 = vmatprep.subr.bf16.mxu0 %v7335_v27  ;;  %v8804_v27 = vrot.slane %v8764_v2, %v8759_v59 }
 0x12d   : > { %v8688_v32 = vpop.f32.mrb[12].mxu0 }
 0x12e   : > { %v8690_v33 = vpop.f32.mrb[13].mxu0 }
 0x12f   : > { %2573 = vmatpush1.bf16.msra.mxu0 %v7333_v28  ;;  %v8695_v35 = vpop.f32.mrb[14].mxu0  ;;  %v2756_v28 = vmul.f32 %v8768_v9, %v8628_v10 }
 0x130   : > { %2574 = vmatprep.subr.bf16.mxu0 %v7338_v29  ;;  %v8700_v41 = vpop.f32.mrb[15].mxu0 }
 0x132   : > { %2465 = vmatmul.mubr.bf16.gmra.mrb[96].mxu0 %v8560_v36 }
 0x133   : > { %2575 = vmatpush1.bf16.msra.mxu0 %v7336_v34  ;;  %6595 = vmatprep.mubr.msk.bf16.mxu0 %vm1823_vm0, %v8416_v7  ;;  %v7347_v7 = vld [vmem:[%s10902_s1 + $0x674] ss:$72 sps:$4 sm:$0xff]   ;;  %v8812_v34 = vrot.slane %v8764_v2, %v8771_v4 }
 0x134   : > { %2576 = vmatprep.subr.bf16.mxu0 %v7341_v40  ;;  %v3013_v40 = vadd.f32 %v8777_v13, %v2737_v12 }
 0x135   : > { %v8711_v46 = vpop.f32.mrb[16].mxu0 }
 0x136   : > { %v8713_v50 = vpop.f32.mrb[17].mxu0  ;;  %v3193_v12 = vmax.f32 %v3013_v40, 0.0 }
 0x137   : > { %2577 = vmatpush1.bf16.msra.mxu0 %v7339_v42  ;;  %v8718_v52 = vpop.f32.mrb[18].mxu0 }
 0x138   : > { %2578 = vmatprep.subr.bf16.mxu0 %v7344_v43  ;;  %v8723_v39 = vpop.f32.mrb[19].mxu0  ;;  %v3014_v43 = vadd.f32 %v8790_v20, %v2738_v14  ;;  %v2773_v14 = vmul.f32 %v8756_v58, %v8642_v6 }
 0x13b   : > { %2579 = vmatpush1.bf16.msra.mxu0 %v7342_v51 }
 0x13c   : > { %2580 = vmatprep.subr.bf16.mxu0 %v7347_v7  ;;  %v3031_v7 = vadd.f32 %v8777_v13, %v2755_v24 }
 0x13e   : > { %v3211_v6 = vmax.f32 %v3031_v7, 0.0  ;;  %v3049_v7 = vadd.f32 %v8777_v13, %v2773_v14 }
 0x13f   : > { %2581 = vmatpush1.bf16.msra.mxu0 %v7345_v55 }
 0x140   : > { %6594 = vmatprep.subr.msk.bf16.mxu0 %vm1839_vm1, %v6545_v56  ;;  %v3032_v56 = vadd.f32 %v8790_v20, %v2756_v28 }
 0x143   : > { %2583 = vmatpush1.bf16.msra.mxu0 %v1889_v63 }
 0x146   : > { %2591 = vmatmul.mubr.bf16.vlgmr.msra.gmra.mrb[100].mxu0 %v8468_v23  ;;  %v8798_v23 = vpop.f32.mrb[5].mxu1 }
 0x147   : > { %6596 = vmatprep.mubr.msk.bf16.mxu0 %vm1823_vm0, %v8472_v26  ;;  %v8806_v5 = vpop.f32.mrb[6].mxu1 }
 0x148   : > { %v8814_v26 = vpop.f32.mrb[7].mxu1 }
 0x149   : > { %v2011_v29 = vpop.f32.mrb[20].mxu0  ;;  %v8830_v24 = vpop.f32.mrb[8].mxu1 }
 0x14a   : > { %v2739_v8 = vmul.f32 %v8782_v16, %v2011_v29  ;;  %v2013_v42 = vpop.f32.mrb[21].mxu0  ;;  %v8837_v40 = vpop.f32.mrb[9].mxu1 }
 0x14b   : > { %v2740_v47 = vmul.f32 %v8794_v3, %v2013_v42  ;;  %v2015_v51 = vpop.f32.mrb[22].mxu0 }
 0x14c   : > { %v3015_v10 = vadd.f32 %v8804_v27, %v2739_v8  ;;  %v2757_v53 = vmul.f32 %v8782_v16, %v2015_v51  ;;  %v2017_v55 = vpop.f32.mrb[23].mxu0  ;;  %v3194_v8 = vmax.f32 %v3014_v43, 0.0  ;;  %v2774_v51 = vmul.f32 %v8768_v9, %v8644_v15 }
 0x14d   : > { %v3016_v57 = vadd.f32 %v8812_v34, %v2740_v47  ;;  %v2758_v63 = vmul.f32 %v8794_v3, %v2017_v55  ;;  %v8843_v55 = vpop.f32.mrb[10].mxu1  ;;  %v3212_v43 = vmax.f32 %v3032_v56, 0.0  ;;  %v2792_v15 = vmul.f32 %v8768_v9, %v8654_v19 }
 0x14e   : > { %v3195_v29 = vmax.f32 %v3015_v10, 0.0  ;;  %v3033_v42 = vadd.f32 %v8804_v27, %v2757_v53  ;;  %2601 = vmatmul.mubr.bf16.gmra.mrb[104].mxu0 %v8488_v30  ;;  %v2791_v10 = vmul.f32 %v8756_v58, %v8649_v17 }
 0x14f   : > { %v3196_v28 = vmax.f32 %v3016_v57, 0.0  ;;  %v3034_v47 = vadd.f32 %v8812_v34, %v2758_v63  ;;  %6597 = vmatprep.mubr.msk.bf16.mxu0 %vm1823_vm0, %v8492_v31  ;;  %v8849_v31 = vpop.f32.mrb[11].mxu1  ;;  %v3068_v14 = vadd.f32 %v8790_v20, %v2792_v15 }
 0x150   : > { %v8841_v53 = vmax.f32 %v3193_v12, %v3195_v29  ;;  %v3213_v30 = vmax.f32 %v3033_v42, 0.0  ;;  %v3050_v29 = vadd.f32 %v8790_v20, %v2774_v51  ;;  %v2809_v51 = vmul.f32 %v8756_v58, %v8665_v21 }
 0x151   : > { %v8847_v57 = vmax.f32 %v3194_v8, %v3196_v28  ;;  %v3214_v63 = vmax.f32 %v3034_v47, 0.0  ;;  %v2021_v61 = vpop.f32.mrb[24].mxu0  ;;  %v3067_v8 = vadd.f32 %v8777_v13, %v2791_v10  ;;  %v8869_v10 = vpop.f32.mrb[12].mxu1 }
 0x152   : > { %v8852_v48 = vmax.f32 %v3211_v6, %v3213_v30  ;;  %v2775_v17 = vmul.f32 %v8782_v16, %v2021_v61  ;;  %v2023_v12 = vpop.f32.mrb[25].mxu0  ;;  %v3229_v30 = vmax.f32 %v3049_v7, 0.0  ;;  %v2827_v7 = vmul.f32 %v8756_v58, %v8672_v25 }
 0x153   : > { %v8856_v42 = vmax.f32 %v3212_v43, %v3214_v63  ;;  %v2776_v56 = vmul.f32 %v8794_v3, %v2023_v12  ;;  %v2025_v19 = vpop.f32.mrb[26].mxu0  ;;  %v2810_v12 = vmul.f32 %v8768_v9, %v8667_v22  ;;  %v3247_v21 = vmax.f32 %v3067_v8, 0.0 }
 0x154   : > { %v3051_v28 = vadd.f32 %v8804_v27, %v2775_v17  ;;  %v2793_v47 = vmul.f32 %v8782_v16, %v2025_v19  ;;  %v2027_v4 = vpop.f32.mrb[27].mxu0  ;;  %v3230_v17 = vmax.f32 %v3050_v29, 0.0  ;;  %v3248_v29 = vmax.f32 %v3068_v14, 0.0 }
 0x155   : > { %v3052_v6 = vadd.f32 %v8812_v34, %v2776_v56  ;;  %v2794_v61 = vmul.f32 %v8794_v3, %v2027_v4  ;;  %v8876_v4 = vpop.f32.mrb[13].mxu1  ;;  %v2828_v22 = vmul.f32 %v8768_v9, %v8677_v11  ;;  %v3085_v8 = vadd.f32 %v8777_v13, %v2809_v51 }
 0x156   : > { %v3231_v43 = vmax.f32 %v3051_v28, 0.0  ;;  %v3069_v63 = vadd.f32 %v8804_v27, %v2793_v47  ;;  %2611 = vmatmul.mubr.bf16.gmra.mrb[108].mxu0 %v8512_v37  ;;  %v8882_v28 = vpop.f32.mrb[14].mxu1 }
 0x157   : > { %v3232_v15 = vmax.f32 %v3052_v6, 0.0  ;;  %v3070_v56 = vadd.f32 %v8812_v34, %v2794_v61  ;;  %6598 = vmatprep.mubr.msk.bf16.mxu0 %vm1823_vm0, %v8516_v38  ;;  %v8888_v38 = vpop.f32.mrb[15].mxu1  ;;  %v3104_v51 = vadd.f32 %v8790_v20, %v2828_v22 }
 0x158   : > { %v8880_v19 = vmax.f32 %v3229_v30, %v3231_v43  ;;  %v3249_v37 = vmax.f32 %v3069_v63, 0.0  ;;  %10938 = vst [vmem:[#allocation8_spill] sm:$0xff] %v8888_v38  ;;  %v3086_v43 = vadd.f32 %v8790_v20, %v2810_v12  ;;  %v2845_v12 = vmul.f32 %v8756_v58, %v8688_v32 }
 0x159   : > { %v8886_v47 = vmax.f32 %v3230_v17, %v3232_v15  ;;  %v3250_v6 = vmax.f32 %v3070_v56, 0.0  ;;  %v2031_v61 = vpop.f32.mrb[28].mxu0  ;;  %v3103_v17 = vadd.f32 %v8777_v13, %v2827_v7  ;;  %v8908_v7 = vpop.f32.mrb[16].mxu1 }
 0x15a   : > { %v8891_v59 = vmax.f32 %v3247_v21, %v3249_v37  ;;  %v2811_v25 = vmul.f32 %v8782_v16, %v2031_v61  ;;  %v2033_v30 = vpop.f32.mrb[29].mxu0  ;;  %v3265_v61 = vmax.f32 %v3085_v8, 0.0  ;;  %v2863_v8 = vmul.f32 %v8756_v58, %v8695_v35 }
 0x15b   : > { %v8895_v63 = vmax.f32 %v3248_v29, %v3250_v6  ;;  %v2812_v14 = vmul.f32 %v8794_v3, %v2033_v30  ;;  %v2035_v11 = vpop.f32.mrb[30].mxu0  ;;  %v2846_v30 = vmul.f32 %v8768_v9, %v8690_v33  ;;  %v3283_v32 = vmax.f32 %v3103_v17, 0.0 }
 0x15c   : > { %v3087_v15 = vadd.f32 %v8804_v27, %v2811_v25  ;;  %v2829_v56 = vmul.f32 %v8782_v16, %v2035_v11  ;;  %v2037_v38 = vpop.f32.mrb[31].mxu0  ;;  %v3266_v25 = vmax.f32 %v3086_v43, 0.0  ;;  %v3284_v43 = vmax.f32 %v3104_v51, 0.0 }
 0x15d   : > { %v3088_v21 = vadd.f32 %v8812_v34, %v2812_v14  ;;  %v2830_v37 = vmul.f32 %v8794_v3, %v2037_v38  ;;  %v8915_v38 = vpop.f32.mrb[17].mxu1  ;;  %v2864_v33 = vmul.f32 %v8768_v9, %v8700_v41  ;;  %v3121_v17 = vadd.f32 %v8777_v13, %v2845_v12 }
 0x15e   : > { %v3267_v29 = vmax.f32 %v3087_v15, 0.0  ;;  %v3105_v6 = vadd.f32 %v8804_v27, %v2829_v56  ;;  %2621 = vmatmul.mubr.bf16.gmra.mrb[112].mxu0 %v8536_v44  ;;  %10939 = vst [vmem:[#allocation9_spill] sm:$0xff] %v8915_v38  ;;  %v8921_v15 = vpop.f32.mrb[18].mxu1 }
 0x15f   : > { %v3268_v22 = vmax.f32 %v3088_v21, 0.0  ;;  %v3106_v14 = vadd.f32 %v8812_v34, %v2830_v37  ;;  %6599 = vmatprep.mubr.msk.bf16.mxu0 %vm1823_vm0, %v8540_v45  ;;  %10940 = vst [vmem:[#allocation10_spill] sm:$0xff] %v8921_v15  ;;  %v8927_v45 = vpop.f32.mrb[19].mxu1  ;;  %v3140_v12 = vadd.f32 %v8790_v20, %v2864_v33  ;;  %v7350_v33 = vld [vmem:[%s10905_s4] ss:$8 sps:$4 sm:$0xff]  }
 0x160   : > { %v8919_v11 = vmax.f32 %v3265_v61, %v3267_v29  ;;  %v3285_v44 = vmax.f32 %v3105_v6, 0.0  ;;  %10941 = vst [vmem:[#allocation11_spill] sm:$0xff] %v8927_v45  ;;  %v3122_v29 = vadd.f32 %v8790_v20, %v2846_v30  ;;  %v7352_v30 = vld [vmem:[%s10905_s4 + $0x4] ss:$8 sps:$4 sm:$0xff]  }
 0x161   : > { %v8925_v56 = vmax.f32 %v3266_v25, %v3268_v22  ;;  %v3286_v21 = vmax.f32 %v3106_v14, 0.0  ;;  %v2041_v37 = vpop.f32.mrb[32].mxu0  ;;  %v3139_v25 = vadd.f32 %v8777_v13, %v2863_v8  ;;  %4841 = vmatprep.subr.bf16.mxu1 %v7352_v30 }
 0x162   : > { %v8930_v38 = vmax.f32 %v3283_v32, %v3285_v44  ;;  %v2847_v35 = vmul.f32 %v8782_v16, %v2041_v37  ;;  %v2043_v61 = vpop.f32.mrb[33].mxu0  ;;  %4842 = vmatpush1.bf16.msra.mxu1 %v7350_v33 }
 0x163   : > { %v8934_v6 = vmax.f32 %v3284_v43, %v3286_v21  ;;  %v2848_v51 = vmul.f32 %v8794_v3, %v2043_v61  ;;  %v2045_v41 = vpop.f32.mrb[34].mxu0  ;;  %v3301_v43 = vmax.f32 %v3121_v17, 0.0  ;;  %v2881_v21 = vmul.f32 %v8756_v58, %v8711_v46 }
 0x164   : > { %v3123_v22 = vadd.f32 %v8804_v27, %v2847_v35  ;;  %v2865_v14 = vmul.f32 %v8782_v16, %v2045_v41  ;;  %v2047_v45 = vpop.f32.mrb[35].mxu0  ;;  %v3302_v35 = vmax.f32 %v3122_v29, 0.0  ;;  %v3319_v17 = vmax.f32 %v3139_v25, 0.0 }
 0x165   : > { %v3124_v32 = vadd.f32 %v8812_v34, %v2848_v51  ;;  %v2866_v44 = vmul.f32 %v8794_v3, %v2047_v45  ;;  %v2882_v45 = vmul.f32 %v8768_v9, %v8713_v50  ;;  %v2899_v46 = vmul.f32 %v8756_v58, %v8718_v52 }
 0x166   : > { %v3303_v8 = vmax.f32 %v3123_v22, 0.0  ;;  %v3141_v37 = vadd.f32 %v8804_v27, %v2865_v14  ;;  %2631 = vmatmul.mubr.bf16.gmra.mrb[116].mxu0 %v8560_v36  ;;  %v3320_v36 = vmax.f32 %v3140_v12, 0.0  ;;  %v2900_v14 = vmul.f32 %v8768_v9, %v8723_v39  ;;  %v7353_v12 = vld [vmem:[%s10905_s4 + $0x10] ss:$8 sps:$4 sm:$0xff]  }
 0x167   : > { %v3304_v61 = vmax.f32 %v3124_v32, 0.0  ;;  %v3142_v51 = vadd.f32 %v8812_v34, %v2866_v44  ;;  %v7355_v32 = vld [vmem:[%s10905_s4 + $0x14] ss:$8 sps:$4 sm:$0xff]   ;;  %v3157_v25 = vadd.f32 %v8777_v13, %v2881_v21  ;;  %v3158_v39 = vadd.f32 %v8790_v20, %v2882_v45 }
 0x168   : > { %v8958_v41 = vmax.f32 %v3301_v43, %v3303_v8  ;;  %v3321_v22 = vmax.f32 %v3141_v37, 0.0  ;;  %4843 = vmatprep.subr.bf16.mxu1 %v7355_v32  ;;  %v3175_v8 = vadd.f32 %v8777_v13, %v2899_v46 }
 0x169   : > { %v8962_v29 = vmax.f32 %v3302_v35, %v3304_v61  ;;  %v3322_v15 = vmax.f32 %v3142_v51, 0.0  ;;  %v2051_v50 = vpop.f32.mrb[36].mxu0  ;;  %4844 = vmatpush1.bf16.msra.mxu1 %v7353_v12  ;;  %v3176_v35 = vadd.f32 %v8790_v20, %v2900_v14  ;;  %v3337_v51 = vmax.f32 %v3157_v25, 0.0  ;;  %v7359_v12 = vld [vmem:[%s10905_s4 + $0x30] ss:$8 sps:$4 sm:$0xff]  }
 0x16a   : > { %v8968_v44 = vmax.f32 %v3319_v17, %v3321_v22  ;;  %v2883_v52 = vmul.f32 %v8782_v16, %v2051_v50  ;;  %v2053_v58 = vpop.f32.mrb[37].mxu0  ;;  %v3338_v46 = vmax.f32 %v3158_v39, 0.0 }
 0x16b   : > { %v8975_v9 = vmax.f32 %v3320_v36, %v3322_v15  ;;  %v2884_v30 = vmul.f32 %v8794_v3, %v2053_v58  ;;  %v2055_v43 = vpop.f32.mrb[38].mxu0  ;;  %v7358_v15 = vld [vmem:[%s10905_s4 + $0x24] ss:$8 sps:$4 sm:$0xff]   ;;  %v3355_v36 = vmax.f32 %v3175_v8, 0.0  ;;  %v3356_v50 = vmax.f32 %v3176_v35, 0.0 }
 0x16c   : > { %v3159_v21 = vadd.f32 %v8804_v27, %v2883_v52  ;;  %v2901_v37 = vmul.f32 %v8782_v16, %v2055_v43  ;;  %v2057_v33 = vpop.f32.mrb[39].mxu0  ;;  %v7356_v16 = vld [vmem:[%s10905_s4 + $0x20] ss:$8 sps:$4 sm:$0xff]   ;;  %4845 = vmatprep.subr.bf16.mxu1 %v7358_v15  ;;  %v9002_v58 = vsub.s32 6, %v8728_v54 }
 0x16d   : > { %v3160_v61 = vadd.f32 %v8812_v34, %v2884_v30  ;;  %v2902_v45 = vmul.f32 %v8794_v3, %v2057_v33  ;;  %4846 = vmatpush1.bf16.msra.mxu1 %v7356_v16  ;;  %v9012_v30 = vsub.s32 7, %v8728_v54  ;;  %v9024_v33 = vsub.s32 4, %v8728_v54 }
 0x16e   : > { %v3339_v17 = vmax.f32 %v3159_v21, 0.0  ;;  %v3177_v13 = vadd.f32 %v8804_v27, %v2901_v37  ;;  %v7361_v27 = vld [vmem:[%s10905_s4 + $0x34] ss:$8 sps:$4 sm:$0xff]   ;;  %10942 = vst [vmem:[#allocation12_spill] sm:$0xff] %v9002_v58  ;;  %v7364_v37 = vld [vmem:[%s10905_s4 + $0x44] ss:$8 sps:$4 sm:$0xff]   ;;  %v9028_v35 = vrot.slane %v8741_v49, %v9002_v58 }
 0x16f   : > { %v3340_v22 = vmax.f32 %v3160_v61, 0.0  ;;  %v3178_v20 = vadd.f32 %v8812_v34, %v2902_v45  ;;  %v9004_v34 = vpop.f32.mrb[20].mxu1  ;;  %10943 = vst [vmem:[#allocation13_spill] sm:$0xff] %v9012_v30  ;;  %4847 = vmatprep.subr.bf16.mxu1 %v7361_v27  ;;  %10945 = vst [vmem:[#allocation15_spill] sm:$0xff] %v9024_v33  ;;  %v7362_v61 = vld [vmem:[%s10905_s4 + $0x40] ss:$8 sps:$4 sm:$0xff]   ;;  %v9038_v15 = vrot.slane %v8741_v49, %v9012_v30 }
 0x170   : > { %v8992_v14 = vmax.f32 %v3337_v51, %v3339_v17  ;;  %v3357_v3 = vmax.f32 %v3177_v13, 0.0  ;;  %v9014_v43 = vpop.f32.mrb[21].mxu1  ;;  %v9034_v45 = vsub.s32 5, %v8728_v54  ;;  %v7367_v51 = vld [vmem:[%s10905_s4 + $0x54] ss:$8 sps:$4 sm:$0xff]   ;;  %v9045_v17 = vrot.slane %v8741_v49, %v9024_v33 }
 0x171   : > { %v8994_v32 = vmax.f32 %v3338_v46, %v3340_v22  ;;  %v3358_v25 = vmax.f32 %v3178_v20, 0.0  ;;  %v9016_v8 = vpop.f32.mrb[22].mxu1  ;;  %4848 = vmatpush1.bf16.msra.mxu1 %v7359_v12  ;;  %v2743_v13 = vmul.f32 %v9028_v35, %v8736_v60  ;;  %v9051_v54 = vrot.slane %v8764_v2, %v9002_v58  ;;  %v7365_v46 = vld [vmem:[%s10905_s4 + $0x50] ss:$8 sps:$4 sm:$0xff]  }
 0x172   : > { %v8999_v52 = vmax.f32 %v3355_v36, %v3357_v3  ;;  %v9018_v21 = vpop.f32.mrb[23].mxu1  ;;  %10946 = vst [vmem:[#allocation16_spill] sm:$0xff] %v9034_v45  ;;  %4849 = vmatprep.subr.bf16.mxu1 %v7364_v37  ;;  %v9060_v22 = vrot.slane %v8741_v49, %v9034_v45  ;;  %v2744_v20 = vmul.f32 %v9038_v15, %v8746_v62  ;;  %v7370_v37 = vld [vmem:[%s10905_s4 + $0x64] ss:$8 sps:$4 sm:$0xff]  }
 0x173   : > { %v9009_v39 = vmax.f32 %v3356_v50, %v3358_v25  ;;  %10944 = vst [vmem:[#allocation14_spill] sm:$0xff] %v9018_v21  ;;  %v9053_v16 = vpop.f32.mrb[24].mxu1  ;;  %v9066_v60 = vrot.slane %v8764_v2, %v9012_v30  ;;  %v9072_v3 = vrot.slane %v8764_v2, %v9024_v33  ;;  %v2761_v50 = vmul.f32 %v9028_v35, %v8750_v0 }
 0x174   : > { %10947 = vst [vmem:[#allocation17_spill] sm:$0xff] %v9053_v16  ;;  %v9068_v36 = vpop.f32.mrb[25].mxu1  ;;  %v9080_v62 = vrot.slane %v8764_v2, %v9034_v45  ;;  %v2762_v27 = vmul.f32 %v9038_v15, %v8752_v1 }
 0x175   : > { %4850 = vmatpush1.bf16.msra.mxu1 %v7362_v61  ;;  %10948 = vst [vmem:[#allocation18_spill] sm:$0xff] %v9068_v36  ;;  %v9076_v25 = vpop.f32.mrb[26].mxu1  ;;  %v3020_v1 = vadd.f32 %v9066_v60, %v2744_v20 }
 0x176   : > { %4851 = vmatprep.subr.bf16.mxu1 %v7367_v51  ;;  %10949 = vst [vmem:[#allocation19_spill] sm:$0xff] %v9076_v25  ;;  %v9084_v12 = vpop.f32.mrb[27].mxu1  ;;  %v3019_v51 = vadd.f32 %v9051_v54, %v2743_v13  ;;  %v3038_v25 = vadd.f32 %v9066_v60, %v2762_v27 }
 0x177   : > { %10950 = vst [vmem:[#allocation20_spill] sm:$0xff] %v9084_v12  ;;  %v9108_v36 = vpop.f32.mrb[28].mxu1 }
 0x178   : > { %10951 = vst [vmem:[#allocation21_spill] sm:$0xff] %v9108_v36  ;;  %v2797_v36 = vmul.f32 %v9028_v35, %v8806_v5 }
 0x179   : > { %4852 = vmatpush1.bf16.msra.mxu1 %v7365_v46  ;;  %v7368_v46 = vld [vmem:[%s10905_s4 + $0x60] ss:$8 sps:$4 sm:$0xff]  }
 0x17a   : > { %4853 = vmatprep.subr.bf16.mxu1 %v7370_v37 }
 0x17d   : > { %v2094_v49 = vpop.f32.mrb[40].mxu0  ;;  %4854 = vmatpush1.bf16.msra.mxu1 %v7368_v46  ;;  %v3200_v46 = vmax.f32 %v3020_v1, 0.0  ;;  %v3218_v1 = vmax.f32 %v3038_v25, 0.0  ;;  %v7374_v25 = vld [vmem:[%s10905_s4 + $0x80] ss:$8 sps:$4 sm:$0xff]  }
 0x17e   : > { %v2741_v61 = vmul.f32 %v9045_v17, %v2094_v49  ;;  %v2096_v0 = vpop.f32.mrb[41].mxu0  ;;  %v3037_v49 = vadd.f32 %v9051_v54, %v2761_v50  ;;  %v7371_v50 = vld [vmem:[%s10905_s4 + $0x70] ss:$8 sps:$4 sm:$0xff]  }
 0x17f   : > { %v2742_v2 = vmul.f32 %v9060_v22, %v2096_v0  ;;  %v2098_v45 = vpop.f32.mrb[42].mxu0  ;;  %v7373_v0 = vld [vmem:[%s10905_s4 + $0x74] ss:$8 sps:$4 sm:$0xff]  }
 0x180   : > { %v3017_v33 = vadd.f32 %v9072_v3, %v2741_v61  ;;  %v2759_v30 = vmul.f32 %v9045_v17, %v2098_v45  ;;  %v2100_v58 = vpop.f32.mrb[43].mxu0  ;;  %v3199_v61 = vmax.f32 %v3019_v51, 0.0  ;;  %v2779_v45 = vmul.f32 %v9028_v35, %v8784_v18  ;;  %4855 = vmatprep.subr.bf16.mxu1 %v7373_v0 }
 0x181   : > { %v3018_v13 = vadd.f32 %v9080_v62, %v2742_v2  ;;  %v2760_v12 = vmul.f32 %v9060_v22, %v2100_v58  ;;  %v2780_v2 = vmul.f32 %v9038_v15, %v8798_v23  ;;  %v3217_v18 = vmax.f32 %v3037_v49, 0.0  ;;  %4856 = vmatpush1.bf16.msra.mxu1 %v7371_v50 }
 0x182   : > { %v3197_v20 = vmax.f32 %v3017_v33, 0.0  ;;  %v3035_v37 = vadd.f32 %v9072_v3, %v2759_v30  ;;  %v9116_v33 = vpop.f32.mrb[29].mxu1  ;;  %v2798_v23 = vmul.f32 %v9038_v15, %v8814_v26 }
 0x183   : > { %v3198_v58 = vmax.f32 %v3018_v13, 0.0  ;;  %v3036_v27 = vadd.f32 %v9080_v62, %v2760_v12  ;;  %10952 = vst [vmem:[#allocation22_spill] sm:$0xff] %v9116_v33  ;;  %v9121_v16 = vpop.f32.mrb[30].mxu1 }
 0x184   : > { %v3393_v30 = vmax.f32 %v8841_v53, %v3197_v20  ;;  %v3215_v51 = vmax.f32 %v3035_v37, 0.0  ;;  %v9126_v33 = vpop.f32.mrb[31].mxu1  ;;  %v7376_v53 = vld [vmem:[%s10905_s4 + $0x84] ss:$8 sps:$4 sm:$0xff]  }
 0x185   : > { %v3394_v13 = vmax.f32 %v8847_v57, %v3198_v58  ;;  %v3216_v12 = vmax.f32 %v3036_v27, 0.0  ;;  %v2104_v21 = vpop.f32.mrb[44].mxu0  ;;  %v3055_v57 = vadd.f32 %v9051_v54, %v2779_v45  ;;  %4857 = vmatprep.subr.bf16.mxu1 %v7376_v53 }
 0x186   : > { %v3395_v49 = vmax.f32 %v8852_v48, %v3215_v51  ;;  %v9132_v5 = vmax.f32 %v3393_v30, %v3199_v61  ;;  %v2777_v0 = vmul.f32 %v9045_v17, %v2104_v21  ;;  %v2106_v20 = vpop.f32.mrb[45].mxu0  ;;  %v3056_v48 = vadd.f32 %v9066_v60, %v2780_v2  ;;  %4858 = vmatpush1.bf16.msra.mxu1 %v7374_v25  ;;  %v7379_v2 = vld [vmem:[%s10905_s4 + $0x94] ss:$8 sps:$4 sm:$0xff]  }
 0x187   : > { %v3396_v26 = vmax.f32 %v8856_v42, %v3216_v12  ;;  %v9140_v37 = vmax.f32 %v3394_v13, %v3200_v46  ;;  %v2778_v50 = vmul.f32 %v9060_v22, %v2106_v20  ;;  %v2108_v58 = vpop.f32.mrb[46].mxu0  ;;  %v3073_v30 = vadd.f32 %v9051_v54, %v2797_v36  ;;  %4859 = vmatprep.subr.bf16.mxu1 %v7379_v2 }
 0x188   : > { %v9144_v61 = vmax.f32 %v3395_v49, %v3217_v18  ;;  %v3053_v21 = vadd.f32 %v9072_v3, %v2777_v0  ;;  %v2795_v45 = vmul.f32 %v9045_v17, %v2108_v58  ;;  %v2110_v27 = vpop.f32.mrb[47].mxu0  ;;  %v3074_v13 = vadd.f32 %v9066_v60, %v2798_v23  ;;  %v9160_v49 = vpop.f32.mrb[32].mxu1 }
 0x189   : > { %v9149_v51 = vmax.f32 %v3396_v26, %v3218_v1  ;;  %v3054_v42 = vadd.f32 %v9080_v62, %v2778_v50  ;;  %v2796_v46 = vmul.f32 %v9060_v22, %v2110_v27  ;;  %v3235_v53 = vmax.f32 %v3055_v57, 0.0  ;;  %v7377_v1 = vld [vmem:[%s10905_s4 + $0x90] ss:$8 sps:$4 sm:$0xff]   ;;  %v9168_v26 = vpop.f32.mrb[33].mxu1 }
 0x18a   : > { %v3233_v18 = vmax.f32 %v3053_v21, 0.0  ;;  %v3071_v12 = vadd.f32 %v9072_v3, %v2795_v45  ;;  %v2815_v36 = vmul.f32 %v9028_v35, %v8830_v24  ;;  %v3236_v20 = vmax.f32 %v3056_v48, 0.0  ;;  %v9173_v21 = vpop.f32.mrb[34].mxu1  ;;  %4860 = vmatpush1.bf16.msra.mxu1 %v7377_v1 }
 0x18b   : > { %v3234_v0 = vmax.f32 %v3054_v42, 0.0  ;;  %v3072_v23 = vadd.f32 %v9080_v62, %v2796_v46  ;;  %v2816_v25 = vmul.f32 %v9038_v15, %v8837_v40  ;;  %v3253_v24 = vmax.f32 %v3073_v30, 0.0  ;;  %v9178_v46 = vpop.f32.mrb[35].mxu1 }
 0x18c   : > { %v3397_v57 = vmax.f32 %v8880_v19, %v3233_v18  ;;  %v3251_v50 = vmax.f32 %v3071_v12, 0.0  ;;  %v2833_v58 = vmul.f32 %v9028_v35, %v8843_v55  ;;  %v3254_v48 = vmax.f32 %v3074_v13, 0.0  ;;  %v7382_v19 = vld [vmem:[%s10905_s4 + $0xa4] ss:$8 sps:$4 sm:$0xff]   ;;  %v7380_v13 = vld [vmem:[%s10905_s4 + $0xa0] ss:$8 sps:$4 sm:$0xff]  }
 0x18d   : > { %v3398_v45 = vmax.f32 %v8886_v47, %v3234_v0  ;;  %v3252_v27 = vmax.f32 %v3072_v23, 0.0  ;;  %v2114_v42 = vpop.f32.mrb[48].mxu0  ;;  %v2834_v40 = vmul.f32 %v9038_v15, %v8849_v31  ;;  %v3091_v47 = vadd.f32 %v9051_v54, %v2815_v36  ;;  %4861 = vmatprep.subr.bf16.mxu1 %v7382_v19 }
 0x18e   : > { %v3399_v30 = vmax.f32 %v8891_v59, %v3251_v50  ;;  %v9184_v55 = vmax.f32 %v3397_v57, %v3235_v53  ;;  %v2813_v2 = vmul.f32 %v9045_v17, %v2114_v42  ;;  %v2116_v18 = vpop.f32.mrb[49].mxu0  ;;  %v3092_v59 = vadd.f32 %v9066_v60, %v2816_v25  ;;  %4862 = vmatpush1.bf16.msra.mxu1 %v7380_v13  ;;  %v7383_v25 = vld [vmem:[%s10905_s4 + $0xb0] ss:$8 sps:$4 sm:$0xff]  }
 0x18f   : > { %v3400_v31 = vmax.f32 %v8895_v63, %v3252_v27  ;;  %v9192_v12 = vmax.f32 %v3398_v45, %v3236_v20  ;;  %v2814_v1 = vmul.f32 %v9060_v22, %v2116_v18  ;;  %v2118_v0 = vpop.f32.mrb[50].mxu0  ;;  %v3109_v50 = vadd.f32 %v9051_v54, %v2833_v58 }
 0x190   : > { %v9196_v53 = vmax.f32 %v3399_v30, %v3253_v24  ;;  %v3089_v23 = vadd.f32 %v9072_v3, %v2813_v2  ;;  %v2831_v36 = vmul.f32 %v9045_v17, %v2118_v0  ;;  %v2120_v57 = vpop.f32.mrb[51].mxu0  ;;  %v3110_v45 = vadd.f32 %v9066_v60, %v2834_v40  ;;  %v7385_v24 = vld [vmem:[%s10905_s4 + $0xb4] ss:$8 sps:$4 sm:$0xff]   ;;  %v9215_v30 = vpop.f32.mrb[36].mxu1  ;;  %v7388_v40 = vld [vmem:[%s10905_s4 + $0xc4] ss:$8 sps:$4 sm:$0xff]  }
 0x191   : > { %v9201_v42 = vmax.f32 %v3400_v31, %v3254_v48  ;;  %v3090_v63 = vadd.f32 %v9080_v62, %v2814_v1  ;;  %v2832_v20 = vmul.f32 %v9060_v22, %v2120_v57  ;;  %v3271_v19 = vmax.f32 %v3091_v47, 0.0  ;;  %v9223_v1 = vpop.f32.mrb[37].mxu1  ;;  %4863 = vmatprep.subr.bf16.mxu1 %v7385_v24  ;;  %v10954_v24 = vld [vmem:[#allocation8_spill] sm:$0xff] }
 0x192   : > { %v3269_v27 = vmax.f32 %v3089_v23, 0.0  ;;  %v3107_v58 = vadd.f32 %v9072_v3, %v2831_v36  ;;  %v2851_v48 = vmul.f32 %v9028_v35, %v8869_v10  ;;  %v3272_v13 = vmax.f32 %v3092_v59, 0.0  ;;  %v9228_v36 = vpop.f32.mrb[38].mxu1  ;;  %4864 = vmatpush1.bf16.msra.mxu1 %v7383_v25  ;;  %v7386_v59 = vld [vmem:[%s10905_s4 + $0xc0] ss:$8 sps:$4 sm:$0xff]  }
 0x193   : > { %v3270_v2 = vmax.f32 %v3090_v63, 0.0  ;;  %v3108_v18 = vadd.f32 %v9080_v62, %v2832_v20  ;;  %v2852_v31 = vmul.f32 %v9038_v15, %v8876_v4  ;;  %v3289_v10 = vmax.f32 %v3109_v50, 0.0  ;;  %10953 = vst [vmem:[#allocation23_spill] sm:$0xff] %v9228_v36  ;;  %4865 = vmatprep.subr.bf16.mxu1 %v7388_v40 }
 0x194   : > { %v3401_v47 = vmax.f32 %v8919_v11, %v3269_v27  ;;  %v3287_v0 = vmax.f32 %v3107_v58, 0.0  ;;  %v2869_v23 = vmul.f32 %v9028_v35, %v8882_v28  ;;  %v3290_v63 = vmax.f32 %v3110_v45, 0.0  ;;  %v9236_v27 = vpop.f32.mrb[39].mxu1 }
 0x195   : > { %v3402_v57 = vmax.f32 %v8925_v56, %v3270_v2  ;;  %v3288_v4 = vmax.f32 %v3108_v18, 0.0  ;;  %v2124_v20 = vpop.f32.mrb[52].mxu0  ;;  %v2870_v11 = vmul.f32 %v9038_v15, %v10954_v24  ;;  %10955 = vst [vmem:[#allocation8_spill] sm:$0xff] %v9236_v27  ;;  %v3127_v36 = vadd.f32 %v9051_v54, %v2851_v48 }
 0x196   : > { %v3403_v28 = vmax.f32 %v8930_v38, %v3287_v0  ;;  %v9239_v50 = vmax.f32 %v3401_v47, %v3271_v19  ;;  %v2849_v25 = vmul.f32 %v9045_v17, %v2124_v20  ;;  %v2126_v58 = vpop.f32.mrb[53].mxu0  ;;  %v3128_v24 = vadd.f32 %v9066_v60, %v2852_v31  ;;  %4866 = vmatpush1.bf16.msra.mxu1 %v7386_v59  ;;  %v7391_v31 = vld [vmem:[%s10905_s4 + $0xd4] ss:$8 sps:$4 sm:$0xff]   ;;  %v7389_v59 = vld [vmem:[%s10905_s4 + $0xd0] ss:$8 sps:$4 sm:$0xff]  }
 0x197   : > { %v3404_v56 = vmax.f32 %v8934_v6, %v3288_v4  ;;  %v9244_v2 = vmax.f32 %v3402_v57, %v3272_v13  ;;  %v2850_v45 = vmul.f32 %v9060_v22, %v2126_v58  ;;  %v2128_v18 = vpop.f32.mrb[54].mxu0  ;;  %v3145_v47 = vadd.f32 %v9051_v54, %v2869_v23  ;;  %4867 = vmatprep.subr.bf16.mxu1 %v7391_v31 }
 0x198   : > { %v9248_v27 = vmax.f32 %v3403_v28, %v3289_v10  ;;  %v3125_v38 = vadd.f32 %v9072_v3, %v2849_v25  ;;  %v2867_v19 = vmul.f32 %v9045_v17, %v2128_v18  ;;  %v2130_v40 = vpop.f32.mrb[55].mxu0  ;;  %v3146_v0 = vadd.f32 %v9066_v60, %v2870_v11  ;;  %v10956_v11 = vld [vmem:[#allocation9_spill] sm:$0xff] }
 0x199   : > { %v9253_v48 = vmax.f32 %v3404_v56, %v3290_v63  ;;  %v3126_v6 = vadd.f32 %v9080_v62, %v2850_v45  ;;  %v2868_v13 = vmul.f32 %v9060_v22, %v2130_v40  ;;  %v3307_v4 = vmax.f32 %v3127_v36, 0.0  ;;  %v10957_v36 = vld [vmem:[#allocation10_spill] sm:$0xff] }
 0x19a   : > { %v3305_v10 = vmax.f32 %v3125_v38, 0.0  ;;  %v3143_v57 = vadd.f32 %v9072_v3, %v2867_v19  ;;  %v2887_v23 = vmul.f32 %v9028_v35, %v8908_v7  ;;  %v3308_v28 = vmax.f32 %v3128_v24, 0.0  ;;  %4868 = vmatpush1.bf16.msra.mxu1 %v7389_v59 }
 0x19b   : > { %v3306_v63 = vmax.f32 %v3126_v6, 0.0  ;;  %v3144_v20 = vadd.f32 %v9080_v62, %v2868_v13  ;;  %v2888_v25 = vmul.f32 %v9038_v15, %v10956_v11  ;;  %v3325_v45 = vmax.f32 %v3145_v47, 0.0  ;;  %v10958_v6 = vld [vmem:[#allocation11_spill] sm:$0xff]  ;;  %v7394_v13 = vld [vmem:[%s10905_s4 + $0xe4] ss:$8 sps:$4 sm:$0xff]  }
 0x19c   : > { %v3405_v58 = vmax.f32 %v8958_v41, %v3305_v10  ;;  %v3323_v56 = vmax.f32 %v3143_v57, 0.0  ;;  %v2905_v18 = vmul.f32 %v9028_v35, %v10957_v36  ;;  %v3326_v19 = vmax.f32 %v3146_v0, 0.0  ;;  %4869 = vmatprep.subr.bf16.mxu1 %v7394_v13 }
 0x19d   : > { %v3406_v7 = vmax.f32 %v8962_v29, %v3306_v63  ;;  %v3324_v38 = vmax.f32 %v3144_v20, 0.0  ;;  %v2134_v40 = vpop.f32.mrb[56].mxu0  ;;  %v2906_v24 = vmul.f32 %v9038_v15, %v10958_v6  ;;  %v3163_v10 = vadd.f32 %v9051_v54, %v2887_v23  ;;  %v7392_v29 = vld [vmem:[%s10905_s4 + $0xe0] ss:$8 sps:$4 sm:$0xff]  }
 0x19e   : > { %v3407_v41 = vmax.f32 %v8968_v44, %v3323_v56  ;;  %v9280_v31 = vmax.f32 %v3405_v58, %v3307_v4  ;;  %v2885_v47 = vmul.f32 %v9045_v17, %v2134_v40  ;;  %v2136_v35 = vpop.f32.mrb[57].mxu0  ;;  %v3164_v44 = vadd.f32 %v9066_v60, %v2888_v25  ;;  %4870 = vmatpush1.bf16.msra.mxu1 %v7392_v29  ;;  %v7397_v25 = vld [vmem:[%s10905_s4 + $0xf4] ss:$8 sps:$4 sm:$0xff]  }
 0x19f   : > { %v3408_v0 = vmax.f32 %v8975_v9, %v3324_v38  ;;  %v9288_v15 = vmax.f32 %v3406_v7, %v3308_v28  ;;  %v2886_v57 = vmul.f32 %v9060_v22, %v2136_v35  ;;  %v2138_v59 = vpop.f32.mrb[58].mxu0  ;;  %v3181_v11 = vadd.f32 %v9051_v54, %v2905_v18  ;;  %v7395_v54 = vld [vmem:[%s10905_s4 + $0xf0] ss:$8 sps:$4 sm:$0xff]   ;;  %4871 = vmatprep.subr.bf16.mxu1 %v7397_v25 }
 0x1a0   : > { %v9292_v4 = vmax.f32 %v3407_v41, %v3325_v45  ;;  %v3161_v63 = vadd.f32 %v9072_v3, %v2885_v47  ;;  %v2903_v23 = vmul.f32 %v9045_v17, %v2138_v59  ;;  %v2140_v20 = vpop.f32.mrb[59].mxu0  ;;  %v3182_v56 = vadd.f32 %v9066_v60, %v2906_v24  ;;  %v10963_v59 = vld [vmem:[#allocation7_spill] sm:$0xff] }
 0x1a1   : > { %v9297_v58 = vmax.f32 %v3408_v0, %v3326_v19  ;;  %v3162_v9 = vadd.f32 %v9080_v62, %v2886_v57  ;;  %v2904_v28 = vmul.f32 %v9060_v22, %v2140_v20  ;;  %v3343_v17 = vmax.f32 %v3163_v10, 0.0  ;;  %v10962_v57 = vld [vmem:[#allocation6_spill] sm:$0xff] }
 0x1a2   : > { %v3341_v45 = vmax.f32 %v3161_v63, 0.0  ;;  %v3179_v36 = vadd.f32 %v9072_v3, %v2903_v23  ;;  %v3344_v38 = vmax.f32 %v3164_v44, 0.0  ;;  %v3361_v19 = vmax.f32 %v3181_v11, 0.0  ;;  %4872 = vmatpush1.bf16.msra.mxu1 %v7395_v54  ;;  %v7400_v3 = vld [vmem:[%s10905_s4 + $0x104] ss:$8 sps:$4 sm:$0xff]  }
 0x1a3   : > { %v3342_v18 = vmax.f32 %v3162_v9, 0.0  ;;  %v3180_v7 = vadd.f32 %v9080_v62, %v2904_v28  ;;  %v3362_v24 = vmax.f32 %v3182_v56, 0.0  ;;  %v9318_v62 = vpop.f32.mrb[40].mxu1  ;;  %4924 = vmatprep.subr.bf16.mxu1 %v7400_v3  ;;  %v9349_v63 = vld [vmem:[%s10904_s3 + $0x8] sm:$0xff]  ;;  %v10964_v23 = vld [vmem:[#allocation4_spill] sm:$0xff] }
 0x1a4   : > { %v3409_v22 = vmax.f32 %v8992_v14, %v3341_v45  ;;  %v3359_v60 = vmax.f32 %v3179_v36, 0.0  ;;  %v9323_v35 = vpop.f32.mrb[41].mxu1  ;;  %v9359_v9 = vrot.slane %v9349_v63, %v10962_v57  ;;  %v10966_v56 = vld [vmem:[#allocation5_spill] sm:$0xff]  ;;  %v9371_v36 = vrot.slane %v9349_v63, %v10963_v59 }
 0x1a5   : > { %v3410_v40 = vmax.f32 %v8994_v32, %v3342_v18  ;;  %v3360_v6 = vmax.f32 %v3180_v7, 0.0  ;;  %10959 = vst [vmem:[#allocation9_spill] sm:$0xff] %v9323_v35  ;;  %v9327_v10 = vpop.f32.mrb[42].mxu1 }
 0x1a6   : > { %v3411_v13 = vmax.f32 %v8999_v52, %v3359_v60  ;;  %v9316_v41 = vmax.f32 %v3409_v22, %v3343_v17  ;;  %10960 = vst [vmem:[#allocation10_spill] sm:$0xff] %v9327_v10  ;;  %v9334_v52 = vld [vmem:[%s10903_s2 + $0x8] sm:$0xff]  ;;  %v9336_v0 = vpop.f32.mrb[43].mxu1 }
 0x1a7   : > { %v3412_v47 = vmax.f32 %v9009_v39, %v3360_v6  ;;  %v9321_v14 = vmax.f32 %v3410_v40, %v3344_v38  ;;  %10961 = vst [vmem:[#allocation11_spill] sm:$0xff] %v9336_v0  ;;  %v9340_v39 = vrot.slane %v9334_v52, %v10962_v57  ;;  %v9344_v44 = vrot.slane %v9334_v52, %v10963_v59 }
 0x1a8   : > { %v9325_v32 = vmax.f32 %v3411_v13, %v3361_v19  ;;  %v9353_v20 = vrot.slane %v9334_v52, %v10964_v23  ;;  %v9365_v25 = vrot.slane %v9334_v52, %v10966_v56  ;;  %v9385_v38 = vrot.slane %v9349_v63, %v10966_v56 }
 0x1a9   : > { %v9329_v29 = vmax.f32 %v3412_v47, %v3362_v24  ;;  %v2747_v11 = vmul.f32 %v9340_v39, %v9004_v34  ;;  %v2748_v45 = vmul.f32 %v9344_v44, %v9014_v43  ;;  %v9377_v34 = vrot.slane %v9349_v63, %v10964_v23  ;;  %v10969_v43 = vld [vmem:[#allocation14_spill] sm:$0xff]  ;;  %v10971_v23 = vld [vmem:[#allocation17_spill] sm:$0xff] }
 0x1aa   : > { %v9361_v28 = vpop.f32.mrb[44].mxu1  ;;  %v2765_v54 = vmul.f32 %v9340_v39, %v9016_v8  ;;  %v2766_v22 = vmul.f32 %v9344_v44, %v10969_v43 }
 0x1ab   : > { %10965 = vst [vmem:[#allocation24_spill] sm:$0xff] %v9361_v28  ;;  %v9373_v17 = vpop.f32.mrb[45].mxu1  ;;  %v3023_v6 = vadd.f32 %v9359_v9, %v2747_v11  ;;  %v3024_v3 = vadd.f32 %v9371_v36, %v2748_v45  ;;  %v2783_v11 = vmul.f32 %v9340_v39, %v10971_v23  ;;  %v10974_v28 = vld [vmem:[#allocation19_spill] sm:$0xff] }
 0x1ac   : > { %10967 = vst [vmem:[#allocation25_spill] sm:$0xff] %v9373_v17  ;;  %v9381_v18 = vpop.f32.mrb[46].mxu1  ;;  %v3041_v57 = vadd.f32 %v9359_v9, %v2765_v54 }
 0x1ad   : > { %10968 = vst [vmem:[#allocation26_spill] sm:$0xff] %v9381_v18  ;;  %v9389_v60 = vpop.f32.mrb[47].mxu1  ;;  %v3203_v45 = vmax.f32 %v3023_v6, 0.0  ;;  %v10972_v18 = vld [vmem:[#allocation18_spill] sm:$0xff] }
 0x1ae   : > { %10970 = vst [vmem:[#allocation14_spill] sm:$0xff] %v9389_v60  ;;  %v3221_v0 = vmax.f32 %v3041_v57, 0.0 }
 0x1b1   : > { %v2260_v7 = vpop.f32.mrb[60].mxu0 }
 0x1b2   : > { %v2745_v19 = vmul.f32 %v9353_v20, %v2260_v7  ;;  %v2262_v40 = vpop.f32.mrb[61].mxu0  ;;  %v3042_v7 = vadd.f32 %v9371_v36, %v2766_v22 }
 0x1b3   : > { %v2746_v24 = vmul.f32 %v9365_v25, %v2262_v40  ;;  %v2264_v8 = vpop.f32.mrb[62].mxu0 }
 0x1b4   : > { %v3021_v13 = vadd.f32 %v9377_v34, %v2745_v19  ;;  %v2763_v47 = vmul.f32 %v9353_v20, %v2264_v8  ;;  %v2266_v59 = vpop.f32.mrb[63].mxu0  ;;  %v2784_v19 = vmul.f32 %v9344_v44, %v10972_v18  ;;  %v9406_v8 = vpop.f32.mrb[48].mxu1 }
 0x1b5   : > { %v3022_v43 = vadd.f32 %v9385_v38, %v2746_v24  ;;  %v2764_v56 = vmul.f32 %v9365_v25, %v2266_v59  ;;  %10973 = vst [vmem:[#allocation17_spill] sm:$0xff] %v9406_v8  ;;  %v3204_v24 = vmax.f32 %v3024_v3, 0.0  ;;  %v2801_v59 = vmul.f32 %v9340_v39, %v10974_v28  ;;  %v9411_v22 = vpop.f32.mrb[49].mxu1 }
 0x1b6   : > { %v3201_v40 = vmax.f32 %v3021_v13, 0.0  ;;  %v3039_v60 = vadd.f32 %v9377_v34, %v2763_v47  ;;  %10975 = vst [vmem:[#allocation18_spill] sm:$0xff] %v9411_v22  ;;  %v10976_v47 = vld [vmem:[#allocation20_spill] sm:$0xff]  ;;  %v9416_v10 = vpop.f32.mrb[50].mxu1  ;;  %v3222_v8 = vmax.f32 %v3042_v7, 0.0  ;;  %v3059_v3 = vadd.f32 %v9359_v9, %v2783_v11 }
 0x1b7   : > { %v3202_v17 = vmax.f32 %v3022_v43, 0.0  ;;  %v3040_v54 = vadd.f32 %v9385_v38, %v2764_v56  ;;  %v2802_v6 = vmul.f32 %v9344_v44, %v10976_v47  ;;  %v9420_v35 = vpop.f32.mrb[51].mxu1  ;;  %v3077_v7 = vadd.f32 %v9359_v9, %v2801_v59 }
 0x1b8   : > { %v3433_v23 = vmax.f32 %v9132_v5, %v3201_v40  ;;  %v3219_v13 = vmax.f32 %v3039_v60, 0.0  ;;  %v3060_v60 = vadd.f32 %v9371_v36, %v2784_v19  ;;  %v3239_v59 = vmax.f32 %v3059_v3, 0.0 }
 0x1b9   : > { %v3434_v18 = vmax.f32 %v9140_v37, %v3202_v17  ;;  %v3220_v43 = vmax.f32 %v3040_v54, 0.0  ;;  %v2270_v56 = vpop.f32.mrb[64].mxu0 }
 0x1ba   : > { %v3435_v28 = vmax.f32 %v9144_v61, %v3219_v13  ;;  %v9423_v22 = vmax.f32 %v3433_v23, %v3203_v45  ;;  %v2781_v5 = vmul.f32 %v9353_v20, %v2270_v56  ;;  %v2272_v57 = vpop.f32.mrb[65].mxu0  ;;  %v3078_v23 = vadd.f32 %v9371_v36, %v2802_v6  ;;  %v10978_v56 = vld [vmem:[#allocation22_spill] sm:$0xff] }
 0x1bb   : > { %v3436_v40 = vmax.f32 %v9149_v51, %v3220_v43  ;;  %v9428_v47 = vmax.f32 %v3434_v18, %v3204_v24  ;;  %v2782_v37 = vmul.f32 %v9365_v25, %v2272_v57  ;;  %v2274_v17 = vpop.f32.mrb[66].mxu0  ;;  %v10977_v24 = vld [vmem:[#allocation21_spill] sm:$0xff]  ;;  %v3240_v6 = vmax.f32 %v3060_v60, 0.0 }
 0x1bc   : > { %v9432_v11 = vmax.f32 %v3435_v28, %v3221_v0  ;;  %v3057_v61 = vadd.f32 %v9377_v34, %v2781_v5  ;;  %v2799_v45 = vmul.f32 %v9353_v20, %v2274_v17  ;;  %v2276_v54 = vpop.f32.mrb[67].mxu0  ;;  %v2819_v18 = vmul.f32 %v9340_v39, %v10977_v24  ;;  %v9446_v5 = vpop.f32.mrb[52].mxu1 }
 0x1bd   : > { %v9437_v13 = vmax.f32 %v3436_v40, %v3222_v8  ;;  %v3058_v51 = vadd.f32 %v9385_v38, %v2782_v37  ;;  %v2800_v19 = vmul.f32 %v9365_v25, %v2276_v54  ;;  %v2820_v28 = vmul.f32 %v9344_v44, %v10978_v56  ;;  %10979 = vst [vmem:[#allocation19_spill] sm:$0xff] %v9446_v5  ;;  %v9449_v37 = vpop.f32.mrb[53].mxu1 }
 0x1be   : > { %v3237_v43 = vmax.f32 %v3057_v61, 0.0  ;;  %v3075_v0 = vadd.f32 %v9377_v34, %v2799_v45  ;;  %v3257_v40 = vmax.f32 %v3077_v7, 0.0  ;;  %v3258_v24 = vmax.f32 %v3078_v23, 0.0  ;;  %v9454_v3 = vpop.f32.mrb[54].mxu1 }
 0x1bf   : > { %v3238_v57 = vmax.f32 %v3058_v51, 0.0  ;;  %v3076_v8 = vadd.f32 %v9385_v38, %v2800_v19  ;;  %v2837_v61 = vmul.f32 %v9340_v39, %v9121_v16  ;;  %v3095_v51 = vadd.f32 %v9359_v9, %v2819_v18  ;;  %v9460_v7 = vpop.f32.mrb[55].mxu1 }
 0x1c0   : > { %v3437_v17 = vmax.f32 %v9184_v55, %v3237_v43  ;;  %v3255_v54 = vmax.f32 %v3075_v0, 0.0  ;;  %v2838_v60 = vmul.f32 %v9344_v44, %v9126_v33  ;;  %v3096_v43 = vadd.f32 %v9371_v36, %v2820_v28 }
 0x1c1   : > { %v3438_v45 = vmax.f32 %v9192_v12, %v3238_v57  ;;  %v3256_v56 = vmax.f32 %v3076_v8, 0.0  ;;  %v2280_v5 = vpop.f32.mrb[68].mxu0  ;;  %v2855_v33 = vmul.f32 %v9340_v39, %v9160_v49 }
 0x1c2   : > { %v3439_v55 = vmax.f32 %v9196_v53, %v3255_v54  ;;  %v9463_v19 = vmax.f32 %v3437_v17, %v3239_v59  ;;  %v2817_v23 = vmul.f32 %v9353_v20, %v2280_v5  ;;  %v2282_v16 = vpop.f32.mrb[69].mxu0  ;;  %v3113_v17 = vadd.f32 %v9359_v9, %v2837_v61 }
 0x1c3   : > { %v3440_v12 = vmax.f32 %v9201_v42, %v3256_v56  ;;  %v9468_v0 = vmax.f32 %v3438_v45, %v3240_v6  ;;  %v2818_v18 = vmul.f32 %v9365_v25, %v2282_v16  ;;  %v2284_v57 = vpop.f32.mrb[70].mxu0  ;;  %v3114_v54 = vadd.f32 %v9371_v36, %v2838_v60 }
 0x1c4   : > { %v9473_v8 = vmax.f32 %v3439_v55, %v3257_v40  ;;  %v3093_v53 = vadd.f32 %v9377_v34, %v2817_v23  ;;  %v2835_v59 = vmul.f32 %v9353_v20, %v2284_v57  ;;  %v2286_v5 = vpop.f32.mrb[71].mxu0  ;;  %v3275_v40 = vmax.f32 %v3095_v51, 0.0  ;;  %v9486_v55 = vpop.f32.mrb[56].mxu1 }
 0x1c5   : > { %v9478_v28 = vmax.f32 %v3440_v12, %v3258_v24  ;;  %v3094_v42 = vadd.f32 %v9385_v38, %v2818_v18  ;;  %v2836_v6 = vmul.f32 %v9365_v25, %v2286_v5  ;;  %v2856_v56 = vmul.f32 %v9344_v44, %v9168_v26  ;;  %v9490_v12 = vpop.f32.mrb[57].mxu1 }
 0x1c6   : > { %v3273_v45 = vmax.f32 %v3093_v53, 0.0  ;;  %v3111_v49 = vadd.f32 %v9377_v34, %v2835_v59  ;;  %v3276_v24 = vmax.f32 %v3096_v43, 0.0  ;;  %v3131_v16 = vadd.f32 %v9359_v9, %v2855_v33  ;;  %v9495_v53 = vpop.f32.mrb[58].mxu1 }
 0x1c7   : > { %v3274_v23 = vmax.f32 %v3094_v42, 0.0  ;;  %v3112_v61 = vadd.f32 %v9385_v38, %v2836_v6  ;;  %v3293_v57 = vmax.f32 %v3113_v17, 0.0  ;;  %v2873_v51 = vmul.f32 %v9340_v39, %v9173_v21  ;;  %v9500_v33 = vpop.f32.mrb[59].mxu1 }
 0x1c8   : > { %v3441_v18 = vmax.f32 %v9239_v50, %v3273_v45  ;;  %v3291_v60 = vmax.f32 %v3111_v49, 0.0  ;;  %v3294_v5 = vmax.f32 %v3114_v54, 0.0  ;;  %v2874_v43 = vmul.f32 %v9344_v44, %v9178_v46  ;;  %10980 = vst [vmem:[#allocation20_spill] sm:$0xff] %v9500_v33 }
 0x1c9   : > { %v3442_v26 = vmax.f32 %v9244_v2, %v3274_v23  ;;  %v3292_v59 = vmax.f32 %v3112_v61, 0.0  ;;  %v2290_v42 = vpop.f32.mrb[72].mxu0  ;;  %v3132_v21 = vadd.f32 %v9371_v36, %v2856_v56  ;;  %v3311_v61 = vmax.f32 %v3131_v16, 0.0 }
 0x1ca   : > { %v3443_v6 = vmax.f32 %v9248_v27, %v3291_v60  ;;  %v9503_v50 = vmax.f32 %v3441_v18, %v3275_v40  ;;  %v2853_v17 = vmul.f32 %v9353_v20, %v2290_v42  ;;  %v2292_v45 = vpop.f32.mrb[73].mxu0  ;;  %v3149_v18 = vadd.f32 %v9359_v9, %v2873_v51 }
 0x1cb   : > { %v3444_v49 = vmax.f32 %v9253_v48, %v3292_v59  ;;  %v9508_v2 = vmax.f32 %v3442_v26, %v3276_v24  ;;  %v2854_v54 = vmul.f32 %v9365_v25, %v2292_v45  ;;  %v2294_v23 = vpop.f32.mrb[74].mxu0  ;;  %v3150_v24 = vadd.f32 %v9371_v36, %v2874_v43 }
 0x1cc   : > { %v9511_v46 = vmax.f32 %v3443_v6, %v3293_v57  ;;  %v3129_v33 = vadd.f32 %v9377_v34, %v2853_v17  ;;  %v2871_v27 = vmul.f32 %v9353_v20, %v2294_v23  ;;  %v2296_v40 = vpop.f32.mrb[75].mxu0  ;;  %v3312_v57 = vmax.f32 %v3132_v21, 0.0 }
 0x1cd   : > { %v9516_v60 = vmax.f32 %v3444_v49, %v3294_v5  ;;  %v3130_v56 = vadd.f32 %v9385_v38, %v2854_v54  ;;  %v2872_v48 = vmul.f32 %v9365_v25, %v2296_v40  ;;  %v2891_v59 = vmul.f32 %v9340_v39, %v9215_v30  ;;  %v10981_v49 = vld [vmem:[#allocation23_spill] sm:$0xff] }
 0x1ce   : > { %v3309_v26 = vmax.f32 %v3129_v33, 0.0  ;;  %v3147_v16 = vadd.f32 %v9377_v34, %v2871_v27  ;;  %v2892_v51 = vmul.f32 %v9344_v44, %v9223_v1  ;;  %v3329_v45 = vmax.f32 %v3149_v18, 0.0  ;;  %v10982_v27 = vld [vmem:[#allocation8_spill] sm:$0xff] }
 0x1cf   : > { %v3310_v42 = vmax.f32 %v3130_v56, 0.0  ;;  %v3148_v6 = vadd.f32 %v9385_v38, %v2872_v48  ;;  %v2909_v43 = vmul.f32 %v9340_v39, %v10981_v49  ;;  %v7736_v33 = vmov 0.0  }
 0x1d0   : > { %v3445_v5 = vmax.f32 %v9280_v31, %v3309_v26  ;;  %v3327_v17 = vmax.f32 %v3147_v16, 0.0  ;;  %3554 = vst [vmem:[#allocation2 + $0xa8] sm:$0xff] %v7736_v33  ;;  %3553 = vst [vmem:[#allocation2 + $0xa0] sm:$0xff] %v7736_v33  ;;  %v3330_v30 = vmax.f32 %v3150_v24, 0.0  ;;  %v2910_v40 = vmul.f32 %v9344_v44, %v10982_v27 }
 0x1d1   : > { %v3446_v21 = vmax.f32 %v9288_v15, %v3310_v42  ;;  %v3328_v54 = vmax.f32 %v3148_v6, 0.0  ;;  %v2300_v23 = vpop.f32.mrb[76].mxu0  ;;  %v3167_v39 = vadd.f32 %v9359_v9, %v2891_v59  ;;  %v3168_v16 = vadd.f32 %v9371_v36, %v2892_v51 }
 0x1d2   : > { %v3447_v1 = vmax.f32 %v9292_v4, %v3327_v17  ;;  %v9534_v56 = vmax.f32 %v3445_v5, %v3311_v61  ;;  %v2889_v31 = vmul.f32 %v9353_v20, %v2300_v23  ;;  %v2302_v18 = vpop.f32.mrb[77].mxu0  ;;  %v3185_v6 = vadd.f32 %v9359_v9, %v2909_v43 }
 0x1d3   : > { %v3448_v48 = vmax.f32 %v9297_v58, %v3328_v54  ;;  %v9539_v26 = vmax.f32 %v3446_v21, %v3312_v57  ;;  %v2890_v15 = vmul.f32 %v9365_v25, %v2302_v18  ;;  %v2304_v24 = vpop.f32.mrb[78].mxu0  ;;  %v3186_v59 = vadd.f32 %v9371_v36, %v2910_v40  ;;  %v10985_v18 = vld [vmem:[#allocation15_spill] sm:$0xff] }
 0x1d4   : > { %v9543_v42 = vmax.f32 %v3447_v1, %v3329_v45  ;;  %v3165_v4 = vadd.f32 %v9377_v34, %v2889_v31  ;;  %v2907_v44 = vmul.f32 %v9353_v20, %v2304_v24  ;;  %v2306_v61 = vpop.f32.mrb[79].mxu0  ;;  %v3347_v45 = vmax.f32 %v3167_v39, 0.0  ;;  %v10983_v1 = vld [vmem:[#allocation12_spill] sm:$0xff]  ;;  %v10984_v31 = vld [vmem:[#allocation13_spill] sm:$0xff] }
 0x1d5   : > { %v9548_v5 = vmax.f32 %v3448_v48, %v3330_v30  ;;  %v3166_v58 = vadd.f32 %v9385_v38, %v2890_v15  ;;  %v2908_v57 = vmul.f32 %v9365_v25, %v2306_v61  ;;  %v3348_v21 = vmax.f32 %v3168_v16, 0.0  ;;  %v10986_v48 = vld [vmem:[#allocation16_spill] sm:$0xff]  ;;  %v10987_v24 = vld [vmem:[#allocation9_spill] sm:$0xff] }
 0x1d6   : > { %v3345_v17 = vmax.f32 %v3165_v4, 0.0  ;;  %v3183_v51 = vadd.f32 %v9377_v34, %v2907_v44  ;;  %v3365_v9 = vmax.f32 %v3185_v6, 0.0  ;;  %v3366_v23 = vmax.f32 %v3186_v59, 0.0 }
 0x1d7   : > { %v3346_v49 = vmax.f32 %v3166_v58, 0.0  ;;  %v3184_v33 = vadd.f32 %v9385_v38, %v2908_v57  ;;  %v9583_v39 = vrot.slane %v9349_v63, %v10983_v1  ;;  %v9587_v15 = vrot.slane %v9334_v52, %v10986_v48 }
 0x1d8   : > { %v3449_v20 = vmax.f32 %v9316_v41, %v3345_v17  ;;  %v3363_v54 = vmax.f32 %v3183_v51, 0.0  ;;  %v9569_v41 = vrot.slane %v9334_v52, %v10983_v1  ;;  %v9593_v4 = vrot.slane %v9349_v63, %v10984_v31  ;;  %v10990_v1 = vld [vmem:[#allocation24_spill] sm:$0xff] }
 0x1d9   : > { %v3450_v43 = vmax.f32 %v9321_v14, %v3346_v49  ;;  %v3364_v30 = vmax.f32 %v3184_v33, 0.0  ;;  %v9573_v14 = vrot.slane %v9334_v52, %v10984_v31  ;;  %v9597_v44 = vrot.slane %v9349_v63, %v10985_v18 }
 0x1da   : > { %v3451_v25 = vmax.f32 %v9325_v32, %v3363_v54  ;;  %v9558_v27 = vmax.f32 %v3449_v20, %v3347_v45  ;;  %v9577_v32 = vrot.slane %v9334_v52, %v10985_v18  ;;  %v9603_v58 = vrot.slane %v9349_v63, %v10986_v48  ;;  %v10989_v52 = vld [vmem:[#allocation11_spill] sm:$0xff] }
 0x1db   : > { %v3452_v36 = vmax.f32 %v9329_v29, %v3364_v30  ;;  %v9561_v34 = vmax.f32 %v3450_v43, %v3348_v21  ;;  %v2751_v29 = vmul.f32 %v9569_v41, %v9318_v62  ;;  %v2752_v16 = vmul.f32 %v9573_v14, %v10987_v24  ;;  %v10988_v62 = vld [vmem:[#allocation10_spill] sm:$0xff]  ;;  %v10991_v24 = vld [vmem:[#allocation25_spill] sm:$0xff] }
 0x1dc   : > { %v9563_v40 = vmax.f32 %v3451_v25, %v3365_v9  ;;  %v2769_v61 = vmul.f32 %v9569_v41, %v10988_v62  ;;  %v2770_v57 = vmul.f32 %v9573_v14, %v10989_v52  ;;  %v2787_v31 = vmul.f32 %v9569_v41, %v10990_v1  ;;  %v10992_v52 = vld [vmem:[#allocation26_spill] sm:$0xff] }
 0x1dd   : > { %v9565_v38 = vmax.f32 %v3452_v36, %v3366_v23  ;;  %v3027_v51 = vadd.f32 %v9583_v39, %v2751_v29  ;;  %v3028_v33 = vadd.f32 %v9593_v4, %v2752_v16  ;;  %v2788_v16 = vmul.f32 %v9573_v14, %v10991_v24 }
 0x1de   : > { %v3045_v63 = vadd.f32 %v9583_v39, %v2769_v61  ;;  %v3046_v30 = vadd.f32 %v9593_v4, %v2770_v57  ;;  %v2805_v57 = vmul.f32 %v9569_v41, %v10992_v52 }
 0x1df   : > { %v3207_v36 = vmax.f32 %v3027_v51, 0.0  ;;  %v3208_v48 = vmax.f32 %v3028_v33, 0.0 }
 0x1e0   : > { %v3226_v51 = vmax.f32 %v3046_v30, 0.0 }
 0x1e5   : > { %v2426_v6 = vpop.f32.mrb[80].mxu0 }
 0x1e6   : > { %v2749_v59 = vmul.f32 %v9577_v32, %v2426_v6  ;;  %v2428_v17 = vpop.f32.mrb[81].mxu0  ;;  %v3225_v6 = vmax.f32 %v3045_v63, 0.0  ;;  %v3063_v63 = vadd.f32 %v9583_v39, %v2787_v31 }
 0x1e7   : > { %v2750_v45 = vmul.f32 %v9587_v15, %v2428_v17  ;;  %v2430_v49 = vpop.f32.mrb[82].mxu0 }
 0x1e8   : > { %v3025_v21 = vadd.f32 %v9597_v44, %v2749_v59  ;;  %v2767_v20 = vmul.f32 %v9577_v32, %v2430_v49  ;;  %v2432_v54 = vpop.f32.mrb[83].mxu0  ;;  %v10993_v49 = vld [vmem:[#allocation14_spill] sm:$0xff] }
 0x1e9   : > { %v3026_v9 = vadd.f32 %v9603_v58, %v2750_v45  ;;  %v2768_v43 = vmul.f32 %v9587_v15, %v2432_v54 }
 0x1ea   : > { %v3205_v23 = vmax.f32 %v3025_v21, 0.0  ;;  %v3043_v25 = vadd.f32 %v9597_v44, %v2767_v20  ;;  %v2806_v21 = vmul.f32 %v9573_v14, %v10993_v49 }
 0x1eb   : > { %v3206_v18 = vmax.f32 %v3026_v9, 0.0  ;;  %v3044_v29 = vadd.f32 %v9603_v58, %v2768_v43 }
 0x1ec   : > { %v3473_v62 = vmax.f32 %v9423_v22, %v3205_v23  ;;  %v3223_v61 = vmax.f32 %v3043_v25, 0.0  ;;  %v3064_v23 = vadd.f32 %v9593_v4, %v2788_v16 }
 0x1ed   : > { %v3474_v59 = vmax.f32 %v9428_v47, %v3206_v18  ;;  %v3224_v17 = vmax.f32 %v3044_v29, 0.0  ;;  %v2436_v45 = vpop.f32.mrb[84].mxu0  ;;  %v3081_v18 = vadd.f32 %v9583_v39, %v2805_v57  ;;  %v10995_v57 = vld [vmem:[#allocation18_spill] sm:$0xff] }
 0x1ee   : > { %v3475_v33 = vmax.f32 %v9432_v11, %v3223_v61  ;;  %v9630_v20 = vmax.f32 %v3473_v62, %v3207_v36  ;;  %v2785_v54 = vmul.f32 %v9577_v32, %v2436_v45  ;;  %v2438_v22 = vpop.f32.mrb[85].mxu0  ;;  %v3243_v62 = vmax.f32 %v3063_v63, 0.0  ;;  %v10994_v61 = vld [vmem:[#allocation17_spill] sm:$0xff] }
 0x1ef   : > { %v3476_v9 = vmax.f32 %v9437_v13, %v3224_v17  ;;  %v9635_v43 = vmax.f32 %v3474_v59, %v3208_v48  ;;  %v2786_v47 = vmul.f32 %v9587_v15, %v2438_v22  ;;  %v2440_v30 = vpop.f32.mrb[86].mxu0  ;;  %v3082_v48 = vadd.f32 %v9593_v4, %v2806_v21 }
 0x1f0   : > { %v9639_v25 = vmax.f32 %v3475_v33, %v3225_v6  ;;  %v3061_v11 = vadd.f32 %v9597_v44, %v2785_v54  ;;  %v2803_v36 = vmul.f32 %v9577_v32, %v2440_v30  ;;  %v2442_v1 = vpop.f32.mrb[87].mxu0  ;;  %v2823_v6 = vmul.f32 %v9569_v41, %v10994_v61 }
 0x1f1   : > { %v9644_v29 = vmax.f32 %v3476_v9, %v3226_v51  ;;  %v3062_v13 = vadd.f32 %v9603_v58, %v2786_v47  ;;  %v2804_v31 = vmul.f32 %v9587_v15, %v2442_v1  ;;  %v3244_v17 = vmax.f32 %v3064_v23, 0.0 }
 0x1f2   : > { %v3241_v24 = vmax.f32 %v3061_v11, 0.0  ;;  %v3079_v16 = vadd.f32 %v9597_v44, %v2803_v36  ;;  %v2824_v51 = vmul.f32 %v9573_v14, %v10995_v57  ;;  %v3261_v33 = vmax.f32 %v3081_v18, 0.0 }
 0x1f3   : > { %v3242_v52 = vmax.f32 %v3062_v13, 0.0  ;;  %v3080_v59 = vadd.f32 %v9603_v58, %v2804_v31  ;;  %v2841_v21 = vmul.f32 %v9569_v41, %v9416_v10  ;;  %v3262_v63 = vmax.f32 %v3082_v48, 0.0 }
 0x1f4   : > { %v3477_v45 = vmax.f32 %v9463_v19, %v3241_v24  ;;  %v3259_v49 = vmax.f32 %v3079_v16, 0.0  ;;  %v2842_v47 = vmul.f32 %v9573_v14, %v9420_v35  ;;  %v3099_v36 = vadd.f32 %v9583_v39, %v2823_v6 }
 0x1f5   : > { %v3478_v54 = vmax.f32 %v9468_v0, %v3242_v52  ;;  %v3260_v22 = vmax.f32 %v3080_v59, 0.0  ;;  %v2446_v9 = vpop.f32.mrb[88].mxu0  ;;  %v3100_v13 = vadd.f32 %v9593_v4, %v2824_v51  ;;  %v3117_v24 = vadd.f32 %v9583_v39, %v2841_v21 }
 0x1f6   : > { %v3479_v30 = vmax.f32 %v9473_v8, %v3259_v49  ;;  %v9662_v23 = vmax.f32 %v3477_v45, %v3243_v62  ;;  %v2821_v11 = vmul.f32 %v9577_v32, %v2446_v9  ;;  %v2448_v19 = vpop.f32.mrb[89].mxu0  ;;  %v3118_v61 = vadd.f32 %v9593_v4, %v2842_v47 }
 0x1f7   : > { %v3480_v1 = vmax.f32 %v9478_v28, %v3260_v22  ;;  %v9667_v10 = vmax.f32 %v3478_v54, %v3244_v17  ;;  %v2822_v0 = vmul.f32 %v9587_v15, %v2448_v19  ;;  %v2450_v18 = vpop.f32.mrb[90].mxu0  ;;  %v3279_v59 = vmax.f32 %v3099_v36, 0.0  ;;  %v10996_v17 = vld [vmem:[#allocation19_spill] sm:$0xff] }
 0x1f8   : > { %v9671_v31 = vmax.f32 %v3479_v30, %v3261_v33  ;;  %v3097_v35 = vadd.f32 %v9597_v44, %v2821_v11  ;;  %v2839_v8 = vmul.f32 %v9577_v32, %v2450_v18  ;;  %v2452_v48 = vpop.f32.mrb[91].mxu0  ;;  %v2859_v57 = vmul.f32 %v9569_v41, %v10996_v17 }
 0x1f9   : > { %v9676_v16 = vmax.f32 %v3480_v1, %v3262_v63  ;;  %v3098_v28 = vadd.f32 %v9603_v58, %v2822_v0  ;;  %v2840_v62 = vmul.f32 %v9587_v15, %v2452_v48  ;;  %v3280_v49 = vmax.f32 %v3100_v13, 0.0 }
 0x1fa   : > { %v3277_v6 = vmax.f32 %v3097_v35, 0.0  ;;  %v3115_v52 = vadd.f32 %v9597_v44, %v2839_v8  ;;  %v2860_v33 = vmul.f32 %v9573_v14, %v9449_v37  ;;  %v3297_v22 = vmax.f32 %v3117_v24, 0.0 }
 0x1fb   : > { %v3278_v51 = vmax.f32 %v3098_v28, 0.0  ;;  %v3116_v45 = vadd.f32 %v9603_v58, %v2840_v62  ;;  %v2877_v63 = vmul.f32 %v9569_v41, %v9454_v3  ;;  %v3298_v30 = vmax.f32 %v3118_v61, 0.0 }
 0x1fc   : > { %v3481_v21 = vmax.f32 %v9503_v50, %v3277_v6  ;;  %v3295_v54 = vmax.f32 %v3115_v52, 0.0  ;;  %v2878_v19 = vmul.f32 %v9573_v14, %v9460_v7  ;;  %v3135_v0 = vadd.f32 %v9583_v39, %v2859_v57 }
 0x1fd   : > { %v3482_v9 = vmax.f32 %v9508_v2, %v3278_v51  ;;  %v3296_v47 = vmax.f32 %v3116_v45, 0.0  ;;  %v2456_v11 = vpop.f32.mrb[92].mxu0  ;;  %v3136_v35 = vadd.f32 %v9593_v4, %v2860_v33  ;;  %v3153_v24 = vadd.f32 %v9583_v39, %v2877_v63 }
 0x1fe   : > { %v3483_v36 = vmax.f32 %v9511_v46, %v3295_v54  ;;  %v9694_v1 = vmax.f32 %v3481_v21, %v3279_v59  ;;  %v2857_v37 = vmul.f32 %v9577_v32, %v2456_v11  ;;  %v2458_v50 = vpop.f32.mrb[93].mxu0  ;;  %v3154_v61 = vadd.f32 %v9593_v4, %v2878_v19 }
 0x1ff   : > { %v3484_v18 = vmax.f32 %v9516_v60, %v3296_v47  ;;  %v9699_v3 = vmax.f32 %v3482_v9, %v3280_v49  ;;  %v2858_v2 = vmul.f32 %v9587_v15, %v2458_v50  ;;  %v2460_v13 = vpop.f32.mrb[94].mxu0  ;;  %v3315_v59 = vmax.f32 %v3135_v0, 0.0 }
 0x200   : > { %v9703_v8 = vmax.f32 %v3483_v36, %v3297_v22  ;;  %v3133_v7 = vadd.f32 %v9597_v44, %v2857_v37  ;;  %v2875_v46 = vmul.f32 %v9577_v32, %v2460_v13  ;;  %v2462_v48 = vpop.f32.mrb[95].mxu0  ;;  %v2895_v17 = vmul.f32 %v9569_v41, %v9486_v55  ;;  %v10997_v55 = vld [vmem:[#allocation20_spill] sm:$0xff] }
 0x201   : > { %v9708_v28 = vmax.f32 %v3484_v18, %v3298_v30  ;;  %v3134_v60 = vadd.f32 %v9603_v58, %v2858_v2  ;;  %v2876_v62 = vmul.f32 %v9587_v15, %v2462_v48  ;;  %v3316_v45 = vmax.f32 %v3136_v35, 0.0 }
 0x202   : > { %v3313_v6 = vmax.f32 %v3133_v7, 0.0  ;;  %v3151_v52 = vadd.f32 %v9597_v44, %v2875_v46  ;;  %v2896_v49 = vmul.f32 %v9573_v14, %v9490_v12  ;;  %v3333_v54 = vmax.f32 %v3153_v24, 0.0 }
 0x203   : > { %v3314_v57 = vmax.f32 %v3134_v60, 0.0  ;;  %v3152_v51 = vadd.f32 %v9603_v58, %v2876_v62  ;;  %v2913_v22 = vmul.f32 %v9569_v41, %v9495_v53  ;;  %v3334_v47 = vmax.f32 %v3154_v61, 0.0 }
 0x204   : > { %v3485_v33 = vmax.f32 %v9534_v56, %v3313_v6  ;;  %v3331_v21 = vmax.f32 %v3151_v52, 0.0  ;;  %v2914_v11 = vmul.f32 %v9573_v14, %v10997_v55  ;;  %v3171_v37 = vadd.f32 %v9583_v39, %v2895_v17 }
 0x205   : > { %v3486_v63 = vmax.f32 %v9539_v26, %v3314_v57  ;;  %v3332_v9 = vmax.f32 %v3152_v51, 0.0  ;;  %v2466_v30 = vpop.f32.mrb[96].mxu0  ;;  %v3172_v0 = vadd.f32 %v9593_v4, %v2896_v49  ;;  %v3189_v13 = vadd.f32 %v9583_v39, %v2913_v22  ;;  %v10998_v49 = vld [vmem:[#allocation4_spill] sm:$0xff] }
 0x206   : > { %v3487_v19 = vmax.f32 %v9543_v42, %v3331_v21  ;;  %v9726_v36 = vmax.f32 %v3485_v33, %v3315_v59  ;;  %v2893_v12 = vmul.f32 %v9577_v32, %v2466_v30  ;;  %v2468_v56 = vpop.f32.mrb[97].mxu0  ;;  %v3190_v46 = vadd.f32 %v9593_v4, %v2914_v11  ;;  %v10999_v33 = vld [vmem:[#allocation5_spill] sm:$0xff] }
 0x207   : > { %v3488_v50 = vmax.f32 %v9548_v5, %v3332_v9  ;;  %v9731_v53 = vmax.f32 %v3486_v63, %v3316_v45  ;;  %v2894_v26 = vmul.f32 %v9587_v15, %v2468_v56  ;;  %v2470_v41 = vpop.f32.mrb[98].mxu0  ;;  %v3351_v60 = vmax.f32 %v3171_v37, 0.0 }
 0x208   : > { %v9735_v18 = vmax.f32 %v3487_v19, %v3333_v54  ;;  %v3169_v42 = vadd.f32 %v9597_v44, %v2893_v12  ;;  %v2911_v14 = vmul.f32 %v9577_v32, %v2470_v41  ;;  %v2472_v2 = vpop.f32.mrb[99].mxu0  ;;  %v3352_v6 = vmax.f32 %v3172_v0, 0.0 }
 0x209   : > { %v9740_v35 = vmax.f32 %v3488_v50, %v3334_v47  ;;  %v3170_v5 = vadd.f32 %v9603_v58, %v2894_v26  ;;  %v2912_v7 = vmul.f32 %v9587_v15, %v2472_v2  ;;  %v3369_v39 = vmax.f32 %v3189_v13, 0.0 }
 0x20a   : > { %v3349_v48 = vmax.f32 %v3169_v42, 0.0  ;;  %v3187_v24 = vadd.f32 %v9597_v44, %v2911_v14  ;;  %v3370_v57 = vmax.f32 %v3190_v46, 0.0 }
 0x20b   : > { %v3350_v62 = vmax.f32 %v3170_v5, 0.0  ;;  %v3188_v61 = vadd.f32 %v9603_v58, %v2912_v7 }
 0x20c   : > { %v3489_v32 = vmax.f32 %v9558_v27, %v3349_v48  ;;  %v3367_v52 = vmax.f32 %v3187_v24, 0.0  ;;  %v2643_v27 = vld [vmem:[%s10903_s2 + $0x10] sm:$0x3] }
 0x20d   : > { %v3490_v59 = vmax.f32 %v9561_v34, %v3350_v62  ;;  %v3368_v17 = vmax.f32 %v3188_v61, 0.0  ;;  %v2919_v34 = vld [vmem:[%s10904_s3 + $0x10] sm:$0x3]  ;;  %v9769_v21 = vrot.slane %v2643_v27, %v10999_v33 }
 0x20e   : > { %v3491_v15 = vmax.f32 %v9563_v40, %v3367_v52  ;;  %v9750_v51 = vmax.f32 %v3489_v32, %v3351_v60  ;;  %v9766_v40 = vrot.slane %v2643_v27, %v10998_v49  ;;  %v9775_v22 = vrot.slane %v2919_v34, %v10999_v33 }
 0x20f   : > { %v3492_v4 = vmax.f32 %v9565_v38, %v3368_v17  ;;  %v9753_v44 = vmax.f32 %v3490_v59, %v3352_v6  ;;  %v9772_v38 = vrot.slane %v2919_v34, %v10998_v49  ;;  %v7403_v59 = vld [vmem:[%s10905_s4 + $0x114] ss:$8 sps:$4 sm:$0xff]  }
 0x210   : > { %v9755_v45 = vmax.f32 %v3491_v15, %v3369_v39 }
 0x211   : > { %v9757_v58 = vmax.f32 %v3492_v4, %v3370_v57 }
 0x219   : > { %v2592_v54 = vpop.f32.mrb[100].mxu0 }
 0x21a   : > { %v2753_v63 = vmul.f32 %v9766_v40, %v2592_v54  ;;  %v2594_v9 = vpop.f32.mrb[101].mxu0 }
 0x21b   : > { %v2754_v47 = vmul.f32 %v9769_v21, %v2594_v9  ;;  %v2596_v30 = vpop.f32.mrb[102].mxu0 }
 0x21c   : > { %v3029_v55 = vadd.f32 %v9772_v38, %v2753_v63  ;;  %v2771_v11 = vmul.f32 %v9766_v40, %v2596_v30  ;;  %v2598_v19 = vpop.f32.mrb[103].mxu0  ;;  %v7401_v63 = vld [vmem:[%s10905_s4 + $0x110] ss:$8 sps:$4 sm:$0xff]  }
 0x21d   : > { %v3030_v12 = vadd.f32 %v9775_v22, %v2754_v47  ;;  %v2772_v56 = vmul.f32 %v9769_v21, %v2598_v19 }
 0x21e   : > { %v3209_v37 = vmax.f32 %v3029_v55, 0.0  ;;  %v3047_v50 = vadd.f32 %v9772_v38, %v2771_v11 }
 0x21f   : > { %v3210_v26 = vmax.f32 %v3030_v12, 0.0  ;;  %v3048_v41 = vadd.f32 %v9775_v22, %v2772_v56 }
 0x220   : > { %v3513_v0 = vmax.f32 %v9630_v20, %v3209_v37  ;;  %v3227_v42 = vmax.f32 %v3047_v50, 0.0 }
 0x221   : > { %v3514_v14 = vmax.f32 %v9635_v43, %v3210_v26  ;;  %v3228_v2 = vmax.f32 %v3048_v41, 0.0  ;;  %v2602_v13 = vpop.f32.mrb[104].mxu0 }
 0x222   : > { %3533 = vst [vmem:[#allocation2] sm:$0xff] %v3513_v0  ;;  %v9788_v5 = vmax.f32 %v9639_v25, %v3227_v42  ;;  %v2789_v7 = vmul.f32 %v9766_v40, %v2602_v13  ;;  %v2604_v46 = vpop.f32.mrb[105].mxu0 }
 0x223   : > { %3534 = vst [vmem:[#allocation2 + $0x8] sm:$0xff] %v3514_v14  ;;  %v9792_v48 = vmax.f32 %v9644_v29, %v3228_v2  ;;  %v2790_v24 = vmul.f32 %v9769_v21, %v2604_v46  ;;  %v2606_v60 = vpop.f32.mrb[106].mxu0  ;;  %v7398_v29 = vld [vmem:[%s10905_s4 + $0x100] ss:$8 sps:$4 sm:$0xff]  }
 0x224   : > { %v3555_v20 = vpack.c.bf16 %v9788_v5, %v3513_v0  ;;  %v3065_v43 = vadd.f32 %v9772_v38, %v2789_v7  ;;  %v2807_v62 = vmul.f32 %v9766_v40, %v2606_v60  ;;  %v2608_v61 = vpop.f32.mrb[107].mxu0  ;;  %v7404_v2 = vld [vmem:[%s10905_s4 + $0x120] ss:$8 sps:$4 sm:$0xff]  }
 0x225   : > { %v3066_v25 = vadd.f32 %v9775_v22, %v2790_v24  ;;  %v2808_v6 = vmul.f32 %v9769_v21, %v2608_v61  ;;  %v3556_v32 = vpack.c.bf16 %v9792_v48, %v3514_v14  ;;  %v7409_v24 = vld [vmem:[%s10905_s4 + $0x134] ss:$8 sps:$4 sm:$0xff]  }
 0x226   : > { %v3245_v52 = vmax.f32 %v3065_v43, 0.0  ;;  %v3083_v39 = vadd.f32 %v9772_v38, %v2807_v62 }
 0x227   : > { %v3246_v17 = vmax.f32 %v3066_v25, 0.0  ;;  %v3084_v57 = vadd.f32 %v9775_v22, %v2808_v6  ;;  %4873 = vmatprep.mubr.bf16.mxu1 %v3556_v32 }
 0x228   : > { %v3517_v15 = vmax.f32 %v9662_v23, %v3245_v52  ;;  %v3263_v4 = vmax.f32 %v3083_v39, 0.0  ;;  %4874 = vmatmul.mubr.bf16.vlgmr.msra.gmra.mrb[60].mxu1 %v3555_v20  ;;  %v7406_v23 = vld [vmem:[%s10905_s4 + $0x124] ss:$8 sps:$4 sm:$0xff]  }
 0x229   : > { %v3518_v27 = vmax.f32 %v9667_v10, %v3246_v17  ;;  %v3264_v34 = vmax.f32 %v3084_v57, 0.0  ;;  %4925 = vmatpush1.bf16.msra.mxu1 %v7398_v29  ;;  %v2612_v54 = vpop.f32.mrb[108].mxu0  ;;  %v3565_v9 = vld [vmem:[#allocation2] sm:$0xfe] }
 0x22a   : > { %v3519_v47 = vmax.f32 %v9671_v31, %v3263_v4  ;;  %v2825_v30 = vmul.f32 %v9766_v40, %v2612_v54  ;;  %v2614_v55 = vpop.f32.mrb[109].mxu0  ;;  %4926 = vmatprep.subr.bf16.mxu1 %v7403_v59  ;;  %v3566_v11 = vld [vmem:[#allocation2 + $0x8] sm:$0xfe]  ;;  %v3587_v10 = vpack.c.bf16 %v9788_v5, %v3565_v9 }
 0x22b   : > { %v3520_v19 = vmax.f32 %v9676_v16, %v3264_v34  ;;  %v2826_v12 = vmul.f32 %v9769_v21, %v2614_v55  ;;  %v2616_v56 = vpop.f32.mrb[110].mxu0  ;;  %v3588_v37 = vpack.c.bf16 %v9792_v48, %v3566_v11  ;;  %v9844_v39 = vld [vmem:[#allocation2 + $0x8] sm:$0xfc] }
 0x22c   : > { %v3101_v31 = vadd.f32 %v9772_v38, %v2825_v30  ;;  %v2843_v50 = vmul.f32 %v9766_v40, %v2616_v56  ;;  %v2618_v26 = vpop.f32.mrb[111].mxu0  ;;  %v9825_v41 = vpack.c.bf16 %v3519_v47, %v3517_v15  ;;  %v3625_v0 = vshrl.u32 %v3587_v10, 16  ;;  %v7407_v15 = vld [vmem:[%s10905_s4 + $0x130] ss:$8 sps:$4 sm:$0xff]  }
 0x22d   : > { %v3102_v42 = vadd.f32 %v9775_v22, %v2826_v12  ;;  %v2844_v14 = vmul.f32 %v9769_v21, %v2618_v26  ;;  %4927 = vmatpush1.bf16.msra.mxu1 %v7401_v63  ;;  %v9829_v16 = vpack.c.bf16 %v3520_v19, %v3518_v27  ;;  %v3637_v13 = vshrl.u32 %v3588_v37, 16 }
 0x22e   : > { %v3281_v7 = vmax.f32 %v3101_v31, 0.0  ;;  %v3119_v46 = vadd.f32 %v9772_v38, %v2843_v50  ;;  %4928 = vmatprep.subr.bf16.mxu1 %v7406_v23  ;;  %v3639_v60 = vshll.u32 %v3588_v37, 16  ;;  %v3627_v20 = vshll.u32 %v3587_v10, 16  ;;  %v7410_v31 = vld [vmem:[%s10905_s4 + $0x140] ss:$8 sps:$4 sm:$0xff]  }
 0x22f   : > { %v3282_v43 = vmax.f32 %v3102_v42, 0.0  ;;  %v3120_v62 = vadd.f32 %v9775_v22, %v2844_v14  ;;  %4883 = vmatprep.mubr.bf16.mxu1 %v9829_v16  ;;  %v3644_v61 = vshll.u32 %v9829_v16, 16  ;;  %v3632_v25 = vshll.u32 %v9825_v41, 16  ;;  %v7415_v42 = vld [vmem:[%s10905_s4 + $0x154] ss:$8 sps:$4 sm:$0xff]  }
 0x230   : > { %v3521_v6 = vmax.f32 %v9694_v1, %v3281_v7  ;;  %v3299_v32 = vmax.f32 %v3119_v46, 0.0  ;;  %4884 = vmatmul.mubr.bf16.gmra.mrb[64].mxu1 %v9825_v41  ;;  %v3641_v29 = vrot.slane %v3639_v60, 1  ;;  %v3629_v52 = vrot.slane %v3627_v20, 1  ;;  %v9890_v60 = vld [vmem:[#allocation2] sm:$0xfc] }
 0x231   : > { %v3522_v59 = vmax.f32 %v9699_v3, %v3282_v43  ;;  %v3300_v17 = vmax.f32 %v3120_v62, 0.0  ;;  %4929 = vmatpush1.bf16.msra.mxu1 %v7404_v2  ;;  %v2622_v57 = vpop.f32.mrb[112].mxu0  ;;  %v3646_v4 = vrot.slane %v3644_v61, 1  ;;  %v3634_v1 = vrot.slane %v3632_v25, 1  ;;  %v7412_v3 = vld [vmem:[%s10905_s4 + $0x144] ss:$8 sps:$4 sm:$0xff]  }
 0x232   : > { %v3523_v27 = vmax.f32 %v9703_v8, %v3299_v32  ;;  %v2861_v34 = vmul.f32 %v9766_v40, %v2622_v57  ;;  %v2624_v54 = vpop.f32.mrb[113].mxu0  ;;  %4930 = vmatprep.subr.bf16.mxu1 %v7409_v24  ;;  %v3642_v63 = vor.u32 %v3641_v29, %v3637_v13  ;;  %v3630_v9 = vor.u32 %v3629_v52, %v3625_v0 }
 0x233   : > { %v3524_v47 = vmax.f32 %v9708_v28, %v3300_v17  ;;  %v2862_v30 = vmul.f32 %v9769_v21, %v2624_v54  ;;  %v2626_v55 = vpop.f32.mrb[114].mxu0  ;;  %v3604_v23 = vpack.c.bf16 %v9792_v48, %v9844_v39  ;;  %v3656_v14 = vshrl.u32 %v9829_v16, 16  ;;  %v7413_v39 = vld [vmem:[%s10905_s4 + $0x150] ss:$8 sps:$4 sm:$0xff]  }
 0x234   : > { %v3137_v8 = vadd.f32 %v9772_v38, %v2861_v34  ;;  %v2879_v11 = vmul.f32 %v9766_v40, %v2626_v55  ;;  %v2628_v10 = vpop.f32.mrb[115].mxu0  ;;  %v9865_v19 = vpack.c.bf16 %v3523_v27, %v3521_v6  ;;  %v9868_v12 = vsel %vm3623_vm2, %v3642_v63, %v3646_v4 }
 0x235   : > { %v3138_v56 = vadd.f32 %v9775_v22, %v2862_v30  ;;  %v2880_v28 = vmul.f32 %v9769_v21, %v2628_v10  ;;  %4931 = vmatpush1.bf16.msra.mxu1 %v7407_v15  ;;  %v9872_v37 = vpack.c.bf16 %v3524_v47, %v3522_v59  ;;  %v9878_v50 = vsel %vm3623_vm2, %v3630_v9, %v3634_v1  ;;  %v7416_v10 = vld [vmem:[%s10905_s4 + $0x160] ss:$8 sps:$4 sm:$0xff]  }
 0x236   : > { %v3317_v26 = vmax.f32 %v3137_v8, 0.0  ;;  %v3155_v0 = vadd.f32 %v9772_v38, %v2879_v11  ;;  %4932 = vmatprep.subr.bf16.mxu1 %v7412_v3  ;;  %v3648_v2 = vshrl.u32 %v9825_v41, 16  ;;  %v3652_v24 = vshll.u32 %v9865_v19, 16 }
 0x237   : > { %v3318_v13 = vmax.f32 %v3138_v56, 0.0  ;;  %v3156_v7 = vadd.f32 %v9775_v22, %v2880_v28  ;;  %4893 = vmatprep.mubr.bf16.mxu1 %v9872_v37  ;;  %v3660_v46 = vshll.u32 %v9872_v37, 16  ;;  %v3658_v62 = vor.u32 %v3656_v14, %v3646_v4 }
 0x238   : > { %v3525_v20 = vmax.f32 %v9726_v36, %v3317_v26  ;;  %v3335_v43 = vmax.f32 %v3155_v0, 0.0  ;;  %4894 = vmatmul.mubr.bf16.gmra.mrb[68].mxu1 %v9865_v19  ;;  %v3650_v6 = vor.u32 %v3648_v2, %v3634_v1  ;;  %v3654_v59 = vrot.slane %v3652_v24, 1 }
 0x239   : > { %v3526_v32 = vmax.f32 %v9731_v53, %v3318_v13  ;;  %v3336_v29 = vmax.f32 %v3156_v7, 0.0  ;;  %4933 = vmatpush1.bf16.msra.mxu1 %v7410_v31  ;;  %v2632_v52 = vpop.f32.mrb[116].mxu0  ;;  %v3662_v36 = vrot.slane %v3660_v46, 1  ;;  %v7418_v53 = vld [vmem:[%s10905_s4 + $0x164] ss:$8 sps:$4 sm:$0xff]   ;;  %v3672_v4 = vshrl.u32 %v9872_v37, 16 }
 0x23a   : > { %v3527_v17 = vmax.f32 %v9735_v18, %v3335_v43  ;;  %v2897_v57 = vmul.f32 %v9766_v40, %v2632_v52  ;;  %v2634_v15 = vpop.f32.mrb[117].mxu0  ;;  %4934 = vmatprep.subr.bf16.mxu1 %v7415_v42  ;;  %v3603_v1 = vpack.c.bf16 %v9788_v5, %v9890_v60  ;;  %v9920_v3 = vsel %vm3623_vm2, %v3650_v6, %v3654_v59  ;;  %v7421_v31 = vld [vmem:[%s10905_s4 + $0x174] ss:$8 sps:$4 sm:$0xff]  }
 0x23b   : > { %v3528_v27 = vmax.f32 %v9740_v35, %v3336_v29  ;;  %v2898_v34 = vmul.f32 %v9769_v21, %v2634_v15  ;;  %v2636_v54 = vpop.f32.mrb[118].mxu0  ;;  %v9917_v18 = vsel %vm3623_vm2, %v3658_v62, %v3662_v36  ;;  %v3664_v55 = vshrl.u32 %v9865_v19, 16  ;;  %v7419_v62 = vld [vmem:[%s10905_s4 + $0x170] ss:$8 sps:$4 sm:$0xff]   ;;  %v7424_v29 = vld [vmem:[%s10905_s4 + $0x184] ss:$8 sps:$4 sm:$0xff]  }
 0x23c   : > { %v3173_v63 = vadd.f32 %v9772_v38, %v2897_v57  ;;  %v2915_v9 = vmul.f32 %v9766_v40, %v2636_v54  ;;  %v2638_v47 = vpop.f32.mrb[119].mxu0  ;;  %v9924_v30 = vpack.c.bf16 %v3527_v17, %v3525_v20  ;;  %v3738_v56 = vrot.slane %v3604_v23, 1 }
 0x23d   : > { %v3174_v35 = vadd.f32 %v9775_v22, %v2898_v34  ;;  %v2916_v8 = vmul.f32 %v9769_v21, %v2638_v47  ;;  %4935 = vmatpush1.bf16.msra.mxu1 %v7413_v39  ;;  %v9929_v11 = vpack.c.bf16 %v3528_v27, %v3526_v32  ;;  %v3674_v26 = vor.u32 %v3672_v4, %v3662_v36  ;;  %v3608_v36 = vld [vmem:[#allocation2 + $0x8] sm:$0xf8]  ;;  %v7427_v47 = vld [vmem:[%s10905_s4 + $0x194] ss:$8 sps:$4 sm:$0xff]  }
 0x23e   : > { %v3353_v28 = vmax.f32 %v3173_v63, 0.0  ;;  %v3191_v40 = vadd.f32 %v9772_v38, %v2915_v9  ;;  %4936 = vmatprep.subr.bf16.mxu1 %v7418_v53  ;;  %v3668_v21 = vshll.u32 %v9924_v30, 16  ;;  %v3666_v38 = vor.u32 %v3664_v55, %v3654_v59 }
 0x23f   : > { %v3354_v0 = vmax.f32 %v3174_v35, 0.0  ;;  %v3192_v42 = vadd.f32 %v9775_v22, %v2916_v8  ;;  %4903 = vmatprep.mubr.bf16.mxu1 %v9929_v11  ;;  %v3676_v23 = vshll.u32 %v9929_v11, 16  ;;  %v3739_v20 = vrot.slane %v9829_v16, 1 }
 0x240   : > { %v3529_v13 = vmax.f32 %v9750_v51, %v3353_v28  ;;  %v3371_v7 = vmax.f32 %v3191_v40, 0.0  ;;  %4904 = vmatmul.mubr.bf16.gmra.mrb[72].mxu1 %v9924_v30  ;;  %v3670_v60 = vrot.slane %v3668_v21, 1  ;;  %v3680_v51 = vshrl.u32 %v9924_v30, 16 }
 0x241   : > { %v3530_v43 = vmax.f32 %v9753_v44, %v3354_v0  ;;  %v3372_v22 = vmax.f32 %v3192_v42, 0.0  ;;  %4937 = vmatpush1.bf16.msra.mxu1 %v7416_v10  ;;  %v3678_v6 = vrot.slane %v3676_v23, 1  ;;  %v3688_v52 = vshrl.u32 %v9929_v11, 16 }
 0x242   : > { %v3531_v32 = vmax.f32 %v9755_v45, %v3371_v7  ;;  %4938 = vmatprep.subr.bf16.mxu1 %v7421_v31  ;;  %v9963_v44 = vsel %vm3623_vm2, %v3666_v38, %v3670_v60  ;;  %v9967_v39 = vsel %vm3734_vm3, %v3738_v56, %v3739_v20  ;;  %v3735_v45 = vrot.slane %v3603_v1, 1  ;;  %v7425_v7 = vld [vmem:[%s10905_s4 + $0x190] ss:$8 sps:$4 sm:$0xff]  }
 0x243   : > { %v3532_v59 = vmax.f32 %v9757_v58, %v3372_v22  ;;  %v9971_v17 = vsel %vm3623_vm2, %v3674_v26, %v3678_v6  ;;  %v3736_v57 = vrot.slane %v9825_v41, 1  ;;  %v3743_v53 = vrot.slane %v9872_v37, 1  ;;  %v7422_v58 = vld [vmem:[%s10905_s4 + $0x180] ss:$8 sps:$4 sm:$0xff]  }
 0x244   : > { %v9974_v15 = vpack.c.bf16 %v3531_v32, %v3529_v13  ;;  %v3741_v27 = vrot.slane %v9865_v19, 1  ;;  %v3747_v34 = vrot.slane %v9929_v11, 1  ;;  %v3745_v1 = vrot.slane %v9924_v30, 1  ;;  %v7428_v32 = vld [vmem:[%s10905_s4 + $0x1a0] ss:$8 sps:$4 sm:$0xff]  }
 0x245   : > { %4939 = vmatpush1.bf16.msra.mxu1 %v7419_v62  ;;  %v9979_v54 = vpack.c.bf16 %v3532_v59, %v3530_v43  ;;  %v9985_v63 = vsel %vm3734_vm3, %v3735_v45, %v3736_v57  ;;  %v3612_v9 = vpack.c.bf16 %v9792_v48, %v3608_v36  ;;  %v3682_v35 = vor.u32 %v3680_v51, %v3670_v60  ;;  %v7433_v59 = vld [vmem:[%s10905_s4 + $0x1b4] ss:$8 sps:$4 sm:$0xff]  }
 0x246   : > { %4940 = vmatprep.subr.bf16.mxu1 %v7424_v29  ;;  %v3684_v8 = vshll.u32 %v9974_v15, 16  ;;  %v9996_v10 = vsel %vm3734_vm3, %v3739_v20, %v3743_v53  ;;  %v9999_v56 = vsel %vm3734_vm3, %v3736_v57, %v3741_v27  ;;  %v3690_v28 = vor.u32 %v3688_v52, %v3678_v6 }
 0x247   : > { %4913 = vmatprep.mubr.bf16.mxu1 %v9979_v54  ;;  %v3692_v40 = vshll.u32 %v9979_v54, 16  ;;  %v10006_v31 = vsel %vm3734_vm3, %v3743_v53, %v3747_v34  ;;  %v10009_v26 = vsel %vm3734_vm3, %v3741_v27, %v3745_v1  ;;  %v3751_v42 = vrot.slane %v9979_v54, 1 }
 0x248   : > { %4914 = vmatmul.mubr.bf16.gmra.mrb[76].mxu1 %v9974_v15  ;;  %v10014_v0 = vrot.slane %v3684_v8, 1  ;;  %v3749_v38 = vrot.slane %v9974_v15, 1  ;;  %v3781_v13 = vshrl.u32 %v3612_v9, 16  ;;  %v3784_v20 = vshll.u32 %v3612_v9, 16  ;;  %v3616_v9 = vld [vmem:[#allocation2 + $0x8] sm:$0xf0] }
 0x249   : > { %4941 = vmatpush1.bf16.msra.mxu1 %v7422_v58  ;;  %4956 = vmatprep.mubr.bf16.mxu1 %v9868_v12  ;;  %v10024_v60 = vrot.slane %v3692_v40, 1  ;;  %v3788_v43 = vrot.slane %v3656_v14, 1  ;;  %v3789_v22 = vrot.slane %v3644_v61, 2  ;;  %v7430_v12 = vld [vmem:[%s10905_s4 + $0x1a4] ss:$8 sps:$4 sm:$0xff]   ;;  %v10040_v6 = vsel %vm3734_vm3, %v3747_v34, %v3751_v42 }
 0x24a   : > { %4942 = vmatprep.subr.bf16.mxu1 %v7427_v47  ;;  %v10035_v62 = vsel %vm3623_vm2, %v3682_v35, %v10014_v0  ;;  %v10045_v14 = vsel %vm3734_vm3, %v3745_v1, %v3749_v38  ;;  %v3607_v61 = vld [vmem:[#allocation2] sm:$0xf8]  ;;  %v3776_v29 = vrot.slane %v3648_v2, 1  ;;  %v3696_v45 = vshrl.u32 %v9974_v15, 16 }
 0x24b   : > { %v10054_v36 = vsel %vm3623_vm2, %v3690_v28, %v10024_v60  ;;  %v3783_v57 = vrot.slane %v3781_v13, 1  ;;  %v3786_v53 = vrot.slane %v3784_v20, 2  ;;  %v3790_v27 = vor.u32 %v3789_v22, %v3788_v43 }
 0x24c   : > { %v3704_v34 = vshrl.u32 %v9979_v54, 16  ;;  %v3611_v2 = vpack.c.bf16 %v9788_v5, %v3607_v61  ;;  %v3777_v58 = vrot.slane %v3632_v25, 2  ;;  %v3796_v1 = vrot.slane %v3672_v4, 1 }
 0x24d   : > { %4943 = vmatpush1.bf16.msra.mxu1 %v7425_v7  ;;  %v3787_v47 = vor.u32 %v3786_v53, %v3783_v57  ;;  %v3797_v35 = vrot.slane %v3660_v46, 2  ;;  %v3792_v28 = vrot.slane %v3664_v55, 1  ;;  %v3793_v13 = vrot.slane %v3652_v24, 2  ;;  %v3615_v7 = vld [vmem:[#allocation2] sm:$0xf0] }
 0x24e   : > { %4944 = vmatprep.subr.bf16.mxu1 %v7430_v12  ;;  %v3769_v20 = vshrl.u32 %v3611_v2, 16  ;;  %v3772_v43 = vshll.u32 %v3611_v2, 16  ;;  %v3778_v22 = vor.u32 %v3777_v58, %v3776_v29  ;;  %v3804_v25 = vrot.slane %v3688_v52, 1  ;;  %v7431_v24 = vld [vmem:[%s10905_s4 + $0x1b0] ss:$8 sps:$4 sm:$0xff]  }
 0x24f   : > { %v10075_v4 = vsel %vm3767_vm4, %v3787_v47, %v3790_v27  ;;  %v3798_v12 = vor.u32 %v3797_v35, %v3796_v1  ;;  %v3794_v61 = vor.u32 %v3793_v13, %v3792_v28  ;;  %v3805_v46 = vrot.slane %v3676_v23, 2  ;;  %v7436_v52 = vld [vmem:[%s10905_s4 + $0x1c4] ss:$8 sps:$4 sm:$0xff]  }
 0x250   : > { %v3771_v55 = vrot.slane %v3769_v20, 1  ;;  %v3774_v57 = vrot.slane %v3772_v43, 2  ;;  %v3620_v29 = vpack.c.bf16 %v9792_v48, %v3616_v9  ;;  %v3619_v53 = vpack.c.bf16 %v9788_v5, %v3615_v7  ;;  %v7439_v7 = vld [vmem:[%s10905_s4 + $0x1d4] ss:$8 sps:$4 sm:$0xff]  }
 0x251   : > { %4945 = vmatpush1.bf16.msra.mxu1 %v7428_v32  ;;  %v10088_v2 = vsel %vm3767_vm4, %v3790_v27, %v3798_v12  ;;  %v10091_v23 = vsel %vm3767_vm4, %v3778_v22, %v3794_v61  ;;  %v3806_v32 = vor.u32 %v3805_v46, %v3804_v25  ;;  %v3800_v58 = vrot.slane %v3680_v51, 1 }
 0x252   : > { %4946 = vmatprep.subr.bf16.mxu1 %v7433_v59  ;;  %v3775_v1 = vor.u32 %v3774_v57, %v3771_v55  ;;  %v3801_v48 = vrot.slane %v3668_v21, 2  ;;  %v3812_v5 = vrot.slane %v3704_v34, 1  ;;  %v3813_v59 = vrot.slane %v3692_v40, 2  ;;  %v7434_v21 = vld [vmem:[%s10905_s4 + $0x1c0] ss:$8 sps:$4 sm:$0xff]  }
 0x253   : > { %v10102_v27 = vsel %vm3767_vm4, %v3798_v12, %v3806_v32  ;;  %v3808_v9 = vrot.slane %v3696_v45, 1  ;;  %v3809_v47 = vrot.slane %v3684_v8, 2  ;;  %v3852_v51 = vrot.slane %v3620_v29, 2  ;;  %v7442_v57 = vld [vmem:[%s10905_s4 + $0x1e4] ss:$8 sps:$4 sm:$0xff]  }
 0x254   : > { %v10112_v35 = vsel %vm3767_vm4, %v3775_v1, %v3778_v22  ;;  %v3802_v28 = vor.u32 %v3801_v48, %v3800_v58  ;;  %v10114_v40 = vor.u32 %v3813_v59, %v3812_v5  ;;  %v3853_v13 = vrot.slane %v9829_v16, 2  ;;  %v7440_v1 = vld [vmem:[%s10905_s4 + $0x1e0] ss:$8 sps:$4 sm:$0xff]   ;;  %v7445_v48 = vld [vmem:[%s10905_s4 + $0x1f4] ss:$8 sps:$4 sm:$0xff]  }
 0x255   : > { %4947 = vmatpush1.bf16.msra.mxu1 %v7431_v24  ;;  %v10120_v8 = vor.u32 %v3809_v47, %v3808_v9  ;;  %v3849_v20 = vrot.slane %v3619_v53, 2  ;;  %v3850_v43 = vrot.slane %v9825_v41, 2  ;;  %v3857_v25 = vrot.slane %v9872_v37, 2  ;;  %v7437_v37 = vld [vmem:[%s10905_s4 + $0x1d0] ss:$8 sps:$4 sm:$0xff]  }
 0x256   : > { %4948 = vmatprep.subr.bf16.mxu1 %v7436_v52  ;;  %v10125_v22 = vsel %vm3767_vm4, %v3794_v61, %v3802_v28  ;;  %v10129_v12 = vsel %vm3767_vm4, %v3806_v32, %v10114_v40  ;;  %v10132_v16 = vsel %vm3848_vm5, %v3852_v51, %v3853_v13  ;;  %v3855_v61 = vrot.slane %v9865_v19, 2  ;;  %v7443_v5 = vld [vmem:[%s10905_s4 + $0x1f0] ss:$8 sps:$4 sm:$0xff]   ;;  %v7448_v59 = vld [vmem:[%s10905_s4 + $0x204] ss:$8 sps:$4 sm:$0xff]  }
 0x257   : > { %v10136_v46 = vsel %vm3767_vm4, %v3802_v28, %v10120_v8  ;;  %v10139_v24 = vsel %vm3848_vm5, %v3849_v20, %v3850_v43  ;;  %v10142_v41 = vsel %vm3848_vm5, %v3853_v13, %v3857_v25  ;;  %v3861_v55 = vrot.slane %v9929_v11, 2  ;;  %v7446_v9 = vld [vmem:[%s10905_s4 + $0x200] ss:$8 sps:$4 sm:$0xff]   ;;  %v7451_v47 = vld [vmem:[%s10905_s4 + $0x214] ss:$8 sps:$4 sm:$0xff]  }
 0x258   : > { %v3859_v29 = vrot.slane %v9924_v30, 2  ;;  %v3865_v53 = vrot.slane %v9979_v54, 2  ;;  %v3863_v52 = vrot.slane %v9974_v15, 2  ;;  %v10156_v32 = vsel %vm3848_vm5, %v3850_v43, %v3855_v61  ;;  %v7449_v51 = vld [vmem:[%s10905_s4 + $0x210] ss:$8 sps:$4 sm:$0xff]  }
 0x259   : > { %4949 = vmatpush1.bf16.msra.mxu1 %v7434_v21  ;;  %v10159_v58 = vsel %vm3848_vm5, %v3857_v25, %v3861_v55  ;;  %v7454_v21 = vld [vmem:[%s10905_s4 + $0x224] ss:$8 sps:$4 sm:$0xff]   ;;  %v7452_v28 = vld [vmem:[%s10905_s4 + $0x220] ss:$8 sps:$4 sm:$0xff]  }
 0x25a   : > { %4950 = vmatprep.subr.bf16.mxu1 %v7439_v7  ;;  %v10162_v19 = vsel %vm3848_vm5, %v3855_v61, %v3859_v29  ;;  %v10167_v11 = vsel %vm3848_vm5, %v3861_v55, %v3865_v53  ;;  %v10172_v30 = vsel %vm3848_vm5, %v3859_v29, %v3863_v52  ;;  %v3586_v13 = vld [vmem:[#allocation2 + $0xa8] sm:$0x1]  ;;  %v7460_v7 = vld [vmem:[%s10905_s4 + $0x244] ss:$8 sps:$4 sm:$0xff]   ;;  %v3585_v25 = vld [vmem:[#allocation2 + $0xa0] sm:$0x1] }
 0x25b   : > { %v3598_v20 = vpack.c.bf16 %v3586_v13, %v3586_v13  ;;  %v7458_v43 = vld [vmem:[%s10905_s4 + $0x240] ss:$8 sps:$4 sm:$0xff]   ;;  %v7466_v61 = vld [vmem:[%s10905_s4 + $0x264] ss:$8 sps:$4 sm:$0xff]   ;;  %v3597_v55 = vpack.c.bf16 %v3585_v25, %v3585_v25  ;;  %v7469_v29 = vld [vmem:[%s10905_s4 + $0x274] ss:$8 sps:$4 sm:$0xff]  }
 0x25c   : > { %v7485_v13 = vld [vmem:[%s10905_s4 + $0x2d0] ss:$8 sps:$4 sm:$0xff]   ;;  %v7494_v25 = vld [vmem:[%s10905_s4 + $0x300] ss:$8 sps:$4 sm:$0xff]   ;;  %v7601_v15 = vld [vmem:[%s10908_s7 + $0x64] ss:$16 sps:$4 sm:$0xff]  }
 0x25d   : > { %4951 = vmatpush1.bf16.msra.mxu1 %v7437_v37  ;;  %v7461_v37 = vld [vmem:[%s10905_s4 + $0x250] ss:$8 sps:$4 sm:$0xff]  }
 0x25e   : > { %4952 = vmatprep.subr.bf16.mxu1 %v7442_v57  ;;  %v3706_v57 = vor.u32 %v3704_v34, %v10024_v60  ;;  %v7467_v60 = vld [vmem:[%s10905_s4 + $0x270] ss:$8 sps:$4 sm:$0xff]   ;;  %v7472_v34 = vld [vmem:[%s10905_s4 + $0x284] ss:$8 sps:$4 sm:$0xff]  }
 0x25f   : > { %v7599_v54 = vld [vmem:[%s10908_s7 + $0x60] ss:$16 sps:$4 sm:$0xff]  }
 0x261   : > { %4953 = vmatpush1.bf16.msra.mxu1 %v7440_v1  ;;  %v3700_v1 = vshll.u32 %v3597_v55, 16  ;;  %v7502_v55 = vld [vmem:[%s10905_s4 + $0x324] ss:$8 sps:$4 sm:$0xff]  }
 0x262   : > { %4954 = vmatprep.subr.bf16.mxu1 %v7445_v48 }
 0x265   : > { %4955 = vmatpush1.bf16.msra.mxu1 %v7443_v5  ;;  %v3698_v5 = vor.u32 %v3696_v45, %v10014_v0  ;;  %v7473_v0 = vld [vmem:[%s10905_s4 + $0x290] ss:$8 sps:$4 sm:$0xff]   ;;  %v7478_v45 = vld [vmem:[%s10905_s4 + $0x2a4] ss:$8 sps:$4 sm:$0xff]  }
 0x266   : > { %5007 = vmatprep.subr.bf16.mxu1 %v7448_v59  ;;  %v3702_v59 = vrot.slane %v3700_v1, 1  ;;  %v7509_v1 = vld [vmem:[%s10905_s4 + $0x350] ss:$8 sps:$4 sm:$0xff]  }
 0x268   : > { %4957 = vmatmul.mubr.bf16.vlgmr.msra.gmra.mrb[60].mxu1 %v9878_v50  ;;  %v7457_v50 = vld [vmem:[%s10905_s4 + $0x234] ss:$8 sps:$4 sm:$0xff]  }
 0x269   : > { %4966 = vmatprep.mubr.bf16.mxu1 %v9917_v18  ;;  %5008 = vmatpush1.bf16.msra.mxu1 %v7446_v9  ;;  %v7455_v18 = vld [vmem:[%s10905_s4 + $0x230] ss:$8 sps:$4 sm:$0xff]   ;;  %v7475_v9 = vld [vmem:[%s10905_s4 + $0x294] ss:$8 sps:$4 sm:$0xff]  }
 0x26a   : > { %5009 = vmatprep.subr.bf16.mxu1 %v7451_v47  ;;  %v3703_v47 = vsel %vm3623_vm2, %v3698_v5, %v3702_v59 }
 0x26d   : > { %5010 = vmatpush1.bf16.msra.mxu1 %v7449_v51  ;;  %v7476_v51 = vld [vmem:[%s10905_s4 + $0x2a0] ss:$8 sps:$4 sm:$0xff]  }
 0x26e   : > { %5011 = vmatprep.subr.bf16.mxu1 %v7454_v21  ;;  %v7481_v21 = vld [vmem:[%s10905_s4 + $0x2b4] ss:$8 sps:$4 sm:$0xff]  }
 0x270   : > { %4967 = vmatmul.mubr.bf16.gmra.mrb[64].mxu1 %v9920_v3  ;;  %v7463_v3 = vld [vmem:[%s10905_s4 + $0x254] ss:$8 sps:$4 sm:$0xff]  }
 0x271   : > { %4976 = vmatprep.mubr.bf16.mxu1 %v9971_v17  ;;  %5012 = vmatpush1.bf16.msra.mxu1 %v7452_v28  ;;  %v3708_v17 = vshll.u32 %v3598_v20, 16  ;;  %v7484_v28 = vld [vmem:[%s10905_s4 + $0x2c4] ss:$8 sps:$4 sm:$0xff]   ;;  %v7488_v20 = vld [vmem:[%s10905_s4 + $0x2e0] ss:$8 sps:$4 sm:$0xff]  }
 0x272   : > { %5013 = vmatprep.subr.bf16.mxu1 %v7457_v50  ;;  %v7482_v50 = vld [vmem:[%s10905_s4 + $0x2c0] ss:$8 sps:$4 sm:$0xff]  }
 0x275   : > { %5014 = vmatpush1.bf16.msra.mxu1 %v7455_v18  ;;  %v7487_v18 = vld [vmem:[%s10905_s4 + $0x2d4] ss:$8 sps:$4 sm:$0xff]  }
 0x276   : > { %5015 = vmatprep.subr.bf16.mxu1 %v7460_v7  ;;  %v7490_v7 = vld [vmem:[%s10905_s4 + $0x2e4] ss:$8 sps:$4 sm:$0xff]  }
 0x278   : > { %4977 = vmatmul.mubr.bf16.gmra.mrb[68].mxu1 %v9963_v44  ;;  %v3710_v44 = vrot.slane %v3708_v17, 1  ;;  %v7496_v17 = vld [vmem:[%s10905_s4 + $0x304] ss:$8 sps:$4 sm:$0xff]  }
 0x279   : > { %4986 = vmatprep.mubr.bf16.mxu1 %v10054_v36  ;;  %5016 = vmatpush1.bf16.msra.mxu1 %v7458_v43  ;;  %v7464_v36 = vld [vmem:[%s10905_s4 + $0x260] ss:$8 sps:$4 sm:$0xff]   ;;  %v7493_v43 = vld [vmem:[%s10905_s4 + $0x2f4] ss:$8 sps:$4 sm:$0xff]  }
 0x27a   : > { %5017 = vmatprep.subr.bf16.mxu1 %v7463_v3  ;;  %v3711_v48 = vsel %vm3623_vm2, %v3706_v57, %v3710_v44  ;;  %v7491_v3 = vld [vmem:[%s10905_s4 + $0x2f0] ss:$8 sps:$4 sm:$0xff]   ;;  %v7500_v57 = vld [vmem:[%s10905_s4 + $0x320] ss:$8 sps:$4 sm:$0xff]   ;;  %v7508_v44 = vld [vmem:[%s10905_s4 + $0x344] ss:$8 sps:$4 sm:$0xff]  }
 0x27d   : > { %5018 = vmatpush1.bf16.msra.mxu1 %v7461_v37  ;;  %v7499_v37 = vld [vmem:[%s10905_s4 + $0x314] ss:$8 sps:$4 sm:$0xff]  }
 0x27e   : > { %5019 = vmatprep.subr.bf16.mxu1 %v7466_v61  ;;  %v7497_v61 = vld [vmem:[%s10905_s4 + $0x310] ss:$8 sps:$4 sm:$0xff]  }
 0x280   : > { %4987 = vmatmul.mubr.bf16.gmra.mrb[72].mxu1 %v10035_v62  ;;  %v7470_v62 = vld [vmem:[%s10905_s4 + $0x280] ss:$8 sps:$4 sm:$0xff]  }
 0x281   : > { %4996 = vmatprep.mubr.bf16.mxu1 %v3711_v48  ;;  %5020 = vmatpush1.bf16.msra.mxu1 %v7464_v36  ;;  %v7506_v36 = vld [vmem:[%s10905_s4 + $0x340] ss:$8 sps:$4 sm:$0xff]   ;;  %v7514_v48 = vld [vmem:[%s10905_s4 + $0x364] ss:$8 sps:$4 sm:$0xff]  }
 0x282   : > { %5021 = vmatprep.subr.bf16.mxu1 %v7469_v29  ;;  %v3602_v29 = vld [vmem:[#allocation2 + $0xa8] sm:$0x3] }
 0x285   : > { %5022 = vmatpush1.bf16.msra.mxu1 %v7467_v60 }
 0x286   : > { %5023 = vmatprep.subr.bf16.mxu1 %v7472_v34  ;;  %v3601_v34 = vld [vmem:[#allocation2 + $0xa0] sm:$0x3] }
 0x287   : > { %v3605_v5 = vpack.c.bf16 %v3601_v34, %v3601_v34 }
 0x288   : > { %4997 = vmatmul.mubr.bf16.gmra.mrb[76].mxu1 %v3703_v47 }
 0x289   : > { %5024 = vmatpush1.bf16.msra.mxu1 %v7470_v62  ;;  %5039 = vmatprep.mubr.bf16.mxu1 %v9967_v39  ;;  %v7479_v39 = vld [vmem:[%s10905_s4 + $0x2b0] ss:$8 sps:$4 sm:$0xff]   ;;  %v3753_v47 = vrot.slane %v3605_v5, 1  ;;  %v7562_v5 = vld [vmem:[%s10905_s4 + $0x464] ss:$8 sps:$4 sm:$0xff]  }
 0x28a   : > { %5025 = vmatprep.subr.bf16.mxu1 %v7475_v9  ;;  %v7515_v62 = vld [vmem:[%s10905_s4 + $0x370] ss:$8 sps:$4 sm:$0xff]   ;;  %v7520_v9 = vld [vmem:[%s10905_s4 + $0x384] ss:$8 sps:$4 sm:$0xff]  }
 0x28d   : > { %5026 = vmatpush1.bf16.msra.mxu1 %v7473_v0  ;;  %v3754_v0 = vsel %vm3734_vm3, %v3749_v38, %v3753_v47  ;;  %v7595_v38 = vld [vmem:[%s10908_s7 + $0x24] ss:$16 sps:$4 sm:$0xff]  }
 0x28e   : > { %5027 = vmatprep.subr.bf16.mxu1 %v7478_v45  ;;  %v7590_v45 = vld [vmem:[%s10908_s7] ss:$16 sps:$4 sm:$0xff]  }
 0x291   : > { %5028 = vmatpush1.bf16.msra.mxu1 %v7476_v51  ;;  %v7592_v51 = vld [vmem:[%s10908_s7 + $0x4] ss:$16 sps:$4 sm:$0xff]  }
 0x292   : > { %5029 = vmatprep.subr.bf16.mxu1 %v7481_v21  ;;  %v7521_v21 = vld [vmem:[%s10905_s4 + $0x390] ss:$8 sps:$4 sm:$0xff]   ;;  %5755 = vmatprep.subr.bf16.mxu0 %v7592_v51 }
 0x293   : > { %5756 = vmatpush1.bf16.msra.mxu0 %v7590_v45  ;;  %v7568_v45 = vld [vmem:[%s10905_s4 + $0x484] ss:$8 sps:$4 sm:$0xff]  }
 0x294   : > { %5757 = vmatprep.subr.bf16.mxu0 %v7595_v38  ;;  %v7569_v38 = vld [vmem:[%s10905_s4 + $0x490] ss:$8 sps:$4 sm:$0xff]  }
 0x295   : > { %5030 = vmatpush1.bf16.msra.mxu1 %v7479_v39  ;;  %v7526_v39 = vld [vmem:[%s10905_s4 + $0x3a4] ss:$8 sps:$4 sm:$0xff]  }
 0x296   : > { %5031 = vmatprep.subr.bf16.mxu1 %v7484_v28  ;;  %v7593_v28 = vld [vmem:[%s10908_s7 + $0x20] ss:$16 sps:$4 sm:$0xff]  }
 0x297   : > { %5758 = vmatpush1.bf16.msra.mxu0 %v7593_v28  ;;  %v7572_v28 = vld [vmem:[%s10905_s4 + $0x4a0] ss:$8 sps:$4 sm:$0xff]  }
 0x299   : > { %5032 = vmatpush1.bf16.msra.mxu1 %v7482_v50  ;;  %v7529_v50 = vld [vmem:[%s10905_s4 + $0x3b4] ss:$8 sps:$4 sm:$0xff]  }
 0x29a   : > { %5033 = vmatprep.subr.bf16.mxu1 %v7487_v18  ;;  %v7527_v18 = vld [vmem:[%s10905_s4 + $0x3b0] ss:$8 sps:$4 sm:$0xff]  }
 0x29d   : > { %5034 = vmatpush1.bf16.msra.mxu1 %v7485_v13  ;;  %v7532_v13 = vld [vmem:[%s10905_s4 + $0x3c4] ss:$8 sps:$4 sm:$0xff]  }
 0x29e   : > { %5035 = vmatprep.subr.bf16.mxu1 %v7490_v7  ;;  %v7530_v7 = vld [vmem:[%s10905_s4 + $0x3c0] ss:$8 sps:$4 sm:$0xff]  }
 0x2a1   : > { %5036 = vmatpush1.bf16.msra.mxu1 %v7488_v20  ;;  %v7535_v20 = vld [vmem:[%s10905_s4 + $0x3d4] ss:$8 sps:$4 sm:$0xff]  }
 0x2a2   : > { %5037 = vmatprep.subr.bf16.mxu1 %v7493_v43  ;;  %v7533_v43 = vld [vmem:[%s10905_s4 + $0x3d0] ss:$8 sps:$4 sm:$0xff]  }
 0x2a5   : > { %5038 = vmatpush1.bf16.msra.mxu1 %v7491_v3  ;;  %v7538_v3 = vld [vmem:[%s10905_s4 + $0x3e4] ss:$8 sps:$4 sm:$0xff]  }
 0x2a6   : > { %5090 = vmatprep.subr.bf16.mxu1 %v7496_v17  ;;  %v7536_v17 = vld [vmem:[%s10905_s4 + $0x3e0] ss:$8 sps:$4 sm:$0xff]  }
 0x2a8   : > { %5040 = vmatmul.mubr.bf16.vlgmr.msra.gmra.mrb[60].mxu1 %v9985_v63  ;;  %v7505_v63 = vld [vmem:[%s10905_s4 + $0x334] ss:$8 sps:$4 sm:$0xff]  }
 0x2a9   : > { %5049 = vmatprep.mubr.bf16.mxu1 %v9996_v10  ;;  %5091 = vmatpush1.bf16.msra.mxu1 %v7494_v25  ;;  %v7503_v10 = vld [vmem:[%s10905_s4 + $0x330] ss:$8 sps:$4 sm:$0xff]   ;;  %v7541_v25 = vld [vmem:[%s10905_s4 + $0x3f4] ss:$8 sps:$4 sm:$0xff]  }
 0x2aa   : > { %5092 = vmatprep.subr.bf16.mxu1 %v7499_v37  ;;  %v7539_v37 = vld [vmem:[%s10905_s4 + $0x3f0] ss:$8 sps:$4 sm:$0xff]  }
 0x2ad   : > { %5093 = vmatpush1.bf16.msra.mxu1 %v7497_v61  ;;  %v7544_v61 = vld [vmem:[%s10905_s4 + $0x404] ss:$8 sps:$4 sm:$0xff]  }
 0x2ae   : > { %5094 = vmatprep.subr.bf16.mxu1 %v7502_v55  ;;  %v7542_v55 = vld [vmem:[%s10905_s4 + $0x400] ss:$8 sps:$4 sm:$0xff]  }
 0x2b0   : > { %5050 = vmatmul.mubr.bf16.gmra.mrb[64].mxu1 %v9999_v56  ;;  %v7511_v56 = vld [vmem:[%s10905_s4 + $0x354] ss:$8 sps:$4 sm:$0xff]  }
 0x2b1   : > { %5059 = vmatprep.mubr.bf16.mxu1 %v10006_v31  ;;  %5095 = vmatpush1.bf16.msra.mxu1 %v7500_v57  ;;  %v3606_v31 = vpack.c.bf16 %v3602_v29, %v3602_v29  ;;  %v7547_v57 = vld [vmem:[%s10905_s4 + $0x414] ss:$8 sps:$4 sm:$0xff]   ;;  %v7551_v29 = vld [vmem:[%s10905_s4 + $0x430] ss:$8 sps:$4 sm:$0xff]  }
 0x2b2   : > { %5096 = vmatprep.subr.bf16.mxu1 %v7505_v63  ;;  %v7545_v63 = vld [vmem:[%s10905_s4 + $0x410] ss:$8 sps:$4 sm:$0xff]  }
 0x2b3   : > { %v3755_v60 = vrot.slane %v3606_v31, 1 }
 0x2b5   : > { %5097 = vmatpush1.bf16.msra.mxu1 %v7503_v10  ;;  %v3756_v59 = vsel %vm3734_vm3, %v3751_v42, %v3755_v60  ;;  %v7523_v42 = vld [vmem:[%s10905_s4 + $0x394] ss:$8 sps:$4 sm:$0xff]   ;;  %v7550_v10 = vld [vmem:[%s10905_s4 + $0x424] ss:$8 sps:$4 sm:$0xff]  }
 0x2b6   : > { %5098 = vmatprep.subr.bf16.mxu1 %v7508_v44  ;;  %v7548_v44 = vld [vmem:[%s10905_s4 + $0x420] ss:$8 sps:$4 sm:$0xff]  }
 0x2b8   : > { %5060 = vmatmul.mubr.bf16.gmra.mrb[68].mxu1 %v10009_v26  ;;  %v7512_v26 = vld [vmem:[%s10905_s4 + $0x360] ss:$8 sps:$4 sm:$0xff]  }
 0x2b9   : > { %5069 = vmatprep.mubr.bf16.mxu1 %v10040_v6  ;;  %5099 = vmatpush1.bf16.msra.mxu1 %v7506_v36  ;;  %v7517_v6 = vld [vmem:[%s10905_s4 + $0x374] ss:$8 sps:$4 sm:$0xff]   ;;  %v3610_v36 = vld [vmem:[#allocation2 + $0xa8] sm:$0x7] }
 0x2ba   : > { %5100 = vmatprep.subr.bf16.mxu1 %v7511_v56  ;;  %v7556_v56 = vld [vmem:[%s10905_s4 + $0x444] ss:$8 sps:$4 sm:$0xff]  }
 0x2bd   : > { %5101 = vmatpush1.bf16.msra.mxu1 %v7509_v1 }
 0x2be   : > { %5102 = vmatprep.subr.bf16.mxu1 %v7514_v48  ;;  %v3609_v48 = vld [vmem:[#allocation2 + $0xa0] sm:$0x7] }
 0x2bf   : > { %v3613_v60 = vpack.c.bf16 %v3609_v48, %v3609_v48  ;;  %v7625_v48 = vld [vmem:[%s10908_s7 + $0x164] ss:$16 sps:$4 sm:$0xff]  }
 0x2c0   : > { %5070 = vmatmul.mubr.bf16.gmra.mrb[72].mxu1 %v10045_v14  ;;  %v7518_v14 = vld [vmem:[%s10905_s4 + $0x380] ss:$8 sps:$4 sm:$0xff]  }
 0x2c1   : > { %5079 = vmatprep.mubr.bf16.mxu1 %v3756_v59  ;;  %5103 = vmatpush1.bf16.msra.mxu1 %v7512_v26  ;;  %v3817_v59 = vshrl.u32 %v3613_v60, 16 }
 0x2c2   : > { %5104 = vmatprep.subr.bf16.mxu1 %v7517_v6  ;;  %v7557_v6 = vld [vmem:[%s10905_s4 + $0x450] ss:$8 sps:$4 sm:$0xff]  }
 0x2c3   : > { %v3819_v47 = vrot.slane %v3817_v59, 1  ;;  %v7635_v59 = vld [vmem:[%s10908_s7 + $0x1e0] ss:$16 sps:$4 sm:$0xff]  }
 0x2c5   : > { %5105 = vmatpush1.bf16.msra.mxu1 %v7515_v62  ;;  %v3820_v62 = vshll.u32 %v3613_v60, 16  ;;  %v7631_v60 = vld [vmem:[%s10908_s7 + $0x1a4] ss:$16 sps:$4 sm:$0xff]  }
 0x2c6   : > { %5106 = vmatprep.subr.bf16.mxu1 %v7520_v9 }
 0x2c8   : > { %5080 = vmatmul.mubr.bf16.gmra.mrb[76].mxu1 %v3754_v0  ;;  %v7563_v0 = vld [vmem:[%s10905_s4 + $0x470] ss:$8 sps:$4 sm:$0xff]  }
 0x2c9   : > { %5107 = vmatpush1.bf16.msra.mxu1 %v7518_v14  ;;  %5122 = vmatprep.mubr.bf16.mxu1 %v10075_v4  ;;  %v7524_v4 = vld [vmem:[%s10905_s4 + $0x3a0] ss:$8 sps:$4 sm:$0xff]   ;;  %v3822_v14 = vrot.slane %v3820_v62, 2  ;;  %v7640_v62 = vld [vmem:[%s10908_s7 + $0xc] ss:$16 sps:$4 sm:$0xff]  }
 0x2ca   : > { %5108 = vmatprep.subr.bf16.mxu1 %v7523_v42 }
 0x2cb   : > { %v3823_v51 = vor.u32 %v3822_v14, %v3819_v47 }
 0x2cd   : > { %5109 = vmatpush1.bf16.msra.mxu1 %v7521_v21  ;;  %v3824_v21 = vsel %vm3767_vm4, %v10120_v8, %v3823_v51  ;;  %v7577_v8 = vld [vmem:[%s10905_s4 + $0x4b4] ss:$8 sps:$4 sm:$0xff]  }
 0x2ce   : > { %5110 = vmatprep.subr.bf16.mxu1 %v7526_v39  ;;  %v7574_v39 = vld [vmem:[%s10905_s4 + $0x4a4] ss:$8 sps:$4 sm:$0xff]  }
 0x2d1   : > { %5111 = vmatpush1.bf16.msra.mxu1 %v7524_v4  ;;  %v7580_v4 = vld [vmem:[%s10905_s4 + $0x4c4] ss:$8 sps:$4 sm:$0xff]  }
 0x2d2   : > { %5112 = vmatprep.subr.bf16.mxu1 %v7529_v50  ;;  %v7578_v50 = vld [vmem:[%s10905_s4 + $0x4c0] ss:$8 sps:$4 sm:$0xff]  }
 0x2d5   : > { %5113 = vmatpush1.bf16.msra.mxu1 %v7527_v18  ;;  %v7583_v18 = vld [vmem:[%s10905_s4 + $0x4d4] ss:$8 sps:$4 sm:$0xff]  }
 0x2d6   : > { %5114 = vmatprep.subr.bf16.mxu1 %v7532_v13  ;;  %v7581_v13 = vld [vmem:[%s10905_s4 + $0x4d0] ss:$8 sps:$4 sm:$0xff]  }
 0x2d9   : > { %5115 = vmatpush1.bf16.msra.mxu1 %v7530_v7  ;;  %v7586_v7 = vld [vmem:[%s10905_s4 + $0x4e4] ss:$8 sps:$4 sm:$0xff]  }
 0x2da   : > { %5116 = vmatprep.subr.bf16.mxu1 %v7535_v20  ;;  %v7584_v20 = vld [vmem:[%s10905_s4 + $0x4e0] ss:$8 sps:$4 sm:$0xff]  }
 0x2dd   : > { %5117 = vmatpush1.bf16.msra.mxu1 %v7533_v43  ;;  %v7589_v43 = vld [vmem:[%s10905_s4 + $0x4f4] ss:$8 sps:$4 sm:$0xff]  }
 0x2de   : > { %5118 = vmatprep.subr.bf16.mxu1 %v7538_v3  ;;  %v7587_v3 = vld [vmem:[%s10905_s4 + $0x4f0] ss:$8 sps:$4 sm:$0xff]  }
 0x2e1   : > { %5119 = vmatpush1.bf16.msra.mxu1 %v7536_v17  ;;  %v3618_v17 = vld [vmem:[#allocation2 + $0xa8] sm:$0xf] }
 0x2e2   : > { %5120 = vmatprep.subr.bf16.mxu1 %v7541_v25  ;;  %v3622_v25 = vpack.c.bf16 %v3618_v17, %v3618_v17 }
 0x2e5   : > { %5121 = vmatpush1.bf16.msra.mxu1 %v7539_v37  ;;  %v3869_v37 = vrot.slane %v3622_v25, 2 }
 0x2e6   : > { %5173 = vmatprep.subr.bf16.mxu1 %v7544_v61  ;;  %v3617_v61 = vld [vmem:[#allocation2 + $0xa0] sm:$0xf] }
 0x2e8   : > { %5123 = vmatmul.mubr.bf16.vlgmr.msra.gmra.mrb[60].mxu1 %v10112_v35  ;;  %v3614_v35 = vpack.c.bf16 %v3610_v36, %v3610_v36  ;;  %v7616_v36 = vld [vmem:[%s10908_s7 + $0x104] ss:$16 sps:$4 sm:$0xff]  }
 0x2e9   : > { %5132 = vmatprep.mubr.bf16.mxu1 %v10088_v2  ;;  %5174 = vmatpush1.bf16.msra.mxu1 %v7542_v55  ;;  %v7553_v2 = vld [vmem:[%s10905_s4 + $0x434] ss:$8 sps:$4 sm:$0xff]   ;;  %v3621_v55 = vpack.c.bf16 %v3617_v61, %v3617_v61 }
 0x2ea   : > { %5175 = vmatprep.subr.bf16.mxu1 %v7547_v57  ;;  %v3826_v31 = vshrl.u32 %v3614_v35, 16  ;;  %v3829_v1 = vshll.u32 %v3614_v35, 16  ;;  %v7610_v57 = vld [vmem:[%s10908_s7 + $0xc4] ss:$16 sps:$4 sm:$0xff]   ;;  %v7617_v35 = vld [vmem:[%s10908_s7 + $0x120] ss:$16 sps:$4 sm:$0xff]  }
 0x2ec   : > { %v3828_v34 = vrot.slane %v3826_v31, 1  ;;  %v3831_v26 = vrot.slane %v3829_v1, 2  ;;  %v7620_v31 = vld [vmem:[%s10908_s7 + $0x140] ss:$16 sps:$4 sm:$0xff]  }
 0x2ed   : > { %5176 = vmatpush1.bf16.msra.mxu1 %v7545_v63  ;;  %v7608_v63 = vld [vmem:[%s10908_s7 + $0xc0] ss:$16 sps:$4 sm:$0xff]  }
 0x2ee   : > { %5177 = vmatprep.subr.bf16.mxu1 %v7550_v10  ;;  %v3832_v9 = vor.u32 %v3831_v26, %v3828_v34  ;;  %v7611_v10 = vld [vmem:[%s10908_s7 + $0xe0] ss:$16 sps:$4 sm:$0xff]   ;;  %v7634_v26 = vld [vmem:[%s10908_s7 + $0x1c4] ss:$16 sps:$4 sm:$0xff]  }
 0x2ef   : > { %v7623_v1 = vld [vmem:[%s10908_s7 + $0x160] ss:$16 sps:$4 sm:$0xff]  }
 0x2f0   : > { %5133 = vmatmul.mubr.bf16.gmra.mrb[64].mxu1 %v10091_v23  ;;  %v7554_v23 = vld [vmem:[%s10905_s4 + $0x440] ss:$8 sps:$4 sm:$0xff]   ;;  %v3833_v42 = vsel %vm3767_vm4, %v10114_v40, %v3832_v9  ;;  %v7571_v40 = vld [vmem:[%s10905_s4 + $0x494] ss:$8 sps:$4 sm:$0xff]  }
 0x2f1   : > { %5142 = vmatprep.mubr.bf16.mxu1 %v10102_v27  ;;  %5178 = vmatpush1.bf16.msra.mxu1 %v7548_v44  ;;  %v7559_v27 = vld [vmem:[%s10905_s4 + $0x454] ss:$8 sps:$4 sm:$0xff]   ;;  %v7629_v34 = vld [vmem:[%s10908_s7 + $0x1a0] ss:$16 sps:$4 sm:$0xff]  }
 0x2f2   : > { %5179 = vmatprep.subr.bf16.mxu1 %v7553_v2  ;;  %v7613_v44 = vld [vmem:[%s10908_s7 + $0xe4] ss:$16 sps:$4 sm:$0xff]   ;;  %v7614_v2 = vld [vmem:[%s10908_s7 + $0x100] ss:$16 sps:$4 sm:$0xff]  }
 0x2f3   : > { %v5256_v9 = vld [vmem:[%s10906_s5] sm:$0x3] }
 0x2f4   : > { %v10635_v47 = vrot.slane %v5256_v9, %v10999_v33 }
 0x2f5   : > { %5180 = vmatpush1.bf16.msra.mxu1 %v7551_v29  ;;  %v7619_v29 = vld [vmem:[%s10908_s7 + $0x124] ss:$16 sps:$4 sm:$0xff]  }
 0x2f6   : > { %5181 = vmatprep.subr.bf16.mxu1 %v7556_v56  ;;  %v7622_v56 = vld [vmem:[%s10908_s7 + $0x144] ss:$16 sps:$4 sm:$0xff]  }
 0x2f8   : > { %5143 = vmatmul.mubr.bf16.gmra.mrb[68].mxu1 %v10125_v22  ;;  %v7560_v22 = vld [vmem:[%s10905_s4 + $0x460] ss:$8 sps:$4 sm:$0xff]  }
 0x2f9   : > { %5152 = vmatprep.mubr.bf16.mxu1 %v10129_v12  ;;  %5182 = vmatpush1.bf16.msra.mxu1 %v7554_v23  ;;  %v7565_v12 = vld [vmem:[%s10905_s4 + $0x474] ss:$8 sps:$4 sm:$0xff]  }
 0x2fa   : > { %5183 = vmatprep.subr.bf16.mxu1 %v7559_v27  ;;  %v7628_v23 = vld [vmem:[%s10908_s7 + $0x184] ss:$16 sps:$4 sm:$0xff]   ;;  %v7626_v27 = vld [vmem:[%s10908_s7 + $0x180] ss:$16 sps:$4 sm:$0xff]  }
 0x2fd   : > { %5184 = vmatpush1.bf16.msra.mxu1 %v7557_v6  ;;  %v7632_v6 = vld [vmem:[%s10908_s7 + $0x1c0] ss:$16 sps:$4 sm:$0xff]  }
 0x2fe   : > { %5185 = vmatprep.subr.bf16.mxu1 %v7562_v5  ;;  %v7637_v5 = vld [vmem:[%s10908_s7 + $0x1e4] ss:$16 sps:$4 sm:$0xff]  }
 0x300   : > { %5153 = vmatmul.mubr.bf16.gmra.mrb[72].mxu1 %v10136_v46  ;;  %v7566_v46 = vld [vmem:[%s10905_s4 + $0x480] ss:$8 sps:$4 sm:$0xff]  }
 0x301   : > { %5162 = vmatprep.mubr.bf16.mxu1 %v3833_v42  ;;  %5186 = vmatpush1.bf16.msra.mxu1 %v7560_v22  ;;  %v5288_v22 = vld [vmem:[%s10907_s6] sm:$0x3] }
 0x302   : > { %5187 = vmatprep.subr.bf16.mxu1 %v7565_v12  ;;  %v10632_v12 = vrot.slane %v5256_v9, %v10998_v49  ;;  %v10638_v14 = vrot.slane %v5288_v22, %v10998_v49 }
 0x305   : > { %5188 = vmatpush1.bf16.msra.mxu1 %v7563_v0  ;;  %v10641_v0 = vrot.slane %v5288_v22, %v10999_v33 }
 0x306   : > { %5189 = vmatprep.subr.bf16.mxu1 %v7568_v45 }
 0x308   : > { %5163 = vmatmul.mubr.bf16.gmra.mrb[76].mxu1 %v3824_v21 }
 0x309   : > { %5190 = vmatpush1.bf16.msra.mxu1 %v7566_v46  ;;  %5205 = vmatprep.mubr.bf16.mxu1 %v10132_v16  ;;  %v7575_v16 = vld [vmem:[%s10905_s4 + $0x4b0] ss:$8 sps:$4 sm:$0xff]  }
 0x30a   : > { %5191 = vmatprep.subr.bf16.mxu1 %v7571_v40 }
 0x30d   : > { %5192 = vmatpush1.bf16.msra.mxu1 %v7569_v38 }
 0x30e   : > { %5193 = vmatprep.subr.bf16.mxu1 %v7574_v39 }
 0x311   : > { %5194 = vmatpush1.bf16.msra.mxu1 %v7572_v28 }
 0x312   : > { %5195 = vmatprep.subr.bf16.mxu1 %v7577_v8 }
 0x315   : > { %5196 = vmatpush1.bf16.msra.mxu1 %v7575_v16 }
 0x316   : > { %5197 = vmatprep.subr.bf16.mxu1 %v7580_v4 }
 0x319   : > { %5198 = vmatpush1.bf16.msra.mxu1 %v7578_v50 }
 0x31a   : > { %5199 = vmatprep.subr.bf16.mxu1 %v7583_v18 }
 0x31d   : > { %5200 = vmatpush1.bf16.msra.mxu1 %v7581_v13 }
 0x31e   : > { %5201 = vmatprep.subr.bf16.mxu1 %v7586_v7 }
 0x321   : > { %5202 = vmatpush1.bf16.msra.mxu1 %v7584_v20 }
 0x322   : > { %5203 = vmatprep.subr.bf16.mxu1 %v7589_v43 }
 0x325   : > { %5204 = vmatpush1.bf16.msra.mxu1 %v7587_v3 }
 0x328   : > { %5206 = vmatmul.mubr.bf16.vlgmr.msra.gmra.mrb[60].mxu1 %v10139_v24  ;;  %v3870_v24 = vsel %vm3848_vm5, %v3865_v53, %v3869_v37  ;;  %v7604_v53 = vld [vmem:[%s10908_s7 + $0x84] ss:$16 sps:$4 sm:$0xff]  }
 0x329   : > { %5215 = vmatprep.mubr.bf16.mxu1 %v10142_v41  ;;  %v3867_v41 = vrot.slane %v3621_v55, 2 }
 0x330   : > { %5216 = vmatmul.mubr.bf16.gmra.mrb[64].mxu1 %v10156_v32  ;;  %v3868_v32 = vsel %vm3848_vm5, %v3863_v52, %v3867_v41  ;;  %v7602_v52 = vld [vmem:[%s10908_s7 + $0x80] ss:$16 sps:$4 sm:$0xff]  }
 0x331   : > { %5225 = vmatprep.mubr.bf16.mxu1 %v10159_v58  ;;  %v7596_v58 = vld [vmem:[%s10908_s7 + $0x40] ss:$16 sps:$4 sm:$0xff]  }
 0x338   : > { %5226 = vmatmul.mubr.bf16.gmra.mrb[68].mxu1 %v10162_v19  ;;  %v7598_v19 = vld [vmem:[%s10908_s7 + $0x44] ss:$16 sps:$4 sm:$0xff]  }
 0x339   : > { %5235 = vmatprep.mubr.bf16.mxu1 %v10167_v11  ;;  %5759 = vmatprep.subr.bf16.mxu0 %v7598_v19  ;;  %v7605_v11 = vld [vmem:[%s10908_s7 + $0xa0] ss:$16 sps:$4 sm:$0xff]  }
 0x33a   : > { %5760 = vmatpush1.bf16.msra.mxu0 %v7596_v58 }
 0x33b   : > { %5761 = vmatprep.subr.bf16.mxu0 %v7601_v15 }
 0x33e   : > { %5762 = vmatpush1.bf16.msra.mxu0 %v7599_v54 }
 0x33f   : > { %5763 = vmatprep.subr.bf16.mxu0 %v7604_v53 }
 0x340   : > { %5236 = vmatmul.mubr.bf16.gmra.mrb[72].mxu1 %v10172_v30  ;;  %v7607_v30 = vld [vmem:[%s10908_s7 + $0xa4] ss:$16 sps:$4 sm:$0xff]  }
 0x341   : > { %5245 = vmatprep.mubr.bf16.mxu1 %v3870_v24 }
 0x342   : > { %5764 = vmatpush1.bf16.msra.mxu0 %v7602_v52 }
 0x343   : > { %5765 = vmatprep.subr.bf16.mxu0 %v7607_v30 }
 0x346   : > { %5766 = vmatpush1.bf16.msra.mxu0 %v7605_v11 }
 0x347   : > { %5767 = vmatprep.subr.bf16.mxu0 %v7610_v57 }
 0x348   : > { %5246 = vmatmul.mubr.bf16.gmra.mrb[76].mxu1 %v3868_v32 }
 0x34a   : > { %5768 = vmatpush1.bf16.msra.mxu0 %v7608_v63 }
 0x34b   : > { %5769 = vmatprep.subr.bf16.mxu0 %v7613_v44 }
 0x34e   : > { %5770 = vmatpush1.bf16.msra.mxu0 %v7611_v10 }
 0x34f   : > { %5771 = vmatprep.subr.bf16.mxu0 %v7616_v36 }
 0x352   : > { %5772 = vmatpush1.bf16.msra.mxu0 %v7614_v2 }
 0x353   : > { %5773 = vmatprep.subr.bf16.mxu0 %v7619_v29 }
 0x356   : > { %5774 = vmatpush1.bf16.msra.mxu0 %v7617_v35 }
 0x357   : > { %5775 = vmatprep.subr.bf16.mxu0 %v7622_v56 }
 0x35a   : > { %5776 = vmatpush1.bf16.msra.mxu0 %v7620_v31 }
 0x35b   : > { %5777 = vmatprep.subr.bf16.mxu0 %v7625_v48 }
 0x35e   : > { %5778 = vmatpush1.bf16.msra.mxu0 %v7623_v1 }
 0x35f   : > { %5779 = vmatprep.subr.bf16.mxu0 %v7628_v23 }
 0x362   : > { %5780 = vmatpush1.bf16.msra.mxu0 %v7626_v27 }
 0x363   : > { %5781 = vmatprep.subr.bf16.mxu0 %v7631_v60 }
 0x366   : > { %5782 = vmatpush1.bf16.msra.mxu0 %v7629_v34 }
 0x367   : > { %5783 = vmatprep.subr.bf16.mxu0 %v7634_v26 }
 0x36a   : > { %5784 = vmatpush1.bf16.msra.mxu0 %v7632_v6 }
 0x36b   : > { %5785 = vmatprep.subr.bf16.mxu0 %v7637_v5 }
 0x36e   : > { %5786 = vmatpush1.bf16.msra.mxu0 %v7635_v59 }
 0x36f   : > { %5796 = vmatprep.subr.bf16.mxu0 %v7640_v62 }
 0x3fb   : > { %v5207_v42 = vpop.f32.mrb[60].mxu1 }
 0x3fc   : > { %v5268_v45 = vmul.f32 %v10632_v12, %v5207_v42  ;;  %v5209_v51 = vpop.f32.mrb[61].mxu1 }
 0x3fd   : > { %v5269_v46 = vmul.f32 %v10635_v47, %v5209_v51  ;;  %v5211_v40 = vpop.f32.mrb[62].mxu1 }
 0x3fe   : > { %v5300_v21 = vadd.f32 %v10638_v14, %v5268_v45  ;;  %v5270_v38 = vmul.f32 %v10632_v12, %v5211_v40  ;;  %v5213_v39 = vpop.f32.mrb[63].mxu1 }
 0x3ff   : > { %v5301_v28 = vadd.f32 %v10641_v0, %v5269_v46  ;;  %v5271_v8 = vmul.f32 %v10635_v47, %v5213_v39 }
 0x400   : > { %v5320_v16 = vmax.f32 %v5300_v21, 0.0  ;;  %v5302_v4 = vadd.f32 %v10638_v14, %v5270_v38 }
 0x401   : > { %v5321_v50 = vmax.f32 %v5301_v28, 0.0  ;;  %v5303_v18 = vadd.f32 %v10641_v0, %v5271_v8 }
 0x402   : > { %v5322_v13 = vmax.f32 %v5302_v4, 0.0 }
 0x403   : > { %v5340_v7 = vmax.f32 %v5320_v16, %v5321_v50  ;;  %v5323_v20 = vmax.f32 %v5303_v18, 0.0  ;;  %v5217_v43 = vpop.f32.mrb[64].mxu1 }
 0x404   : > { %v5272_v3 = vmul.f32 %v10632_v12, %v5217_v43  ;;  %v5219_v17 = vpop.f32.mrb[65].mxu1 }
 0x405   : > { %5350 = vst [vmem:[#allocation3] sm:$0xff] %v5340_v7  ;;  %v5341_v25 = vmax.f32 %v5322_v13, %v5323_v20  ;;  %v5273_v37 = vmul.f32 %v10635_v47, %v5219_v17  ;;  %v5221_v61 = vpop.f32.mrb[66].mxu1 }
 0x406   : > { %v5304_v55 = vadd.f32 %v10638_v14, %v5272_v3  ;;  %v5274_v24 = vmul.f32 %v10632_v12, %v5221_v61  ;;  %v5223_v41 = vpop.f32.mrb[67].mxu1 }
 0x407   : > { %5351 = vst [vmem:[#allocation3 + $0x8] sm:$0xff] %v5341_v25  ;;  %v5305_v32 = vadd.f32 %v10641_v0, %v5273_v37  ;;  %v5275_v58 = vmul.f32 %v10635_v47, %v5223_v41 }
 0x408   : > { %v5324_v19 = vmax.f32 %v5304_v55, 0.0  ;;  %v5306_v54 = vadd.f32 %v10638_v14, %v5274_v24 }
 0x409   : > { %v5325_v15 = vmax.f32 %v5305_v32, 0.0  ;;  %v5307_v53 = vadd.f32 %v10641_v0, %v5275_v58 }
 0x40a   : > { %v5326_v52 = vmax.f32 %v5306_v54, 0.0 }
 0x40b   : > { %v5342_v11 = vmax.f32 %v5324_v19, %v5325_v15  ;;  %v5327_v30 = vmax.f32 %v5307_v53, 0.0  ;;  %v5227_v57 = vpop.f32.mrb[68].mxu1 }
 0x40c   : > { %v5276_v63 = vmul.f32 %v10632_v12, %v5227_v57  ;;  %v5229_v10 = vpop.f32.mrb[69].mxu1 }
 0x40d   : > { %5352 = vst [vmem:[#allocation3 + $0x10] sm:$0xff] %v5342_v11  ;;  %v5343_v44 = vmax.f32 %v5326_v52, %v5327_v30  ;;  %v5277_v36 = vmul.f32 %v10635_v47, %v5229_v10  ;;  %v5231_v2 = vpop.f32.mrb[70].mxu1 }
 0x40e   : > { %v5308_v35 = vadd.f32 %v10638_v14, %v5276_v63  ;;  %v5278_v29 = vmul.f32 %v10632_v12, %v5231_v2  ;;  %v5233_v56 = vpop.f32.mrb[71].mxu1  ;;  %v7644_v2 = vld [vmem:[%s10908_s7 + $0x48] ss:$16 sps:$4 sm:$0xff]  }
 0x40f   : > { %5353 = vst [vmem:[#allocation3 + $0x18] sm:$0xff] %v5343_v44  ;;  %v5309_v31 = vadd.f32 %v10641_v0, %v5277_v36  ;;  %v5279_v1 = vmul.f32 %v10635_v47, %v5233_v56  ;;  %v7641_v44 = vld [vmem:[%s10908_s7 + $0x28] ss:$16 sps:$4 sm:$0xff]   ;;  %v7646_v36 = vld [vmem:[%s10908_s7 + $0x4c] ss:$16 sps:$4 sm:$0xff]  }
 0x410   : > { %v5328_v48 = vmax.f32 %v5308_v35, 0.0  ;;  %v5310_v23 = vadd.f32 %v10638_v14, %v5278_v29  ;;  %v7649_v35 = vld [vmem:[%s10908_s7 + $0x6c] ss:$16 sps:$4 sm:$0xff]   ;;  %v7647_v29 = vld [vmem:[%s10908_s7 + $0x68] ss:$16 sps:$4 sm:$0xff]  }
 0x411   : > { %v5329_v27 = vmax.f32 %v5309_v31, 0.0  ;;  %v5311_v60 = vadd.f32 %v10641_v0, %v5279_v1  ;;  %v7652_v56 = vld [vmem:[%s10908_s7 + $0x8c] ss:$16 sps:$4 sm:$0xff]   ;;  %v7650_v31 = vld [vmem:[%s10908_s7 + $0x88] ss:$16 sps:$4 sm:$0xff]  }
 0x412   : > { %v5330_v34 = vmax.f32 %v5310_v23, 0.0  ;;  %v7655_v1 = vld [vmem:[%s10908_s7 + $0xac] ss:$16 sps:$4 sm:$0xff]  }
 0x413   : > { %v5344_v26 = vmax.f32 %v5328_v48, %v5329_v27  ;;  %v5331_v6 = vmax.f32 %v5311_v60, 0.0  ;;  %v5237_v5 = vpop.f32.mrb[72].mxu1  ;;  %v7653_v48 = vld [vmem:[%s10908_s7 + $0xa8] ss:$16 sps:$4 sm:$0xff]   ;;  %v7658_v23 = vld [vmem:[%s10908_s7 + $0xcc] ss:$16 sps:$4 sm:$0xff]  }
 0x414   : > { %v5280_v59 = vmul.f32 %v10632_v12, %v5237_v5  ;;  %v5239_v62 = vpop.f32.mrb[73].mxu1  ;;  %v7656_v27 = vld [vmem:[%s10908_s7 + $0xc8] ss:$16 sps:$4 sm:$0xff]   ;;  %v7661_v60 = vld [vmem:[%s10908_s7 + $0xec] ss:$16 sps:$4 sm:$0xff]  }
 0x415   : > { %5354 = vst [vmem:[#allocation3 + $0x20] sm:$0xff] %v5344_v26  ;;  %v5345_v9 = vmax.f32 %v5330_v34, %v5331_v6  ;;  %v5281_v22 = vmul.f32 %v10635_v47, %v5239_v62  ;;  %v5241_v42 = vpop.f32.mrb[74].mxu1  ;;  %v7659_v34 = vld [vmem:[%s10908_s7 + $0xe8] ss:$16 sps:$4 sm:$0xff]   ;;  %v7664_v26 = vld [vmem:[%s10908_s7 + $0x10c] ss:$16 sps:$4 sm:$0xff]  }
 0x416   : > { %v5312_v45 = vadd.f32 %v10638_v14, %v5280_v59  ;;  %v5282_v51 = vmul.f32 %v10632_v12, %v5241_v42  ;;  %v5243_v46 = vpop.f32.mrb[75].mxu1  ;;  %v7662_v6 = vld [vmem:[%s10908_s7 + $0x108] ss:$16 sps:$4 sm:$0xff]   ;;  %v7667_v5 = vld [vmem:[%s10908_s7 + $0x12c] ss:$16 sps:$4 sm:$0xff]  }
 0x417   : > { %5355 = vst [vmem:[#allocation3 + $0x28] sm:$0xff] %v5345_v9  ;;  %v5313_v40 = vadd.f32 %v10641_v0, %v5281_v22  ;;  %v5283_v21 = vmul.f32 %v10635_v47, %v5243_v46  ;;  %v7665_v59 = vld [vmem:[%s10908_s7 + $0x128] ss:$16 sps:$4 sm:$0xff]   ;;  %v7670_v62 = vld [vmem:[%s10908_s7 + $0x14c] ss:$16 sps:$4 sm:$0xff]  }
 0x418   : > { %v5332_v38 = vmax.f32 %v5312_v45, 0.0  ;;  %v5314_v39 = vadd.f32 %v10638_v14, %v5282_v51  ;;  %v7668_v9 = vld [vmem:[%s10908_s7 + $0x148] ss:$16 sps:$4 sm:$0xff]   ;;  %v7673_v22 = vld [vmem:[%s10908_s7 + $0x16c] ss:$16 sps:$4 sm:$0xff]  }
 0x419   : > { %v5333_v28 = vmax.f32 %v5313_v40, 0.0  ;;  %v5315_v8 = vadd.f32 %v10641_v0, %v5283_v21  ;;  %v7671_v42 = vld [vmem:[%s10908_s7 + $0x168] ss:$16 sps:$4 sm:$0xff]   ;;  %v7676_v45 = vld [vmem:[%s10908_s7 + $0x18c] ss:$16 sps:$4 sm:$0xff]  }
 0x41a   : > { %v5334_v16 = vmax.f32 %v5314_v39, 0.0  ;;  %v7674_v51 = vld [vmem:[%s10908_s7 + $0x188] ss:$16 sps:$4 sm:$0xff]   ;;  %v7679_v46 = vld [vmem:[%s10908_s7 + $0x1ac] ss:$16 sps:$4 sm:$0xff]  }
 0x41b   : > { %v5346_v4 = vmax.f32 %v5332_v38, %v5333_v28  ;;  %v5335_v50 = vmax.f32 %v5315_v8, 0.0  ;;  %v5247_v18 = vpop.f32.mrb[76].mxu1  ;;  %v7677_v40 = vld [vmem:[%s10908_s7 + $0x1a8] ss:$16 sps:$4 sm:$0xff]   ;;  %v7682_v21 = vld [vmem:[%s10908_s7 + $0x1cc] ss:$16 sps:$4 sm:$0xff]  }
 0x41c   : > { %v5284_v13 = vmul.f32 %v10632_v12, %v5247_v18  ;;  %v5249_v7 = vpop.f32.mrb[77].mxu1  ;;  %v7680_v38 = vld [vmem:[%s10908_s7 + $0x1c8] ss:$16 sps:$4 sm:$0xff]   ;;  %v7685_v39 = vld [vmem:[%s10908_s7 + $0x1ec] ss:$16 sps:$4 sm:$0xff]   ;;  %v7686_v8 = vld [vmem:[%s10911_s10 + $0x40] sm:$0xff]  }
 0x41d   : > { %5356 = vst [vmem:[#allocation3 + $0x30] sm:$0xff] %v5346_v4  ;;  %v5347_v20 = vmax.f32 %v5334_v16, %v5335_v50  ;;  %v5285_v43 = vmul.f32 %v10635_v47, %v5249_v7  ;;  %v5251_v3 = vpop.f32.mrb[78].mxu1  ;;  %v7683_v28 = vld [vmem:[%s10908_s7 + $0x1e8] ss:$16 sps:$4 sm:$0xff]   ;;  %v7687_v16 = vld [vmem:[%s10911_s10] sm:$0xff]   ;;  %v7690_v18 = vld [vmem:[%s10911_s10 + $0x50] sm:$0xff]  }
 0x41e   : > { %v5316_v17 = vadd.f32 %v10638_v14, %v5284_v13  ;;  %v5286_v25 = vmul.f32 %v10632_v12, %v5251_v3  ;;  %v5253_v37 = vpop.f32.mrb[79].mxu1  ;;  %v7688_v4 = vld [vmem:[%s10911_s10 + $0x48] sm:$0xff]   ;;  %v7691_v13 = vld [vmem:[%s10911_s10 + $0x10] sm:$0xff]   ;;  %v7692_v7 = vld [vmem:[%s10911_s10 + $0x58] sm:$0xff]  }
 0x41f   : > { %5357 = vst [vmem:[#allocation3 + $0x38] sm:$0xff] %v5347_v20  ;;  %v5317_v61 = vadd.f32 %v10641_v0, %v5285_v43  ;;  %v5287_v55 = vmul.f32 %v10635_v47, %v5253_v37  ;;  %v7638_v47 = vld [vmem:[%s10908_s7 + $0x8] ss:$16 sps:$4 sm:$0xff]   ;;  %v7694_v43 = vld [vmem:[%s10911_s10 + $0x60] sm:$0xff]   ;;  %v7698_v37 = vld [vmem:[%s10911_s10 + $0x70] sm:$0xff]  }
 0x420   : > { %v5336_v24 = vmax.f32 %v5316_v17, 0.0  ;;  %v5318_v41 = vadd.f32 %v10638_v14, %v5286_v25  ;;  %v7689_v50 = vld [vmem:[%s10911_s10 + $0x8] sm:$0xff]   ;;  %v7693_v20 = vld [vmem:[%s10911_s10 + $0x18] sm:$0xff]   ;;  %v7695_v3 = vld [vmem:[%s10911_s10 + $0x20] sm:$0xff]  }
 0x421   : > { %v5337_v32 = vmax.f32 %v5317_v61, 0.0  ;;  %v5319_v58 = vadd.f32 %v10641_v0, %v5287_v55  ;;  %v7643_v0 = vld [vmem:[%s10908_s7 + $0x2c] ss:$16 sps:$4 sm:$0xff]   ;;  %v7699_v61 = vld [vmem:[%s10911_s10 + $0x30] sm:$0xff]  }
 0x422   : > { %v5338_v19 = vmax.f32 %v5318_v41, 0.0  ;;  %v7696_v17 = vld [vmem:[%s10911_s10 + $0x68] sm:$0xff]   ;;  %v7700_v55 = vld [vmem:[%s10911_s10 + $0x78] sm:$0xff]   ;;  %v7702_v41 = vld [vmem:[%s10911_s10 + $0xc0] sm:$0xff]  }
 0x423   : > { %v5348_v54 = vmax.f32 %v5336_v24, %v5337_v32  ;;  %v5339_v15 = vmax.f32 %v5319_v58, 0.0  ;;  %v7697_v25 = vld [vmem:[%s10911_s10 + $0x28] sm:$0xff]   ;;  %v7701_v24 = vld [vmem:[%s10911_s10 + $0x38] sm:$0xff]   ;;  %v5837_v32 = vld [vmem:[%s10909_s8] sm:$0xf] }
 0x424   : > { %v5863_v58 = vld [vmem:[%s10910_s9] sm:$0xf] }
 0x425   : > { %5358 = vst [vmem:[#allocation3 + $0x40] sm:$0xff] %v5348_v54  ;;  %v5349_v53 = vmax.f32 %v5338_v19, %v5339_v15  ;;  %v5842_v19 = vrot.slane %v5837_v32, %v10998_v49  ;;  %v5846_v54 = vrot.slane %v5837_v32, %v10999_v33  ;;  %v5868_v15 = vrot.slane %v5863_v58, %v10998_v49  ;;  %v7704_v49 = vld [vmem:[%s10911_s10 + $0xc8] sm:$0xff]  }
 0x427   : > { %5359 = vst [vmem:[#allocation3 + $0x48] sm:$0xff] %v5349_v53 }
 0x42c   : > { %v5360_v52 = vld [vmem:[#allocation3] ss:$10 sm:$0xff]  ;;  %v5362_v12 = vld [vmem:[#allocation3 + $0x1] ss:$10 sm:$0xff] }
 0x42d   : > { %v5363_v57 = vmax.f32 %v5360_v52, %v5362_v12  ;;  %v5872_v52 = vrot.slane %v5863_v58, %v10999_v33  ;;  %v7705_v33 = vld [vmem:[%s10911_s10 + $0x88] sm:$0xff]  }
 0x42e   : > { %v5365_v11 = vld [vmem:[#allocation3 + $0x2] ss:$10 sm:$0xff]  ;;  %v5367_v30 = vld [vmem:[#allocation3 + $0x3] ss:$10 sm:$0xff] }
 0x42f   : > { %v5368_v63 = vmax.f32 %v5365_v11, %v5367_v30  ;;  %v10686_v14 = vpack.c.bf16 %v5363_v57, %v5363_v57 }
 0x431   : > { %v5370_v10 = vpack.c.bf16 %v5368_v63, %v5368_v63 }
 0x433   : > { %5787 = vmatprep.mubr.bf16.mxu0 %v5370_v10 }
 0x434   : > { %5788 = vmatmul.mubr.bf16.vlgmr.msra.gmra.mrb[120].mxu0 %v10686_v14 }
 0x435   : > { %5797 = vmatpush1.bf16.msra.mxu0 %v7638_v47  ;;  %5828 = vmatprep.mubr.bf16.mxu0 %v5370_v10 }
 0x436   : > { %5798 = vmatprep.subr.bf16.mxu0 %v7643_v0 }
 0x439   : > { %5799 = vmatpush1.bf16.msra.mxu0 %v7641_v44 }
 0x43a   : > { %5800 = vmatprep.subr.bf16.mxu0 %v7646_v36  ;;  %v7703_v36 = vld [vmem:[%s10911_s10 + $0x80] sm:$0xff]  }
 0x43d   : > { %5801 = vmatpush1.bf16.msra.mxu0 %v7644_v2 }
 0x43e   : > { %5802 = vmatprep.subr.bf16.mxu0 %v7649_v35  ;;  %v7706_v35 = vld [vmem:[%s10911_s10 + $0xd0] sm:$0xff]  }
 0x441   : > { %5803 = vmatpush1.bf16.msra.mxu0 %v7647_v29  ;;  %v7707_v29 = vld [vmem:[%s10911_s10 + $0x90] sm:$0xff]  }
 0x442   : > { %5804 = vmatprep.subr.bf16.mxu0 %v7652_v56  ;;  %v7708_v56 = vld [vmem:[%s10911_s10 + $0xd8] sm:$0xff]  }
 0x445   : > { %5805 = vmatpush1.bf16.msra.mxu0 %v7650_v31  ;;  %v7709_v31 = vld [vmem:[%s10911_s10 + $0x98] sm:$0xff]  }
 0x446   : > { %5806 = vmatprep.subr.bf16.mxu0 %v7655_v1  ;;  %v7710_v1 = vld [vmem:[%s10911_s10 + $0xe0] sm:$0xff]  }
 0x449   : > { %5807 = vmatpush1.bf16.msra.mxu0 %v7653_v48  ;;  %v7711_v48 = vld [vmem:[%s10911_s10 + $0xa0] sm:$0xff]  }
 0x44a   : > { %5808 = vmatprep.subr.bf16.mxu0 %v7658_v23  ;;  %v7712_v23 = vld [vmem:[%s10911_s10 + $0xe8] sm:$0xff]  }
 0x44d   : > { %5809 = vmatpush1.bf16.msra.mxu0 %v7656_v27  ;;  %v7713_v27 = vld [vmem:[%s10911_s10 + $0xa8] sm:$0xff]  }
 0x44e   : > { %5810 = vmatprep.subr.bf16.mxu0 %v7661_v60  ;;  %v7714_v60 = vld [vmem:[%s10911_s10 + $0xf0] sm:$0xff]  }
 0x451   : > { %5811 = vmatpush1.bf16.msra.mxu0 %v7659_v34  ;;  %v7715_v34 = vld [vmem:[%s10911_s10 + $0xb0] sm:$0xff]  }
 0x452   : > { %5812 = vmatprep.subr.bf16.mxu0 %v7664_v26  ;;  %v7716_v26 = vld [vmem:[%s10911_s10 + $0xf8] sm:$0xff]  }
 0x455   : > { %5813 = vmatpush1.bf16.msra.mxu0 %v7662_v6  ;;  %v7717_v6 = vld [vmem:[%s10911_s10 + $0xb8] sm:$0xff]  }
 0x456   : > { %5814 = vmatprep.subr.bf16.mxu0 %v7667_v5  ;;  %v11000_v5 = vld [vmem:[#allocation6_spill] sm:$0xff] }
 0x459   : > { %5815 = vmatpush1.bf16.msra.mxu0 %v7665_v59  ;;  %v5850_v59 = vrot.slane %v5837_v32, %v11000_v5 }
 0x45a   : > { %5816 = vmatprep.subr.bf16.mxu0 %v7670_v62  ;;  %v11001_v62 = vld [vmem:[#allocation7_spill] sm:$0xff] }
 0x45d   : > { %5817 = vmatpush1.bf16.msra.mxu0 %v7668_v9  ;;  %v5854_v9 = vrot.slane %v5837_v32, %v11001_v62 }
 0x45e   : > { %5818 = vmatprep.subr.bf16.mxu0 %v7673_v22  ;;  %v5876_v22 = vrot.slane %v5863_v58, %v11000_v5 }
 0x461   : > { %5819 = vmatpush1.bf16.msra.mxu0 %v7671_v42 }
 0x462   : > { %5820 = vmatprep.subr.bf16.mxu0 %v7676_v45  ;;  %v5880_v45 = vrot.slane %v5863_v58, %v11001_v62 }
 0x465   : > { %5821 = vmatpush1.bf16.msra.mxu0 %v7674_v51 }
 0x466   : > { %5822 = vmatprep.subr.bf16.mxu0 %v7679_v46 }
 0x469   : > { %5823 = vmatpush1.bf16.msra.mxu0 %v7677_v40 }
 0x46a   : > { %5824 = vmatprep.subr.bf16.mxu0 %v7682_v21 }
 0x46d   : > { %5825 = vmatpush1.bf16.msra.mxu0 %v7680_v38 }
 0x46e   : > { %5826 = vmatprep.subr.bf16.mxu0 %v7685_v39 }
 0x471   : > { %5827 = vmatpush1.bf16.msra.mxu0 %v7683_v28 }
 0x472   : > { %6860 = vmatprep.subr.bf16.mxu0 %v7686_v8 }
 0x474   : > { %5829 = vmatmul.mubr.bf16.vlgmr.msra.gmra.mrb[124].mxu0 %v10686_v14 }
 0x475   : > { %6861 = vmatpush3.bf16.msra.mxu0 %v7687_v16 }
 0x476   : > { %6862 = vmatprep.subr.bf16.mxu0 %v7688_v4 }
 0x479   : > { %6863 = vmatpush3.bf16.msra.mxu0 %v7689_v50 }
 0x47a   : > { %6864 = vmatprep.subr.bf16.mxu0 %v7690_v18 }
 0x47d   : > { %6865 = vmatpush3.bf16.msra.mxu0 %v7691_v13 }
 0x47e   : > { %6866 = vmatprep.subr.bf16.mxu0 %v7692_v7 }
 0x481   : > { %6867 = vmatpush3.bf16.msra.mxu0 %v7693_v20 }
 0x482   : > { %6868 = vmatprep.subr.bf16.mxu0 %v7694_v43 }
 0x485   : > { %6869 = vmatpush3.bf16.msra.mxu0 %v7695_v3  ;;  %v6824_v3 = vld [vmem:[%s10912_s11] ss:$0 sm:$0xff] }
 0x486   : > { %6870 = vmatprep.subr.bf16.mxu0 %v7696_v17 }
 0x489   : > { %6871 = vmatpush3.bf16.msra.mxu0 %v7697_v25 }
 0x48a   : > { %6872 = vmatprep.subr.bf16.mxu0 %v7698_v37 }
 0x48d   : > { %6873 = vmatpush3.bf16.msra.mxu0 %v7699_v61 }
 0x48e   : > { %6874 = vmatprep.subr.bf16.mxu0 %v7700_v55 }
 0x491   : > { %6875 = vmatpush3.bf16.msra.mxu0 %v7701_v24 }
 0x492   : > { %6882 = vmatprep.subr.bf16.mxu0 %v7702_v41 }
 0x507   : > { %v5789_v53 = vpop.f32.mrb[120].mxu0 }
 0x508   : > { %v5859_v12 = vmul.f32 %v5842_v19, %v5789_v53  ;;  %v5791_v11 = vpop.f32.mrb[121].mxu0 }
 0x509   : > { %v5860_v30 = vmul.f32 %v5846_v54, %v5791_v11  ;;  %v5793_v57 = vpop.f32.mrb[122].mxu0 }
 0x50a   : > { %v5885_v63 = vadd.f32 %v5868_v15, %v5859_v12  ;;  %v5794_v10 = vpop.f32.mrb[123].mxu0 }
 0x50b   : > { %v5886_v47 = vadd.f32 %v5872_v52, %v5860_v30 }
 0x50c   : > { %v5889_v14 = vmax.f32 %v5885_v63, 0.0 }
 0x50d   : > { %v5890_v0 = vmax.f32 %v5886_v47, 0.0 }
 0x50e   : > { %v5893_v2 = vpack.c.bf16 %v5889_v14, %v5889_v14 }
 0x50f   : > { %v5894_v44 = vpack.c.bf16 %v5890_v0, %v5890_v0 }
 0x511   : > { %6192 = vmatprep.mubr.bf16.mxu0 %v5894_v44 }
 0x512   : > { %6193 = vmatmul.mubr.bf16.vlgmr.msra.gmra.mrb[128].mxu0 %v5893_v2 }
 0x513   : > { %6883 = vmatpush3.bf16.msra.mxu0 %v7703_v36 }
 0x514   : > { %6884 = vmatprep.subr.bf16.mxu0 %v7704_v49 }
 0x517   : > { %6885 = vmatpush3.bf16.msra.mxu0 %v7705_v33 }
 0x518   : > { %6886 = vmatprep.subr.bf16.mxu0 %v7706_v35 }
 0x51b   : > { %6887 = vmatpush3.bf16.msra.mxu0 %v7707_v29 }
 0x51c   : > { %6888 = vmatprep.subr.bf16.mxu0 %v7708_v56 }
 0x51f   : > { %6889 = vmatpush3.bf16.msra.mxu0 %v7709_v31 }
 0x520   : > { %6890 = vmatprep.subr.bf16.mxu0 %v7710_v1 }
 0x523   : > { %6891 = vmatpush3.bf16.msra.mxu0 %v7711_v48 }
 0x524   : > { %6892 = vmatprep.subr.bf16.mxu0 %v7712_v23 }
 0x527   : > { %6893 = vmatpush3.bf16.msra.mxu0 %v7713_v27 }
 0x528   : > { %6894 = vmatprep.subr.bf16.mxu0 %v7714_v60 }
 0x52b   : > { %6895 = vmatpush3.bf16.msra.mxu0 %v7715_v34 }
 0x52c   : > { %6896 = vmatprep.subr.bf16.mxu0 %v7716_v26 }
 0x52f   : > { %6897 = vmatpush3.bf16.msra.mxu0 %v7717_v6 }
 0x547   : > { %v5830_v42 = vpop.f32.mrb[124].mxu0 }
 0x548   : > { %v5861_v51 = vmul.f32 %v5850_v59, %v5830_v42  ;;  %v5832_v46 = vpop.f32.mrb[125].mxu0 }
 0x549   : > { %v5862_v40 = vmul.f32 %v5854_v9, %v5832_v46  ;;  %v5834_v21 = vpop.f32.mrb[126].mxu0 }
 0x54a   : > { %v5887_v38 = vadd.f32 %v5876_v22, %v5861_v51  ;;  %v5835_v39 = vpop.f32.mrb[127].mxu0 }
 0x54b   : > { %v5888_v28 = vadd.f32 %v5880_v45, %v5862_v40 }
 0x54c   : > { %v5891_v8 = vmax.f32 %v5887_v38, 0.0 }
 0x54d   : > { %v5892_v16 = vmax.f32 %v5888_v28, 0.0 }
 0x54e   : > { %v5895_v50 = vpack.c.bf16 %v5891_v8, %v5891_v8 }
 0x54f   : > { %v5896_v4 = vpack.c.bf16 %v5892_v16, %v5892_v16 }
 0x551   : > { %6232 = vmatprep.mubr.bf16.mxu0 %v5896_v4 }
 0x552   : > { %6233 = vmatmul.mubr.bf16.vlgmr.msra.gmra.mrb[132].mxu0 %v5895_v50 }
 0x5e5   : > { %v6876_v18 = vpop.f32.mrb[128].mxu0 }
 0x5e6   : > { %v6877_v13 = vpop.f32.mrb[129].mxu0 }
 0x5e7   : > { %v6878_v7 = vadd.f32 %v6877_v13, %v6876_v18  ;;  %v6879_v20 = vpop.f32.mrb[130].mxu0 }
 0x5e8   : > { %v6880_v43 = vpop.f32.mrb[131].mxu0 }
 0x5e9   : > { %v6195_v37 = vadd.f32 %v6878_v7, %v6824_v3 }
 0x625   : > { %v6898_v17 = vpop.f32.mrb[132].mxu0 }
 0x626   : > { %v6899_v25 = vpop.f32.mrb[133].mxu0 }
 0x627   : > { %v6900_v61 = vadd.f32 %v6899_v25, %v6898_v17  ;;  %v6901_v55 = vpop.f32.mrb[134].mxu0 }
 0x628   : > { %v6902_v24 = vpop.f32.mrb[135].mxu0 }
 0x629   : > { %v6235_v41 = vadd.f32 %v6900_v61, %v6195_v37 }
 0x62b   : > { %6240 = vst [vmem:[%s416_s14] sm:$0xff] %v6235_v41 }
 0x62c PF: > { %s22_s21 = sadd.s32 1, %s7734_s21  }
 0x62d   : > { %p19_p5 = scmp.ge.s32.totalorder %s22_s21, 4  }
 0x62f   :  { %21 = sbr.rel (!%p19_p5) target bundleno = 1 (0x1), region = 101 }

</bundles_post_ra>
